<compile_context>
chip_gen: v7x
topology: tpu7x:2x2x1
jax: 0.10.0
libtpu: 0.0.40
codegen_flags: <defaults>
</compile_context>

<pallas_src>
import functools

import jax
import jax.numpy as jnp
from jax import lax
from jax.experimental import pallas as pl
from jax.experimental.pallas import tpu as pltpu

# Keep f32 matmul precision identical for the Pallas kernel and the pure-JAX
# reference so the correctness check can be tight.
jax.config.update("jax_default_matmul_precision", "highest")

_LN_EPS = 1e-6


# ---------------------------------------------------------------------------
# In-kernel helpers
# ---------------------------------------------------------------------------
def _dropout(x, seed_ref, rate, training, salt):
    """Inverted dropout (train-mode only; statically disabled otherwise)."""
    if not training or rate <= 0.0:
        return x
    pltpu.prng_seed(seed_ref[0] + salt)
    bits = pltpu.prng_random_bits(x.shape)
    if bits.dtype != jnp.uint32:
        bits = pltpu.bitcast(bits, jnp.uint32)
    thresh = jnp.uint32(min(int(rate * 4294967296.0), 4294967295))
    return jnp.where(bits >= thresh, x * (1.0 / (1.0 - rate)), 0.0)


def _softmax_lastdim(x):
    z = x - jnp.max(x, axis=-1, keepdims=True)
    e = jnp.exp(z)
    # Exact reciprocal (approx=False): keeps numerics within the test tolerance
    # while moving the divide off the main VPU path.
    return e * pl.reciprocal(jnp.sum(e, axis=-1, keepdims=True))


# ---------------------------------------------------------------------------
# Single fused kernel: patch-embed -> 6 unrolled encoder blocks -> final MLP
# ---------------------------------------------------------------------------
def _encoder_fused_kernel(seed_ref,
                          patches_ref, w_patch_ref, b_patch_ref, pos_ref,
                          ln_g_ref, ln_b_ref, wqkv_ref, bqkv_ref,
                          w1_ref, b1_ref, w2_ref, b2_ref,
                          fw1_ref, fb1_ref, fw2_ref, fb2_ref,
                          o_ref,
                          *, num_blocks, dropout_rate, training, inv_scale):
    # --- patch embedding: Conv2d(3->1, k=p, s=p) == per-patch dot + bias + pos
    # patches: (B, P, C)  w_patch: (1, 1, C)  ->  x: (B, P) with P == D
    emb = jnp.sum(patches_ref[...] * w_patch_ref[...], axis=-1)
    x = emb + b_patch_ref[...] + pos_ref[...]

    D = x.shape[-1]

    def layer_norm(h, g, beta):
        mu = jnp.mean(h, axis=-1, keepdims=True)
        var = jnp.mean(jnp.square(h - mu), axis=-1, keepdims=True)
        return (h - mu) * lax.rsqrt(var + _LN_EPS) * g + beta

    # --- encoder blocks, fully unrolled; all weights already VMEM-resident
    for i in range(num_blocks):
        g, beta = ln_g_ref[i], ln_b_ref[i]                  # (1, D)

        # attention sub-block (the original module attends over the batch dim)
        h = layer_norm(x, g, beta)
        qkv = jnp.dot(h, wqkv_ref[i],
                      preferred_element_type=jnp.float32) + bqkv_ref[i]
        q = qkv[:, :D]
        k = qkv[:, D:2 * D]
        v = qkv[:, 2 * D:]
        # q @ k.T without materialising a transpose: contract the feature axes.
        scores = lax.dot_general(q, k, (((1,), (1,)), ((), ())),
                                 preferred_element_type=jnp.float32) * inv_scale
        attn = jnp.dot(_softmax_lastdim(scores), v,
                       preferred_element_type=jnp.float32)
        sum1 = attn + x

        # MLP sub-block (original code reuses norm1's params for the 2nd norm)
        h2 = layer_norm(sum1, g, beta)
        a1 = jnp.maximum(
            jnp.dot(h2, w1_ref[i], preferred_element_type=jnp.float32)
            + b1_ref[i], 0.0)
        a2 = jnp.maximum(
            jnp.dot(a1, w2_ref[i], preferred_element_type=jnp.float32)
            + b2_ref[i], 0.0)
        a2 = _dropout(a2, seed_ref, dropout_rate, training, salt=i)
        x = a2 + sum1

    # --- final MLP + Softmax (nn.Softmax() on a 2-D input defaults to dim=1)
    y1 = jnp.maximum(
        jnp.dot(x, fw1_ref[...], preferred_element_type=jnp.float32)
        + fb1_ref[...], 0.0)
    y2 = jnp.maximum(
        jnp.dot(y1, fw2_ref[...], preferred_element_type=jnp.float32)
        + fb2_ref[...], 0.0)
    y2 = _dropout(y2, seed_ref, dropout_rate, training, salt=num_blocks + 1)
    o_ref[...] = _softmax_lastdim(y2).astype(o_ref.dtype)


def extract_patches(img, patch):
    """Non-overlapping patch flattening (pure layout; == im2col for k==stride)."""
    B, C, H, W = img.shape
    ph, pw = H // patch, W // patch
    p = img.reshape(B, C, ph, patch, pw, patch)
    p = p.transpose(0, 2, 4, 1, 3, 5)            # (B, ph, pw, C, patch, patch)
    return p.reshape(B, ph * pw, C * patch * patch)


def encoder_forward(img, params, *, patch_size, dropout_rate=0.8,
                    training=False, seed=0):
    patches = extract_patches(img, patch_size)    # layout-only im2col
    B, P, C = patches.shape
    bp, fp = params["blocks"], params["final"]
    nb, D, _ = bp["wqkv"].shape
    O = fp["w1"].shape[1]
    assert P == D

    seed_arr = jnp.asarray([seed], dtype=jnp.int32)

    kernel = functools.partial(
        _encoder_fused_kernel,
        num_blocks=nb,
        dropout_rate=float(dropout_rate),
        training=bool(training),
        inv_scale=1.0 / float(D),                 # 1 / sqrt(D * D)
    )

    flops = int(nb * (2 * B * D * 3 * D + 2 * B * B * D * 2 + 2 * B * D * D * 2)
                + 2 * B * D * O + 2 * B * O * O)
    bytes_accessed = int(4 * (patches.size + B * O
                              + sum(int(v.size) for v in bp.values())
                              + sum(int(v.size) for v in fp.values())))
    cost = pl.CostEstimate(flops=flops,
                           transcendentals=int(nb * (B * B + 2 * B) + B * O),
                           bytes_accessed=bytes_accessed)

    full = lambda shape: pl.BlockSpec(shape, lambda i: (0,) * len(shape))

    return pl.pallas_call(
        kernel,
        out_shape=jax.ShapeDtypeStruct((B, O), jnp.float32),
        grid=(1,),                                 # single fused invocation
        in_specs=[
            pl.BlockSpec(memory_space=pltpu.MemorySpace.SMEM),   # seed (scalar)
            full((B, P, C)),                       # patches
            full((1, 1, C)),                       # conv weight (flattened)
            full((1, 1)),                          # conv bias
            full((1, P)),                          # positional encoding
            full((nb, 1, D)), full((nb, 1, D)),    # layernorm gamma / beta
            full((nb, D, 3 * D)), full((nb, 1, 3 * D)),   # fused Wqkv / bqkv
            full((nb, D, D)), full((nb, 1, D)),    # W1 / b1
            full((nb, D, D)), full((nb, 1, D)),    # W2 / b2
            full((D, O)), full((1, O)),            # final W1 / b1
            full((O, O)), full((1, O)),            # final W2 / b2
        ],
        out_specs=pl.BlockSpec((B, O), lambda i: (0, 0)),
        compiler_params=pltpu.CompilerParams(
            dimension_semantics=("arbitrary",)),
        cost_estimate=cost,
    )(seed_arr, patches,
      params["w_patch"], params["b_patch"], params["pos"],
      bp["ln_g"], bp["ln_b"], bp["wqkv"], bp["bqkv"],
      bp["w1"], bp["b1"], bp["w2"], bp["b2"],
      fp["w1"], fp["b1"], fp["w2"], fp["b2"])


# ---------------------------------------------------------------------------
# Parameter init (PyTorch-like uniform) and pure-JAX reference
# ---------------------------------------------------------------------------
def init_encoder_params(key, *, patch_size, pitch, out_size, num_blocks):
    D = pitch * pitch
    C = 3 * patch_size * patch_size
    ks = jax.random.split(key, 17)

    def lin(k, fan_in, shape):
        lim = 1.0 / (fan_in ** 0.5)
        return jax.random.uniform(k, shape, jnp.float32, -lim, lim)

    wq = lin(ks[0], D, (num_blocks, D, D))
    bq = lin(ks[1], D, (num_blocks, 1, D))
    wk = lin(ks[2], D, (num_blocks, D, D))
    bk = lin(ks[3], D, (num_blocks, 1, D))
    wv = lin(ks[4], D, (num_blocks, D, D))
    bv = lin(ks[5], D, (num_blocks, 1, D))
    blocks = {
        "ln_g": jnp.ones((num_blocks, 1, D), jnp.float32),
        "ln_b": jnp.zeros((num_blocks, 1, D), jnp.float32),
        # Q|K|V fused into one lane-dense (D, 3D) matmul operand per block.
        "wqkv": jnp.concatenate([wq, wk, wv], axis=-1),
        "bqkv": jnp.concatenate([bq, bk, bv], axis=-1),
        "w1": lin(ks[6], D, (num_blocks, D, D)), "b1": lin(ks[7], D, (num_blocks, 1, D)),
        "w2": lin(ks[8], D, (num_blocks, D, D)), "b2": lin(ks[9], D, (num_blocks, 1, D)),
    }
    final = {
        "w1": lin(ks[10], D, (D, out_size)),
        "b1": lin(ks[11], D, (1, out_size)),
        "w2": lin(ks[12], out_size, (out_size, out_size)),
        "b2": lin(ks[13], out_size, (1, out_size)),
    }
    return {
        "w_patch": lin(ks[14], C, (1, 1, C)),   # Conv2d(3->1,k=p,s=p) weight flat
        "b_patch": lin(ks[15], C, (1, 1)),
        "pos": jax.random.normal(ks[16], (1, D), jnp.float32),
        "blocks": blocks,
        "final": final,
    }


def ref_encoder_forward(img, params, *, patch_size):
    patches = extract_patches(img, patch_size)
    w = params["w_patch"].reshape(-1)
    x = (jnp.einsum("bpc,c->bp", patches, w)
         + params["b_patch"].reshape(1, 1) + params["pos"])

    def layer_norm(h, g, b):
        mu = jnp.mean(h, axis=-1, keepdims=True)
        var = jnp.mean(jnp.square(h - mu), axis=-1, keepdims=True)
        return (h - mu) * lax.rsqrt(var + _LN_EPS) * g + b

    bp = params["blocks"]
    D = x.shape[-1]
    for i in range(bp["wqkv"].shape[0]):
        g, be = bp["ln_g"][i], bp["ln_b"][i]
        h = layer_norm(x, g, be)
        qkv = h @ bp["wqkv"][i] + bp["bqkv"][i]
        q, k, v = qkv[:, :D], qkv[:, D:2 * D], qkv[:, 2 * D:]
        s = (q @ k.T) * (1.0 / D)                 # / sqrt(D * D)
        sum1 = jax.nn.softmax(s, axis=-1) @ v + x
        h2 = layer_norm(sum1, g, be)              # norm1 reused, as in the spec
        a1 = jax.nn.relu(h2 @ bp["w1"][i] + bp["b1"][i])
        a2 = jax.nn.relu(a1 @ bp["w2"][i] + bp["b2"][i])
        x = a2 + sum1                             # dropout identity in eval mode
    fp = params["final"]
    y1 = jax.nn.relu(x @ fp["w1"] + fp["b1"])
    y2 = jax.nn.relu(y1 @ fp["w2"] + fp["b2"])
    return jax.nn.softmax(y2, axis=-1)


if __name__ == "__main__":
    key = jax.random.PRNGKey(0)
    k_img, k_par = jax.random.split(key)

    # Shapes implied by the spec: kernel_size=4 -> pitch_size=8, 32x32 RGB input,
    # feature dim D = 8*8 = 64. out_size chosen lane-dense (128).
    batch, patch_size, pitch = 2, 4, 8
    out_size, num_blocks, dropout_rate = 128, 6, 0.8

    img = jax.random.normal(k_img, (batch, 3, 32, 32), dtype=jnp.float32)
    params = init_encoder_params(k_par, patch_size=patch_size, pitch=pitch,
                                 out_size=out_size, num_blocks=num_blocks)

    # Eval-mode forward (dropout identity, like model.eval()). Train-mode dropout
    # is implemented in-kernel behind the `training` flag.
    out = jax.block_until_ready(
        encoder_forward(img, params, patch_size=patch_size,
                        dropout_rate=dropout_rate, training=False, seed=0))

    ref = ref_encoder_forward(img, params, patch_size=patch_size)
    assert out.shape == (batch, out_size)
    assert bool(jnp.all(jnp.isfinite(out)))
    max_diff = float(jnp.max(jnp.abs(out - ref)))
    assert max_diff < 2e-4, f"mismatch vs reference: {max_diff}"

    print("KERNEL_OK")
</pallas_src>

<mosaic_0001>
module attributes {stable_mosaic.version = 11 : i64} {
  func.func @_encoder_fused_kernel(%arg0: i32, %arg1: memref<1xi32, #tpu.memory_space<smem>>, %arg2: memref<2x64x48xf32, #tpu.memory_space<vmem>>, %arg3: memref<1x1x48xf32, #tpu.memory_space<vmem>>, %arg4: memref<1x1xf32, #tpu.memory_space<vmem>>, %arg5: memref<1x64xf32, #tpu.memory_space<vmem>>, %arg6: memref<6x1x64xf32, #tpu.memory_space<vmem>>, %arg7: memref<6x1x64xf32, #tpu.memory_space<vmem>>, %arg8: memref<6x64x192xf32, #tpu.memory_space<vmem>>, %arg9: memref<6x1x192xf32, #tpu.memory_space<vmem>>, %arg10: memref<6x64x64xf32, #tpu.memory_space<vmem>>, %arg11: memref<6x1x64xf32, #tpu.memory_space<vmem>>, %arg12: memref<6x64x64xf32, #tpu.memory_space<vmem>>, %arg13: memref<6x1x64xf32, #tpu.memory_space<vmem>>, %arg14: memref<64x128xf32, #tpu.memory_space<vmem>>, %arg15: memref<1x128xf32, #tpu.memory_space<vmem>>, %arg16: memref<128x128xf32, #tpu.memory_space<vmem>>, %arg17: memref<1x128xf32, #tpu.memory_space<vmem>>, %arg18: memref<2x128xf32, #tpu.memory_space<vmem>>) attributes {dimension_semantics = [#tpu.dimension_semantics<arbitrary>], iteration_bounds = array<i64: 1>, scalar_prefetch = 0 : i64, scratch_operands = 0 : i64, tpu.core_type = #tpu.core_type<tc>, window_params = [{transform_indices = @transform_0, window_bounds = array<i64: 1>}, {pipeline_mode = #tpu.pipeline_mode<synchronous>, transform_indices = @transform_1, window_bounds = array<i64: 2, 64, 48>}, {pipeline_mode = #tpu.pipeline_mode<synchronous>, transform_indices = @transform_2, window_bounds = array<i64: 1, 1, 48>}, {pipeline_mode = #tpu.pipeline_mode<synchronous>, transform_indices = @transform_3, window_bounds = array<i64: 1, 1>}, {pipeline_mode = #tpu.pipeline_mode<synchronous>, transform_indices = @transform_4, window_bounds = array<i64: 1, 64>}, {pipeline_mode = #tpu.pipeline_mode<synchronous>, transform_indices = @transform_5, window_bounds = array<i64: 6, 1, 64>}, {pipeline_mode = #tpu.pipeline_mode<synchronous>, transform_indices = @transform_6, window_bounds = array<i64: 6, 1, 64>}, {pipeline_mode = #tpu.pipeline_mode<synchronous>, transform_indices = @transform_7, window_bounds = array<i64: 6, 64, 192>}, {pipeline_mode = #tpu.pipeline_mode<synchronous>, transform_indices = @transform_8, window_bounds = array<i64: 6, 1, 192>}, {pipeline_mode = #tpu.pipeline_mode<synchronous>, transform_indices = @transform_9, window_bounds = array<i64: 6, 64, 64>}, {pipeline_mode = #tpu.pipeline_mode<synchronous>, transform_indices = @transform_10, window_bounds = array<i64: 6, 1, 64>}, {pipeline_mode = #tpu.pipeline_mode<synchronous>, transform_indices = @transform_11, window_bounds = array<i64: 6, 64, 64>}, {pipeline_mode = #tpu.pipeline_mode<synchronous>, transform_indices = @transform_12, window_bounds = array<i64: 6, 1, 64>}, {pipeline_mode = #tpu.pipeline_mode<synchronous>, transform_indices = @transform_13, window_bounds = array<i64: 64, 128>}, {pipeline_mode = #tpu.pipeline_mode<synchronous>, transform_indices = @transform_14, window_bounds = array<i64: 1, 128>}, {pipeline_mode = #tpu.pipeline_mode<synchronous>, transform_indices = @transform_15, window_bounds = array<i64: 128, 128>}, {pipeline_mode = #tpu.pipeline_mode<synchronous>, transform_indices = @transform_16, window_bounds = array<i64: 1, 128>}, {pipeline_mode = #tpu.pipeline_mode<synchronous>, transform_indices = @transform_17, window_bounds = array<i64: 2, 128>}]} {
    %c0 = arith.constant 0 : index
    %c0_0 = arith.constant 0 : index
    %c0_1 = arith.constant 0 : index
    %0 = vector.load %arg2[%c0, %c0_0, %c0_1] : memref<2x64x48xf32, #tpu.memory_space<vmem>>, vector<2x64x48xf32>
    %c0_2 = arith.constant 0 : index
    %c0_3 = arith.constant 0 : index
    %c0_4 = arith.constant 0 : index
    %1 = vector.load %arg3[%c0_2, %c0_3, %c0_4] : memref<1x1x48xf32, #tpu.memory_space<vmem>>, vector<1x1x48xf32>
    %2 = vector.broadcast %1 : vector<1x1x48xf32> to vector<2x64x48xf32>
    %3 = arith.mulf %0, %2 : vector<2x64x48xf32>
    %cst = arith.constant dense<0.000000e+00> : vector<2x64xf32>
    %4 = vector.multi_reduction <add>, %3, %cst [2] : vector<2x64x48xf32> to vector<2x64xf32>
    %c0_5 = arith.constant 0 : index
    %c0_6 = arith.constant 0 : index
    %5 = vector.load %arg4[%c0_5, %c0_6] : memref<1x1xf32, #tpu.memory_space<vmem>>, vector<1x1xf32>
    %6 = vector.broadcast %5 : vector<1x1xf32> to vector<2x64xf32>
    %7 = arith.addf %4, %6 : vector<2x64xf32>
    %c0_7 = arith.constant 0 : index
    %c0_8 = arith.constant 0 : index
    %8 = vector.load %arg5[%c0_7, %c0_8] : memref<1x64xf32, #tpu.memory_space<vmem>>, vector<1x64xf32>
    %9 = vector.broadcast %8 : vector<1x64xf32> to vector<2x64xf32>
    %10 = arith.addf %7, %9 : vector<2x64xf32>
    %c0_9 = arith.constant 0 : index
    %c0_10 = arith.constant 0 : index
    %c0_11 = arith.constant 0 : index
    %11 = vector.load %arg6[%c0_9, %c0_10, %c0_11] : memref<6x1x64xf32, #tpu.memory_space<vmem>>, vector<1x1x64xf32>
    %12 = vector.shape_cast %11 : vector<1x1x64xf32> to vector<1x64xf32>
    %c0_12 = arith.constant 0 : index
    %c0_13 = arith.constant 0 : index
    %c0_14 = arith.constant 0 : index
    %13 = vector.load %arg7[%c0_12, %c0_13, %c0_14] : memref<6x1x64xf32, #tpu.memory_space<vmem>>, vector<1x1x64xf32>
    %14 = vector.shape_cast %13 : vector<1x1x64xf32> to vector<1x64xf32>
    %cst_15 = arith.constant dense<0.000000e+00> : vector<2xf32>
    %15 = vector.multi_reduction <add>, %10, %cst_15 [1] : vector<2x64xf32> to vector<2xf32>
    %16 = vector.shape_cast %15 : vector<2xf32> to vector<2x1xf32>
    %cst_16 = arith.constant 6.400000e+01 : f32
    %17 = vector.broadcast %cst_16 : f32 to vector<2x1xf32>
    %18 = arith.divf %16, %17 : vector<2x1xf32>
    %19 = vector.broadcast %18 : vector<2x1xf32> to vector<2x64xf32>
    %20 = arith.subf %10, %19 : vector<2x64xf32>
    %21 = arith.mulf %20, %20 : vector<2x64xf32>
    %cst_17 = arith.constant dense<0.000000e+00> : vector<2xf32>
    %22 = vector.multi_reduction <add>, %21, %cst_17 [1] : vector<2x64xf32> to vector<2xf32>
    %23 = vector.shape_cast %22 : vector<2xf32> to vector<2x1xf32>
    %cst_18 = arith.constant 6.400000e+01 : f32
    %24 = vector.broadcast %cst_18 : f32 to vector<2x1xf32>
    %25 = arith.divf %23, %24 : vector<2x1xf32>
    %26 = vector.broadcast %18 : vector<2x1xf32> to vector<2x64xf32>
    %27 = arith.subf %10, %26 : vector<2x64xf32>
    %cst_19 = arith.constant 9.99999997E-7 : f32
    %28 = vector.broadcast %cst_19 : f32 to vector<2x1xf32>
    %29 = arith.addf %25, %28 : vector<2x1xf32>
    %30 = math.rsqrt %29 : vector<2x1xf32>
    %31 = vector.broadcast %30 : vector<2x1xf32> to vector<2x64xf32>
    %32 = arith.mulf %27, %31 : vector<2x64xf32>
    %33 = vector.broadcast %12 : vector<1x64xf32> to vector<2x64xf32>
    %34 = arith.mulf %32, %33 : vector<2x64xf32>
    %35 = vector.broadcast %14 : vector<1x64xf32> to vector<2x64xf32>
    %36 = arith.addf %34, %35 : vector<2x64xf32>
    %c0_20 = arith.constant 0 : index
    %c0_21 = arith.constant 0 : index
    %c0_22 = arith.constant 0 : index
    %37 = vector.load %arg8[%c0_20, %c0_21, %c0_22] : memref<6x64x192xf32, #tpu.memory_space<vmem>>, vector<1x64x192xf32>
    %38 = vector.shape_cast %37 : vector<1x64x192xf32> to vector<64x192xf32>
    %cst_23 = arith.constant dense<0.000000e+00> : vector<2x192xf32>
    %39 = tpu.matmul %36, %38, %cst_23 {dimension_numbers = #tpu.dot_dimension_numbers<[1], [0], [0], [1], [0, 0, 1, 1], [], []>, precision = #tpu.contract_precision<fp32>} : vector<2x64xf32>, vector<64x192xf32>, vector<2x192xf32> -> vector<2x192xf32>
    %c0_24 = arith.constant 0 : index
    %c0_25 = arith.constant 0 : index
    %c0_26 = arith.constant 0 : index
    %40 = vector.load %arg9[%c0_24, %c0_25, %c0_26] : memref<6x1x192xf32, #tpu.memory_space<vmem>>, vector<1x1x192xf32>
    %41 = vector.shape_cast %40 : vector<1x1x192xf32> to vector<1x192xf32>
    %42 = vector.broadcast %41 : vector<1x192xf32> to vector<2x192xf32>
    %43 = arith.addf %39, %42 : vector<2x192xf32>
    %44 = vector.extract_strided_slice %43 {offsets = [0, 0], sizes = [2, 64], strides = [1, 1]} : vector<2x192xf32> to vector<2x64xf32>
    %45 = vector.extract_strided_slice %43 {offsets = [0, 64], sizes = [2, 64], strides = [1, 1]} : vector<2x192xf32> to vector<2x64xf32>
    %46 = vector.extract_strided_slice %43 {offsets = [0, 128], sizes = [2, 64], strides = [1, 1]} : vector<2x192xf32> to vector<2x64xf32>
    %cst_27 = arith.constant dense<0.000000e+00> : vector<2x2xf32>
    %47 = tpu.matmul %44, %45, %cst_27 {dimension_numbers = #tpu.dot_dimension_numbers<[1], [1], [0], [0], [0, 0, 1, 0], [], []>, precision = #tpu.contract_precision<fp32>} : vector<2x64xf32>, vector<2x64xf32>, vector<2x2xf32> -> vector<2x2xf32>
    %cst_28 = arith.constant 1.562500e-02 : f32
    %48 = vector.broadcast %cst_28 : f32 to vector<2x2xf32>
    %49 = arith.mulf %47, %48 : vector<2x2xf32>
    %cst_29 = arith.constant dense<0xFF800000> : vector<2xf32>
    %50 = vector.multi_reduction <maximumf>, %49, %cst_29 [1] : vector<2x2xf32> to vector<2xf32>
    %51 = vector.shape_cast %50 : vector<2xf32> to vector<2x1xf32>
    %52 = vector.broadcast %51 : vector<2x1xf32> to vector<2x2xf32>
    %53 = arith.subf %49, %52 : vector<2x2xf32>
    %54 = math.exp %53 : vector<2x2xf32>
    %cst_30 = arith.constant dense<0.000000e+00> : vector<2xf32>
    %55 = vector.multi_reduction <add>, %54, %cst_30 [1] : vector<2x2xf32> to vector<2xf32>
    %56 = vector.shape_cast %55 : vector<2xf32> to vector<2x1xf32>
    %57 = tpu.reciprocal %56 : vector<2x1xf32> -> vector<2x1xf32>
    %58 = vector.broadcast %57 : vector<2x1xf32> to vector<2x2xf32>
    %59 = arith.mulf %54, %58 : vector<2x2xf32>
    %cst_31 = arith.constant dense<0.000000e+00> : vector<2x64xf32>
    %60 = tpu.matmul %59, %46, %cst_31 {dimension_numbers = #tpu.dot_dimension_numbers<[1], [0], [0], [1], [0, 0, 1, 1], [], []>, precision = #tpu.contract_precision<fp32>} : vector<2x2xf32>, vector<2x64xf32>, vector<2x64xf32> -> vector<2x64xf32>
    %61 = arith.addf %60, %10 : vector<2x64xf32>
    %cst_32 = arith.constant dense<0.000000e+00> : vector<2xf32>
    %62 = vector.multi_reduction <add>, %61, %cst_32 [1] : vector<2x64xf32> to vector<2xf32>
    %63 = vector.shape_cast %62 : vector<2xf32> to vector<2x1xf32>
    %cst_33 = arith.constant 6.400000e+01 : f32
    %64 = vector.broadcast %cst_33 : f32 to vector<2x1xf32>
    %65 = arith.divf %63, %64 : vector<2x1xf32>
    %66 = vector.broadcast %65 : vector<2x1xf32> to vector<2x64xf32>
    %67 = arith.subf %61, %66 : vector<2x64xf32>
    %68 = arith.mulf %67, %67 : vector<2x64xf32>
    %cst_34 = arith.constant dense<0.000000e+00> : vector<2xf32>
    %69 = vector.multi_reduction <add>, %68, %cst_34 [1] : vector<2x64xf32> to vector<2xf32>
    %70 = vector.shape_cast %69 : vector<2xf32> to vector<2x1xf32>
    %cst_35 = arith.constant 6.400000e+01 : f32
    %71 = vector.broadcast %cst_35 : f32 to vector<2x1xf32>
    %72 = arith.divf %70, %71 : vector<2x1xf32>
    %73 = vector.broadcast %65 : vector<2x1xf32> to vector<2x64xf32>
    %74 = arith.subf %61, %73 : vector<2x64xf32>
    %cst_36 = arith.constant 9.99999997E-7 : f32
    %75 = vector.broadcast %cst_36 : f32 to vector<2x1xf32>
    %76 = arith.addf %72, %75 : vector<2x1xf32>
    %77 = math.rsqrt %76 : vector<2x1xf32>
    %78 = vector.broadcast %77 : vector<2x1xf32> to vector<2x64xf32>
    %79 = arith.mulf %74, %78 : vector<2x64xf32>
    %80 = vector.broadcast %12 : vector<1x64xf32> to vector<2x64xf32>
    %81 = arith.mulf %79, %80 : vector<2x64xf32>
    %82 = vector.broadcast %14 : vector<1x64xf32> to vector<2x64xf32>
    %83 = arith.addf %81, %82 : vector<2x64xf32>
    %c0_37 = arith.constant 0 : index
    %c0_38 = arith.constant 0 : index
    %c0_39 = arith.constant 0 : index
    %84 = vector.load %arg10[%c0_37, %c0_38, %c0_39] : memref<6x64x64xf32, #tpu.memory_space<vmem>>, vector<1x64x64xf32>
    %85 = vector.shape_cast %84 : vector<1x64x64xf32> to vector<64x64xf32>
    %cst_40 = arith.constant dense<0.000000e+00> : vector<2x64xf32>
    %86 = tpu.matmul %83, %85, %cst_40 {dimension_numbers = #tpu.dot_dimension_numbers<[1], [0], [0], [1], [0, 0, 1, 1], [], []>, precision = #tpu.contract_precision<fp32>} : vector<2x64xf32>, vector<64x64xf32>, vector<2x64xf32> -> vector<2x64xf32>
    %c0_41 = arith.constant 0 : index
    %c0_42 = arith.constant 0 : index
    %c0_43 = arith.constant 0 : index
    %87 = vector.load %arg11[%c0_41, %c0_42, %c0_43] : memref<6x1x64xf32, #tpu.memory_space<vmem>>, vector<1x1x64xf32>
    %88 = vector.shape_cast %87 : vector<1x1x64xf32> to vector<1x64xf32>
    %89 = vector.broadcast %88 : vector<1x64xf32> to vector<2x64xf32>
    %90 = arith.addf %86, %89 : vector<2x64xf32>
    %cst_44 = arith.constant 0.000000e+00 : f32
    %91 = vector.broadcast %cst_44 : f32 to vector<2x64xf32>
    %92 = arith.maximumf %90, %91 : vector<2x64xf32>
    %c0_45 = arith.constant 0 : index
    %c0_46 = arith.constant 0 : index
    %c0_47 = arith.constant 0 : index
    %93 = vector.load %arg12[%c0_45, %c0_46, %c0_47] : memref<6x64x64xf32, #tpu.memory_space<vmem>>, vector<1x64x64xf32>
    %94 = vector.shape_cast %93 : vector<1x64x64xf32> to vector<64x64xf32>
    %cst_48 = arith.constant dense<0.000000e+00> : vector<2x64xf32>
    %95 = tpu.matmul %92, %94, %cst_48 {dimension_numbers = #tpu.dot_dimension_numbers<[1], [0], [0], [1], [0, 0, 1, 1], [], []>, precision = #tpu.contract_precision<fp32>} : vector<2x64xf32>, vector<64x64xf32>, vector<2x64xf32> -> vector<2x64xf32>
    %c0_49 = arith.constant 0 : index
    %c0_50 = arith.constant 0 : index
    %c0_51 = arith.constant 0 : index
    %96 = vector.load %arg13[%c0_49, %c0_50, %c0_51] : memref<6x1x64xf32, #tpu.memory_space<vmem>>, vector<1x1x64xf32>
    %97 = vector.shape_cast %96 : vector<1x1x64xf32> to vector<1x64xf32>
    %98 = vector.broadcast %97 : vector<1x64xf32> to vector<2x64xf32>
    %99 = arith.addf %95, %98 : vector<2x64xf32>
    %cst_52 = arith.constant 0.000000e+00 : f32
    %100 = vector.broadcast %cst_52 : f32 to vector<2x64xf32>
    %101 = arith.maximumf %99, %100 : vector<2x64xf32>
    %102 = arith.addf %101, %61 : vector<2x64xf32>
    %c1 = arith.constant 1 : index
    %c0_53 = arith.constant 0 : index
    %c0_54 = arith.constant 0 : index
    %103 = vector.load %arg6[%c1, %c0_53, %c0_54] : memref<6x1x64xf32, #tpu.memory_space<vmem>>, vector<1x1x64xf32>
    %104 = vector.shape_cast %103 : vector<1x1x64xf32> to vector<1x64xf32>
    %c1_55 = arith.constant 1 : index
    %c0_56 = arith.constant 0 : index
    %c0_57 = arith.constant 0 : index
    %105 = vector.load %arg7[%c1_55, %c0_56, %c0_57] : memref<6x1x64xf32, #tpu.memory_space<vmem>>, vector<1x1x64xf32>
    %106 = vector.shape_cast %105 : vector<1x1x64xf32> to vector<1x64xf32>
    %cst_58 = arith.constant dense<0.000000e+00> : vector<2xf32>
    %107 = vector.multi_reduction <add>, %102, %cst_58 [1] : vector<2x64xf32> to vector<2xf32>
    %108 = vector.shape_cast %107 : vector<2xf32> to vector<2x1xf32>
    %cst_59 = arith.constant 6.400000e+01 : f32
    %109 = vector.broadcast %cst_59 : f32 to vector<2x1xf32>
    %110 = arith.divf %108, %109 : vector<2x1xf32>
    %111 = vector.broadcast %110 : vector<2x1xf32> to vector<2x64xf32>
    %112 = arith.subf %102, %111 : vector<2x64xf32>
    %113 = arith.mulf %112, %112 : vector<2x64xf32>
    %cst_60 = arith.constant dense<0.000000e+00> : vector<2xf32>
    %114 = vector.multi_reduction <add>, %113, %cst_60 [1] : vector<2x64xf32> to vector<2xf32>
    %115 = vector.shape_cast %114 : vector<2xf32> to vector<2x1xf32>
    %cst_61 = arith.constant 6.400000e+01 : f32
    %116 = vector.broadcast %cst_61 : f32 to vector<2x1xf32>
    %117 = arith.divf %115, %116 : vector<2x1xf32>
    %118 = vector.broadcast %110 : vector<2x1xf32> to vector<2x64xf32>
    %119 = arith.subf %102, %118 : vector<2x64xf32>
    %cst_62 = arith.constant 9.99999997E-7 : f32
    %120 = vector.broadcast %cst_62 : f32 to vector<2x1xf32>
    %121 = arith.addf %117, %120 : vector<2x1xf32>
    %122 = math.rsqrt %121 : vector<2x1xf32>
    %123 = vector.broadcast %122 : vector<2x1xf32> to vector<2x64xf32>
    %124 = arith.mulf %119, %123 : vector<2x64xf32>
    %125 = vector.broadcast %104 : vector<1x64xf32> to vector<2x64xf32>
    %126 = arith.mulf %124, %125 : vector<2x64xf32>
    %127 = vector.broadcast %106 : vector<1x64xf32> to vector<2x64xf32>
    %128 = arith.addf %126, %127 : vector<2x64xf32>
    %c1_63 = arith.constant 1 : index
    %c0_64 = arith.constant 0 : index
    %c0_65 = arith.constant 0 : index
    %129 = vector.load %arg8[%c1_63, %c0_64, %c0_65] : memref<6x64x192xf32, #tpu.memory_space<vmem>>, vector<1x64x192xf32>
    %130 = vector.shape_cast %129 : vector<1x64x192xf32> to vector<64x192xf32>
    %cst_66 = arith.constant dense<0.000000e+00> : vector<2x192xf32>
    %131 = tpu.matmul %128, %130, %cst_66 {dimension_numbers = #tpu.dot_dimension_numbers<[1], [0], [0], [1], [0, 0, 1, 1], [], []>, precision = #tpu.contract_precision<fp32>} : vector<2x64xf32>, vector<64x192xf32>, vector<2x192xf32> -> vector<2x192xf32>
    %c1_67 = arith.constant 1 : index
    %c0_68 = arith.constant 0 : index
    %c0_69 = arith.constant 0 : index
    %132 = vector.load %arg9[%c1_67, %c0_68, %c0_69] : memref<6x1x192xf32, #tpu.memory_space<vmem>>, vector<1x1x192xf32>
    %133 = vector.shape_cast %132 : vector<1x1x192xf32> to vector<1x192xf32>
    %134 = vector.broadcast %133 : vector<1x192xf32> to vector<2x192xf32>
    %135 = arith.addf %131, %134 : vector<2x192xf32>
    %136 = vector.extract_strided_slice %135 {offsets = [0, 0], sizes = [2, 64], strides = [1, 1]} : vector<2x192xf32> to vector<2x64xf32>
    %137 = vector.extract_strided_slice %135 {offsets = [0, 64], sizes = [2, 64], strides = [1, 1]} : vector<2x192xf32> to vector<2x64xf32>
    %138 = vector.extract_strided_slice %135 {offsets = [0, 128], sizes = [2, 64], strides = [1, 1]} : vector<2x192xf32> to vector<2x64xf32>
    %cst_70 = arith.constant dense<0.000000e+00> : vector<2x2xf32>
    %139 = tpu.matmul %136, %137, %cst_70 {dimension_numbers = #tpu.dot_dimension_numbers<[1], [1], [0], [0], [0, 0, 1, 0], [], []>, precision = #tpu.contract_precision<fp32>} : vector<2x64xf32>, vector<2x64xf32>, vector<2x2xf32> -> vector<2x2xf32>
    %cst_71 = arith.constant 1.562500e-02 : f32
    %140 = vector.broadcast %cst_71 : f32 to vector<2x2xf32>
    %141 = arith.mulf %139, %140 : vector<2x2xf32>
    %cst_72 = arith.constant dense<0xFF800000> : vector<2xf32>
    %142 = vector.multi_reduction <maximumf>, %141, %cst_72 [1] : vector<2x2xf32> to vector<2xf32>
    %143 = vector.shape_cast %142 : vector<2xf32> to vector<2x1xf32>
    %144 = vector.broadcast %143 : vector<2x1xf32> to vector<2x2xf32>
    %145 = arith.subf %141, %144 : vector<2x2xf32>
    %146 = math.exp %145 : vector<2x2xf32>
    %cst_73 = arith.constant dense<0.000000e+00> : vector<2xf32>
    %147 = vector.multi_reduction <add>, %146, %cst_73 [1] : vector<2x2xf32> to vector<2xf32>
    %148 = vector.shape_cast %147 : vector<2xf32> to vector<2x1xf32>
    %149 = tpu.reciprocal %148 : vector<2x1xf32> -> vector<2x1xf32>
    %150 = vector.broadcast %149 : vector<2x1xf32> to vector<2x2xf32>
    %151 = arith.mulf %146, %150 : vector<2x2xf32>
    %cst_74 = arith.constant dense<0.000000e+00> : vector<2x64xf32>
    %152 = tpu.matmul %151, %138, %cst_74 {dimension_numbers = #tpu.dot_dimension_numbers<[1], [0], [0], [1], [0, 0, 1, 1], [], []>, precision = #tpu.contract_precision<fp32>} : vector<2x2xf32>, vector<2x64xf32>, vector<2x64xf32> -> vector<2x64xf32>
    %153 = arith.addf %152, %102 : vector<2x64xf32>
    %cst_75 = arith.constant dense<0.000000e+00> : vector<2xf32>
    %154 = vector.multi_reduction <add>, %153, %cst_75 [1] : vector<2x64xf32> to vector<2xf32>
    %155 = vector.shape_cast %154 : vector<2xf32> to vector<2x1xf32>
    %cst_76 = arith.constant 6.400000e+01 : f32
    %156 = vector.broadcast %cst_76 : f32 to vector<2x1xf32>
    %157 = arith.divf %155, %156 : vector<2x1xf32>
    %158 = vector.broadcast %157 : vector<2x1xf32> to vector<2x64xf32>
    %159 = arith.subf %153, %158 : vector<2x64xf32>
    %160 = arith.mulf %159, %159 : vector<2x64xf32>
    %cst_77 = arith.constant dense<0.000000e+00> : vector<2xf32>
    %161 = vector.multi_reduction <add>, %160, %cst_77 [1] : vector<2x64xf32> to vector<2xf32>
    %162 = vector.shape_cast %161 : vector<2xf32> to vector<2x1xf32>
    %cst_78 = arith.constant 6.400000e+01 : f32
    %163 = vector.broadcast %cst_78 : f32 to vector<2x1xf32>
    %164 = arith.divf %162, %163 : vector<2x1xf32>
    %165 = vector.broadcast %157 : vector<2x1xf32> to vector<2x64xf32>
    %166 = arith.subf %153, %165 : vector<2x64xf32>
    %cst_79 = arith.constant 9.99999997E-7 : f32
    %167 = vector.broadcast %cst_79 : f32 to vector<2x1xf32>
    %168 = arith.addf %164, %167 : vector<2x1xf32>
    %169 = math.rsqrt %168 : vector<2x1xf32>
    %170 = vector.broadcast %169 : vector<2x1xf32> to vector<2x64xf32>
    %171 = arith.mulf %166, %170 : vector<2x64xf32>
    %172 = vector.broadcast %104 : vector<1x64xf32> to vector<2x64xf32>
    %173 = arith.mulf %171, %172 : vector<2x64xf32>
    %174 = vector.broadcast %106 : vector<1x64xf32> to vector<2x64xf32>
    %175 = arith.addf %173, %174 : vector<2x64xf32>
    %c1_80 = arith.constant 1 : index
    %c0_81 = arith.constant 0 : index
    %c0_82 = arith.constant 0 : index
    %176 = vector.load %arg10[%c1_80, %c0_81, %c0_82] : memref<6x64x64xf32, #tpu.memory_space<vmem>>, vector<1x64x64xf32>
    %177 = vector.shape_cast %176 : vector<1x64x64xf32> to vector<64x64xf32>
    %cst_83 = arith.constant dense<0.000000e+00> : vector<2x64xf32>
    %178 = tpu.matmul %175, %177, %cst_83 {dimension_numbers = #tpu.dot_dimension_numbers<[1], [0], [0], [1], [0, 0, 1, 1], [], []>, precision = #tpu.contract_precision<fp32>} : vector<2x64xf32>, vector<64x64xf32>, vector<2x64xf32> -> vector<2x64xf32>
    %c1_84 = arith.constant 1 : index
    %c0_85 = arith.constant 0 : index
    %c0_86 = arith.constant 0 : index
    %179 = vector.load %arg11[%c1_84, %c0_85, %c0_86] : memref<6x1x64xf32, #tpu.memory_space<vmem>>, vector<1x1x64xf32>
    %180 = vector.shape_cast %179 : vector<1x1x64xf32> to vector<1x64xf32>
    %181 = vector.broadcast %180 : vector<1x64xf32> to vector<2x64xf32>
    %182 = arith.addf %178, %181 : vector<2x64xf32>
    %cst_87 = arith.constant 0.000000e+00 : f32
    %183 = vector.broadcast %cst_87 : f32 to vector<2x64xf32>
    %184 = arith.maximumf %182, %183 : vector<2x64xf32>
    %c1_88 = arith.constant 1 : index
    %c0_89 = arith.constant 0 : index
    %c0_90 = arith.constant 0 : index
    %185 = vector.load %arg12[%c1_88, %c0_89, %c0_90] : memref<6x64x64xf32, #tpu.memory_space<vmem>>, vector<1x64x64xf32>
    %186 = vector.shape_cast %185 : vector<1x64x64xf32> to vector<64x64xf32>
    %cst_91 = arith.constant dense<0.000000e+00> : vector<2x64xf32>
    %187 = tpu.matmul %184, %186, %cst_91 {dimension_numbers = #tpu.dot_dimension_numbers<[1], [0], [0], [1], [0, 0, 1, 1], [], []>, precision = #tpu.contract_precision<fp32>} : vector<2x64xf32>, vector<64x64xf32>, vector<2x64xf32> -> vector<2x64xf32>
    %c1_92 = arith.constant 1 : index
    %c0_93 = arith.constant 0 : index
    %c0_94 = arith.constant 0 : index
    %188 = vector.load %arg13[%c1_92, %c0_93, %c0_94] : memref<6x1x64xf32, #tpu.memory_space<vmem>>, vector<1x1x64xf32>
    %189 = vector.shape_cast %188 : vector<1x1x64xf32> to vector<1x64xf32>
    %190 = vector.broadcast %189 : vector<1x64xf32> to vector<2x64xf32>
    %191 = arith.addf %187, %190 : vector<2x64xf32>
    %cst_95 = arith.constant 0.000000e+00 : f32
    %192 = vector.broadcast %cst_95 : f32 to vector<2x64xf32>
    %193 = arith.maximumf %191, %192 : vector<2x64xf32>
    %194 = arith.addf %193, %153 : vector<2x64xf32>
    %c2 = arith.constant 2 : index
    %c0_96 = arith.constant 0 : index
    %c0_97 = arith.constant 0 : index
    %195 = vector.load %arg6[%c2, %c0_96, %c0_97] : memref<6x1x64xf32, #tpu.memory_space<vmem>>, vector<1x1x64xf32>
    %196 = vector.shape_cast %195 : vector<1x1x64xf32> to vector<1x64xf32>
    %c2_98 = arith.constant 2 : index
    %c0_99 = arith.constant 0 : index
    %c0_100 = arith.constant 0 : index
    %197 = vector.load %arg7[%c2_98, %c0_99, %c0_100] : memref<6x1x64xf32, #tpu.memory_space<vmem>>, vector<1x1x64xf32>
    %198 = vector.shape_cast %197 : vector<1x1x64xf32> to vector<1x64xf32>
    %cst_101 = arith.constant dense<0.000000e+00> : vector<2xf32>
    %199 = vector.multi_reduction <add>, %194, %cst_101 [1] : vector<2x64xf32> to vector<2xf32>
    %200 = vector.shape_cast %199 : vector<2xf32> to vector<2x1xf32>
    %cst_102 = arith.constant 6.400000e+01 : f32
    %201 = vector.broadcast %cst_102 : f32 to vector<2x1xf32>
    %202 = arith.divf %200, %201 : vector<2x1xf32>
    %203 = vector.broadcast %202 : vector<2x1xf32> to vector<2x64xf32>
    %204 = arith.subf %194, %203 : vector<2x64xf32>
    %205 = arith.mulf %204, %204 : vector<2x64xf32>
    %cst_103 = arith.constant dense<0.000000e+00> : vector<2xf32>
    %206 = vector.multi_reduction <add>, %205, %cst_103 [1] : vector<2x64xf32> to vector<2xf32>
    %207 = vector.shape_cast %206 : vector<2xf32> to vector<2x1xf32>
    %cst_104 = arith.constant 6.400000e+01 : f32
    %208 = vector.broadcast %cst_104 : f32 to vector<2x1xf32>
    %209 = arith.divf %207, %208 : vector<2x1xf32>
    %210 = vector.broadcast %202 : vector<2x1xf32> to vector<2x64xf32>
    %211 = arith.subf %194, %210 : vector<2x64xf32>
    %cst_105 = arith.constant 9.99999997E-7 : f32
    %212 = vector.broadcast %cst_105 : f32 to vector<2x1xf32>
    %213 = arith.addf %209, %212 : vector<2x1xf32>
    %214 = math.rsqrt %213 : vector<2x1xf32>
    %215 = vector.broadcast %214 : vector<2x1xf32> to vector<2x64xf32>
    %216 = arith.mulf %211, %215 : vector<2x64xf32>
    %217 = vector.broadcast %196 : vector<1x64xf32> to vector<2x64xf32>
    %218 = arith.mulf %216, %217 : vector<2x64xf32>
    %219 = vector.broadcast %198 : vector<1x64xf32> to vector<2x64xf32>
    %220 = arith.addf %218, %219 : vector<2x64xf32>
    %c2_106 = arith.constant 2 : index
    %c0_107 = arith.constant 0 : index
    %c0_108 = arith.constant 0 : index
    %221 = vector.load %arg8[%c2_106, %c0_107, %c0_108] : memref<6x64x192xf32, #tpu.memory_space<vmem>>, vector<1x64x192xf32>
    %222 = vector.shape_cast %221 : vector<1x64x192xf32> to vector<64x192xf32>
    %cst_109 = arith.constant dense<0.000000e+00> : vector<2x192xf32>
    %223 = tpu.matmul %220, %222, %cst_109 {dimension_numbers = #tpu.dot_dimension_numbers<[1], [0], [0], [1], [0, 0, 1, 1], [], []>, precision = #tpu.contract_precision<fp32>} : vector<2x64xf32>, vector<64x192xf32>, vector<2x192xf32> -> vector<2x192xf32>
    %c2_110 = arith.constant 2 : index
    %c0_111 = arith.constant 0 : index
    %c0_112 = arith.constant 0 : index
    %224 = vector.load %arg9[%c2_110, %c0_111, %c0_112] : memref<6x1x192xf32, #tpu.memory_space<vmem>>, vector<1x1x192xf32>
    %225 = vector.shape_cast %224 : vector<1x1x192xf32> to vector<1x192xf32>
    %226 = vector.broadcast %225 : vector<1x192xf32> to vector<2x192xf32>
    %227 = arith.addf %223, %226 : vector<2x192xf32>
    %228 = vector.extract_strided_slice %227 {offsets = [0, 0], sizes = [2, 64], strides = [1, 1]} : vector<2x192xf32> to vector<2x64xf32>
    %229 = vector.extract_strided_slice %227 {offsets = [0, 64], sizes = [2, 64], strides = [1, 1]} : vector<2x192xf32> to vector<2x64xf32>
    %230 = vector.extract_strided_slice %227 {offsets = [0, 128], sizes = [2, 64], strides = [1, 1]} : vector<2x192xf32> to vector<2x64xf32>
    %cst_113 = arith.constant dense<0.000000e+00> : vector<2x2xf32>
    %231 = tpu.matmul %228, %229, %cst_113 {dimension_numbers = #tpu.dot_dimension_numbers<[1], [1], [0], [0], [0, 0, 1, 0], [], []>, precision = #tpu.contract_precision<fp32>} : vector<2x64xf32>, vector<2x64xf32>, vector<2x2xf32> -> vector<2x2xf32>
    %cst_114 = arith.constant 1.562500e-02 : f32
    %232 = vector.broadcast %cst_114 : f32 to vector<2x2xf32>
    %233 = arith.mulf %231, %232 : vector<2x2xf32>
    %cst_115 = arith.constant dense<0xFF800000> : vector<2xf32>
    %234 = vector.multi_reduction <maximumf>, %233, %cst_115 [1] : vector<2x2xf32> to vector<2xf32>
    %235 = vector.shape_cast %234 : vector<2xf32> to vector<2x1xf32>
    %236 = vector.broadcast %235 : vector<2x1xf32> to vector<2x2xf32>
    %237 = arith.subf %233, %236 : vector<2x2xf32>
    %238 = math.exp %237 : vector<2x2xf32>
    %cst_116 = arith.constant dense<0.000000e+00> : vector<2xf32>
    %239 = vector.multi_reduction <add>, %238, %cst_116 [1] : vector<2x2xf32> to vector<2xf32>
    %240 = vector.shape_cast %239 : vector<2xf32> to vector<2x1xf32>
    %241 = tpu.reciprocal %240 : vector<2x1xf32> -> vector<2x1xf32>
    %242 = vector.broadcast %241 : vector<2x1xf32> to vector<2x2xf32>
    %243 = arith.mulf %238, %242 : vector<2x2xf32>
    %cst_117 = arith.constant dense<0.000000e+00> : vector<2x64xf32>
    %244 = tpu.matmul %243, %230, %cst_117 {dimension_numbers = #tpu.dot_dimension_numbers<[1], [0], [0], [1], [0, 0, 1, 1], [], []>, precision = #tpu.contract_precision<fp32>} : vector<2x2xf32>, vector<2x64xf32>, vector<2x64xf32> -> vector<2x64xf32>
    %245 = arith.addf %244, %194 : vector<2x64xf32>
    %cst_118 = arith.constant dense<0.000000e+00> : vector<2xf32>
    %246 = vector.multi_reduction <add>, %245, %cst_118 [1] : vector<2x64xf32> to vector<2xf32>
    %247 = vector.shape_cast %246 : vector<2xf32> to vector<2x1xf32>
    %cst_119 = arith.constant 6.400000e+01 : f32
    %248 = vector.broadcast %cst_119 : f32 to vector<2x1xf32>
    %249 = arith.divf %247, %248 : vector<2x1xf32>
    %250 = vector.broadcast %249 : vector<2x1xf32> to vector<2x64xf32>
    %251 = arith.subf %245, %250 : vector<2x64xf32>
    %252 = arith.mulf %251, %251 : vector<2x64xf32>
    %cst_120 = arith.constant dense<0.000000e+00> : vector<2xf32>
    %253 = vector.multi_reduction <add>, %252, %cst_120 [1] : vector<2x64xf32> to vector<2xf32>
    %254 = vector.shape_cast %253 : vector<2xf32> to vector<2x1xf32>
    %cst_121 = arith.constant 6.400000e+01 : f32
    %255 = vector.broadcast %cst_121 : f32 to vector<2x1xf32>
    %256 = arith.divf %254, %255 : vector<2x1xf32>
    %257 = vector.broadcast %249 : vector<2x1xf32> to vector<2x64xf32>
    %258 = arith.subf %245, %257 : vector<2x64xf32>
    %cst_122 = arith.constant 9.99999997E-7 : f32
    %259 = vector.broadcast %cst_122 : f32 to vector<2x1xf32>
    %260 = arith.addf %256, %259 : vector<2x1xf32>
    %261 = math.rsqrt %260 : vector<2x1xf32>
    %262 = vector.broadcast %261 : vector<2x1xf32> to vector<2x64xf32>
    %263 = arith.mulf %258, %262 : vector<2x64xf32>
    %264 = vector.broadcast %196 : vector<1x64xf32> to vector<2x64xf32>
    %265 = arith.mulf %263, %264 : vector<2x64xf32>
    %266 = vector.broadcast %198 : vector<1x64xf32> to vector<2x64xf32>
    %267 = arith.addf %265, %266 : vector<2x64xf32>
    %c2_123 = arith.constant 2 : index
    %c0_124 = arith.constant 0 : index
    %c0_125 = arith.constant 0 : index
    %268 = vector.load %arg10[%c2_123, %c0_124, %c0_125] : memref<6x64x64xf32, #tpu.memory_space<vmem>>, vector<1x64x64xf32>
    %269 = vector.shape_cast %268 : vector<1x64x64xf32> to vector<64x64xf32>
    %cst_126 = arith.constant dense<0.000000e+00> : vector<2x64xf32>
    %270 = tpu.matmul %267, %269, %cst_126 {dimension_numbers = #tpu.dot_dimension_numbers<[1], [0], [0], [1], [0, 0, 1, 1], [], []>, precision = #tpu.contract_precision<fp32>} : vector<2x64xf32>, vector<64x64xf32>, vector<2x64xf32> -> vector<2x64xf32>
    %c2_127 = arith.constant 2 : index
    %c0_128 = arith.constant 0 : index
    %c0_129 = arith.constant 0 : index
    %271 = vector.load %arg11[%c2_127, %c0_128, %c0_129] : memref<6x1x64xf32, #tpu.memory_space<vmem>>, vector<1x1x64xf32>
    %272 = vector.shape_cast %271 : vector<1x1x64xf32> to vector<1x64xf32>
    %273 = vector.broadcast %272 : vector<1x64xf32> to vector<2x64xf32>
    %274 = arith.addf %270, %273 : vector<2x64xf32>
    %cst_130 = arith.constant 0.000000e+00 : f32
    %275 = vector.broadcast %cst_130 : f32 to vector<2x64xf32>
    %276 = arith.maximumf %274, %275 : vector<2x64xf32>
    %c2_131 = arith.constant 2 : index
    %c0_132 = arith.constant 0 : index
    %c0_133 = arith.constant 0 : index
    %277 = vector.load %arg12[%c2_131, %c0_132, %c0_133] : memref<6x64x64xf32, #tpu.memory_space<vmem>>, vector<1x64x64xf32>
    %278 = vector.shape_cast %277 : vector<1x64x64xf32> to vector<64x64xf32>
    %cst_134 = arith.constant dense<0.000000e+00> : vector<2x64xf32>
    %279 = tpu.matmul %276, %278, %cst_134 {dimension_numbers = #tpu.dot_dimension_numbers<[1], [0], [0], [1], [0, 0, 1, 1], [], []>, precision = #tpu.contract_precision<fp32>} : vector<2x64xf32>, vector<64x64xf32>, vector<2x64xf32> -> vector<2x64xf32>
    %c2_135 = arith.constant 2 : index
    %c0_136 = arith.constant 0 : index
    %c0_137 = arith.constant 0 : index
    %280 = vector.load %arg13[%c2_135, %c0_136, %c0_137] : memref<6x1x64xf32, #tpu.memory_space<vmem>>, vector<1x1x64xf32>
    %281 = vector.shape_cast %280 : vector<1x1x64xf32> to vector<1x64xf32>
    %282 = vector.broadcast %281 : vector<1x64xf32> to vector<2x64xf32>
    %283 = arith.addf %279, %282 : vector<2x64xf32>
    %cst_138 = arith.constant 0.000000e+00 : f32
    %284 = vector.broadcast %cst_138 : f32 to vector<2x64xf32>
    %285 = arith.maximumf %283, %284 : vector<2x64xf32>
    %286 = arith.addf %285, %245 : vector<2x64xf32>
    %c3 = arith.constant 3 : index
    %c0_139 = arith.constant 0 : index
    %c0_140 = arith.constant 0 : index
    %287 = vector.load %arg6[%c3, %c0_139, %c0_140] : memref<6x1x64xf32, #tpu.memory_space<vmem>>, vector<1x1x64xf32>
    %288 = vector.shape_cast %287 : vector<1x1x64xf32> to vector<1x64xf32>
    %c3_141 = arith.constant 3 : index
    %c0_142 = arith.constant 0 : index
    %c0_143 = arith.constant 0 : index
    %289 = vector.load %arg7[%c3_141, %c0_142, %c0_143] : memref<6x1x64xf32, #tpu.memory_space<vmem>>, vector<1x1x64xf32>
    %290 = vector.shape_cast %289 : vector<1x1x64xf32> to vector<1x64xf32>
    %cst_144 = arith.constant dense<0.000000e+00> : vector<2xf32>
    %291 = vector.multi_reduction <add>, %286, %cst_144 [1] : vector<2x64xf32> to vector<2xf32>
    %292 = vector.shape_cast %291 : vector<2xf32> to vector<2x1xf32>
    %cst_145 = arith.constant 6.400000e+01 : f32
    %293 = vector.broadcast %cst_145 : f32 to vector<2x1xf32>
    %294 = arith.divf %292, %293 : vector<2x1xf32>
    %295 = vector.broadcast %294 : vector<2x1xf32> to vector<2x64xf32>
    %296 = arith.subf %286, %295 : vector<2x64xf32>
    %297 = arith.mulf %296, %296 : vector<2x64xf32>
    %cst_146 = arith.constant dense<0.000000e+00> : vector<2xf32>
    %298 = vector.multi_reduction <add>, %297, %cst_146 [1] : vector<2x64xf32> to vector<2xf32>
    %299 = vector.shape_cast %298 : vector<2xf32> to vector<2x1xf32>
    %cst_147 = arith.constant 6.400000e+01 : f32
    %300 = vector.broadcast %cst_147 : f32 to vector<2x1xf32>
    %301 = arith.divf %299, %300 : vector<2x1xf32>
    %302 = vector.broadcast %294 : vector<2x1xf32> to vector<2x64xf32>
    %303 = arith.subf %286, %302 : vector<2x64xf32>
    %cst_148 = arith.constant 9.99999997E-7 : f32
    %304 = vector.broadcast %cst_148 : f32 to vector<2x1xf32>
    %305 = arith.addf %301, %304 : vector<2x1xf32>
    %306 = math.rsqrt %305 : vector<2x1xf32>
    %307 = vector.broadcast %306 : vector<2x1xf32> to vector<2x64xf32>
    %308 = arith.mulf %303, %307 : vector<2x64xf32>
    %309 = vector.broadcast %288 : vector<1x64xf32> to vector<2x64xf32>
    %310 = arith.mulf %308, %309 : vector<2x64xf32>
    %311 = vector.broadcast %290 : vector<1x64xf32> to vector<2x64xf32>
    %312 = arith.addf %310, %311 : vector<2x64xf32>
    %c3_149 = arith.constant 3 : index
    %c0_150 = arith.constant 0 : index
    %c0_151 = arith.constant 0 : index
    %313 = vector.load %arg8[%c3_149, %c0_150, %c0_151] : memref<6x64x192xf32, #tpu.memory_space<vmem>>, vector<1x64x192xf32>
    %314 = vector.shape_cast %313 : vector<1x64x192xf32> to vector<64x192xf32>
    %cst_152 = arith.constant dense<0.000000e+00> : vector<2x192xf32>
    %315 = tpu.matmul %312, %314, %cst_152 {dimension_numbers = #tpu.dot_dimension_numbers<[1], [0], [0], [1], [0, 0, 1, 1], [], []>, precision = #tpu.contract_precision<fp32>} : vector<2x64xf32>, vector<64x192xf32>, vector<2x192xf32> -> vector<2x192xf32>
    %c3_153 = arith.constant 3 : index
    %c0_154 = arith.constant 0 : index
    %c0_155 = arith.constant 0 : index
    %316 = vector.load %arg9[%c3_153, %c0_154, %c0_155] : memref<6x1x192xf32, #tpu.memory_space<vmem>>, vector<1x1x192xf32>
    %317 = vector.shape_cast %316 : vector<1x1x192xf32> to vector<1x192xf32>
    %318 = vector.broadcast %317 : vector<1x192xf32> to vector<2x192xf32>
    %319 = arith.addf %315, %318 : vector<2x192xf32>
    %320 = vector.extract_strided_slice %319 {offsets = [0, 0], sizes = [2, 64], strides = [1, 1]} : vector<2x192xf32> to vector<2x64xf32>
    %321 = vector.extract_strided_slice %319 {offsets = [0, 64], sizes = [2, 64], strides = [1, 1]} : vector<2x192xf32> to vector<2x64xf32>
    %322 = vector.extract_strided_slice %319 {offsets = [0, 128], sizes = [2, 64], strides = [1, 1]} : vector<2x192xf32> to vector<2x64xf32>
    %cst_156 = arith.constant dense<0.000000e+00> : vector<2x2xf32>
    %323 = tpu.matmul %320, %321, %cst_156 {dimension_numbers = #tpu.dot_dimension_numbers<[1], [1], [0], [0], [0, 0, 1, 0], [], []>, precision = #tpu.contract_precision<fp32>} : vector<2x64xf32>, vector<2x64xf32>, vector<2x2xf32> -> vector<2x2xf32>
    %cst_157 = arith.constant 1.562500e-02 : f32
    %324 = vector.broadcast %cst_157 : f32 to vector<2x2xf32>
    %325 = arith.mulf %323, %324 : vector<2x2xf32>
    %cst_158 = arith.constant dense<0xFF800000> : vector<2xf32>
    %326 = vector.multi_reduction <maximumf>, %325, %cst_158 [1] : vector<2x2xf32> to vector<2xf32>
    %327 = vector.shape_cast %326 : vector<2xf32> to vector<2x1xf32>
    %328 = vector.broadcast %327 : vector<2x1xf32> to vector<2x2xf32>
    %329 = arith.subf %325, %328 : vector<2x2xf32>
    %330 = math.exp %329 : vector<2x2xf32>
    %cst_159 = arith.constant dense<0.000000e+00> : vector<2xf32>
    %331 = vector.multi_reduction <add>, %330, %cst_159 [1] : vector<2x2xf32> to vector<2xf32>
    %332 = vector.shape_cast %331 : vector<2xf32> to vector<2x1xf32>
    %333 = tpu.reciprocal %332 : vector<2x1xf32> -> vector<2x1xf32>
    %334 = vector.broadcast %333 : vector<2x1xf32> to vector<2x2xf32>
    %335 = arith.mulf %330, %334 : vector<2x2xf32>
    %cst_160 = arith.constant dense<0.000000e+00> : vector<2x64xf32>
    %336 = tpu.matmul %335, %322, %cst_160 {dimension_numbers = #tpu.dot_dimension_numbers<[1], [0], [0], [1], [0, 0, 1, 1], [], []>, precision = #tpu.contract_precision<fp32>} : vector<2x2xf32>, vector<2x64xf32>, vector<2x64xf32> -> vector<2x64xf32>
    %337 = arith.addf %336, %286 : vector<2x64xf32>
    %cst_161 = arith.constant dense<0.000000e+00> : vector<2xf32>
    %338 = vector.multi_reduction <add>, %337, %cst_161 [1] : vector<2x64xf32> to vector<2xf32>
    %339 = vector.shape_cast %338 : vector<2xf32> to vector<2x1xf32>
    %cst_162 = arith.constant 6.400000e+01 : f32
    %340 = vector.broadcast %cst_162 : f32 to vector<2x1xf32>
    %341 = arith.divf %339, %340 : vector<2x1xf32>
    %342 = vector.broadcast %341 : vector<2x1xf32> to vector<2x64xf32>
    %343 = arith.subf %337, %342 : vector<2x64xf32>
    %344 = arith.mulf %343, %343 : vector<2x64xf32>
    %cst_163 = arith.constant dense<0.000000e+00> : vector<2xf32>
    %345 = vector.multi_reduction <add>, %344, %cst_163 [1] : vector<2x64xf32> to vector<2xf32>
    %346 = vector.shape_cast %345 : vector<2xf32> to vector<2x1xf32>
    %cst_164 = arith.constant 6.400000e+01 : f32
    %347 = vector.broadcast %cst_164 : f32 to vector<2x1xf32>
    %348 = arith.divf %346, %347 : vector<2x1xf32>
    %349 = vector.broadcast %341 : vector<2x1xf32> to vector<2x64xf32>
    %350 = arith.subf %337, %349 : vector<2x64xf32>
    %cst_165 = arith.constant 9.99999997E-7 : f32
    %351 = vector.broadcast %cst_165 : f32 to vector<2x1xf32>
    %352 = arith.addf %348, %351 : vector<2x1xf32>
    %353 = math.rsqrt %352 : vector<2x1xf32>
    %354 = vector.broadcast %353 : vector<2x1xf32> to vector<2x64xf32>
    %355 = arith.mulf %350, %354 : vector<2x64xf32>
    %356 = vector.broadcast %288 : vector<1x64xf32> to vector<2x64xf32>
    %357 = arith.mulf %355, %356 : vector<2x64xf32>
    %358 = vector.broadcast %290 : vector<1x64xf32> to vector<2x64xf32>
    %359 = arith.addf %357, %358 : vector<2x64xf32>
    %c3_166 = arith.constant 3 : index
    %c0_167 = arith.constant 0 : index
    %c0_168 = arith.constant 0 : index
    %360 = vector.load %arg10[%c3_166, %c0_167, %c0_168] : memref<6x64x64xf32, #tpu.memory_space<vmem>>, vector<1x64x64xf32>
    %361 = vector.shape_cast %360 : vector<1x64x64xf32> to vector<64x64xf32>
    %cst_169 = arith.constant dense<0.000000e+00> : vector<2x64xf32>
    %362 = tpu.matmul %359, %361, %cst_169 {dimension_numbers = #tpu.dot_dimension_numbers<[1], [0], [0], [1], [0, 0, 1, 1], [], []>, precision = #tpu.contract_precision<fp32>} : vector<2x64xf32>, vector<64x64xf32>, vector<2x64xf32> -> vector<2x64xf32>
    %c3_170 = arith.constant 3 : index
    %c0_171 = arith.constant 0 : index
    %c0_172 = arith.constant 0 : index
    %363 = vector.load %arg11[%c3_170, %c0_171, %c0_172] : memref<6x1x64xf32, #tpu.memory_space<vmem>>, vector<1x1x64xf32>
    %364 = vector.shape_cast %363 : vector<1x1x64xf32> to vector<1x64xf32>
    %365 = vector.broadcast %364 : vector<1x64xf32> to vector<2x64xf32>
    %366 = arith.addf %362, %365 : vector<2x64xf32>
    %cst_173 = arith.constant 0.000000e+00 : f32
    %367 = vector.broadcast %cst_173 : f32 to vector<2x64xf32>
    %368 = arith.maximumf %366, %367 : vector<2x64xf32>
    %c3_174 = arith.constant 3 : index
    %c0_175 = arith.constant 0 : index
    %c0_176 = arith.constant 0 : index
    %369 = vector.load %arg12[%c3_174, %c0_175, %c0_176] : memref<6x64x64xf32, #tpu.memory_space<vmem>>, vector<1x64x64xf32>
    %370 = vector.shape_cast %369 : vector<1x64x64xf32> to vector<64x64xf32>
    %cst_177 = arith.constant dense<0.000000e+00> : vector<2x64xf32>
    %371 = tpu.matmul %368, %370, %cst_177 {dimension_numbers = #tpu.dot_dimension_numbers<[1], [0], [0], [1], [0, 0, 1, 1], [], []>, precision = #tpu.contract_precision<fp32>} : vector<2x64xf32>, vector<64x64xf32>, vector<2x64xf32> -> vector<2x64xf32>
    %c3_178 = arith.constant 3 : index
    %c0_179 = arith.constant 0 : index
    %c0_180 = arith.constant 0 : index
    %372 = vector.load %arg13[%c3_178, %c0_179, %c0_180] : memref<6x1x64xf32, #tpu.memory_space<vmem>>, vector<1x1x64xf32>
    %373 = vector.shape_cast %372 : vector<1x1x64xf32> to vector<1x64xf32>
    %374 = vector.broadcast %373 : vector<1x64xf32> to vector<2x64xf32>
    %375 = arith.addf %371, %374 : vector<2x64xf32>
    %cst_181 = arith.constant 0.000000e+00 : f32
    %376 = vector.broadcast %cst_181 : f32 to vector<2x64xf32>
    %377 = arith.maximumf %375, %376 : vector<2x64xf32>
    %378 = arith.addf %377, %337 : vector<2x64xf32>
    %c4 = arith.constant 4 : index
    %c0_182 = arith.constant 0 : index
    %c0_183 = arith.constant 0 : index
    %379 = vector.load %arg6[%c4, %c0_182, %c0_183] : memref<6x1x64xf32, #tpu.memory_space<vmem>>, vector<1x1x64xf32>
    %380 = vector.shape_cast %379 : vector<1x1x64xf32> to vector<1x64xf32>
    %c4_184 = arith.constant 4 : index
    %c0_185 = arith.constant 0 : index
    %c0_186 = arith.constant 0 : index
    %381 = vector.load %arg7[%c4_184, %c0_185, %c0_186] : memref<6x1x64xf32, #tpu.memory_space<vmem>>, vector<1x1x64xf32>
    %382 = vector.shape_cast %381 : vector<1x1x64xf32> to vector<1x64xf32>
    %cst_187 = arith.constant dense<0.000000e+00> : vector<2xf32>
    %383 = vector.multi_reduction <add>, %378, %cst_187 [1] : vector<2x64xf32> to vector<2xf32>
    %384 = vector.shape_cast %383 : vector<2xf32> to vector<2x1xf32>
    %cst_188 = arith.constant 6.400000e+01 : f32
    %385 = vector.broadcast %cst_188 : f32 to vector<2x1xf32>
    %386 = arith.divf %384, %385 : vector<2x1xf32>
    %387 = vector.broadcast %386 : vector<2x1xf32> to vector<2x64xf32>
    %388 = arith.subf %378, %387 : vector<2x64xf32>
    %389 = arith.mulf %388, %388 : vector<2x64xf32>
    %cst_189 = arith.constant dense<0.000000e+00> : vector<2xf32>
    %390 = vector.multi_reduction <add>, %389, %cst_189 [1] : vector<2x64xf32> to vector<2xf32>
    %391 = vector.shape_cast %390 : vector<2xf32> to vector<2x1xf32>
    %cst_190 = arith.constant 6.400000e+01 : f32
    %392 = vector.broadcast %cst_190 : f32 to vector<2x1xf32>
    %393 = arith.divf %391, %392 : vector<2x1xf32>
    %394 = vector.broadcast %386 : vector<2x1xf32> to vector<2x64xf32>
    %395 = arith.subf %378, %394 : vector<2x64xf32>
    %cst_191 = arith.constant 9.99999997E-7 : f32
    %396 = vector.broadcast %cst_191 : f32 to vector<2x1xf32>
    %397 = arith.addf %393, %396 : vector<2x1xf32>
    %398 = math.rsqrt %397 : vector<2x1xf32>
    %399 = vector.broadcast %398 : vector<2x1xf32> to vector<2x64xf32>
    %400 = arith.mulf %395, %399 : vector<2x64xf32>
    %401 = vector.broadcast %380 : vector<1x64xf32> to vector<2x64xf32>
    %402 = arith.mulf %400, %401 : vector<2x64xf32>
    %403 = vector.broadcast %382 : vector<1x64xf32> to vector<2x64xf32>
    %404 = arith.addf %402, %403 : vector<2x64xf32>
    %c4_192 = arith.constant 4 : index
    %c0_193 = arith.constant 0 : index
    %c0_194 = arith.constant 0 : index
    %405 = vector.load %arg8[%c4_192, %c0_193, %c0_194] : memref<6x64x192xf32, #tpu.memory_space<vmem>>, vector<1x64x192xf32>
    %406 = vector.shape_cast %405 : vector<1x64x192xf32> to vector<64x192xf32>
    %cst_195 = arith.constant dense<0.000000e+00> : vector<2x192xf32>
    %407 = tpu.matmul %404, %406, %cst_195 {dimension_numbers = #tpu.dot_dimension_numbers<[1], [0], [0], [1], [0, 0, 1, 1], [], []>, precision = #tpu.contract_precision<fp32>} : vector<2x64xf32>, vector<64x192xf32>, vector<2x192xf32> -> vector<2x192xf32>
    %c4_196 = arith.constant 4 : index
    %c0_197 = arith.constant 0 : index
    %c0_198 = arith.constant 0 : index
    %408 = vector.load %arg9[%c4_196, %c0_197, %c0_198] : memref<6x1x192xf32, #tpu.memory_space<vmem>>, vector<1x1x192xf32>
    %409 = vector.shape_cast %408 : vector<1x1x192xf32> to vector<1x192xf32>
    %410 = vector.broadcast %409 : vector<1x192xf32> to vector<2x192xf32>
    %411 = arith.addf %407, %410 : vector<2x192xf32>
    %412 = vector.extract_strided_slice %411 {offsets = [0, 0], sizes = [2, 64], strides = [1, 1]} : vector<2x192xf32> to vector<2x64xf32>
    %413 = vector.extract_strided_slice %411 {offsets = [0, 64], sizes = [2, 64], strides = [1, 1]} : vector<2x192xf32> to vector<2x64xf32>
    %414 = vector.extract_strided_slice %411 {offsets = [0, 128], sizes = [2, 64], strides = [1, 1]} : vector<2x192xf32> to vector<2x64xf32>
    %cst_199 = arith.constant dense<0.000000e+00> : vector<2x2xf32>
    %415 = tpu.matmul %412, %413, %cst_199 {dimension_numbers = #tpu.dot_dimension_numbers<[1], [1], [0], [0], [0, 0, 1, 0], [], []>, precision = #tpu.contract_precision<fp32>} : vector<2x64xf32>, vector<2x64xf32>, vector<2x2xf32> -> vector<2x2xf32>
    %cst_200 = arith.constant 1.562500e-02 : f32
    %416 = vector.broadcast %cst_200 : f32 to vector<2x2xf32>
    %417 = arith.mulf %415, %416 : vector<2x2xf32>
    %cst_201 = arith.constant dense<0xFF800000> : vector<2xf32>
    %418 = vector.multi_reduction <maximumf>, %417, %cst_201 [1] : vector<2x2xf32> to vector<2xf32>
    %419 = vector.shape_cast %418 : vector<2xf32> to vector<2x1xf32>
    %420 = vector.broadcast %419 : vector<2x1xf32> to vector<2x2xf32>
    %421 = arith.subf %417, %420 : vector<2x2xf32>
    %422 = math.exp %421 : vector<2x2xf32>
    %cst_202 = arith.constant dense<0.000000e+00> : vector<2xf32>
    %423 = vector.multi_reduction <add>, %422, %cst_202 [1] : vector<2x2xf32> to vector<2xf32>
    %424 = vector.shape_cast %423 : vector<2xf32> to vector<2x1xf32>
    %425 = tpu.reciprocal %424 : vector<2x1xf32> -> vector<2x1xf32>
    %426 = vector.broadcast %425 : vector<2x1xf32> to vector<2x2xf32>
    %427 = arith.mulf %422, %426 : vector<2x2xf32>
    %cst_203 = arith.constant dense<0.000000e+00> : vector<2x64xf32>
    %428 = tpu.matmul %427, %414, %cst_203 {dimension_numbers = #tpu.dot_dimension_numbers<[1], [0], [0], [1], [0, 0, 1, 1], [], []>, precision = #tpu.contract_precision<fp32>} : vector<2x2xf32>, vector<2x64xf32>, vector<2x64xf32> -> vector<2x64xf32>
    %429 = arith.addf %428, %378 : vector<2x64xf32>
    %cst_204 = arith.constant dense<0.000000e+00> : vector<2xf32>
    %430 = vector.multi_reduction <add>, %429, %cst_204 [1] : vector<2x64xf32> to vector<2xf32>
    %431 = vector.shape_cast %430 : vector<2xf32> to vector<2x1xf32>
    %cst_205 = arith.constant 6.400000e+01 : f32
    %432 = vector.broadcast %cst_205 : f32 to vector<2x1xf32>
    %433 = arith.divf %431, %432 : vector<2x1xf32>
    %434 = vector.broadcast %433 : vector<2x1xf32> to vector<2x64xf32>
    %435 = arith.subf %429, %434 : vector<2x64xf32>
    %436 = arith.mulf %435, %435 : vector<2x64xf32>
    %cst_206 = arith.constant dense<0.000000e+00> : vector<2xf32>
    %437 = vector.multi_reduction <add>, %436, %cst_206 [1] : vector<2x64xf32> to vector<2xf32>
    %438 = vector.shape_cast %437 : vector<2xf32> to vector<2x1xf32>
    %cst_207 = arith.constant 6.400000e+01 : f32
    %439 = vector.broadcast %cst_207 : f32 to vector<2x1xf32>
    %440 = arith.divf %438, %439 : vector<2x1xf32>
    %441 = vector.broadcast %433 : vector<2x1xf32> to vector<2x64xf32>
    %442 = arith.subf %429, %441 : vector<2x64xf32>
    %cst_208 = arith.constant 9.99999997E-7 : f32
    %443 = vector.broadcast %cst_208 : f32 to vector<2x1xf32>
    %444 = arith.addf %440, %443 : vector<2x1xf32>
    %445 = math.rsqrt %444 : vector<2x1xf32>
    %446 = vector.broadcast %445 : vector<2x1xf32> to vector<2x64xf32>
    %447 = arith.mulf %442, %446 : vector<2x64xf32>
    %448 = vector.broadcast %380 : vector<1x64xf32> to vector<2x64xf32>
    %449 = arith.mulf %447, %448 : vector<2x64xf32>
    %450 = vector.broadcast %382 : vector<1x64xf32> to vector<2x64xf32>
    %451 = arith.addf %449, %450 : vector<2x64xf32>
    %c4_209 = arith.constant 4 : index
    %c0_210 = arith.constant 0 : index
    %c0_211 = arith.constant 0 : index
    %452 = vector.load %arg10[%c4_209, %c0_210, %c0_211] : memref<6x64x64xf32, #tpu.memory_space<vmem>>, vector<1x64x64xf32>
    %453 = vector.shape_cast %452 : vector<1x64x64xf32> to vector<64x64xf32>
    %cst_212 = arith.constant dense<0.000000e+00> : vector<2x64xf32>
    %454 = tpu.matmul %451, %453, %cst_212 {dimension_numbers = #tpu.dot_dimension_numbers<[1], [0], [0], [1], [0, 0, 1, 1], [], []>, precision = #tpu.contract_precision<fp32>} : vector<2x64xf32>, vector<64x64xf32>, vector<2x64xf32> -> vector<2x64xf32>
    %c4_213 = arith.constant 4 : index
    %c0_214 = arith.constant 0 : index
    %c0_215 = arith.constant 0 : index
    %455 = vector.load %arg11[%c4_213, %c0_214, %c0_215] : memref<6x1x64xf32, #tpu.memory_space<vmem>>, vector<1x1x64xf32>
    %456 = vector.shape_cast %455 : vector<1x1x64xf32> to vector<1x64xf32>
    %457 = vector.broadcast %456 : vector<1x64xf32> to vector<2x64xf32>
    %458 = arith.addf %454, %457 : vector<2x64xf32>
    %cst_216 = arith.constant 0.000000e+00 : f32
    %459 = vector.broadcast %cst_216 : f32 to vector<2x64xf32>
    %460 = arith.maximumf %458, %459 : vector<2x64xf32>
    %c4_217 = arith.constant 4 : index
    %c0_218 = arith.constant 0 : index
    %c0_219 = arith.constant 0 : index
    %461 = vector.load %arg12[%c4_217, %c0_218, %c0_219] : memref<6x64x64xf32, #tpu.memory_space<vmem>>, vector<1x64x64xf32>
    %462 = vector.shape_cast %461 : vector<1x64x64xf32> to vector<64x64xf32>
    %cst_220 = arith.constant dense<0.000000e+00> : vector<2x64xf32>
    %463 = tpu.matmul %460, %462, %cst_220 {dimension_numbers = #tpu.dot_dimension_numbers<[1], [0], [0], [1], [0, 0, 1, 1], [], []>, precision = #tpu.contract_precision<fp32>} : vector<2x64xf32>, vector<64x64xf32>, vector<2x64xf32> -> vector<2x64xf32>
    %c4_221 = arith.constant 4 : index
    %c0_222 = arith.constant 0 : index
    %c0_223 = arith.constant 0 : index
    %464 = vector.load %arg13[%c4_221, %c0_222, %c0_223] : memref<6x1x64xf32, #tpu.memory_space<vmem>>, vector<1x1x64xf32>
    %465 = vector.shape_cast %464 : vector<1x1x64xf32> to vector<1x64xf32>
    %466 = vector.broadcast %465 : vector<1x64xf32> to vector<2x64xf32>
    %467 = arith.addf %463, %466 : vector<2x64xf32>
    %cst_224 = arith.constant 0.000000e+00 : f32
    %468 = vector.broadcast %cst_224 : f32 to vector<2x64xf32>
    %469 = arith.maximumf %467, %468 : vector<2x64xf32>
    %470 = arith.addf %469, %429 : vector<2x64xf32>
    %c5 = arith.constant 5 : index
    %c0_225 = arith.constant 0 : index
    %c0_226 = arith.constant 0 : index
    %471 = vector.load %arg6[%c5, %c0_225, %c0_226] : memref<6x1x64xf32, #tpu.memory_space<vmem>>, vector<1x1x64xf32>
    %472 = vector.shape_cast %471 : vector<1x1x64xf32> to vector<1x64xf32>
    %c5_227 = arith.constant 5 : index
    %c0_228 = arith.constant 0 : index
    %c0_229 = arith.constant 0 : index
    %473 = vector.load %arg7[%c5_227, %c0_228, %c0_229] : memref<6x1x64xf32, #tpu.memory_space<vmem>>, vector<1x1x64xf32>
    %474 = vector.shape_cast %473 : vector<1x1x64xf32> to vector<1x64xf32>
    %cst_230 = arith.constant dense<0.000000e+00> : vector<2xf32>
    %475 = vector.multi_reduction <add>, %470, %cst_230 [1] : vector<2x64xf32> to vector<2xf32>
    %476 = vector.shape_cast %475 : vector<2xf32> to vector<2x1xf32>
    %cst_231 = arith.constant 6.400000e+01 : f32
    %477 = vector.broadcast %cst_231 : f32 to vector<2x1xf32>
    %478 = arith.divf %476, %477 : vector<2x1xf32>
    %479 = vector.broadcast %478 : vector<2x1xf32> to vector<2x64xf32>
    %480 = arith.subf %470, %479 : vector<2x64xf32>
    %481 = arith.mulf %480, %480 : vector<2x64xf32>
    %cst_232 = arith.constant dense<0.000000e+00> : vector<2xf32>
    %482 = vector.multi_reduction <add>, %481, %cst_232 [1] : vector<2x64xf32> to vector<2xf32>
    %483 = vector.shape_cast %482 : vector<2xf32> to vector<2x1xf32>
    %cst_233 = arith.constant 6.400000e+01 : f32
    %484 = vector.broadcast %cst_233 : f32 to vector<2x1xf32>
    %485 = arith.divf %483, %484 : vector<2x1xf32>
    %486 = vector.broadcast %478 : vector<2x1xf32> to vector<2x64xf32>
    %487 = arith.subf %470, %486 : vector<2x64xf32>
    %cst_234 = arith.constant 9.99999997E-7 : f32
    %488 = vector.broadcast %cst_234 : f32 to vector<2x1xf32>
    %489 = arith.addf %485, %488 : vector<2x1xf32>
    %490 = math.rsqrt %489 : vector<2x1xf32>
    %491 = vector.broadcast %490 : vector<2x1xf32> to vector<2x64xf32>
    %492 = arith.mulf %487, %491 : vector<2x64xf32>
    %493 = vector.broadcast %472 : vector<1x64xf32> to vector<2x64xf32>
    %494 = arith.mulf %492, %493 : vector<2x64xf32>
    %495 = vector.broadcast %474 : vector<1x64xf32> to vector<2x64xf32>
    %496 = arith.addf %494, %495 : vector<2x64xf32>
    %c5_235 = arith.constant 5 : index
    %c0_236 = arith.constant 0 : index
    %c0_237 = arith.constant 0 : index
    %497 = vector.load %arg8[%c5_235, %c0_236, %c0_237] : memref<6x64x192xf32, #tpu.memory_space<vmem>>, vector<1x64x192xf32>
    %498 = vector.shape_cast %497 : vector<1x64x192xf32> to vector<64x192xf32>
    %cst_238 = arith.constant dense<0.000000e+00> : vector<2x192xf32>
    %499 = tpu.matmul %496, %498, %cst_238 {dimension_numbers = #tpu.dot_dimension_numbers<[1], [0], [0], [1], [0, 0, 1, 1], [], []>, precision = #tpu.contract_precision<fp32>} : vector<2x64xf32>, vector<64x192xf32>, vector<2x192xf32> -> vector<2x192xf32>
    %c5_239 = arith.constant 5 : index
    %c0_240 = arith.constant 0 : index
    %c0_241 = arith.constant 0 : index
    %500 = vector.load %arg9[%c5_239, %c0_240, %c0_241] : memref<6x1x192xf32, #tpu.memory_space<vmem>>, vector<1x1x192xf32>
    %501 = vector.shape_cast %500 : vector<1x1x192xf32> to vector<1x192xf32>
    %502 = vector.broadcast %501 : vector<1x192xf32> to vector<2x192xf32>
    %503 = arith.addf %499, %502 : vector<2x192xf32>
    %504 = vector.extract_strided_slice %503 {offsets = [0, 0], sizes = [2, 64], strides = [1, 1]} : vector<2x192xf32> to vector<2x64xf32>
    %505 = vector.extract_strided_slice %503 {offsets = [0, 64], sizes = [2, 64], strides = [1, 1]} : vector<2x192xf32> to vector<2x64xf32>
    %506 = vector.extract_strided_slice %503 {offsets = [0, 128], sizes = [2, 64], strides = [1, 1]} : vector<2x192xf32> to vector<2x64xf32>
    %cst_242 = arith.constant dense<0.000000e+00> : vector<2x2xf32>
    %507 = tpu.matmul %504, %505, %cst_242 {dimension_numbers = #tpu.dot_dimension_numbers<[1], [1], [0], [0], [0, 0, 1, 0], [], []>, precision = #tpu.contract_precision<fp32>} : vector<2x64xf32>, vector<2x64xf32>, vector<2x2xf32> -> vector<2x2xf32>
    %cst_243 = arith.constant 1.562500e-02 : f32
    %508 = vector.broadcast %cst_243 : f32 to vector<2x2xf32>
    %509 = arith.mulf %507, %508 : vector<2x2xf32>
    %cst_244 = arith.constant dense<0xFF800000> : vector<2xf32>
    %510 = vector.multi_reduction <maximumf>, %509, %cst_244 [1] : vector<2x2xf32> to vector<2xf32>
    %511 = vector.shape_cast %510 : vector<2xf32> to vector<2x1xf32>
    %512 = vector.broadcast %511 : vector<2x1xf32> to vector<2x2xf32>
    %513 = arith.subf %509, %512 : vector<2x2xf32>
    %514 = math.exp %513 : vector<2x2xf32>
    %cst_245 = arith.constant dense<0.000000e+00> : vector<2xf32>
    %515 = vector.multi_reduction <add>, %514, %cst_245 [1] : vector<2x2xf32> to vector<2xf32>
    %516 = vector.shape_cast %515 : vector<2xf32> to vector<2x1xf32>
    %517 = tpu.reciprocal %516 : vector<2x1xf32> -> vector<2x1xf32>
    %518 = vector.broadcast %517 : vector<2x1xf32> to vector<2x2xf32>
    %519 = arith.mulf %514, %518 : vector<2x2xf32>
    %cst_246 = arith.constant dense<0.000000e+00> : vector<2x64xf32>
    %520 = tpu.matmul %519, %506, %cst_246 {dimension_numbers = #tpu.dot_dimension_numbers<[1], [0], [0], [1], [0, 0, 1, 1], [], []>, precision = #tpu.contract_precision<fp32>} : vector<2x2xf32>, vector<2x64xf32>, vector<2x64xf32> -> vector<2x64xf32>
    %521 = arith.addf %520, %470 : vector<2x64xf32>
    %cst_247 = arith.constant dense<0.000000e+00> : vector<2xf32>
    %522 = vector.multi_reduction <add>, %521, %cst_247 [1] : vector<2x64xf32> to vector<2xf32>
    %523 = vector.shape_cast %522 : vector<2xf32> to vector<2x1xf32>
    %cst_248 = arith.constant 6.400000e+01 : f32
    %524 = vector.broadcast %cst_248 : f32 to vector<2x1xf32>
    %525 = arith.divf %523, %524 : vector<2x1xf32>
    %526 = vector.broadcast %525 : vector<2x1xf32> to vector<2x64xf32>
    %527 = arith.subf %521, %526 : vector<2x64xf32>
    %528 = arith.mulf %527, %527 : vector<2x64xf32>
    %cst_249 = arith.constant dense<0.000000e+00> : vector<2xf32>
    %529 = vector.multi_reduction <add>, %528, %cst_249 [1] : vector<2x64xf32> to vector<2xf32>
    %530 = vector.shape_cast %529 : vector<2xf32> to vector<2x1xf32>
    %cst_250 = arith.constant 6.400000e+01 : f32
    %531 = vector.broadcast %cst_250 : f32 to vector<2x1xf32>
    %532 = arith.divf %530, %531 : vector<2x1xf32>
    %533 = vector.broadcast %525 : vector<2x1xf32> to vector<2x64xf32>
    %534 = arith.subf %521, %533 : vector<2x64xf32>
    %cst_251 = arith.constant 9.99999997E-7 : f32
    %535 = vector.broadcast %cst_251 : f32 to vector<2x1xf32>
    %536 = arith.addf %532, %535 : vector<2x1xf32>
    %537 = math.rsqrt %536 : vector<2x1xf32>
    %538 = vector.broadcast %537 : vector<2x1xf32> to vector<2x64xf32>
    %539 = arith.mulf %534, %538 : vector<2x64xf32>
    %540 = vector.broadcast %472 : vector<1x64xf32> to vector<2x64xf32>
    %541 = arith.mulf %539, %540 : vector<2x64xf32>
    %542 = vector.broadcast %474 : vector<1x64xf32> to vector<2x64xf32>
    %543 = arith.addf %541, %542 : vector<2x64xf32>
    %c5_252 = arith.constant 5 : index
    %c0_253 = arith.constant 0 : index
    %c0_254 = arith.constant 0 : index
    %544 = vector.load %arg10[%c5_252, %c0_253, %c0_254] : memref<6x64x64xf32, #tpu.memory_space<vmem>>, vector<1x64x64xf32>
    %545 = vector.shape_cast %544 : vector<1x64x64xf32> to vector<64x64xf32>
    %cst_255 = arith.constant dense<0.000000e+00> : vector<2x64xf32>
    %546 = tpu.matmul %543, %545, %cst_255 {dimension_numbers = #tpu.dot_dimension_numbers<[1], [0], [0], [1], [0, 0, 1, 1], [], []>, precision = #tpu.contract_precision<fp32>} : vector<2x64xf32>, vector<64x64xf32>, vector<2x64xf32> -> vector<2x64xf32>
    %c5_256 = arith.constant 5 : index
    %c0_257 = arith.constant 0 : index
    %c0_258 = arith.constant 0 : index
    %547 = vector.load %arg11[%c5_256, %c0_257, %c0_258] : memref<6x1x64xf32, #tpu.memory_space<vmem>>, vector<1x1x64xf32>
    %548 = vector.shape_cast %547 : vector<1x1x64xf32> to vector<1x64xf32>
    %549 = vector.broadcast %548 : vector<1x64xf32> to vector<2x64xf32>
    %550 = arith.addf %546, %549 : vector<2x64xf32>
    %cst_259 = arith.constant 0.000000e+00 : f32
    %551 = vector.broadcast %cst_259 : f32 to vector<2x64xf32>
    %552 = arith.maximumf %550, %551 : vector<2x64xf32>
    %c5_260 = arith.constant 5 : index
    %c0_261 = arith.constant 0 : index
    %c0_262 = arith.constant 0 : index
    %553 = vector.load %arg12[%c5_260, %c0_261, %c0_262] : memref<6x64x64xf32, #tpu.memory_space<vmem>>, vector<1x64x64xf32>
    %554 = vector.shape_cast %553 : vector<1x64x64xf32> to vector<64x64xf32>
    %cst_263 = arith.constant dense<0.000000e+00> : vector<2x64xf32>
    %555 = tpu.matmul %552, %554, %cst_263 {dimension_numbers = #tpu.dot_dimension_numbers<[1], [0], [0], [1], [0, 0, 1, 1], [], []>, precision = #tpu.contract_precision<fp32>} : vector<2x64xf32>, vector<64x64xf32>, vector<2x64xf32> -> vector<2x64xf32>
    %c5_264 = arith.constant 5 : index
    %c0_265 = arith.constant 0 : index
    %c0_266 = arith.constant 0 : index
    %556 = vector.load %arg13[%c5_264, %c0_265, %c0_266] : memref<6x1x64xf32, #tpu.memory_space<vmem>>, vector<1x1x64xf32>
    %557 = vector.shape_cast %556 : vector<1x1x64xf32> to vector<1x64xf32>
    %558 = vector.broadcast %557 : vector<1x64xf32> to vector<2x64xf32>
    %559 = arith.addf %555, %558 : vector<2x64xf32>
    %cst_267 = arith.constant 0.000000e+00 : f32
    %560 = vector.broadcast %cst_267 : f32 to vector<2x64xf32>
    %561 = arith.maximumf %559, %560 : vector<2x64xf32>
    %562 = arith.addf %561, %521 : vector<2x64xf32>
    %c0_268 = arith.constant 0 : index
    %c0_269 = arith.constant 0 : index
    %563 = vector.load %arg14[%c0_268, %c0_269] : memref<64x128xf32, #tpu.memory_space<vmem>>, vector<64x128xf32>
    %cst_270 = arith.constant dense<0.000000e+00> : vector<2x128xf32>
    %564 = tpu.matmul %562, %563, %cst_270 {dimension_numbers = #tpu.dot_dimension_numbers<[1], [0], [0], [1], [0, 0, 1, 1], [], []>, precision = #tpu.contract_precision<fp32>} : vector<2x64xf32>, vector<64x128xf32>, vector<2x128xf32> -> vector<2x128xf32>
    %c0_271 = arith.constant 0 : index
    %c0_272 = arith.constant 0 : index
    %565 = vector.load %arg15[%c0_271, %c0_272] : memref<1x128xf32, #tpu.memory_space<vmem>>, vector<1x128xf32>
    %566 = vector.broadcast %565 : vector<1x128xf32> to vector<2x128xf32>
    %567 = arith.addf %564, %566 : vector<2x128xf32>
    %cst_273 = arith.constant 0.000000e+00 : f32
    %568 = vector.broadcast %cst_273 : f32 to vector<2x128xf32>
    %569 = arith.maximumf %567, %568 : vector<2x128xf32>
    %c0_274 = arith.constant 0 : index
    %c0_275 = arith.constant 0 : index
    %570 = vector.load %arg16[%c0_274, %c0_275] : memref<128x128xf32, #tpu.memory_space<vmem>>, vector<128x128xf32>
    %cst_276 = arith.constant dense<0.000000e+00> : vector<2x128xf32>
    %571 = tpu.matmul %569, %570, %cst_276 {dimension_numbers = #tpu.dot_dimension_numbers<[1], [0], [0], [1], [0, 0, 1, 1], [], []>, precision = #tpu.contract_precision<fp32>} : vector<2x128xf32>, vector<128x128xf32>, vector<2x128xf32> -> vector<2x128xf32>
    %c0_277 = arith.constant 0 : index
    %c0_278 = arith.constant 0 : index
    %572 = vector.load %arg17[%c0_277, %c0_278] : memref<1x128xf32, #tpu.memory_space<vmem>>, vector<1x128xf32>
    %573 = vector.broadcast %572 : vector<1x128xf32> to vector<2x128xf32>
    %574 = arith.addf %571, %573 : vector<2x128xf32>
    %cst_279 = arith.constant 0.000000e+00 : f32
    %575 = vector.broadcast %cst_279 : f32 to vector<2x128xf32>
    %576 = arith.maximumf %574, %575 : vector<2x128xf32>
    %cst_280 = arith.constant dense<0xFF800000> : vector<2xf32>
    %577 = vector.multi_reduction <maximumf>, %576, %cst_280 [1] : vector<2x128xf32> to vector<2xf32>
    %578 = vector.shape_cast %577 : vector<2xf32> to vector<2x1xf32>
    %579 = vector.broadcast %578 : vector<2x1xf32> to vector<2x128xf32>
    %580 = arith.subf %576, %579 : vector<2x128xf32>
    %581 = math.exp %580 : vector<2x128xf32>
    %cst_281 = arith.constant dense<0.000000e+00> : vector<2xf32>
    %582 = vector.multi_reduction <add>, %581, %cst_281 [1] : vector<2x128xf32> to vector<2xf32>
    %583 = vector.shape_cast %582 : vector<2xf32> to vector<2x1xf32>
    %584 = tpu.reciprocal %583 : vector<2x1xf32> -> vector<2x1xf32>
    %585 = vector.broadcast %584 : vector<2x1xf32> to vector<2x128xf32>
    %586 = arith.mulf %581, %585 : vector<2x128xf32>
    %c0_282 = arith.constant 0 : index
    %c0_283 = arith.constant 0 : index
    %587 = vector.load %arg18[%c0_282, %c0_283] : memref<2x128xf32, #tpu.memory_space<vmem>>, vector<2x128xf32>
    tpu.vector_store %arg18[%c0_282, %c0_283], %586 {strides = array<i32>} : memref<2x128xf32, #tpu.memory_space<vmem>>, vector<2x128xf32>,
    return
  }
  func.func @transform_0(%arg0: i32) -> i32 {
    %c0_i32 = arith.constant 0 : i32
    %c0_i32_0 = arith.constant 0 : i32
    return %c0_i32 : i32
  }
  func.func @transform_1(%arg0: i32) -> (i32, i32, i32) {
    %c0_i32 = arith.constant 0 : i32
    %c0_i32_0 = arith.constant 0 : i32
    %c0_i32_1 = arith.constant 0 : i32
    %c0_i32_2 = arith.constant 0 : i32
    return %c0_i32, %c0_i32_0, %c0_i32_1 : i32, i32, i32
  }
  func.func @transform_2(%arg0: i32) -> (i32, i32, i32) {
    %c0_i32 = arith.constant 0 : i32
    %c0_i32_0 = arith.constant 0 : i32
    %c0_i32_1 = arith.constant 0 : i32
    %c0_i32_2 = arith.constant 0 : i32
    return %c0_i32, %c0_i32_0, %c0_i32_1 : i32, i32, i32
  }
  func.func @transform_3(%arg0: i32) -> (i32, i32) {
    %c0_i32 = arith.constant 0 : i32
    %c0_i32_0 = arith.constant 0 : i32
    %c0_i32_1 = arith.constant 0 : i32
    return %c0_i32, %c0_i32_0 : i32, i32
  }
  func.func @transform_4(%arg0: i32) -> (i32, i32) {
    %c0_i32 = arith.constant 0 : i32
    %c0_i32_0 = arith.constant 0 : i32
    %c0_i32_1 = arith.constant 0 : i32
    return %c0_i32, %c0_i32_0 : i32, i32
  }
  func.func @transform_5(%arg0: i32) -> (i32, i32, i32) {
    %c0_i32 = arith.constant 0 : i32
    %c0_i32_0 = arith.constant 0 : i32
    %c0_i32_1 = arith.constant 0 : i32
    %c0_i32_2 = arith.constant 0 : i32
    return %c0_i32, %c0_i32_0, %c0_i32_1 : i32, i32, i32
  }
  func.func @transform_6(%arg0: i32) -> (i32, i32, i32) {
    %c0_i32 = arith.constant 0 : i32
    %c0_i32_0 = arith.constant 0 : i32
    %c0_i32_1 = arith.constant 0 : i32
    %c0_i32_2 = arith.constant 0 : i32
    return %c0_i32, %c0_i32_0, %c0_i32_1 : i32, i32, i32
  }
  func.func @transform_7(%arg0: i32) -> (i32, i32, i32) {
    %c0_i32 = arith.constant 0 : i32
    %c0_i32_0 = arith.constant 0 : i32
    %c0_i32_1 = arith.constant 0 : i32
    %c0_i32_2 = arith.constant 0 : i32
    return %c0_i32, %c0_i32_0, %c0_i32_1 : i32, i32, i32
  }
  func.func @transform_8(%arg0: i32) -> (i32, i32, i32) {
    %c0_i32 = arith.constant 0 : i32
    %c0_i32_0 = arith.constant 0 : i32
    %c0_i32_1 = arith.constant 0 : i32
    %c0_i32_2 = arith.constant 0 : i32
    return %c0_i32, %c0_i32_0, %c0_i32_1 : i32, i32, i32
  }
  func.func @transform_9(%arg0: i32) -> (i32, i32, i32) {
    %c0_i32 = arith.constant 0 : i32
    %c0_i32_0 = arith.constant 0 : i32
    %c0_i32_1 = arith.constant 0 : i32
    %c0_i32_2 = arith.constant 0 : i32
    return %c0_i32, %c0_i32_0, %c0_i32_1 : i32, i32, i32
  }
  func.func @transform_10(%arg0: i32) -> (i32, i32, i32) {
    %c0_i32 = arith.constant 0 : i32
    %c0_i32_0 = arith.constant 0 : i32
    %c0_i32_1 = arith.constant 0 : i32
    %c0_i32_2 = arith.constant 0 : i32
    return %c0_i32, %c0_i32_0, %c0_i32_1 : i32, i32, i32
  }
  func.func @transform_11(%arg0: i32) -> (i32, i32, i32) {
    %c0_i32 = arith.constant 0 : i32
    %c0_i32_0 = arith.constant 0 : i32
    %c0_i32_1 = arith.constant 0 : i32
    %c0_i32_2 = arith.constant 0 : i32
    return %c0_i32, %c0_i32_0, %c0_i32_1 : i32, i32, i32
  }
  func.func @transform_12(%arg0: i32) -> (i32, i32, i32) {
    %c0_i32 = arith.constant 0 : i32
    %c0_i32_0 = arith.constant 0 : i32
    %c0_i32_1 = arith.constant 0 : i32
    %c0_i32_2 = arith.constant 0 : i32
    return %c0_i32, %c0_i32_0, %c0_i32_1 : i32, i32, i32
  }
  func.func @transform_13(%arg0: i32) -> (i32, i32) {
    %c0_i32 = arith.constant 0 : i32
    %c0_i32_0 = arith.constant 0 : i32
    %c0_i32_1 = arith.constant 0 : i32
    return %c0_i32, %c0_i32_0 : i32, i32
  }
  func.func @transform_14(%arg0: i32) -> (i32, i32) {
    %c0_i32 = arith.constant 0 : i32
    %c0_i32_0 = arith.constant 0 : i32
    %c0_i32_1 = arith.constant 0 : i32
    return %c0_i32, %c0_i32_0 : i32, i32
  }
  func.func @transform_15(%arg0: i32) -> (i32, i32) {
    %c0_i32 = arith.constant 0 : i32
    %c0_i32_0 = arith.constant 0 : i32
    %c0_i32_1 = arith.constant 0 : i32
    return %c0_i32, %c0_i32_0 : i32, i32
  }
  func.func @transform_16(%arg0: i32) -> (i32, i32) {
    %c0_i32 = arith.constant 0 : i32
    %c0_i32_0 = arith.constant 0 : i32
    %c0_i32_1 = arith.constant 0 : i32
    return %c0_i32, %c0_i32_0 : i32, i32
  }
  func.func @transform_17(%arg0: i32) -> (i32, i32) {
    %c0_i32 = arith.constant 0 : i32
    %c0_i32_0 = arith.constant 0 : i32
    %c0_i32_1 = arith.constant 0 : i32
    return %c0_i32, %c0_i32_0 : i32, i32
  }
}

</mosaic_0001>

<bundles_post_ra>
// kernel: tpu_custom_call.1
= control target key start
LH: loop header
LB: loop body
LE: loop exit
PB: predicated region body
PF: predicated region fallthrough
CT: control target
= control target key end

     0   :  { %s27606_s0 = inlined_call_operand.<no memory space> [shape: s32[1], index: 0, kind: input, shape index: {}]   ;;  %s27607_s1 = inlined_call_operand.vmem [shape: f32[2,64,48], index: 1, kind: input, shape index: {}]   ;;  %s27608_s2 = inlined_call_operand.vmem [shape: f32[1,1,48], index: 2, kind: input, shape index: {}]   ;;  %s27609_s3 = inlined_call_operand.<no memory space> [shape: f32[1,1], index: 3, kind: input, shape index: {}]   ;;  %s27610_s4 = inlined_call_operand.vmem [shape: f32[1,64], index: 4, kind: input, shape index: {}]   ;;  %s27611_s5 = inlined_call_operand.vmem [shape: f32[6,1,64], index: 5, kind: input, shape index: {}]   ;;  %s27612_s6 = inlined_call_operand.vmem [shape: f32[6,1,64], index: 6, kind: input, shape index: {}]   ;;  %s27613_s7 = inlined_call_operand.hbm [shape: f32[6,64,192], index: 7, kind: input, shape index: {}]   ;;  %s27614_s8 = inlined_call_operand.vmem [shape: f32[6,1,192], index: 8, kind: input, shape index: {}]   ;;  %s27615_s9 = inlined_call_operand.hbm [shape: f32[6,64,64], index: 9, kind: input, shape index: {}]   ;;  %s27616_s10 = inlined_call_operand.vmem [shape: f32[6,1,64], index: 10, kind: input, shape index: {}]   ;;  %s27617_s11 = inlined_call_operand.hbm [shape: f32[6,64,64], index: 11, kind: input, shape index: {}]   ;;  %s27618_s12 = inlined_call_operand.vmem [shape: f32[6,1,64], index: 12, kind: input, shape index: {}]   ;;  %s27619_s13 = inlined_call_operand.vmem [shape: f32[64,128], index: 13, kind: input, shape index: {}]   ;;  %s27620_s14 = inlined_call_operand.vmem [shape: f32[1,128], index: 14, kind: input, shape index: {}]   ;;  %s27621_s15 = inlined_call_operand.vmem [shape: f32[128,128], index: 15, kind: input, shape index: {}]   ;;  %s27622_s16 = inlined_call_operand.vmem [shape: f32[1,128], index: 16, kind: input, shape index: {}]   ;;  %s27623_s17 = inlined_call_operand.hbm [shape: f32[2,128], index: 17, kind: output, shape index: {}]  }
   0x1   :  { %27675 = sst [smem:[#allocation23_spill]] %s27607_s1  ;;  %v23_v0 = vstv %s27609_s3 }
   0x2   :  { %24 = vst [vmem:[#allocation3] sm:$0x1] %v23_v0 }
   0x3   :  { %25 = vsyncpa [#allocation5], 0 }
   0x4   :  { %26 = vsyncpa [#allocation8], 0 }
   0x5   :  { %27 = vsyncpa [#allocation6], 0  ;;  %s23928_s26 = smov [#allocation7]   ;;  %s23834_s30 = scalar_lea.hbm %s27615_s9, 6144 }
   0x6   :  { %s61_s27 = sshll.u32 %s23928_s26, 4  ;;  %p23835_p0 = scmp.ne.s32.totalorder %s27615_s9, %s23834_s30  ;;  %s62_s27 = int_to_ptr.vmem [resolvable:$true] %s61_s27 }
   0x7   :  { %p23838_p1 = scmp.lt.u32.totalorder %s23834_s30, %s27615_s9 }
   0x9   :  { %p23840_p2 = pnand %p23838_p1, %p23835_p0 }
   0xb   :  { %23843 = shalt.err (!%p23840_p2)
}
   0xc   :  { %s23844_s3 = scalar_lea.vmem %s62_s27, 6144  ;;  %p23849_p4 = scmp.lt.s32.totalorder %s62_s27, %s62_s27 }
   0xd   :  { %p23845_p3 = scmp.ne.s32.totalorder %s62_s27, %s23844_s3  ;;  %p23850_p5 = scmp.lt.s32.totalorder %s23844_s3, %s23844_s3 }
   0xf   :  { %p23851_p6 = por %p23850_p5, %p23849_p4 }
  0x11   :  { %p23852_p7 = pnand %p23851_p6, %p23845_p3 }
  0x13   :  { %23855 = shalt.err (!%p23852_p7)
}
  0x14   :  { %s23929_s20 = smov 128   ;;  %s23930_s21 = smov 8  }
  0x15   :  { %67 = dma.hbm_to_vmem [thread:$0]  %s27615_s9, 6144, %s62_s27, [#allocation8], %s23929_s20, %s23929_s20, %s23930_s21  }
  0x16   :  { %s23931_s24 = smov [#allocation4]   ;;  %s23856_s29 = scalar_lea.hbm %s27613_s7, 12288 }
  0x17   :  { %s47_s25 = sshll.u32 %s23931_s24, 4  ;;  %p23857_p8 = scmp.ne.s32.totalorder %s27613_s7, %s23856_s29  ;;  %s48_s25 = int_to_ptr.vmem [resolvable:$true] %s47_s25 }
  0x18   :  { %p23860_p9 = scmp.lt.u32.totalorder %s23856_s29, %s27613_s7 }
  0x1a   :  { %p23862_p10 = pnand %p23860_p9, %p23857_p8 }
  0x1c   :  { %23865 = shalt.err (!%p23862_p10)
}
  0x1d   :  { %s23866_s1 = scalar_lea.vmem %s48_s25, 12288  ;;  %p23871_p12 = scmp.lt.s32.totalorder %s48_s25, %s48_s25 }
  0x1e   :  { %p23867_p11 = scmp.ne.s32.totalorder %s48_s25, %s23866_s1  ;;  %p23872_p13 = scmp.lt.s32.totalorder %s23866_s1, %s23866_s1 }
  0x20   :  { %p23873_p0 = por %p23872_p13, %p23871_p12 }
  0x22   :  { %p23874_p1 = pnand %p23873_p0, %p23867_p11 }
  0x24   :  { %23877 = shalt.err (!%p23874_p1)
}
  0x25   :  { %s23932_s9 = smov 256   ;;  %s23933_s27 = smov 16  }
  0x26   :  { %53 = dma.hbm_to_vmem [thread:$0]  %s27613_s7, 12288, %s48_s25, [#allocation5], %s23932_s9, %s23932_s9, %s23933_s27  }
  0x27   :  { %s23934_s23 = smov [#allocation9]   ;;  %s23878_s29 = scalar_lea.hbm %s27617_s11, 6144 }
  0x28   :  { %s75_s24 = sshll.u32 %s23934_s23, 4  ;;  %p23879_p2 = scmp.ne.s32.totalorder %s27617_s11, %s23878_s29  ;;  %s76_s24 = int_to_ptr.vmem [resolvable:$true] %s75_s24 }
  0x29   :  { %p23882_p3 = scmp.lt.u32.totalorder %s23878_s29, %s27617_s11 }
  0x2b   :  { %p23884_p4 = pnand %p23882_p3, %p23879_p2 }
  0x2d   :  { %23887 = shalt.err (!%p23884_p4)
}
  0x2e   :  { %s23888_s1 = scalar_lea.vmem %s76_s24, 6144  ;;  %p23893_p6 = scmp.lt.s32.totalorder %s76_s24, %s76_s24 }
  0x2f   :  { %p23889_p5 = scmp.ne.s32.totalorder %s76_s24, %s23888_s1  ;;  %p23894_p7 = scmp.lt.s32.totalorder %s23888_s1, %s23888_s1 }
  0x31   :  { %p23895_p8 = por %p23894_p7, %p23893_p6 }
  0x33   :  { %p23896_p9 = pnand %p23895_p8, %p23889_p5 }
  0x35   :  { %23899 = shalt.err (!%p23896_p9)
}
  0x36   :  { %81 = dma.hbm_to_vmem [thread:$0]  %s27617_s11, 6144, %s76_s24, [#allocation8], %s23929_s20, %s23929_s20, %s23930_s21  }
  0x37   :  { %23922 = dma.done.wait [#allocation5], 12288  }
  0x38   :  { %23923 = vsyncadd [#allocation5], 4294955008 }
  0x39   :  { %23924 = dma.done.wait [#allocation8], 12288  }
  0x3a   :  { %23925 = vsyncadd [#allocation8], 4294955008  ;;  %v23935_v1 = vmov 0   ;;  %s27676_s3 = sld [smem:[#allocation23_spill]]  ;;  %v18705_v3 = vld [vmem:[%s27608_s2] ss:$0 sm:$0xff] }
  0x3b   :  { %23778 = vset.pattern.permute.xlu0 %v23935_v1  ;;  %23779 = vset.pattern.permute.xlu1 %v23935_v1  ;;  %vm140_vm0 = vcmask 392192   ;;  %v18707_v51 = vld [vmem:[%s27610_s4] ss:$0 sm:$0xff]  ;;  %vm353_vm1 = vcmask 130112   ;;  %vm360_vm2 = vcmask 195712   ;;  %vm367_vm3 = vcmask 261312  }
  0x3c   :  { %v18706_v52 = vld [vmem:[#allocation3] ss:$0 sm:$0xff]  ;;  %vm374_vm4 = vcmask 326912   ;;  %vm381_vm5 = vcmask 392512   ;;  %vm388_vm6 = vcmask 458112   ;;  %vm395_vm7 = vcmask 523712  }
  0x3d   :  { %vm436_vm8 = vcmask 1041409   ;;  %vm439_vm9 = vcmask 517120   ;;  %vm958_vm10 = vcmask 523264   ;;  %vm23937_vm11 = vmmov 0   ;;  %s23938_s22 = smov 64  }
  0x3e   :  { %vm2078_vm12 = vcmask 1041408   ;;  %vm2062_vm13 = vcmask 9216   ;;  %vm2074_vm14 = vcmask 15360  }
  0x40   :  { %v109_v2 = vld [vmem:[%s27676_s3 + $0x40] sm:$0xff]  ;;  %v110_v7 = vld [vmem:[%s27676_s3 + $0x48] sm:$0xff]  ;;  %v111_v11 = vld [vmem:[%s27676_s3 + $0x50] sm:$0xff] }
  0x41   :  { %v101_v4 = vld [vmem:[%s27676_s3] sm:$0xff]  ;;  %v132_v5 = vmul.f32 %v18705_v3, %v109_v2  ;;  %v102_v8 = vld [vmem:[%s27676_s3 + $0x8] sm:$0xff]  ;;  %v133_v9 = vmul.f32 %v18705_v3, %v110_v7  ;;  %v103_v12 = vld [vmem:[%s27676_s3 + $0x10] sm:$0xff]  ;;  %v134_v17 = vmul.f32 %v18705_v3, %v111_v11 }
  0x42   :  { %v124_v6 = vmul.f32 %v18705_v3, %v101_v4  ;;  %v125_v10 = vmul.f32 %v18705_v3, %v102_v8  ;;  %v126_v18 = vmul.f32 %v18705_v3, %v103_v12  ;;  %v112_v19 = vld [vmem:[%s27676_s3 + $0x58] sm:$0xff]  ;;  %v113_v25 = vld [vmem:[%s27676_s3 + $0x60] sm:$0xff]  ;;  %v114_v31 = vld [vmem:[%s27676_s3 + $0x68] sm:$0xff] }
  0x43   :  { %v165_v13 = vsel %vm140_vm0, %v132_v5, 0.0  ;;  %v168_v15 = vsel %vm140_vm0, %v133_v9, 0.0  ;;  %v104_v20 = vld [vmem:[%s27676_s3 + $0x18] sm:$0xff]  ;;  %v171_v21 = vsel %vm140_vm0, %v134_v17, 0.0  ;;  %v135_v23 = vmul.f32 %v18705_v3, %v112_v19  ;;  %v105_v26 = vld [vmem:[%s27676_s3 + $0x20] sm:$0xff]  ;;  %v106_v32 = vld [vmem:[%s27676_s3 + $0x28] sm:$0xff] }
  0x44   :  { %v141_v14 = vsel %vm140_vm0, %v124_v6, 0.0  ;;  %166 = vadd.xlane.f32.xlu1 %v165_v13  ;;  %v144_v16 = vsel %vm140_vm0, %v125_v10, 0.0  ;;  %v147_v22 = vsel %vm140_vm0, %v126_v18, 0.0  ;;  %v127_v24 = vmul.f32 %v18705_v3, %v104_v20  ;;  %v115_v37 = vld [vmem:[%s27676_s3 + $0x70] sm:$0xff]  ;;  %v116_v43 = vld [vmem:[%s27676_s3 + $0x78] sm:$0xff] }
  0x45   :  { %142 = vadd.xlane.f32.xlu0 %v141_v14  ;;  %v174_v27 = vsel %vm140_vm0, %v135_v23, 0.0  ;;  %v136_v29 = vmul.f32 %v18705_v3, %v113_v25  ;;  %v128_v30 = vmul.f32 %v18705_v3, %v105_v26  ;;  %v137_v35 = vmul.f32 %v18705_v3, %v114_v31  ;;  %v107_v38 = vld [vmem:[%s27676_s3 + $0x30] sm:$0xff]  ;;  %v108_v44 = vld [vmem:[%s27676_s3 + $0x38] sm:$0xff] }
  0x46   :  { %v150_v28 = vsel %vm140_vm0, %v127_v24, 0.0  ;;  %v129_v36 = vmul.f32 %v18705_v3, %v106_v32  ;;  %v138_v41 = vmul.f32 %v18705_v3, %v115_v37  ;;  %v130_v42 = vmul.f32 %v18705_v3, %v107_v38 }
  0x47   :  { %v177_v33 = vsel %vm140_vm0, %v136_v29, 0.0  ;;  %v153_v34 = vsel %vm140_vm0, %v128_v30, 0.0  ;;  %v180_v39 = vsel %vm140_vm0, %v137_v35, 0.0  ;;  %v139_v47 = vmul.f32 %v18705_v3, %v116_v43 }
  0x48   :  { %169 = vadd.xlane.f32.xlu1 %v168_v15  ;;  %v156_v40 = vsel %vm140_vm0, %v129_v36, 0.0  ;;  %v183_v45 = vsel %vm140_vm0, %v138_v41, 0.0  ;;  %v159_v46 = vsel %vm140_vm0, %v130_v42, 0.0  ;;  %v131_v48 = vmul.f32 %v18705_v3, %v108_v44 }
  0x49   :  { %145 = vadd.xlane.f32.xlu0 %v144_v16  ;;  %v186_v49 = vsel %vm140_vm0, %v139_v47, 0.0 }
  0x4a   :  { %v162_v50 = vsel %vm140_vm0, %v131_v48, 0.0 }
  0x4c   :  { %172 = vadd.xlane.f32.xlu1 %v171_v21 }
  0x4d   :  { %148 = vadd.xlane.f32.xlu0 %v147_v22 }
  0x50   :  { %175 = vadd.xlane.f32.xlu1 %v174_v27 }
  0x51   :  { %151 = vadd.xlane.f32.xlu0 %v150_v28 }
  0x54   :  { %178 = vadd.xlane.f32.xlu1 %v177_v33 }
  0x55   :  { %154 = vadd.xlane.f32.xlu0 %v153_v34 }
  0x58   :  { %181 = vadd.xlane.f32.xlu1 %v180_v39 }
  0x59   :  { %157 = vadd.xlane.f32.xlu0 %v156_v40 }
  0x5c   :  { %184 = vadd.xlane.f32.xlu1 %v183_v45 }
  0x5d   :  { %160 = vadd.xlane.f32.xlu0 %v159_v46 }
  0x60   :  { %187 = vadd.xlane.f32.xlu1 %v186_v49 }
  0x61   :  { %163 = vadd.xlane.f32.xlu0 %v162_v50  ;;  %v342_v50 = vlaneseq }
  0x71   :  { %222 = vbcast.lane.b32.xlu1 %v18707_v51, 256 }
  0x75   :  { %226 = vbcast.lane.b32.xlu1 %v18707_v51, 264 }
  0x77   :  { %196 = vperm.xlu0 %23778, %v18706_v52  }
  0x79   :  { %230 = vbcast.lane.b32.xlu1 %v18707_v51, 272 }
  0x7d   :  { %234 = vbcast.lane.b32.xlu1 %v18707_v51, 280 }
  0x81   :  { %238 = vbcast.lane.b32.xlu1 %v18707_v51, 288 }
  0x85   :  { %242 = vbcast.lane.b32.xlu1 %v18707_v51, 296 }
  0x89   :  { %246 = vbcast.lane.b32.xlu1 %v18707_v51, 304 }
  0x8d   :  { %250 = vbcast.lane.b32.xlu1 %v18707_v51, 312 }
  0xd1   :  { %v167_v53 = vpop.xlane.xlu1 %166 }
  0xd2   :  { %v143_v54 = vpop.xlane.xlu0 %142 }
  0xd5   :  { %v170_v55 = vpop.xlane.xlu1 %169 }
  0xd6   :  { %v146_v56 = vpop.xlane.xlu0 %145 }
  0xd9   :  { %v173_v57 = vpop.xlane.xlu1 %172 }
  0xda   :  { %v149_v58 = vpop.xlane.xlu0 %148 }
  0xdd   :  { %v176_v59 = vpop.xlane.xlu1 %175 }
  0xde   :  { %v152_v60 = vpop.xlane.xlu0 %151 }
  0xe1   :  { %v179_v61 = vpop.xlane.xlu1 %178 }
  0xe2   :  { %v155_v62 = vpop.xlane.xlu0 %154 }
  0xe5   :  { %v182_v63 = vpop.xlane.xlu1 %181 }
  0xe6   :  { %v158_v0 = vpop.xlane.xlu0 %157 }
  0xe9   :  { %v185_v1 = vpop.xlane.xlu1 %184 }
  0xea   :  { %v161_v2 = vpop.xlane.xlu0 %160 }
  0xed   :  { %v188_v3 = vpop.xlane.xlu1 %187 }
  0xee   :  { %v164_v4 = vpop.xlane.xlu0 %163 }
  0xf1   :  { %v223_v5 = vpop.permute.xlu1 %222 }
  0xf5   :  { %v227_v6 = vpop.permute.xlu1 %226 }
  0xf6   :  { %v197_v7 = vpop.permute.xlu0 %196 }
  0xf7   :  { %v200_v8 = vadd.f32 %v197_v7, %v146_v56  ;;  %v199_v9 = vadd.f32 %v197_v7, %v143_v54  ;;  %v208_v12 = vadd.f32 %v197_v7, %v170_v55  ;;  %v207_v13 = vadd.f32 %v197_v7, %v167_v53 }
  0xf8   :  { %v201_v18 = vadd.f32 %v197_v7, %v149_v58  ;;  %v209_v19 = vadd.f32 %v197_v7, %v173_v57  ;;  %v202_v23 = vadd.f32 %v197_v7, %v152_v60  ;;  %v210_v24 = vadd.f32 %v197_v7, %v176_v59 }
  0xf9   :  { %v24146_v10 = vadd.f32 %v227_v6, %v200_v8  ;;  %v24148_v11 = vadd.f32 %v223_v5, %v199_v9  ;;  %v231_v14 = vpop.permute.xlu1 %230  ;;  %v24152_v15 = vadd.f32 %v227_v6, %v208_v12  ;;  %v24154_v16 = vadd.f32 %v223_v5, %v207_v13 }
  0xfa   :  { %v24158_v20 = vadd.f32 %v231_v14, %v201_v18  ;;  %v24160_v21 = vadd.f32 %v231_v14, %v209_v19  ;;  %v203_v28 = vadd.f32 %v197_v7, %v155_v62  ;;  %v211_v29 = vadd.f32 %v197_v7, %v179_v61 }
  0xfb   :  { %298 = vperm.xlu1 %23779, %v24146_v10   ;;  %295 = vperm.xlu0 %23778, %v24148_v11   ;;  %v204_v32 = vadd.f32 %v197_v7, %v158_v0  ;;  %v212_v33 = vadd.f32 %v197_v7, %v182_v63  ;;  %v205_v37 = vadd.f32 %v197_v7, %v161_v2  ;;  %v343_v53 = vand.u32 127, %v342_v50 }
  0xfc   :  { %v213_v38 = vadd.f32 %v197_v7, %v185_v1  ;;  %v206_v42 = vadd.f32 %v197_v7, %v164_v4  ;;  %v214_v43 = vadd.f32 %v197_v7, %v188_v3  ;;  %v24194_v56 = vshrl.u32 %v342_v50, 7 }
  0xfd   :  { %v235_v17 = vpop.permute.xlu1 %234  ;;  %v348_v57 = vadd.s32 4294967288, %v343_v53  ;;  %v355_v58 = vadd.s32 4294967280, %v343_v53  ;;  %v362_v59 = vadd.s32 4294967272, %v343_v53  ;;  %v369_v60 = vadd.s32 4294967264, %v343_v53 }
  0xfe   :  { %v24164_v25 = vadd.f32 %v235_v17, %v202_v23  ;;  %v24166_v26 = vadd.f32 %v235_v17, %v210_v24  ;;  %v376_v63 = vadd.s32 4294967256, %v343_v53  ;;  %v24200_v1 = vsub.s32 %v343_v53, %v24194_v56 }
  0xff   :  { %322 = vperm.xlu1 %23779, %v24152_v15   ;;  %319 = vperm.xlu0 %23778, %v24154_v16   ;;  %v24197_v0 = vsub.s32 %v348_v57, %v24194_v56  ;;  %v24203_v2 = vsub.s32 %v355_v58, %v24194_v56  ;;  %v383_v3 = vadd.s32 4294967248, %v343_v53  ;;  %v24206_v4 = vsub.s32 %v362_v59, %v24194_v56 }
 0x100   :  { %v24209_v5 = vsub.s32 %v369_v60, %v24194_v56  ;;  %v24212_v6 = vsub.s32 %v376_v63, %v24194_v56  ;;  %v390_v9 = vadd.s32 4294967240, %v343_v53 }
 0x101   :  { %v239_v22 = vpop.permute.xlu1 %238 }
 0x102   :  { %v24170_v30 = vadd.f32 %v239_v22, %v203_v28  ;;  %v24172_v31 = vadd.f32 %v239_v22, %v211_v29  ;;  %v24221_v22 = vsub.s32 %v383_v3, %v24194_v56 }
 0x103   :  { %325 = vperm.xlu1 %23779, %v24160_v21   ;;  %301 = vperm.xlu0 %23778, %v24158_v20  }
 0x105   :  { %v243_v27 = vpop.permute.xlu1 %242 }
 0x106   :  { %v24176_v35 = vadd.f32 %v243_v27, %v204_v32  ;;  %v24178_v36 = vadd.f32 %v243_v27, %v212_v33  ;;  %v24228_v33 = vsub.s32 %v390_v9, %v24194_v56 }
 0x107   :  { %328 = vperm.xlu1 %23779, %v24166_v26   ;;  %304 = vperm.xlu0 %23778, %v24164_v25  }
 0x109   :  { %v247_v34 = vpop.permute.xlu1 %246 }
 0x10a   :  { %v24182_v39 = vadd.f32 %v247_v34, %v205_v37  ;;  %v24184_v40 = vadd.f32 %v247_v34, %v213_v38 }
 0x10b   :  { %331 = vperm.xlu1 %23779, %v24172_v31   ;;  %307 = vperm.xlu0 %23778, %v24170_v30  }
 0x10d   :  { %v251_v41 = vpop.permute.xlu1 %250 }
 0x10e   :  { %v24188_v44 = vadd.f32 %v251_v41, %v206_v42  ;;  %v24190_v45 = vadd.f32 %v251_v41, %v214_v43 }
 0x10f   :  { %334 = vperm.xlu1 %23779, %v24178_v36   ;;  %310 = vperm.xlu0 %23778, %v24176_v35  }
 0x113   :  { %337 = vperm.xlu1 %23779, %v24184_v40   ;;  %313 = vperm.xlu0 %23778, %v24182_v39  }
 0x117   :  { %340 = vperm.xlu1 %23779, %v24190_v45   ;;  %316 = vperm.xlu0 %23778, %v24188_v44  }
 0x17a   :  { %v299_v46 = vpop.permute.xlu1 %298  ;;  %v296_v47 = vpop.permute.xlu0 %295 }
 0x17b   :  { %v352_v12 = vrot.slane %v299_v46, %v24197_v0  ;;  %v347_v13 = vrot.slane %v296_v47, %v24200_v1 }
 0x17d   :  { %v354_v34 = vsel %vm353_vm1, %v352_v12, %v347_v13  ;;  %v24259_v12 = vsub.s32 1, %v24194_v56 }
 0x17e   :  { %v323_v48 = vpop.permute.xlu1 %322  ;;  %v320_v49 = vpop.permute.xlu0 %319 }
 0x17f   :  { %v404_v14 = vrot.slane %v323_v48, %v24197_v0  ;;  %v400_v17 = vrot.slane %v320_v49, %v24200_v1  ;;  %27679 = vst [vmem:[#allocation16_spill] sm:$0xff] %v24259_v12 }
 0x181   :  { %v405_v37 = vsel %vm353_vm1, %v404_v14, %v400_v17 }
 0x182   :  { %v326_v51 = vpop.permute.xlu1 %325  ;;  %v302_v52 = vpop.permute.xlu0 %301 }
 0x183   :  { %v409_v18 = vrot.slane %v326_v51, %v24203_v2  ;;  %v359_v19 = vrot.slane %v302_v52, %v24203_v2 }
 0x185   :  { %v410_v42 = vsel %vm360_vm2, %v409_v18, %v405_v37  ;;  %v361_v43 = vsel %vm360_vm2, %v359_v19, %v354_v34 }
 0x186   :  { %v329_v54 = vpop.permute.xlu1 %328  ;;  %v305_v55 = vpop.permute.xlu0 %304 }
 0x187   :  { %v414_v23 = vrot.slane %v329_v54, %v24206_v4  ;;  %v366_v24 = vrot.slane %v305_v55, %v24206_v4 }
 0x189   :  { %v415_v48 = vsel %vm367_vm3, %v414_v23, %v410_v42  ;;  %v368_v49 = vsel %vm367_vm3, %v366_v24, %v361_v43 }
 0x18a   :  { %v332_v61 = vpop.permute.xlu1 %331  ;;  %v308_v62 = vpop.permute.xlu0 %307 }
 0x18b   :  { %v419_v27 = vrot.slane %v332_v61, %v24209_v5  ;;  %v373_v28 = vrot.slane %v308_v62, %v24209_v5 }
 0x18d   :  { %v420_v50 = vsel %vm374_vm4, %v419_v27, %v415_v48  ;;  %v375_v51 = vsel %vm374_vm4, %v373_v28, %v368_v49 }
 0x18e   :  { %v335_v7 = vpop.permute.xlu1 %334  ;;  %v311_v8 = vpop.permute.xlu0 %310 }
 0x18f   :  { %v424_v38 = vrot.slane %v335_v7, %v24212_v6  ;;  %v380_v41 = vrot.slane %v311_v8, %v24212_v6  ;;  %v24256_v7 = vsub.s32 0, %v24194_v56 }
 0x191   :  { %v425_v54 = vsel %vm381_vm5, %v424_v38, %v420_v50  ;;  %v382_v55 = vsel %vm381_vm5, %v380_v41, %v375_v51  ;;  %27678 = vst [vmem:[#allocation15_spill] sm:$0xff] %v24256_v7 }
 0x192   :  { %v338_v29 = vpop.permute.xlu1 %337  ;;  %v314_v32 = vpop.permute.xlu0 %313 }
 0x193   :  { %v429_v46 = vrot.slane %v338_v29, %v24221_v22  ;;  %v387_v47 = vrot.slane %v314_v32, %v24221_v22 }
 0x195   :  { %v389_v59 = vsel %vm388_vm6, %v387_v47, %v382_v55  ;;  %v430_v60 = vsel %vm388_vm6, %v429_v46, %v425_v54 }
 0x196   :  { %v341_v52 = vpop.permute.xlu1 %340  ;;  %v317_v53 = vpop.permute.xlu0 %316 }
 0x197   :  { %v434_v57 = vrot.slane %v341_v52, %v24228_v33  ;;  %v394_v58 = vrot.slane %v317_v53, %v24228_v33 }
 0x199   :  { %v396_v61 = vsel %vm395_vm7, %v394_v58, %v389_v59  ;;  %v435_v62 = vsel %vm395_vm7, %v434_v57, %v430_v60 }
 0x19a   :  { %v24251_v63 = vsel %vm436_vm8, %v435_v62, %v396_v61 }
 0x19b   :  { %27677 = vst [vmem:[#allocation14_spill] sm:$0xff] %v24251_v63  ;;  %v440_v3 = vsel %vm439_vm9, %v24251_v63, 0.0 }
 0x19c   :  { %441 = vadd.xlane.f32.xlu0 %v440_v3 }
 0x229   :  { %v442_v8 = vpop.xlane.xlu0 %441 }
 0x22a   :  { %v444_v9 = vmul.f32 0.015625, %v442_v8 }
 0x22c   :  { %v449_v13 = vrot.slane %v444_v9, %v24256_v7  ;;  %v453_v18 = vrot.slane %v444_v9, %v24259_v12 }
 0x22e   :  { %v24263_v14 = vsub.f32 %v24170_v30, %v449_v13  ;;  %v24266_v17 = vsub.f32 %v24148_v11, %v449_v13  ;;  %v24274_v24 = vsub.f32 %v24188_v44, %v449_v13  ;;  %v24277_v56 = vsub.f32 %v24146_v10, %v449_v13 }
 0x22f   :  { %v24284_v27 = vsub.f32 %v24154_v16, %v453_v18  ;;  %v24289_v28 = vsub.f32 %v24152_v15, %v453_v18  ;;  %v24294_v29 = vsub.f32 %v24158_v20, %v449_v13  ;;  %v24299_v32 = vsub.f32 %v24160_v21, %v453_v18 }
 0x230   :  { %v476_v19 = vmul.f32 %v24263_v14, %v24263_v14  ;;  %v472_v23 = vmul.f32 %v24266_v17, %v24266_v17  ;;  %v479_v11 = vmul.f32 %v24274_v24, %v24274_v24  ;;  %v473_v30 = vmul.f32 %v24277_v56, %v24277_v56 }
 0x231   :  { %v480_v44 = vmul.f32 %v24284_v27, %v24284_v27  ;;  %v481_v10 = vmul.f32 %v24289_v28, %v24289_v28  ;;  %v474_v16 = vmul.f32 %v24294_v29, %v24294_v29  ;;  %v482_v34 = vmul.f32 %v24299_v32, %v24299_v32 }
 0x232   :  { %517 = vperm.xlu0 %23778, %v476_v19   ;;  %505 = vperm.xlu1 %23779, %v472_v23   ;;  %v24304_v15 = vsub.f32 %v24164_v25, %v449_v13  ;;  %v24309_v20 = vsub.f32 %v24166_v26, %v453_v18  ;;  %v24314_v21 = vsub.f32 %v24172_v31, %v453_v18 }
 0x233   :  { %v24319_v25 = vsub.f32 %v24176_v35, %v449_v13  ;;  %v24324_v26 = vsub.f32 %v24178_v36, %v453_v18  ;;  %v24329_v31 = vsub.f32 %v24182_v39, %v449_v13  ;;  %v24334_v35 = vsub.f32 %v24184_v40, %v453_v18  ;;  %v24346_v39 = vld [vmem:[%s27611_s5] ss:$0 sm:$0xff] }
 0x234   :  { %v475_v37 = vmul.f32 %v24304_v15, %v24304_v15  ;;  %v483_v38 = vmul.f32 %v24309_v20, %v24309_v20  ;;  %v484_v41 = vmul.f32 %v24314_v21, %v24314_v21  ;;  %v24339_v36 = vsub.f32 %v24190_v45, %v453_v18  ;;  %v18709_v40 = vld [vmem:[%s27612_s6] ss:$0 sm:$0xff] }
 0x235   :  { %v477_v42 = vmul.f32 %v24319_v25, %v24319_v25  ;;  %v485_v43 = vmul.f32 %v24324_v26, %v24324_v26  ;;  %v478_v46 = vmul.f32 %v24329_v31, %v24329_v31  ;;  %v486_v47 = vmul.f32 %v24334_v35, %v24334_v35 }
 0x236   :  { %526 = vperm.xlu0 %23778, %v479_v11   ;;  %508 = vperm.xlu1 %23779, %v473_v30   ;;  %v487_v48 = vmul.f32 %v24339_v36, %v24339_v36 }
 0x23a   :  { %529 = vperm.xlu1 %23779, %v480_v44  }
 0x23e   :  { %532 = vperm.xlu1 %23779, %v481_v10  }
 0x242   :  { %511 = vperm.xlu1 %23779, %v474_v16  }
 0x246   :  { %535 = vperm.xlu1 %23779, %v482_v34  }
 0x24a   :  { %514 = vperm.xlu1 %23779, %v475_v37  }
 0x24e   :  { %538 = vperm.xlu1 %23779, %v483_v38  }
 0x252   :  { %541 = vperm.xlu1 %23779, %v484_v41  }
 0x256   :  { %520 = vperm.xlu1 %23779, %v477_v42  }
 0x25a   :  { %544 = vperm.xlu1 %23779, %v485_v43  }
 0x25e   :  { %523 = vperm.xlu1 %23779, %v478_v46  }
 0x262   :  { %547 = vperm.xlu1 %23779, %v486_v47  }
 0x266   :  { %550 = vperm.xlu1 %23779, %v487_v48  }
 0x26a   :  { %672 = vbcast.lane.b32.xlu1 %v24346_v39, 256 }
 0x26e   :  { %676 = vbcast.lane.b32.xlu1 %v24346_v39, 264 }
 0x272   :  { %680 = vbcast.lane.b32.xlu1 %v24346_v39, 272 }
 0x276   :  { %684 = vbcast.lane.b32.xlu1 %v24346_v39, 280 }
 0x27a   :  { %733 = vbcast.lane.b32.xlu1 %v18709_v40, 256 }
 0x27e   :  { %737 = vbcast.lane.b32.xlu1 %v18709_v40, 264 }
 0x282   :  { %688 = vbcast.lane.b32.xlu1 %v24346_v39, 288 }
 0x286   :  { %741 = vbcast.lane.b32.xlu1 %v18709_v40, 272 }
 0x28a   :  { %745 = vbcast.lane.b32.xlu1 %v18709_v40, 280 }
 0x28e   :  { %696 = vbcast.lane.b32.xlu1 %v24346_v39, 304 }
 0x292   :  { %749 = vbcast.lane.b32.xlu1 %v18709_v40, 288 }
 0x296   :  { %700 = vbcast.lane.b32.xlu1 %v24346_v39, 312 }
 0x29a   :  { %753 = vbcast.lane.b32.xlu1 %v18709_v40, 296 }
 0x29e   :  { %757 = vbcast.lane.b32.xlu1 %v18709_v40, 304 }
 0x2b1   :  { %v506_v45 = vpop.permute.xlu1 %505  ;;  %v518_v8 = vpop.permute.xlu0 %517 }
 0x2b2   :  { %v555_v62 = vrot.slane %v506_v45, %v24200_v1  ;;  %v574_v16 = vrot.slane %v518_v8, %v24209_v5 }
 0x2b5   :  { %v509_v49 = vpop.permute.xlu1 %508  ;;  %v527_v43 = vpop.permute.xlu0 %526 }
 0x2b6   :  { %v559_v60 = vrot.slane %v509_v49, %v24197_v0 }
 0x2b8   :  { %v560_v13 = vsel %vm353_vm1, %v559_v60, %v555_v62 }
 0x2b9   :  { %v530_v50 = vpop.permute.xlu1 %529 }
 0x2ba   :  { %v594_v11 = vrot.slane %v530_v50, %v24200_v1 }
 0x2bd   :  { %v533_v51 = vpop.permute.xlu1 %532 }
 0x2be   :  { %v598_v18 = vrot.slane %v533_v51, %v24197_v0 }
 0x2c0   :  { %v599_v41 = vsel %vm353_vm1, %v598_v18, %v594_v11 }
 0x2c1   :  { %v512_v52 = vpop.permute.xlu1 %511 }
 0x2c2   :  { %v564_v61 = vrot.slane %v512_v52, %v24203_v2 }
 0x2c4   :  { %v565_v19 = vsel %vm360_vm2, %v564_v61, %v560_v13 }
 0x2c5   :  { %v536_v53 = vpop.permute.xlu1 %535 }
 0x2c6   :  { %v603_v23 = vrot.slane %v536_v53, %v24203_v2  ;;  %v589_v53 = vrot.slane %v527_v43, %v24228_v33 }
 0x2c8   :  { %v604_v46 = vsel %vm360_vm2, %v603_v23, %v599_v41 }
 0x2c9   :  { %v515_v54 = vpop.permute.xlu1 %514 }
 0x2ca   :  { %v569_v3 = vrot.slane %v515_v54, %v24206_v4 }
 0x2cc   :  { %v570_v30 = vsel %vm367_vm3, %v569_v3, %v565_v19 }
 0x2cd   :  { %v539_v55 = vpop.permute.xlu1 %538  ;;  %v575_v47 = vsel %vm374_vm4, %v574_v16, %v570_v30 }
 0x2ce   :  { %v608_v44 = vrot.slane %v539_v55, %v24206_v4 }
 0x2d0   :  { %v609_v45 = vsel %vm367_vm3, %v608_v44, %v604_v46 }
 0x2d1   :  { %v542_v57 = vpop.permute.xlu1 %541 }
 0x2d2   :  { %v613_v34 = vrot.slane %v542_v57, %v24209_v5 }
 0x2d4   :  { %v614_v50 = vsel %vm374_vm4, %v613_v34, %v609_v45 }
 0x2d5   :  { %v521_v58 = vpop.permute.xlu1 %520 }
 0x2d6   :  { %v579_v10 = vrot.slane %v521_v58, %v24212_v6 }
 0x2d8   :  { %v580_v49 = vsel %vm381_vm5, %v579_v10, %v575_v47 }
 0x2d9   :  { %v545_v59 = vpop.permute.xlu1 %544 }
 0x2da   :  { %v618_v42 = vrot.slane %v545_v59, %v24212_v6 }
 0x2dc   :  { %v619_v54 = vsel %vm381_vm5, %v618_v42, %v614_v50 }
 0x2dd   :  { %v524_v9 = vpop.permute.xlu1 %523 }
 0x2de   :  { %v584_v37 = vrot.slane %v524_v9, %v24221_v22 }
 0x2e0   :  { %v585_v51 = vsel %vm388_vm6, %v584_v37, %v580_v49 }
 0x2e1   :  { %v548_v38 = vpop.permute.xlu1 %547  ;;  %v590_v58 = vsel %vm395_vm7, %v589_v53, %v585_v51 }
 0x2e2   :  { %v623_v48 = vrot.slane %v548_v38, %v24221_v22 }
 0x2e4   :  { %v624_v57 = vsel %vm388_vm6, %v623_v48, %v619_v54 }
 0x2e5   :  { %v551_v52 = vpop.permute.xlu1 %550 }
 0x2e6   :  { %v628_v55 = vrot.slane %v551_v52, %v24228_v33 }
 0x2e8   :  { %v629_v59 = vsel %vm395_vm7, %v628_v55, %v624_v57 }
 0x2e9   :  { %v630_v60 = vsel %vm436_vm8, %v629_v59, %v590_v58  ;;  %v673_v62 = vpop.permute.xlu1 %672 }
 0x2ea   :  { %v632_v61 = vsel %vm439_vm9, %v630_v60, 0.0 }
 0x2eb   :  { %633 = vadd.xlane.f32.xlu0 %v632_v61 }
 0x2ed   :  { %v677_v3 = vpop.permute.xlu1 %676 }
 0x2f1   :  { %v681_v8 = vpop.permute.xlu1 %680 }
 0x2f5   :  { %v685_v9 = vpop.permute.xlu1 %684 }
 0x2f9   :  { %v734_v13 = vpop.permute.xlu1 %733 }
 0x2fd   :  { %v738_v23 = vpop.permute.xlu1 %737 }
 0x301   :  { %692 = vbcast.lane.b32.xlu0 %v24346_v39, 296  ;;  %v689_v30 = vpop.permute.xlu1 %688 }
 0x305   :  { %761 = vbcast.lane.b32.xlu0 %v18709_v40, 312  ;;  %v742_v44 = vpop.permute.xlu1 %741 }
 0x309   :  { %v746_v16 = vpop.permute.xlu1 %745 }
 0x30d   :  { %v697_v42 = vpop.permute.xlu1 %696 }
 0x378   :  { %v634_v18 = vpop.xlane.xlu0 %633 }
 0x379   :  { %v635_v19 = vmul.f32 0.015625, %v634_v18 }
 0x37b   :  { %v636_v11 = vadd.f32 1e-06, %v635_v19 }
 0x37d   :  { %23780 = vrsqrt.f32 %v636_v11 }
 0x387   :  { %v23781_v10 = vpop.eup %23780 }
 0x388   :  { %v642_v34 = vrot.slane %v23781_v10, %v24256_v7  ;;  %v646_v37 = vrot.slane %v23781_v10, %v24259_v12 }
 0x38a   :  { %v649_v39 = vmul.f32 %v642_v34, %v24266_v17  ;;  %v650_v40 = vmul.f32 %v642_v34, %v24277_v56  ;;  %v657_v38 = vmul.f32 %v646_v37, %v24284_v27  ;;  %v658_v41 = vmul.f32 %v646_v37, %v24289_v28  ;;  %v750_v27 = vpop.permute.xlu1 %749 }
 0x38b   :  { %v659_v47 = vmul.f32 %v646_v37, %v24299_v32  ;;  %v651_v48 = vmul.f32 %v642_v34, %v24294_v29  ;;  %v652_v17 = vmul.f32 %v642_v34, %v24304_v15  ;;  %v660_v56 = vmul.f32 %v646_v37, %v24309_v20 }
 0x38c   :  { %v710_v43 = vmul.f32 %v673_v62, %v649_v39  ;;  %v711_v46 = vmul.f32 %v677_v3, %v650_v40  ;;  %v718_v50 = vmul.f32 %v673_v62, %v657_v38  ;;  %v719_v51 = vmul.f32 %v677_v3, %v658_v41  ;;  %v788_v41 = vld [vmem:[#allocation4 + $0x8] sm:$0xff] }
 0x38d   :  { %v720_v53 = vmul.f32 %v681_v8, %v659_v47  ;;  %v712_v54 = vmul.f32 %v681_v8, %v651_v48  ;;  %v653_v32 = vmul.f32 %v642_v34, %v24263_v14  ;;  %v661_v29 = vmul.f32 %v646_v37, %v24314_v21 }
 0x38e   :  { %v771_v45 = vadd.f32 %v734_v13, %v710_v43  ;;  %v772_v49 = vadd.f32 %v738_v23, %v711_v46  ;;  %v779_v52 = vadd.f32 %v734_v13, %v718_v50  ;;  %v780_v28 = vadd.f32 %v738_v23, %v719_v51  ;;  %v701_v60 = vpop.permute.xlu1 %700  ;;  %v790_v43 = vld [vmem:[#allocation4 + $0x18] sm:$0xff] }
 0x38f   :  { %v713_v55 = vmul.f32 %v685_v9, %v652_v17  ;;  %v721_v57 = vmul.f32 %v685_v9, %v660_v56  ;;  %v781_v58 = vadd.f32 %v742_v44, %v720_v53  ;;  %v773_v59 = vadd.f32 %v742_v44, %v712_v54  ;;  %v693_v9 = vpop.permute.xlu0 %692  ;;  %v792_v17 = vld [vmem:[#allocation4 + $0x28] sm:$0xff]  ;;  %v794_v56 = vld [vmem:[#allocation4 + $0x38] sm:$0xff]  ;;  %v791_v53 = vld [vmem:[#allocation4 + $0x20] sm:$0xff] }
 0x390   :  { %832 = vperm.xlu1 %23779, %v771_v45   ;;  %835 = vperm.xlu0 %23778, %v772_v49   ;;  %v714_v15 = vmul.f32 %v689_v30, %v653_v32  ;;  %v722_v20 = vmul.f32 %v689_v30, %v661_v29  ;;  %v654_v3 = vmul.f32 %v642_v34, %v24319_v25  ;;  %v961_v47 = vand.u32 4294901760, %v788_v41  ;;  %v787_v45 = vld [vmem:[#allocation4] sm:$0xff]  ;;  %v793_v54 = vld [vmem:[#allocation4 + $0x30] sm:$0xff] }
 0x391   :  { %v774_v61 = vadd.f32 %v746_v16, %v713_v55  ;;  %v782_v62 = vadd.f32 %v746_v16, %v721_v57  ;;  %v662_v8 = vmul.f32 %v646_v37, %v24324_v26  ;;  %v655_v14 = vmul.f32 %v642_v34, %v24329_v31 }
 0x392   :  { %v663_v21 = vmul.f32 %v646_v37, %v24334_v35  ;;  %v754_v13 = vpop.permute.xlu1 %753  ;;  %v775_v18 = vadd.f32 %v750_v27, %v714_v15  ;;  %v783_v19 = vadd.f32 %v750_v27, %v722_v20  ;;  %v715_v23 = vmul.f32 %v693_v9, %v654_v3  ;;  %v795_v20 = vld [vmem:[#allocation4 + $0x40] sm:$0xff] }
 0x393   :  { %v723_v11 = vmul.f32 %v693_v9, %v662_v8  ;;  %v656_v30 = vmul.f32 %v642_v34, %v24274_v24  ;;  %v664_v25 = vmul.f32 %v646_v37, %v24339_v36  ;;  %v716_v44 = vmul.f32 %v697_v42, %v655_v14  ;;  %v762_v46 = vpop.permute.xlu0 %761  ;;  %v789_v24 = vld [vmem:[#allocation4 + $0x10] sm:$0xff] }
 0x394   :  { %856 = vperm.xlu1 %23779, %v779_v52   ;;  %859 = vperm.xlu0 %23778, %v780_v28   ;;  %v724_v26 = vmul.f32 %v697_v42, %v663_v21  ;;  %v776_v10 = vadd.f32 %v754_v13, %v715_v23  ;;  %v965_v48 = vand.u32 4294901760, %v790_v43  ;;  %v963_v36 = vand.u32 4294901760, %v787_v45  ;;  %v802_v23 = vld [vmem:[#allocation4 + $0x78] sm:$0xff] }
 0x395   :  { %v784_v16 = vadd.f32 %v754_v13, %v723_v11  ;;  %v717_v31 = vmul.f32 %v701_v60, %v656_v30  ;;  %v725_v35 = vmul.f32 %v701_v60, %v664_v25  ;;  %v967_v34 = vand.u32 4294901760, %v789_v24  ;;  %v799_v11 = vld [vmem:[#allocation4 + $0x60] sm:$0xff] }
 0x396   :  { %v758_v39 = vpop.permute.xlu1 %757  ;;  %v24409_v37 = vpack.c.bf16 %v965_v48, %v961_v47  ;;  %v24413_v51 = vsub.f32 %v787_v45, %v963_v36  ;;  %v969_v52 = vand.u32 4294901760, %v792_v17  ;;  %v973_v28 = vand.u32 4294901760, %v794_v56 }
 0x397   :  { %v777_v40 = vadd.f32 %v758_v39, %v716_v44  ;;  %v785_v38 = vadd.f32 %v758_v39, %v724_v26  ;;  %v778_v42 = vadd.f32 %v762_v46, %v717_v31  ;;  %v786_v49 = vadd.f32 %v762_v46, %v725_v35 }
 0x398   :  { %862 = vperm.xlu0 %23778, %v781_v58   ;;  %838 = vperm.xlu1 %23779, %v773_v59   ;;  %v24411_v50 = vpack.c.bf16 %v967_v34, %v963_v36  ;;  %v24416_v27 = vsub.f32 %v789_v24, %v967_v34  ;;  %v971_v32 = vand.u32 4294901760, %v791_v53  ;;  %v975_v29 = vand.u32 4294901760, %v793_v54  ;;  %v796_v58 = vld [vmem:[#allocation4 + $0x48] sm:$0xff]  ;;  %v798_v59 = vld [vmem:[#allocation4 + $0x58] sm:$0xff] }
 0x399   :  { %21760 = vmatprep.subr.bf16.mxu0 %v24409_v37  ;;  %v24419_v55 = vpack.c.bf16 %v973_v28, %v969_v52  ;;  %v977_v60 = vand.u32 4294901760, %v796_v58  ;;  %v981_v15 = vand.u32 4294901760, %v798_v59  ;;  %v24426_v3 = vsub.f32 %v790_v43, %v965_v48 }
 0x39a   :  { %21762 = vmatpush1.bf16.msra.mxu0 %v24411_v50  ;;  %v24421_v57 = vpack.c.bf16 %v975_v29, %v971_v32  ;;  %v979_v8 = vand.u32 4294901760, %v795_v20  ;;  %v24428_v21 = vsub.f32 %v792_v17, %v969_v52  ;;  %v24430_v9 = vsub.f32 %v794_v56, %v973_v28 }
 0x39b   :  { %21764 = vmatprep.subr.bf16.mxu0 %v24419_v55  ;;  %v24433_v13 = vsub.f32 %v791_v53, %v971_v32  ;;  %v24437_v30 = vpack.c.bf16 %v981_v15, %v977_v60  ;;  %v24439_v25 = vsub.f32 %v796_v58, %v977_v60  ;;  %v24441_v44 = vsub.f32 %v798_v59, %v981_v15 }
 0x39c   :  { %865 = vperm.xlu0 %23778, %v782_v62   ;;  %841 = vperm.xlu1 %23779, %v774_v61   ;;  %v797_v61 = vld [vmem:[#allocation4 + $0x50] sm:$0xff]  ;;  %v24424_v62 = vsub.f32 %v788_v41, %v961_v47  ;;  %v989_v35 = vand.u32 4294901760, %v802_v23  ;;  %v27625_v48 = vmov 0.0   ;;  %v27628_v45 = vand.u32 4294901760, %v24426_v3 }
 0x39d   :  { %v983_v14 = vand.u32 4294901760, %v797_v61  ;;  %1041 = vmatprep.mubr.f32.mxu0 %v27625_v48  ;;  %19707 = vmatprep.subr.mxu1 %v27625_v48  ;;  %v27627_v17 = vand.u32 4294901760, %v24413_v51  ;;  %v1073_v56 = vand.u32 4294901760, %v24416_v27  ;;  %v1079_v52 = vand.u32 4294901760, %v24428_v21 }
 0x39e   :  { %21766 = vmatpush1.bf16.msra.mxu0 %v24421_v57  ;;  %v27629_v41 = vand.u32 4294901760, %v24424_v62  ;;  %v24456_v47 = vsub.f32 %v802_v23, %v989_v35  ;;  %v1091_v53 = vand.u32 4294901760, %v24430_v9 }
 0x39f   :  { %v24443_v26 = vpack.c.bf16 %v983_v14, %v979_v8  ;;  %v24447_v39 = vsub.f32 %v797_v61, %v983_v14  ;;  %21768 = vmatprep.subr.bf16.mxu0 %v24437_v30  ;;  %v1062_v58 = vsub.f32 %v24413_v51, %v27627_v17  ;;  %v1074_v59 = vsub.f32 %v24416_v27, %v1073_v56 }
 0x3a0   :  { %868 = vperm.xlu0 %23778, %v783_v19   ;;  %844 = vperm.xlu1 %23779, %v775_v18   ;;  %v24435_v18 = vsub.f32 %v793_v54, %v975_v29  ;;  %v800_v19 = vld [vmem:[#allocation4 + $0x68] sm:$0xff]  ;;  %v1085_v54 = vand.u32 4294901760, %v24433_v13  ;;  %v1080_v60 = vsub.f32 %v24428_v21, %v1079_v52  ;;  %v1092_v15 = vsub.f32 %v24430_v9, %v1091_v53 }
 0x3a1   :  { %v985_v31 = vand.u32 4294901760, %v800_v19  ;;  %v1063_v14 = vand.u32 4294901760, %v1062_v58 }
 0x3a2   :  { %21770 = vmatpush1.bf16.msra.mxu0 %v24443_v26  ;;  %v1097_v32 = vand.u32 4294901760, %v24435_v18  ;;  %v1081_v23 = vand.u32 4294901760, %v1080_v60 }
 0x3a3   :  { %v24452_v43 = vpack.c.bf16 %v989_v35, %v985_v31  ;;  %v24454_v46 = vsub.f32 %v800_v19, %v985_v31  ;;  %v1075_v19 = vand.u32 4294901760, %v1074_v59  ;;  %v1103_v35 = vand.u32 4294901760, %v24439_v25 }
 0x3a4   :  { %871 = vperm.xlu0 %23778, %v784_v16   ;;  %847 = vperm.xlu1 %23779, %v776_v10   ;;  %v801_v10 = vld [vmem:[#allocation4 + $0x70] sm:$0xff]  ;;  %v24445_v16 = vsub.f32 %v795_v20, %v979_v8  ;;  %v1086_v20 = vsub.f32 %v24433_v13, %v1085_v54  ;;  %v1098_v61 = vsub.f32 %v24435_v18, %v1097_v32 }
 0x3a5   :  { %27680 = vst [vmem:[#allocation17_spill] sm:$0xff] %v24452_v43  ;;  %21772 = vmatprep.subr.bf16.mxu0 %v24452_v43 }
 0x3a6   :  { %v1099_v31 = vand.u32 4294901760, %v1098_v61  ;;  %v1139_v61 = vand.u32 4294901760, %v24456_v47 }
 0x3a8   :  { %874 = vperm.xlu0 %23778, %v785_v38   ;;  %850 = vperm.xlu1 %23779, %v777_v40   ;;  %v987_v40 = vand.u32 4294901760, %v799_v11  ;;  %v991_v38 = vand.u32 4294901760, %v801_v10 }
 0x3aa   :  { %v24460_v24 = vpack.c.bf16 %v991_v38, %v987_v40  ;;  %v24462_v36 = vsub.f32 %v799_v11, %v987_v40  ;;  %v24464_v34 = vsub.f32 %v801_v10, %v991_v38  ;;  %v1093_v11 = vand.u32 4294901760, %v1092_v15 }
 0x3ab   :  { %v1087_v10 = vand.u32 4294901760, %v1086_v20  ;;  %v24490_v40 = vpack.c.bf16 %v1075_v19, %v1063_v14  ;;  %v1115_v38 = vand.u32 4294901760, %v24441_v44  ;;  %v1127_v15 = vand.u32 4294901760, %v24454_v46 }
 0x3ac   :  { %877 = vperm.xlu0 %23778, %v786_v49   ;;  %853 = vperm.xlu1 %23779, %v778_v42   ;;  %27681 = vst [vmem:[#allocation18_spill] sm:$0xff] %v24460_v24  ;;  %v1056_v42 = vsub.f32 %v24424_v62, %v27629_v41  ;;  %v1068_v49 = vsub.f32 %v24426_v3, %v27628_v45  ;;  %v1145_v14 = vand.u32 4294901760, %v24464_v34 }
 0x3ad   :  { %21774 = vmatpush1.bf16.msra.mxu0 %v24460_v24  ;;  %v24495_v48 = vpack.c.bf16 %v1093_v11, %v1081_v23  ;;  %v1116_v58 = vsub.f32 %v24441_v44, %v1115_v38 }
 0x3ae   :  { %v1057_v28 = vand.u32 4294901760, %v1056_v42  ;;  %v1069_v29 = vand.u32 4294901760, %v1068_v49  ;;  %v1109_v42 = vand.u32 4294901760, %v24445_v16  ;;  %v1121_v49 = vand.u32 4294901760, %v24447_v39 }
 0x3af   :  { %v1117_v19 = vand.u32 4294901760, %v1116_v58  ;;  %v1146_v45 = vsub.f32 %v24464_v34, %v1145_v14 }
 0x3b0   :  { %v21775_v8 = vpack.c.bf16 %v1069_v29, %v1057_v28  ;;  %v24497_v28 = vpack.c.bf16 %v1099_v31, %v1087_v10  ;;  %v1104_v29 = vsub.f32 %v24439_v25, %v1103_v35  ;;  %v1110_v59 = vsub.f32 %v24445_v16, %v1109_v42 }
 0x3b1   :  { %v1122_v60 = vsub.f32 %v24447_v39, %v1121_v49  ;;  %v1128_v10 = vsub.f32 %v24454_v46, %v1127_v15  ;;  %v1140_v31 = vsub.f32 %v24456_v47, %v1139_v61  ;;  %v1147_v24 = vand.u32 4294901760, %v1146_v45 }
 0x3b2   :  { %21776 = vmatprep.subr.bf16.mxu0 %v21775_v8  ;;  %v1105_v20 = vand.u32 4294901760, %v1104_v29  ;;  %v1133_v8 = vand.u32 4294901760, %v24462_v36  ;;  %v1111_v23 = vand.u32 4294901760, %v1110_v59  ;;  %v27682_v45 = vand.u32 4294901760, %v24424_v62 }
 0x3b3   :  { %v1123_v11 = vand.u32 4294901760, %v1122_v60  ;;  %v1129_v63 = vand.u32 4294901760, %v1128_v10  ;;  %v1141_v12 = vand.u32 4294901760, %v1140_v31  ;;  %v24545_v31 = vpack.c.bf16 %v1091_v53, %v1079_v52 }
 0x3b4   :  { %v1134_v17 = vsub.f32 %v24462_v36, %v1133_v8  ;;  %v24511_v41 = vpack.c.bf16 %v1117_v19, %v1105_v20  ;;  %v24553_v19 = vpack.c.bf16 %v1139_v61, %v1127_v15 }
 0x3b5   :  { %v24513_v29 = vpack.c.bf16 %v1123_v11, %v1111_v23  ;;  %v24515_v43 = vpack.c.bf16 %v1141_v12, %v1129_v63  ;;  %v27685_v11 = vand.u32 4294901760, %v24413_v51  ;;  %v24549_v63 = vpack.c.bf16 %v1115_v38, %v1103_v35 }
 0x3b6   :  { %v1135_v7 = vand.u32 4294901760, %v1134_v17  ;;  %v24547_v17 = vpack.c.bf16 %v1097_v32, %v1085_v54  ;;  %27687 = vst [vmem:[#allocation21_spill] sm:$0xff] %v24553_v19  ;;  %v24555_v12 = vpack.c.bf16 %v1145_v14, %v1133_v8 }
 0x3b7   :  { %v24543_v10 = vpack.c.bf16 %v1073_v56, %v27685_v11 }
 0x3b8   :  { %v24517_v58 = vpack.c.bf16 %v1147_v24, %v1135_v7  ;;  %v27683_v24 = vand.u32 4294901760, %v24426_v3  ;;  %v24551_v7 = vpack.c.bf16 %v1121_v49, %v1109_v42  ;;  %27688 = vst [vmem:[#allocation22_spill] sm:$0xff] %v24555_v12 }
 0x3ba   :  { %v24539_v23 = vpack.c.bf16 %v27683_v24, %v27682_v45  ;;  %27686 = vst [vmem:[#allocation20_spill] sm:$0xff] %v24551_v7 }
 0x3bc   :  { %27684 = vst [vmem:[#allocation19_spill] sm:$0xff] %v24539_v23 }
 0x40f   :  { %v836_v20 = vpop.permute.xlu0 %835  ;;  %v833_v60 = vpop.permute.xlu1 %832 }
 0x410   :  { %v886_v35 = vrot.slane %v836_v20, %v24197_v0  ;;  %v882_v38 = vrot.slane %v833_v60, %v24200_v1 }
 0x412   :  { %v887_v60 = vsel %vm353_vm1, %v886_v35, %v882_v38 }
 0x413   :  { %v860_v45 = vpop.permute.xlu0 %859  ;;  %v857_v24 = vpop.permute.xlu1 %856 }
 0x414   :  { %v925_v42 = vrot.slane %v860_v45, %v24197_v0  ;;  %v921_v49 = vrot.slane %v857_v24, %v24200_v1 }
 0x416   :  { %v926_v0 = vsel %vm353_vm1, %v925_v42, %v921_v49 }
 0x417   :  { %v863_v59 = vpop.permute.xlu0 %862  ;;  %v839_v23 = vpop.permute.xlu1 %838 }
 0x418   :  { %v930_v15 = vrot.slane %v863_v59, %v24203_v2  ;;  %v891_v61 = vrot.slane %v839_v23, %v24203_v2 }
 0x41a   :  { %v931_v2 = vsel %vm360_vm2, %v930_v15, %v926_v0  ;;  %v892_v23 = vsel %vm360_vm2, %v891_v61, %v887_v60 }
 0x41b   :  { %v866_v56 = vpop.permute.xlu0 %865  ;;  %v842_v11 = vpop.permute.xlu1 %841 }
 0x41c   :  { %v935_v8 = vrot.slane %v866_v56, %v24206_v4  ;;  %v896_v14 = vrot.slane %v842_v11, %v24206_v4 }
 0x41e   :  { %v897_v24 = vsel %vm367_vm3, %v896_v14, %v892_v23 }
 0x41f   :  { %v869_v52 = vpop.permute.xlu0 %868  ;;  %v845_v53 = vpop.permute.xlu1 %844 }
 0x420   :  { %v940_v12 = vrot.slane %v869_v52, %v24209_v5  ;;  %v901_v19 = vrot.slane %v845_v53, %v24209_v5  ;;  %v936_v5 = vsel %vm367_vm3, %v935_v8, %v931_v2 }
 0x422   :  { %v941_v56 = vsel %vm374_vm4, %v940_v12, %v936_v5  ;;  %v902_v11 = vsel %vm374_vm4, %v901_v19, %v897_v24 }
 0x423   :  { %v872_v54 = vpop.permute.xlu0 %871  ;;  %v848_v32 = vpop.permute.xlu1 %847 }
 0x424   :  { %v945_v1 = vrot.slane %v872_v54, %v24212_v6  ;;  %v906_v59 = vrot.slane %v848_v32, %v24212_v6 }
 0x426   :  { %v946_v6 = vsel %vm381_vm5, %v945_v1, %v941_v56  ;;  %v907_v54 = vsel %vm381_vm5, %v906_v59, %v902_v11 }
 0x427   :  { %v875_v7 = vpop.permute.xlu0 %874  ;;  %v851_v20 = vpop.permute.xlu1 %850 }
 0x428   :  { %v950_v4 = vrot.slane %v875_v7, %v24221_v22  ;;  %v911_v45 = vrot.slane %v851_v20, %v24221_v22  ;;  %v27690_v20 = vpack.c.bf16 %v24426_v3, %v24424_v62  ;;  %v27695_v62 = vpack.c.bf16 %v24447_v39, %v24445_v16  ;;  %v27698_v3 = vld [vmem:[#allocation17_spill] sm:$0xff] }
 0x42a   :  { %v951_v22 = vsel %vm388_vm6, %v950_v4, %v946_v6  ;;  %v912_v35 = vsel %vm388_vm6, %v911_v45, %v907_v54 }
 0x42b   :  { %v878_v52 = vpop.permute.xlu0 %877  ;;  %v854_v53 = vpop.permute.xlu1 %853 }
 0x42c   :  { %v955_v32 = vrot.slane %v878_v52, %v24228_v33  ;;  %v916_v7 = vrot.slane %v854_v53, %v24228_v33  ;;  %v27689_v33 = vmov 0.0  }
 0x42d   :  { %19709 = vmatprep.mubr.msk.f32.mxu1 %vm23937_vm11, %v27689_v33 }
 0x42e   :  { %v956_v38 = vsel %vm395_vm7, %v955_v32, %v951_v22  ;;  %v917_v12 = vsel %vm395_vm7, %v916_v7, %v912_v35 }
 0x42f   :  { %v957_v19 = vsel %vm436_vm8, %v956_v38, %v917_v12 }
 0x430   :  { %v959_v42 = vsel %vm958_vm10, %v957_v19, 0 }
 0x431   :  { %v1042_v49 = vand.u32 4294901760, %v959_v42 }
 0x433   :  { %v1043_v15 = vsub.f32 %v959_v42, %v1042_v49 }
 0x435   :  { %v1044_v61 = vand.u32 4294901760, %v1043_v15 }
 0x437   :  { %v1045_v8 = vsub.f32 %v1043_v15, %v1044_v61 }
 0x439   :  { %v1046_v14 = vand.u32 4294901760, %v1045_v8  ;;  %v27706_v8 = vld [vmem:[#allocation14_spill] sm:$0xff] }
 0x43b   :  { %1047 = vmatmul.mubr.f32.vlgmr.msra.gmra.mrb[0].mxu0 %v1046_v14 }
 0x43c   :  { %21778 = vmatpush1.bf16.msra.mxu0 %v24490_v40  ;;  %1197 = vmatprep.mubr.f32.mxu0 %v27689_v33  ;;  %v27691_v40 = vpack.c.bf16 %v24416_v27, %v24413_v51  ;;  %v27696_v51 = vpack.c.bf16 %v24456_v47, %v24454_v46  ;;  %v27697_v27 = vpack.c.bf16 %v24464_v34, %v24462_v36 }
 0x43d   :  { %21780 = vmatprep.subr.bf16.mxu0 %v24495_v48  ;;  %v27694_v48 = vpack.c.bf16 %v24441_v44, %v24439_v25  ;;  %v27703_v25 = vld [vmem:[#allocation22_spill] sm:$0xff] }
 0x440   :  { %21782 = vmatpush1.bf16.msra.mxu0 %v24497_v28 }
 0x441   :  { %21784 = vmatprep.subr.bf16.mxu0 %v24511_v41  ;;  %v27692_v41 = vpack.c.bf16 %v24430_v9, %v24428_v21  ;;  %v27699_v21 = vld [vmem:[#allocation18_spill] sm:$0xff]  ;;  %v27700_v9 = vld [vmem:[#allocation19_spill] sm:$0xff] }
 0x444   :  { %21786 = vmatpush1.bf16.msra.mxu0 %v24513_v29 }
 0x445   :  { %21788 = vmatprep.subr.bf16.mxu0 %v24515_v43  ;;  %v27693_v43 = vpack.c.bf16 %v24435_v18, %v24433_v13  ;;  %v27701_v13 = vld [vmem:[#allocation20_spill] sm:$0xff]  ;;  %v27702_v18 = vld [vmem:[#allocation21_spill] sm:$0xff] }
 0x448   :  { %21790 = vmatpush1.bf16.msra.mxu0 %v24517_v58 }
 0x449   :  { %21792 = vmatprep.subr.bf16.mxu0 %v27690_v20 }
 0x44b   :  { %1199 = vmatmul.mubr.f32.vlgmr.msra.gmra.mrb[0].mxu0 %v1042_v49 }
 0x44c   :  { %21794 = vmatpush1.bf16.msra.mxu0 %v27691_v40  ;;  %1301 = vmatprep.mubr.f32.mxu0 %v27689_v33 }
 0x44d   :  { %21796 = vmatprep.subr.bf16.mxu0 %v27692_v41 }
 0x450   :  { %21798 = vmatpush1.bf16.msra.mxu0 %v27693_v43 }
 0x451   :  { %21800 = vmatprep.subr.bf16.mxu0 %v27694_v48 }
 0x454   :  { %21802 = vmatpush1.bf16.msra.mxu0 %v27695_v62 }
 0x455   :  { %21804 = vmatprep.subr.bf16.mxu0 %v27696_v51 }
 0x458   :  { %21806 = vmatpush1.bf16.msra.mxu0 %v27697_v27  ;;  %v2543_v27 = vld [vmem:[#allocation7] sm:$0xff] }
 0x459   :  { %21808 = vmatprep.subr.bf16.mxu0 %v24409_v37 }
 0x45b   :  { %1304 = vmatmul.mubr.f32.vlgmr.msra.gmra.mrb[0].mxu0 %v1043_v15 }
 0x45c   :  { %21810 = vmatpush1.bf16.msra.mxu0 %v24411_v50  ;;  %1390 = vmatprep.mubr.f32.mxu0 %v27689_v33 }
 0x45d   :  { %21812 = vmatprep.subr.bf16.mxu0 %v24419_v55 }
 0x460   :  { %21814 = vmatpush1.bf16.msra.mxu0 %v24421_v57 }
 0x461   :  { %21816 = vmatprep.subr.bf16.mxu0 %v24437_v30 }
 0x464   :  { %21818 = vmatpush1.bf16.msra.mxu0 %v24443_v26 }
 0x465   :  { %21820 = vmatprep.subr.bf16.mxu0 %v27698_v3 }
 0x468   :  { %21822 = vmatpush1.bf16.msra.mxu0 %v27699_v21 }
 0x469   :  { %21824 = vmatprep.subr.bf16.mxu0 %v27700_v9 }
 0x46b   :  { %1394 = vmatmul.mubr.f32.vlgmr.msra.gmra.mrb[0].mxu0 %v1044_v61 }
 0x46c   :  { %21826 = vmatpush1.bf16.msra.mxu0 %v24543_v10  ;;  %1512 = vmatprep.mubr.f32.mxu0 %v27689_v33 }
 0x46d   :  { %21828 = vmatprep.subr.bf16.mxu0 %v24545_v31  ;;  %v27705_v31 = vld [vmem:[#allocation16_spill] sm:$0xff] }
 0x470   :  { %21830 = vmatpush1.bf16.msra.mxu0 %v24547_v17 }
 0x471   :  { %21832 = vmatprep.subr.bf16.mxu0 %v24549_v63 }
 0x474   :  { %21834 = vmatpush1.bf16.msra.mxu0 %v27701_v13 }
 0x475   :  { %21836 = vmatprep.subr.bf16.mxu0 %v27702_v18 }
 0x478   :  { %21838 = vmatpush1.bf16.msra.mxu0 %v27703_v25  ;;  %v2545_v25 = vld [vmem:[#allocation7 + $0x10] sm:$0xff] }
 0x479   :  { %21840 = vmatprep.subr.bf16.mxu0 %v24409_v37  ;;  %v803_v37 = vld [vmem:[%s27614_s8] sm:$0x3] }
 0x47a   :  { %v812_v60 = vrot.slane %v803_v37, %v27705_v31 }
 0x47b   :  { %1514 = vmatmul.mubr.f32.vlgmr.msra.gmra.mrb[0].mxu0 %v1042_v49 }
 0x47c   :  { %21842 = vmatpush1.bf16.msra.mxu0 %v24411_v50  ;;  %1600 = vmatprep.mubr.f32.mxu0 %v27689_v33  ;;  %v27704_v50 = vld [vmem:[#allocation15_spill] sm:$0xff] }
 0x47d   :  { %21844 = vmatprep.subr.bf16.mxu0 %v24419_v55  ;;  %v808_v55 = vrot.slane %v803_v37, %v27704_v50  ;;  %v2546_v37 = vld [vmem:[#allocation7 + $0x18] sm:$0xff] }
 0x480   :  { %21846 = vmatpush1.bf16.msra.mxu0 %v24421_v57 }
 0x481   :  { %21848 = vmatprep.subr.bf16.mxu0 %v24437_v30 }
 0x484   :  { %21850 = vmatpush1.bf16.msra.mxu0 %v24443_v26 }
 0x485   :  { %21852 = vmatprep.subr.bf16.mxu0 %v27698_v3  ;;  %v2544_v3 = vld [vmem:[#allocation7 + $0x8] sm:$0xff] }
 0x486   :  { %v2565_v9 = vand.u32 4294901760, %v2544_v3 }
 0x488   :  { %21854 = vmatpush1.bf16.msra.mxu0 %v27699_v21  ;;  %v2562_v21 = vand.u32 4294901760, %v2543_v27  ;;  %v24713_v18 = vsub.f32 %v2544_v3, %v2565_v9 }
 0x48a   :  { %v24711_v13 = vsub.f32 %v2543_v27, %v2562_v21 }
 0x48b   :  { %1602 = vmatmul.mubr.f32.vlgmr.msra.gmra.mrb[0].mxu0 %v1042_v49 }
 0x48c   :  { %19783 = vmatprep.mubr.msk.f32.mxu0 %vm23937_vm11, %v27689_v33 }
 0x55e   :  { %v1603_v57 = vpop.f32.mrb[0].mxu0 }
 0x55f   :  { %v23415_v30 = vadd.f32 %v1603_v57, %v808_v55  ;;  %v1605_v44 = vpop.f32.mrb[1].mxu0  ;;  %v2647_v55 = vand.u32 4294901760, %v24711_v13  ;;  %v2654_v57 = vand.u32 4294901760, %v24713_v18 }
 0x560   :  { %v23416_v0 = vadd.f32 %v1605_v44, %v812_v60  ;;  %v2571_v44 = vand.u32 4294901760, %v2546_v37 }
 0x561   :  { %1609 = vrot.lane.b32.xlu1 %v23415_v30, %s23938_s22  ;;  %v1611_v26 = vsel %vm958_vm10, %v23415_v30, 0  ;;  %v2568_v30 = vand.u32 4294901760, %v2545_v25 }
 0x562   :  { %v1681_v16 = vand.u32 4294901760, %v1611_v26  ;;  %v2080_v1 = vsel %vm2078_vm12, %v23416_v0, 0 }
 0x563   :  { %v2083_v59 = vand.u32 4294901760, %v2080_v1 }
 0x564   :  { %v1682_v39 = vsub.f32 %v1611_v26, %v1681_v16  ;;  %v2648_v26 = vsub.f32 %v24711_v13, %v2647_v55 }
 0x565   :  { %v2160_v54 = vsub.f32 %v2080_v1, %v2083_v59  ;;  %v27639_v1 = vmov 0.0|0.0  }
 0x566   :  { %v1683_v46 = vand.u32 4294901760, %v1682_v39  ;;  %21855 = vmatprep.subr.bf16.mxu0 %v27639_v1 }
 0x567   :  { %v2161_v35 = vand.u32 4294901760, %v2160_v54 }
 0x568   :  { %v1684_v34 = vsub.f32 %v1682_v39, %v1683_v46 }
 0x569   :  { %v2162_v19 = vsub.f32 %v2160_v54, %v2161_v35 }
 0x56a   :  { %v1685_v58 = vand.u32 4294901760, %v1684_v34  ;;  %v2649_v34 = vand.u32 4294901760, %v2648_v26 }
 0x56b   :  { %v2163_v15 = vand.u32 4294901760, %v2162_v19  ;;  %v24749_v19 = vpack.c.bf16 %v2565_v9, %v2562_v21  ;;  %v21904_v21 = vpack.c.bf16 %v2654_v57, %v2647_v55 }
 0x56d   :  { %21857 = vmatpush3.bf16.msra.mxu0 %v24749_v19 }
 0x56e   :  { %21858 = vmatprep.subr.bf16.mxu0 %v27639_v1 }
 0x5d3   :  { %v1610_v47 = vpop.permute.xlu1 %1609 }
 0x5d4   :  { %v1613_v36 = vsel %vm958_vm10, %v1610_v47, 0  ;;  %v2547_v47 = vld [vmem:[#allocation7 + $0x20] sm:$0xff] }
 0x5d5   :  { %v1616_v28 = vand.u32 4294901760, %v1613_v36 }
 0x5d7   :  { %v1693_v29 = vsub.f32 %v1613_v36, %v1616_v28  ;;  %19708 = vmatpush3.xpose.msra.mxu1 %v1616_v28  ;;  %v2548_v36 = vld [vmem:[#allocation7 + $0x28] sm:$0xff] }
 0x5d8   :  { %19712 = vmatprep.subr.mxu1 %v27689_v33 }
 0x5d9   :  { %v1694_v17 = vand.u32 4294901760, %v1693_v29 }
 0x5da   :  { %19710 = vmatmul.mubr.f32.vlgmr.msra.gmra.mrb[0].mxu1 %v1685_v58 }
 0x5db   :  { %v1695_v63 = vsub.f32 %v1693_v29, %v1694_v17  ;;  %19714 = vmatprep.mubr.msk.f32.mxu1 %vm23937_vm11, %v27689_v33 }
 0x5dd   :  { %v1696_v10 = vand.u32 4294901760, %v1695_v63  ;;  %v2577_v63 = vand.u32 4294901760, %v2548_v36 }
 0x5df   :  { %19713 = vmatpush3.xpose.msra.mxu1 %v1696_v10 }
 0x5e0   :  { %19717 = vmatprep.subr.mxu1 %v27689_v33 }
 0x5e2   :  { %19715 = vmatmul.mubr.f32.vlgmr.msra.gmra.mrb[0].mxu1 %v1681_v16 }
 0x5e3   :  { %19718 = vmatpush3.xpose.msra.mxu1 %v1693_v29  ;;  %19719 = vmatprep.mubr.msk.f32.mxu1 %vm23937_vm11, %v27689_v33 }
 0x5e4   :  { %19722 = vmatprep.subr.mxu1 %v27689_v33 }
 0x5ea   :  { %19720 = vmatmul.mubr.f32.vlgmr.msra.gmra.mrb[0].mxu1 %v1682_v39  ;;  %v24723_v39 = vsub.f32 %v2545_v25, %v2568_v30 }
 0x5eb   :  { %19723 = vmatpush3.xpose.msra.mxu1 %v1616_v28  ;;  %19724 = vmatprep.mubr.msk.f32.mxu1 %vm23937_vm11, %v27689_v33 }
 0x5ec   :  { %19727 = vmatprep.subr.mxu1 %v27689_v33  ;;  %v2661_v29 = vand.u32 4294901760, %v24723_v39 }
 0x5ee   :  { %v2662_v60 = vsub.f32 %v24723_v39, %v2661_v29 }
 0x5f2   :  { %19725 = vmatmul.mubr.f32.vlgmr.msra.gmra.mrb[0].mxu1 %v1683_v46  ;;  %v24725_v46 = vsub.f32 %v2546_v37, %v2571_v44 }
 0x5f3   :  { %19728 = vmatpush3.xpose.msra.mxu1 %v1694_v17  ;;  %19729 = vmatprep.mubr.msk.f32.mxu1 %vm23937_vm11, %v27689_v33  ;;  %v2574_v17 = vand.u32 4294901760, %v2547_v47 }
 0x5f4   :  { %19732 = vmatprep.subr.mxu1 %v27689_v33  ;;  %v2668_v58 = vand.u32 4294901760, %v24725_v46 }
 0x5f6   :  { %v2669_v0 = vsub.f32 %v24725_v46, %v2668_v58  ;;  %v21907_v9 = vpack.c.bf16 %v2668_v58, %v2661_v29  ;;  %v3099_v29 = vld [vmem:[#allocation9] sm:$0xff]  ;;  %v3100_v58 = vld [vmem:[#allocation9 + $0x8] sm:$0xff] }
 0x5fa   :  { %19730 = vmatmul.mubr.f32.vlgmr.msra.gmra.mrb[0].mxu1 %v1681_v16 }
 0x5fb   :  { %19733 = vmatpush3.xpose.msra.mxu1 %v1616_v28  ;;  %19734 = vmatprep.mubr.msk.f32.mxu1 %vm23937_vm11, %v27689_v33 }
 0x5fc   :  { %19737 = vmatprep.subr.mxu1 %v27689_v33 }
 0x602   :  { %19735 = vmatmul.mubr.f32.vlgmr.msra.gmra.mrb[0].mxu1 %v1681_v16  ;;  %v2655_v16 = vsub.f32 %v24713_v18, %v2654_v57 }
 0x603   :  { %19738 = vmatpush3.msra.mxu1 %v2083_v59  ;;  %19739 = vmatprep.mubr.msk.f32.mxu1 %vm23937_vm11, %v27689_v33 }
 0x604   :  { %19742 = vmatprep.subr.mxu1 %v27689_v33  ;;  %v2656_v28 = vand.u32 4294901760, %v2655_v16 }
 0x606   :  { %v21868_v10 = vpack.c.bf16 %v2656_v28, %v2649_v34 }
 0x6d5   :  { %v2057_v2 = vpop.f32.mrb[0].mxu1 }
 0x6d6   :  { %v2061_v23 = vmul.f32 0.015625, %v2057_v2  ;;  %v19736_v4 = vpop.f32.mrb[1].mxu1  ;;  %v24735_v2 = vsub.f32 %v2548_v36, %v2577_v63 }
 0x6d7   :  { %v2550_v4 = vld [vmem:[#allocation7 + $0x38] sm:$0xff] }
 0x6d8   :  { %v2063_v45 = vsel %vm2062_vm13, %v2061_v23, -inf }
 0x6d9   :  { %2064 = vmax.xlane.f32.xlu0 %v2063_v45  ;;  %v2663_v45 = vand.u32 4294901760, %v2662_v60  ;;  %v3101_v60 = vld [vmem:[#allocation9 + $0x10] sm:$0xff] }
 0x766   :  { %v2065_v5 = vpop.xlane.xlu0 %2064 }
 0x767   :  { %v2066_v24 = vsub.f32 %v2061_v23, %v2065_v5  ;;  %v2549_v23 = vld [vmem:[#allocation7 + $0x30] sm:$0xff]  ;;  %v2670_v5 = vand.u32 4294901760, %v2669_v0  ;;  %v3102_v0 = vld [vmem:[#allocation9 + $0x18] sm:$0xff] }
 0x769   :  { %v2067_v56 = vmul.f32 1.442695, %v2066_v24  ;;  %v2580_v24 = vand.u32 4294901760, %v2549_v23 }
 0x76b   :  { %23782 = vpow2.f32 %v2067_v56  ;;  %v2583_v56 = vand.u32 4294901760, %v2550_v4 }
 0x775   :  { %v23783_v11 = vpop.eup %23782 }
 0x776   :  { %v2069_v52 = vsel %vm2062_vm13, %v23783_v11, 0.0 }
 0x777   :  { %2070 = vadd.xlane.f32.xlu1 %v2069_v52  ;;  %v2682_v52 = vand.u32 4294901760, %v24735_v2 }
 0x804   :  { %v2071_v53 = vpop.xlane.xlu1 %2070 }
 0x805   :  { %23784 = vrcp.f32 %v2071_v53  ;;  %v21871_v53 = vpack.c.bf16 %v2670_v5, %v2663_v45  ;;  %v3104_v45 = vld [vmem:[#allocation9 + $0x28] sm:$0xff] }
 0x80f   :  { %v23785_v6 = vpop.eup %23784 }
 0x810   :  { %v2073_v32 = vmul.f32 %v23785_v6, %v23783_v11  ;;  %v24740_v6 = vsub.f32 %v2549_v23, %v2580_v24 }
 0x812   :  { %v2076_v7 = vsel %vm2074_vm14, %v2073_v32, 0 }
 0x813   :  { %v2148_v22 = vand.u32 4294901760, %v2076_v7 }
 0x815   :  { %v2149_v38 = vsub.f32 %v2076_v7, %v2148_v22  ;;  %v2683_v7 = vsub.f32 %v24735_v2, %v2682_v52 }
 0x817   :  { %v2150_v12 = vand.u32 4294901760, %v2149_v38 }
 0x819   :  { %v2151_v42 = vsub.f32 %v2149_v38, %v2150_v12 }
 0x81b   :  { %v2152_v49 = vand.u32 4294901760, %v2151_v42 }
 0x81d   :  { %19740 = vmatmul.mubr.f32.vlgmr.msra.gmra.mrb[2].mxu1 %v2152_v49 }
 0x81e   :  { %19743 = vmatpush3.msra.mxu1 %v2163_v15  ;;  %19744 = vmatprep.mubr.msk.f32.mxu1 %vm23937_vm11, %v27689_v33 }
 0x81f   :  { %19747 = vmatprep.subr.mxu1 %v27689_v33 }
 0x825   :  { %19745 = vmatmul.mubr.f32.vlgmr.msra.gmra.mrb[2].mxu1 %v2148_v22 }
 0x826   :  { %19748 = vmatpush3.msra.mxu1 %v2160_v54  ;;  %19749 = vmatprep.mubr.msk.f32.mxu1 %vm23937_vm11, %v27689_v33  ;;  %v24742_v54 = vsub.f32 %v2550_v4, %v2583_v56  ;;  %v3103_v4 = vld [vmem:[#allocation9 + $0x20] sm:$0xff] }
 0x827   :  { %19752 = vmatprep.subr.mxu1 %v27689_v33  ;;  %v3130_v5 = vand.u32 4294901760, %v3103_v4 }
 0x828   :  { %v21889_v3 = vpack.c.bf16 %v24742_v54, %v24740_v6 }
 0x82d   :  { %19750 = vmatmul.mubr.f32.vlgmr.msra.gmra.mrb[2].mxu1 %v2149_v38 }
 0x82e   :  { %19753 = vmatpush3.msra.mxu1 %v2083_v59  ;;  %19754 = vmatprep.mubr.msk.f32.mxu1 %vm23937_vm11, %v27689_v33 }
 0x82f   :  { %19757 = vmatprep.subr.mxu1 %v27689_v33 }
 0x835   :  { %19755 = vmatmul.mubr.f32.vlgmr.msra.gmra.mrb[2].mxu1 %v2150_v12  ;;  %v2684_v12 = vand.u32 4294901760, %v2683_v7 }
 0x836   :  { %19758 = vmatpush3.msra.mxu1 %v2161_v35  ;;  %19759 = vmatprep.mubr.msk.f32.mxu1 %vm23937_vm11, %v27689_v33  ;;  %v2696_v35 = vand.u32 4294901760, %v24742_v54 }
 0x837   :  { %19762 = vmatprep.subr.mxu1 %v27689_v33 }
 0x838   :  { %v2697_v49 = vsub.f32 %v24742_v54, %v2696_v35 }
 0x83d   :  { %19760 = vmatmul.mubr.f32.vlgmr.msra.gmra.mrb[2].mxu1 %v2148_v22 }
 0x83e   :  { %19763 = vmatpush3.msra.mxu1 %v2083_v59  ;;  %19764 = vmatprep.mubr.msk.f32.mxu1 %vm23937_vm11, %v27689_v33  ;;  %v24733_v59 = vsub.f32 %v2547_v47, %v2574_v17 }
 0x83f   :  { %21867 = vmatprep.subr.bf16.mxu1 %v27639_v1 }
 0x840   :  { %v2675_v11 = vand.u32 4294901760, %v24733_v59  ;;  %v21886_v27 = vpack.c.bf16 %v24735_v2, %v24733_v59  ;;  %v3127_v2 = vand.u32 4294901760, %v3102_v0 }
 0x842   :  { %v2676_v32 = vsub.f32 %v24733_v59, %v2675_v11  ;;  %v21910_v25 = vpack.c.bf16 %v2682_v52, %v2675_v11  ;;  %v3124_v59 = vand.u32 4294901760, %v3101_v60 }
 0x844   :  { %v2677_v38 = vand.u32 4294901760, %v2676_v32  ;;  %v24827_v23 = vpack.c.bf16 %v3127_v2, %v3124_v59 }
 0x845   :  { %19765 = vmatmul.mubr.f32.vlgmr.msra.gmra.mrb[2].mxu1 %v2148_v22  ;;  %v2689_v22 = vand.u32 4294901760, %v24740_v6 }
 0x846   :  { %19802 = vmatprep.mubr.msk.f32.mxu1 %vm23937_vm11, %v27689_v33  ;;  %21869 = vmatpush3.bf16.msra.mxu1 %v21868_v10  ;;  %v21874_v15 = vpack.c.bf16 %v2684_v12, %v2677_v38  ;;  %v24843_v38 = vsub.f32 %v3102_v0, %v3127_v2  ;;  %v24845_v12 = vsub.f32 %v3103_v4, %v3130_v5  ;;  %v18710_v2 = vld [vmem:[%s27616_s10] ss:$0 sm:$0xff] }
 0x847   :  { %21870 = vmatprep.subr.bf16.mxu1 %v27639_v1  ;;  %v2690_v42 = vsub.f32 %v24740_v6, %v2689_v22  ;;  %v21913_v37 = vpack.c.bf16 %v2696_v35, %v2689_v22  ;;  %v3106_v6 = vld [vmem:[#allocation9 + $0x38] sm:$0xff]  ;;  %v24841_v35 = vsub.f32 %v3101_v60, %v3124_v59 }
 0x848   :  { %v3139_v32 = vand.u32 4294901760, %v3106_v6 }
 0x84a   :  { %21872 = vmatpush3.bf16.msra.mxu1 %v21871_v53  ;;  %v3105_v53 = vld [vmem:[#allocation9 + $0x30] sm:$0xff] }
 0x84b   :  { %21873 = vmatprep.subr.bf16.mxu1 %v27639_v1  ;;  %v3136_v54 = vand.u32 4294901760, %v3105_v53 }
 0x84e   :  { %21875 = vmatpush3.bf16.msra.mxu1 %v21874_v15  ;;  %v24853_v15 = vsub.f32 %v3106_v6, %v3139_v32 }
 0x84f   :  { %21876 = vmatprep.subr.bf16.mxu1 %v27639_v1 }
 0x918   :  { %v2524_v61 = vpop.f32.mrb[2].mxu1 }
 0x919   :  { %v24701_v14 = vadd.f32 %v2524_v61, %v27706_v8  ;;  %v19766_v20 = vpop.f32.mrb[3].mxu1  ;;  %v2691_v61 = vand.u32 4294901760, %v2690_v42  ;;  %v2698_v8 = vand.u32 4294901760, %v2697_v49  ;;  %v24849_v42 = vpack.c.bf16 %v3139_v32, %v3136_v54 }
 0x91a   :  { %v24754_v20 = vpack.c.bf16 %v2571_v44, %v2568_v30  ;;  %v24851_v49 = vsub.f32 %v3105_v53, %v3136_v54 }
 0x91b   :  { %v2528_v40 = vsel %vm439_vm9, %v24701_v14, 0.0 }
 0x91c   :  { %2529 = vadd.xlane.f32.xlu0 %v2528_v40  ;;  %v21877_v40 = vpack.c.bf16 %v2698_v8, %v2691_v61  ;;  %21860 = vmatpush3.bf16.msra.mxu0 %v24754_v20 }
 0x91d   :  { %21861 = vmatprep.subr.bf16.mxu0 %v27639_v1 }
 0x91e   :  { %21878 = vmatpush3.bf16.msra.mxu1 %v21877_v40  ;;  %v3217_v40 = vand.u32 4294901760, %v24841_v35 }
 0x91f   :  { %21879 = vmatprep.subr.bf16.mxu1 %v27639_v1 }
 0x9a9   :  { %v2530_v41 = vpop.xlane.xlu0 %2529 }
 0x9aa   :  { %v2531_v43 = vmul.f32 0.015625, %v2530_v41  ;;  %v21880_v41 = vpack.c.bf16 %v24713_v18, %v24711_v13  ;;  %v23833_v13 = vld [vmem:[%s27612_s6] ss:$0 sm:$0xff] }
 0x9ac   :  { %v24706_v48 = vsub.f32 %v24701_v14, %v2531_v43  ;;  %v24763_v43 = vpack.c.bf16 %v2577_v63, %v2574_v17  ;;  %v3118_v17 = vand.u32 4294901760, %v3099_v29  ;;  %v3121_v63 = vand.u32 4294901760, %v3100_v58 }
 0x9ae   :  { %v2533_v62 = vmul.f32 %v24706_v48, %v24706_v48  ;;  %21863 = vmatpush3.bf16.msra.mxu0 %v24763_v43  ;;  %v24823_v10 = vpack.c.bf16 %v3121_v63, %v3118_v17  ;;  %v24833_v11 = vsub.f32 %v3100_v58, %v3121_v63 }
 0x9af   :  { %21864 = vmatprep.subr.bf16.mxu0 %v27639_v1 }
 0x9b0   :  { %v2534_v51 = vsel %vm439_vm9, %v2533_v62, 0.0  ;;  %v21883_v62 = vpack.c.bf16 %v24725_v46, %v24723_v39  ;;  %v23832_v46 = vld [vmem:[%s27611_s5] ss:$0 sm:$0xff]  ;;  %v3210_v22 = vand.u32 4294901760, %v24833_v11 }
 0x9b1   :  { %2535 = vadd.xlane.f32.xlu0 %v2534_v51  ;;  %v24769_v51 = vpack.c.bf16 %v2583_v56, %v2580_v24  ;;  %v3133_v24 = vand.u32 4294901760, %v3104_v45  ;;  %v24831_v56 = vsub.f32 %v3099_v29, %v3118_v17  ;;  %v21961_v29 = vpack.c.bf16 %v24853_v15, %v24851_v49 }
 0x9b2   :  { %v3211_v8 = vsub.f32 %v24833_v11, %v3210_v22 }
 0x9b3   :  { %21866 = vmatpush3.bf16.msra.mxu0 %v24769_v51  ;;  %v24835_v52 = vpack.c.bf16 %v3133_v24, %v3130_v5  ;;  %v3203_v7 = vand.u32 4294901760, %v24831_v56 }
 0x9b4   :  { %21927 = vmatprep.subr.bf16.mxu0 %v27639_v1 }
 0x9b5   :  { %v3204_v61 = vsub.f32 %v24831_v56, %v3203_v7  ;;  %v21976_v58 = vpack.c.bf16 %v3210_v22, %v3203_v7 }
 0xa3e   :  { %v2536_v30 = vpop.xlane.xlu0 %2535 }
 0xa3f   :  { %v2537_v44 = vmul.f32 0.015625, %v2536_v30 }
 0xa41   :  { %v2538_v26 = vadd.f32 1e-06, %v2537_v44 }
 0xa43   :  { %23786 = vrsqrt.f32 %v2538_v26 }
 0xa4d   :  { %v23787_v16 = vpop.eup %23786 }
 0xa4e   :  { %v2540_v39 = vmul.f32 %v23787_v16, %v24706_v48 }
 0xa50   :  { %v2541_v47 = vmul.f32 %v23832_v46, %v2540_v39  ;;  %v3245_v39 = vand.u32 4294901760, %v24851_v49  ;;  %v3252_v46 = vand.u32 4294901760, %v24853_v15 }
 0xa52   :  { %v2542_v18 = vadd.f32 %v23833_v13, %v2541_v47  ;;  %v3246_v13 = vsub.f32 %v24851_v49, %v3245_v39  ;;  %v21985_v59 = vpack.c.bf16 %v3252_v46, %v3245_v39 }
 0xa54   :  { %v2559_v55 = vsel %vm958_vm10, %v2542_v18, 0  ;;  %v3253_v18 = vsub.f32 %v24853_v15, %v3252_v46 }
 0xa55   :  { %v2634_v57 = vand.u32 4294901760, %v2559_v55 }
 0xa57   :  { %v2635_v36 = vsub.f32 %v2559_v55, %v2634_v57  ;;  %19803 = vmatmul.mubr.f32.vlgmr.msra.gmra.mrb[4].mxu1 %v2634_v57  ;;  %v3247_v55 = vand.u32 4294901760, %v3246_v13 }
 0xa58   :  { %21881 = vmatpush3.bf16.msra.mxu1 %v21880_v41  ;;  %19821 = vmatprep.mubr.msk.f32.mxu1 %vm23937_vm11, %v27689_v33  ;;  %v3224_v41 = vand.u32 4294901760, %v24843_v38 }
 0xa59   :  { %21882 = vmatprep.subr.bf16.mxu1 %v27639_v1  ;;  %v2636_v48 = vand.u32 4294901760, %v2635_v36 }
 0xa5a   :  { %v21979_v17 = vpack.c.bf16 %v3224_v41, %v3217_v40 }
 0xa5b   :  { %v2637_v34 = vsub.f32 %v2635_v36, %v2636_v48 }
 0xa5c   :  { %21884 = vmatpush3.bf16.msra.mxu1 %v21883_v62  ;;  %v3218_v62 = vsub.f32 %v24841_v35, %v3217_v40 }
 0xa5d   :  { %21885 = vmatprep.subr.bf16.mxu1 %v27639_v1  ;;  %v2638_v28 = vand.u32 4294901760, %v2637_v34  ;;  %v21955_v34 = vpack.c.bf16 %v24843_v38, %v24841_v35 }
 0xa5f   :  { %19784 = vmatmul.mubr.f32.vlgmr.msra.gmra.mrb[2].mxu0 %v2638_v28 }
 0xa60   :  { %21887 = vmatpush3.bf16.msra.mxu1 %v21886_v27  ;;  %19897 = vmatprep.mubr.msk.f32.mxu0 %vm23937_vm11, %v27689_v33 }
 0xa61   :  { %21888 = vmatprep.subr.bf16.mxu1 %v27639_v1  ;;  %21929 = vmatpush3.bf16.msra.mxu0 %v24823_v10 }
 0xa62   :  { %21930 = vmatprep.subr.bf16.mxu0 %v27639_v1 }
 0xa64   :  { %21890 = vmatpush3.bf16.msra.mxu1 %v21889_v3  ;;  %v3219_v3 = vand.u32 4294901760, %v3218_v62 }
 0xa65   :  { %21891 = vmatprep.subr.bf16.mxu1 %v27639_v1  ;;  %21932 = vmatpush3.bf16.msra.mxu0 %v24827_v23 }
 0xa66   :  { %21933 = vmatprep.subr.bf16.mxu0 %v27639_v1 }
 0xa67   :  { %19822 = vmatmul.mubr.f32.vlgmr.msra.gmra.mrb[4].mxu1 %v2635_v36 }
 0xa68   :  { %21893 = vmatpush3.bf16.msra.mxu1 %v24749_v19  ;;  %19840 = vmatprep.mubr.msk.f32.mxu1 %vm23937_vm11, %v27689_v33 }
 0xa69   :  { %21894 = vmatprep.subr.bf16.mxu1 %v27639_v1  ;;  %21935 = vmatpush3.bf16.msra.mxu0 %v24835_v52 }
 0xa6a   :  { %21936 = vmatprep.subr.bf16.mxu0 %v27639_v1 }
 0xa6c   :  { %21896 = vmatpush3.bf16.msra.mxu1 %v24754_v20 }
 0xa6d   :  { %21897 = vmatprep.subr.bf16.mxu1 %v27639_v1  ;;  %21938 = vmatpush3.bf16.msra.mxu0 %v24849_v42 }
 0xa6e   :  { %21939 = vmatprep.subr.bf16.mxu0 %v27639_v1 }
 0xa70   :  { %21899 = vmatpush3.bf16.msra.mxu1 %v24763_v43 }
 0xa71   :  { %21900 = vmatprep.subr.bf16.mxu1 %v27639_v1 }
 0xa74   :  { %21902 = vmatpush3.bf16.msra.mxu1 %v24769_v51 }
 0xa75   :  { %21903 = vmatprep.subr.bf16.mxu1 %v27639_v1 }
 0xa77   :  { %19841 = vmatmul.mubr.f32.vlgmr.msra.gmra.mrb[4].mxu1 %v2636_v48  ;;  %v21952_v48 = vpack.c.bf16 %v24833_v11, %v24831_v56 }
 0xa78   :  { %21905 = vmatpush3.bf16.msra.mxu1 %v21904_v21  ;;  %19859 = vmatprep.mubr.msk.f32.mxu1 %vm23937_vm11, %v27689_v33 }
 0xa79   :  { %21906 = vmatprep.subr.bf16.mxu1 %v27639_v1 }
 0xa7c   :  { %21908 = vmatpush3.bf16.msra.mxu1 %v21907_v9  ;;  %v3231_v9 = vand.u32 4294901760, %v24845_v12 }
 0xa7d   :  { %21909 = vmatprep.subr.bf16.mxu1 %v27639_v1 }
 0xa7e   :  { %v3232_v30 = vsub.f32 %v24845_v12, %v3231_v9 }
 0xa80   :  { %21911 = vmatpush3.bf16.msra.mxu1 %v21910_v25  ;;  %v3233_v26 = vand.u32 4294901760, %v3232_v30  ;;  %v3692_v30 = vld [vmem:[#allocation4 + $0xa0] sm:$0xff] }
 0xa81   :  { %21912 = vmatprep.subr.bf16.mxu1 %v27639_v1 }
 0xa84   :  { %21914 = vmatpush3.bf16.msra.mxu1 %v21913_v37 }
 0xa85   :  { %21915 = vmatprep.subr.bf16.mxu1 %v27639_v1 }
 0xa87   :  { %19860 = vmatmul.mubr.f32.vlgmr.msra.gmra.mrb[4].mxu1 %v2634_v57 }
 0xa88   :  { %21917 = vmatpush3.bf16.msra.mxu1 %v24749_v19  ;;  %19878 = vmatprep.mubr.msk.f32.mxu1 %vm23937_vm11, %v27689_v33  ;;  %v24847_v19 = vsub.f32 %v3104_v45, %v3133_v24 }
 0xa89   :  { %21918 = vmatprep.subr.bf16.mxu1 %v27639_v1 }
 0xa8a   :  { %v3238_v25 = vand.u32 4294901760, %v24847_v19  ;;  %v21958_v28 = vpack.c.bf16 %v24847_v19, %v24845_v12 }
 0xa8c   :  { %21920 = vmatpush3.bf16.msra.mxu1 %v24754_v20  ;;  %v3205_v20 = vand.u32 4294901760, %v3204_v61  ;;  %v3239_v44 = vsub.f32 %v24847_v19, %v3238_v25  ;;  %v21982_v63 = vpack.c.bf16 %v3238_v25, %v3231_v9  ;;  %v3695_v9 = vld [vmem:[#allocation4 + $0xb8] sm:$0xff] }
 0xa8d   :  { %21921 = vmatprep.subr.bf16.mxu1 %v27639_v1 }
 0xa8e   :  { %v3240_v16 = vand.u32 4294901760, %v3239_v44  ;;  %v3694_v44 = vld [vmem:[#allocation4 + $0xb0] sm:$0xff] }
 0xa90   :  { %21923 = vmatpush3.bf16.msra.mxu1 %v24763_v43  ;;  %v3212_v43 = vand.u32 4294901760, %v3211_v8  ;;  %v21946_v47 = vpack.c.bf16 %v3240_v16, %v3233_v26  ;;  %v3689_v8 = vld [vmem:[#allocation4 + $0x88] sm:$0xff]  ;;  %v3730_v26 = vand.u32 4294901760, %v3692_v30  ;;  %v3734_v16 = vand.u32 4294901760, %v3694_v44 }
 0xa91   :  { %21924 = vmatprep.subr.bf16.mxu1 %v27639_v1  ;;  %v3720_v40 = vand.u32 4294901760, %v3689_v8 }
 0xa92   :  { %v21940_v27 = vpack.c.bf16 %v3212_v43, %v3205_v20  ;;  %v3691_v20 = vld [vmem:[#allocation4 + $0x98] sm:$0xff]  ;;  %v3690_v43 = vld [vmem:[#allocation4 + $0x90] sm:$0xff] }
 0xa93   :  { %v24943_v39 = vsub.f32 %v3689_v8, %v3720_v40 }
 0xa94   :  { %21926 = vmatpush3.bf16.msra.mxu1 %v24769_v51  ;;  %v3225_v51 = vsub.f32 %v24843_v38, %v3224_v41  ;;  %v3688_v41 = vld [vmem:[#allocation4 + $0x80] sm:$0xff] }
 0xa95   :  { %v3722_v62 = vand.u32 4294901760, %v3688_v41 }
 0xa96   :  { %v3226_v21 = vand.u32 4294901760, %v3225_v51  ;;  %v3726_v51 = vand.u32 4294901760, %v3690_v43 }
 0xa97   :  { %19879 = vmatmul.mubr.f32.vlgmr.msra.gmra.mrb[4].mxu1 %v2634_v57  ;;  %v3254_v57 = vand.u32 4294901760, %v3253_v18  ;;  %v3697_v18 = vld [vmem:[#allocation4 + $0xc8] sm:$0xff] }
 0xa98   :  { %3800 = vmatprep.mubr.f32.mxu1 %v27689_v33  ;;  %v21943_v37 = vpack.c.bf16 %v3226_v21, %v3219_v3  ;;  %v24939_v3 = vpack.c.bf16 %v3726_v51, %v3722_v62  ;;  %v3693_v21 = vld [vmem:[#allocation4 + $0xa8] sm:$0xff]  ;;  %v24949_v13 = vsub.f32 %v3690_v43, %v3726_v51 }
 0xa99   :  { %v21949_v36 = vpack.c.bf16 %v3254_v57, %v3247_v55  ;;  %v3728_v25 = vand.u32 4294901760, %v3693_v21  ;;  %v3699_v55 = vld [vmem:[#allocation4 + $0xd8] sm:$0xff]  ;;  %v3696_v57 = vld [vmem:[#allocation4 + $0xc0] sm:$0xff] }
 0xb32   :  { %v2640_v60 = vpop.f32.mrb[2].mxu0 }
 0xb33   :  { %v19785_v0 = vpop.f32.mrb[3].mxu0  ;;  %v2641_v4 = vadd.f32 %v18710_v2, %v2640_v60  ;;  %v24961_v60 = vsub.f32 %v3694_v44, %v3734_v16  ;;  %v3700_v2 = vld [vmem:[#allocation4 + $0xe0] sm:$0xff] }
 0xb34   :  { %v3736_v0 = vand.u32 4294901760, %v3697_v18 }
 0xb35   :  { %v3856_v44 = vand.u32 4294901760, %v24961_v60 }
 0xb6a   :  { %v3094_v45 = vpop.f32.mrb[4].mxu1 }
 0xb6b   :  { %v23419_v5 = vadd.f32 %v3094_v45, %v2641_v4  ;;  %v19880_v24 = vpop.f32.mrb[5].mxu1  ;;  %v3738_v4 = vand.u32 4294901760, %v3696_v57 }
 0xb6d   :  { %v3098_v56 = vmax.f32 %v23419_v5, 0.0 }
 0xb6f   :  { %v3115_v11 = vsel %vm958_vm10, %v3098_v56, 0  ;;  %v3702_v56 = vld [vmem:[#allocation4 + $0xf0] sm:$0xff] }
 0xb70   :  { %v3190_v53 = vand.u32 4294901760, %v3115_v11 }
 0xb72   :  { %v3191_v6 = vsub.f32 %v3115_v11, %v3190_v53 }
 0xb74   :  { %v3192_v54 = vand.u32 4294901760, %v3191_v6 }
 0xb76   :  { %v3193_v32 = vsub.f32 %v3191_v6, %v3192_v54 }
 0xb78   :  { %v3194_v7 = vand.u32 4294901760, %v3193_v32 }
 0xb7a   :  { %19898 = vmatmul.mubr.f32.vlgmr.msra.gmra.mrb[4].mxu0 %v3194_v7  ;;  %v24973_v7 = vsub.f32 %v3696_v57, %v3738_v4 }
 0xb7b   :  { %21941 = vmatpush3.bf16.msra.mxu0 %v21940_v27  ;;  %19916 = vmatprep.mubr.msk.f32.mxu0 %vm23937_vm11, %v27689_v33 }
 0xb7c   :  { %21942 = vmatprep.subr.bf16.mxu0 %v27639_v1 }
 0xb7f   :  { %21944 = vmatpush3.bf16.msra.mxu0 %v21943_v37  ;;  %v3732_v37 = vand.u32 4294901760, %v3695_v9 }
 0xb80   :  { %21945 = vmatprep.subr.bf16.mxu0 %v27639_v1 }
 0xb83   :  { %21947 = vmatpush3.bf16.msra.mxu0 %v21946_v47  ;;  %v24947_v47 = vsub.f32 %v3688_v41, %v3722_v62 }
 0xb84   :  { %21948 = vmatprep.subr.bf16.mxu0 %v27639_v1 }
 0xb87   :  { %21950 = vmatpush3.bf16.msra.mxu0 %v21949_v36  ;;  %v24951_v36 = vpack.c.bf16 %v3732_v37, %v3728_v25 }
 0xb88   :  { %21951 = vmatprep.subr.bf16.mxu0 %v27639_v1 }
 0xb8a   :  { %19917 = vmatmul.mubr.f32.vlgmr.msra.gmra.mrb[4].mxu0 %v3190_v53 }
 0xb8b   :  { %21953 = vmatpush3.bf16.msra.mxu0 %v21952_v48  ;;  %19935 = vmatprep.mubr.msk.f32.mxu0 %vm23937_vm11, %v27689_v33  ;;  %v24953_v48 = vsub.f32 %v3693_v21, %v3728_v25 }
 0xb8c   :  { %21954 = vmatprep.subr.bf16.mxu0 %v27639_v1 }
 0xb8d   :  { %v3838_v25 = vand.u32 4294901760, %v24953_v48 }
 0xb8f   :  { %21956 = vmatpush3.bf16.msra.mxu0 %v21955_v34  ;;  %v24955_v34 = vsub.f32 %v3695_v9, %v3732_v37 }
 0xb90   :  { %21957 = vmatprep.subr.bf16.mxu0 %v27639_v1 }
 0xb91   :  { %v3850_v37 = vand.u32 4294901760, %v24955_v34 }
 0xb93   :  { %21959 = vmatpush3.bf16.msra.mxu0 %v21958_v28  ;;  %v24957_v28 = vpack.c.bf16 %v3734_v16, %v3730_v26 }
 0xb94   :  { %21960 = vmatprep.subr.bf16.mxu0 %v27639_v1 }
 0xb97   :  { %21962 = vmatpush3.bf16.msra.mxu0 %v21961_v29  ;;  %v3698_v29 = vld [vmem:[#allocation4 + $0xd0] sm:$0xff] }
 0xb98   :  { %21963 = vmatprep.subr.bf16.mxu0 %v27639_v1  ;;  %v3742_v45 = vand.u32 4294901760, %v3698_v29 }
 0xb9a   :  { %19936 = vmatmul.mubr.f32.vlgmr.msra.gmra.mrb[4].mxu0 %v3191_v6  ;;  %v24971_v32 = vpack.c.bf16 %v3742_v45, %v3738_v4 }
 0xb9b   :  { %21965 = vmatpush3.bf16.msra.mxu0 %v24823_v10  ;;  %19954 = vmatprep.mubr.msk.f32.mxu0 %vm23937_vm11, %v27689_v33 }
 0xb9c   :  { %21966 = vmatprep.subr.bf16.mxu0 %v27639_v1 }
 0xb9f   :  { %21968 = vmatpush3.bf16.msra.mxu0 %v24827_v23 }
 0xba0   :  { %21969 = vmatprep.subr.bf16.mxu0 %v27639_v1 }
 0xba3   :  { %21971 = vmatpush3.bf16.msra.mxu0 %v24835_v52 }
 0xba4   :  { %21972 = vmatprep.subr.bf16.mxu0 %v27639_v1 }
 0xba7   :  { %21974 = vmatpush3.bf16.msra.mxu0 %v24849_v42 }
 0xba8   :  { %21975 = vmatprep.subr.bf16.mxu0 %v27639_v1 }
 0xbaa   :  { %19955 = vmatmul.mubr.f32.vlgmr.msra.gmra.mrb[4].mxu0 %v3192_v54  ;;  %v3746_v54 = vand.u32 4294901760, %v3700_v2 }
 0xbab   :  { %21977 = vmatpush3.bf16.msra.mxu0 %v21976_v58  ;;  %19973 = vmatprep.mubr.msk.f32.mxu0 %vm23937_vm11, %v27689_v33  ;;  %v3701_v58 = vld [vmem:[#allocation4 + $0xe8] sm:$0xff] }
 0xbac   :  { %21978 = vmatprep.subr.bf16.mxu0 %v27639_v1  ;;  %v3744_v5 = vand.u32 4294901760, %v3701_v58 }
 0xbaf   :  { %21980 = vmatpush3.bf16.msra.mxu0 %v21979_v17  ;;  %v3703_v17 = vld [vmem:[#allocation4 + $0xf8] sm:$0xff] }
 0xbb0   :  { %21981 = vmatprep.subr.bf16.mxu0 %v27639_v1  ;;  %v3748_v24 = vand.u32 4294901760, %v3703_v17 }
 0xbb3   :  { %21983 = vmatpush3.bf16.msra.mxu0 %v21982_v63  ;;  %v24959_v63 = vsub.f32 %v3692_v30, %v3730_v26 }
 0xbb4   :  { %21984 = vmatprep.subr.bf16.mxu0 %v27639_v1 }
 0xbb5   :  { %v3844_v30 = vand.u32 4294901760, %v24959_v63 }
 0xbb7   :  { %21986 = vmatpush3.bf16.msra.mxu0 %v21985_v59  ;;  %v3740_v59 = vand.u32 4294901760, %v3699_v55  ;;  %v3845_v57 = vsub.f32 %v24959_v63, %v3844_v30 }
 0xbb8   :  { %21987 = vmatprep.subr.bf16.mxu0 %v27639_v1 }
 0xbb9   :  { %v24965_v11 = vpack.c.bf16 %v3740_v59, %v3736_v0  ;;  %v24969_v6 = vsub.f32 %v3699_v55, %v3740_v59  ;;  %v3851_v55 = vsub.f32 %v24955_v34, %v3850_v37 }
 0xbba   :  { %19974 = vmatmul.mubr.f32.vlgmr.msra.gmra.mrb[4].mxu0 %v3190_v53 }
 0xbbb   :  { %21989 = vmatpush3.bf16.msra.mxu0 %v24823_v10  ;;  %19992 = vmatprep.mubr.msk.f32.mxu0 %vm23937_vm11, %v27689_v33  ;;  %v18711_v10 = vld [vmem:[%s27618_s12] ss:$0 sm:$0xff]  ;;  %v3852_v59 = vand.u32 4294901760, %v3851_v55 }
 0xbbc   :  { %21990 = vmatprep.subr.bf16.mxu0 %v27639_v1 }
 0xbbf   :  { %21992 = vmatpush3.bf16.msra.mxu0 %v24827_v23 }
 0xbc0   :  { %21993 = vmatprep.subr.bf16.mxu0 %v27639_v1 }
 0xbc3   :  { %21995 = vmatpush3.bf16.msra.mxu0 %v24835_v52 }
 0xbc4   :  { %21996 = vmatprep.subr.bf16.mxu0 %v27639_v1 }
 0xbc7   :  { %21998 = vmatpush3.bf16.msra.mxu0 %v24849_v42 }
 0xbc8   :  { %19995 = vmatprep.subr.mxu0 %v27689_v33 }
 0xbca   :  { %19993 = vmatmul.mubr.f32.vlgmr.msra.gmra.mrb[4].mxu0 %v3190_v53  ;;  %v24967_v53 = vsub.f32 %v3697_v18, %v3736_v0  ;;  %v3839_v18 = vsub.f32 %v24953_v48, %v3838_v25 }
 0xbcb   :  { %19997 = vmatprep.mubr.msk.f32.mxu0 %vm23937_vm11, %v27689_v33 }
 0xbcc   :  { %v3840_v0 = vand.u32 4294901760, %v3839_v18 }
 0xc9d   :  { %v3650_v22 = vpop.f32.mrb[4].mxu0 }
 0xc9e   :  { %v23420_v23 = vadd.f32 %v18711_v10, %v3650_v22  ;;  %v19994_v35 = vpop.f32.mrb[5].mxu0  ;;  %v24975_v10 = vsub.f32 %v3698_v29, %v3742_v45  ;;  %v24977_v22 = vpack.c.bf16 %v3748_v24, %v3744_v5  ;;  %v3857_v29 = vsub.f32 %v24961_v60, %v3856_v44 }
 0xc9f   :  { %v24982_v35 = vsub.f32 %v3703_v17, %v3748_v24  ;;  %v3874_v17 = vand.u32 4294901760, %v24969_v6  ;;  %v3868_v24 = vand.u32 4294901760, %v24973_v7 }
 0xca0   :  { %v3654_v38 = vmax.f32 %v23420_v23, 0.0  ;;  %v24980_v23 = vsub.f32 %v3701_v58, %v3744_v5  ;;  %v3862_v58 = vand.u32 4294901760, %v24967_v53  ;;  %v3858_v4 = vand.u32 4294901760, %v3857_v29 }
 0xca1   :  { %v3875_v5 = vsub.f32 %v24969_v6, %v3874_v17 }
 0xca2   :  { %v24927_v52 = vadd.f32 %v24701_v14, %v3654_v38  ;;  %v3724_v14 = vand.u32 4294901760, %v3691_v20  ;;  %v3750_v38 = vand.u32 4294901760, %v3702_v56  ;;  %v3863_v45 = vsub.f32 %v24967_v53, %v3862_v58 }
 0xca4   :  { %v3660_v12 = vsel %vm439_vm9, %v24927_v52, 0.0  ;;  %v24937_v27 = vpack.c.bf16 %v3724_v14, %v3720_v40  ;;  %v24945_v46 = vsub.f32 %v3691_v20, %v3724_v14  ;;  %v24991_v8 = vpack.c.bf16 %v3750_v38, %v3746_v54 }
 0xca5   :  { %3661 = vadd.xlane.f32.xlu0 %v3660_v12  ;;  %v24984_v12 = vsub.f32 %v3700_v2, %v3746_v54  ;;  %v24993_v20 = vsub.f32 %v3702_v56, %v3750_v38  ;;  %v3846_v2 = vand.u32 4294901760, %v3845_v57  ;;  %v3880_v56 = vand.u32 4294901760, %v24975_v10 }
 0xca6   :  { %22000 = vmatprep.subr.bf16.mxu1 %v24937_v27  ;;  %v22019_v54 = vpack.c.bf16 %v3852_v59, %v3840_v0 }
 0xca7   :  { %22002 = vmatpush1.bf16.msra.mxu1 %v24939_v3  ;;  %v22021_v38 = vpack.c.bf16 %v3858_v4, %v3846_v2 }
 0xca8   :  { %22004 = vmatprep.subr.bf16.mxu1 %v24951_v36 }
 0xcab   :  { %22006 = vmatpush1.bf16.msra.mxu1 %v24957_v28 }
 0xcac   :  { %22008 = vmatprep.subr.bf16.mxu1 %v24965_v11 }
 0xcaf   :  { %22010 = vmatpush1.bf16.msra.mxu1 %v24971_v32 }
 0xcb0   :  { %22012 = vmatprep.subr.bf16.mxu1 %v24977_v22 }
 0xcb3   :  { %22014 = vmatpush1.bf16.msra.mxu1 %v24991_v8 }
 0xd32   :  { %v3662_v19 = vpop.xlane.xlu0 %3661 }
 0xd33   :  { %v3663_v42 = vmul.f32 0.015625, %v3662_v19  ;;  %v3814_v19 = vand.u32 4294901760, %v24943_v39 }
 0xd35   :  { %v24932_v49 = vsub.f32 %v24927_v52, %v3663_v42  ;;  %v3826_v42 = vand.u32 4294901760, %v24945_v46  ;;  %v3815_v40 = vsub.f32 %v24943_v39, %v3814_v19 }
 0xd37   :  { %v3665_v15 = vmul.f32 %v24932_v49, %v24932_v49  ;;  %v3827_v14 = vsub.f32 %v24945_v46, %v3826_v42  ;;  %v3816_v62 = vand.u32 4294901760, %v3815_v40  ;;  %v3864_v40 = vand.u32 4294901760, %v3863_v45 }
 0xd39   :  { %v3666_v61 = vsel %vm439_vm9, %v3665_v15, 0.0  ;;  %v27642_v15 = vand.u32 4294901760, %v24947_v47  ;;  %v3828_v51 = vand.u32 4294901760, %v3827_v14  ;;  %v3876_v14 = vand.u32 4294901760, %v3875_v5 }
 0xd3a   :  { %3667 = vadd.xlane.f32.xlu1 %v3666_v61  ;;  %v27641_v61 = vand.u32 4294901760, %v24949_v13 }
 0xd3b   :  { %v3821_v41 = vsub.f32 %v24947_v47, %v27642_v15  ;;  %v22015_v26 = vpack.c.bf16 %v3828_v51, %v3816_v62  ;;  %v3886_v62 = vand.u32 4294901760, %v24980_v23  ;;  %v3898_v51 = vand.u32 4294901760, %v24982_v35 }
 0xd3c   :  { %v3833_v43 = vsub.f32 %v24949_v13, %v27641_v61 }
 0xd3d   :  { %v3822_v21 = vand.u32 4294901760, %v3821_v41  ;;  %22016 = vmatprep.subr.bf16.mxu1 %v22015_v26  ;;  %v3869_v41 = vsub.f32 %v24973_v7, %v3868_v24  ;;  %v22023_v26 = vpack.c.bf16 %v3876_v14, %v3864_v40  ;;  %v3887_v57 = vsub.f32 %v24980_v23, %v3886_v62 }
 0xd3e   :  { %v3834_v9 = vand.u32 4294901760, %v3833_v43  ;;  %v3881_v43 = vsub.f32 %v24975_v10, %v3880_v56  ;;  %v3899_v29 = vsub.f32 %v24982_v35, %v3898_v51  ;;  %v22031_v40 = vpack.c.bf16 %v24945_v46, %v24943_v39  ;;  %v25062_v39 = vld [vmem:[%s27611_s5 + $0x1] ss:$0 sm:$0xff] }
 0xd3f   :  { %v3870_v18 = vand.u32 4294901760, %v3869_v41  ;;  %v3888_v4 = vand.u32 4294901760, %v3887_v57  ;;  %v22033_v14 = vpack.c.bf16 %v24949_v13, %v24947_v47  ;;  %v22035_v41 = vpack.c.bf16 %v24955_v34, %v24953_v48 }
 0xd40   :  { %v25013_v16 = vpack.c.bf16 %v3834_v9, %v3822_v21  ;;  %v3892_v21 = vand.u32 4294901760, %v24984_v12  ;;  %v3904_v9 = vand.u32 4294901760, %v24993_v20  ;;  %v3882_v55 = vand.u32 4294901760, %v3881_v43 }
 0xd41   :  { %v3900_v45 = vand.u32 4294901760, %v3899_v29  ;;  %v22037_v43 = vpack.c.bf16 %v24961_v60, %v24959_v63  ;;  %v22045_v57 = vpack.c.bf16 %v24993_v20, %v24984_v12  ;;  %v22063_v48 = vpack.c.bf16 %v3826_v42, %v3814_v19 }
 0xd42   :  { %v3893_v0 = vsub.f32 %v24984_v12, %v3892_v21  ;;  %v3905_v59 = vsub.f32 %v24993_v20, %v3904_v9  ;;  %v22025_v2 = vpack.c.bf16 %v3882_v55, %v3870_v18  ;;  %v22039_v18 = vpack.c.bf16 %v24969_v6, %v24967_v53 }
 0xd43   :  { %v22027_v61 = vpack.c.bf16 %v3900_v45, %v3888_v4  ;;  %v22041_v55 = vpack.c.bf16 %v24975_v10, %v24973_v7  ;;  %v27707_v34 = vand.u32 4294901760, %v24947_v47  ;;  %v27708_v63 = vand.u32 4294901760, %v24949_v13  ;;  %v25068_v47 = vld [vmem:[%s27612_s6 + $0x1] ss:$0 sm:$0xff] }
 0xd44   :  { %v3894_v5 = vand.u32 4294901760, %v3893_v0  ;;  %v3906_v1 = vand.u32 4294901760, %v3905_v59  ;;  %v22067_v53 = vpack.c.bf16 %v3850_v37, %v3838_v25  ;;  %v22069_v6 = vpack.c.bf16 %v3856_v44, %v3844_v30 }
 0xd45   :  { %v22065_v60 = vpack.c.bf16 %v27708_v63, %v27707_v34  ;;  %v22071_v29 = vpack.c.bf16 %v3874_v17, %v3862_v58  ;;  %v22073_v7 = vpack.c.bf16 %v3880_v56, %v3868_v24  ;;  %v22075_v10 = vpack.c.bf16 %v3898_v51, %v3886_v62 }
 0xd46   :  { %v22029_v15 = vpack.c.bf16 %v3906_v1, %v3894_v5  ;;  %v22043_v1 = vpack.c.bf16 %v24982_v35, %v24980_v23  ;;  %v22077_v0 = vpack.c.bf16 %v3904_v9, %v3892_v21 }
 0xdc7   :  { %v3668_v23 = vpop.xlane.xlu1 %3667 }
 0xdc8   :  { %v3669_v35 = vmul.f32 0.015625, %v3668_v23 }
 0xdca   :  { %v3670_v59 = vadd.f32 1e-06, %v3669_v35 }
 0xdcc   :  { %23788 = vrsqrt.f32 %v3670_v59 }
 0xdd6   :  { %v23789_v12 = vpop.eup %23788 }
 0xdd7   :  { %v3672_v46 = vmul.f32 %v23789_v12, %v24932_v49  ;;  %v27709_v49 = vmov 0.0|0.0  }
 0xdd9   :  { %v3679_v13 = vmul.f32 %v25062_v39, %v3672_v46 }
 0xddb   :  { %v3686_v19 = vadd.f32 %v25068_v47, %v3679_v13 }
 0xddd   :  { %v3718_v42 = vsel %vm958_vm10, %v3686_v19, 0 }
 0xdde   :  { %v3801_v20 = vand.u32 4294901760, %v3718_v42 }
 0xde0   :  { %v3802_v25 = vsub.f32 %v3718_v42, %v3801_v20 }
 0xde2   :  { %v3803_v37 = vand.u32 4294901760, %v3802_v25 }
 0xde4   :  { %v3804_v30 = vsub.f32 %v3802_v25, %v3803_v37 }
 0xde6   :  { %v3805_v44 = vand.u32 4294901760, %v3804_v30 }
 0xde8   :  { %3806 = vmatmul.mubr.f32.vlgmr.msra.gmra.mrb[6].mxu1 %v3805_v44 }
 0xde9   :  { %22018 = vmatpush1.bf16.msra.mxu1 %v25013_v16  ;;  %3956 = vmatprep.mubr.f32.mxu1 %v27689_v33 }
 0xdea   :  { %22020 = vmatprep.subr.bf16.mxu1 %v22019_v54 }
 0xded   :  { %22022 = vmatpush1.bf16.msra.mxu1 %v22021_v38 }
 0xdee   :  { %22024 = vmatprep.subr.bf16.mxu1 %v22023_v26 }
 0xdf1   :  { %22026 = vmatpush1.bf16.msra.mxu1 %v22025_v2 }
 0xdf2   :  { %22028 = vmatprep.subr.bf16.mxu1 %v22027_v61 }
 0xdf5   :  { %22030 = vmatpush1.bf16.msra.mxu1 %v22029_v15 }
 0xdf6   :  { %22032 = vmatprep.subr.bf16.mxu1 %v22031_v40 }
 0xdf8   :  { %3958 = vmatmul.mubr.f32.vlgmr.msra.gmra.mrb[6].mxu1 %v3801_v20 }
 0xdf9   :  { %22034 = vmatpush1.bf16.msra.mxu1 %v22033_v14  ;;  %4060 = vmatprep.mubr.f32.mxu1 %v27689_v33 }
 0xdfa   :  { %22036 = vmatprep.subr.bf16.mxu1 %v22035_v41 }
 0xdfd   :  { %22038 = vmatpush1.bf16.msra.mxu1 %v22037_v43 }
 0xdfe   :  { %22040 = vmatprep.subr.bf16.mxu1 %v22039_v18 }
 0xe01   :  { %22042 = vmatpush1.bf16.msra.mxu1 %v22041_v55 }
 0xe02   :  { %22044 = vmatprep.subr.bf16.mxu1 %v22043_v1 }
 0xe05   :  { %22046 = vmatpush1.bf16.msra.mxu1 %v22045_v57 }
 0xe06   :  { %22048 = vmatprep.subr.bf16.mxu1 %v24937_v27 }
 0xe08   :  { %4063 = vmatmul.mubr.f32.vlgmr.msra.gmra.mrb[6].mxu1 %v3802_v25  ;;  %v5300_v25 = vld [vmem:[#allocation7 + $0x40] sm:$0xff] }
 0xe09   :  { %22050 = vmatpush1.bf16.msra.mxu1 %v24939_v3  ;;  %4149 = vmatprep.mubr.f32.mxu1 %v27689_v33 }
 0xe0a   :  { %22052 = vmatprep.subr.bf16.mxu1 %v24951_v36 }
 0xe0d   :  { %22054 = vmatpush1.bf16.msra.mxu1 %v24957_v28 }
 0xe0e   :  { %22056 = vmatprep.subr.bf16.mxu1 %v24965_v11 }
 0xe11   :  { %22058 = vmatpush1.bf16.msra.mxu1 %v24971_v32 }
 0xe12   :  { %22060 = vmatprep.subr.bf16.mxu1 %v24977_v22 }
 0xe15   :  { %22062 = vmatpush1.bf16.msra.mxu1 %v24991_v8 }
 0xe16   :  { %22064 = vmatprep.subr.bf16.mxu1 %v22063_v48 }
 0xe18   :  { %4153 = vmatmul.mubr.f32.vlgmr.msra.gmra.mrb[6].mxu1 %v3803_v37  ;;  %v5301_v37 = vld [vmem:[#allocation7 + $0x48] sm:$0xff] }
 0xe19   :  { %22066 = vmatpush1.bf16.msra.mxu1 %v22065_v60  ;;  %4271 = vmatprep.mubr.f32.mxu1 %v27689_v33  ;;  %v5323_v30 = vand.u32 4294901760, %v5301_v37 }
 0xe1a   :  { %22068 = vmatprep.subr.bf16.mxu1 %v22067_v53 }
 0xe1d   :  { %22070 = vmatpush1.bf16.msra.mxu1 %v22069_v6 }
 0xe1e   :  { %22072 = vmatprep.subr.bf16.mxu1 %v22071_v29 }
 0xe21   :  { %22074 = vmatpush1.bf16.msra.mxu1 %v22073_v7 }
 0xe22   :  { %22076 = vmatprep.subr.bf16.mxu1 %v22075_v10 }
 0xe25   :  { %22078 = vmatpush1.bf16.msra.mxu1 %v22077_v0 }
 0xe26   :  { %22080 = vmatprep.subr.bf16.mxu1 %v24937_v27  ;;  %v18716_v27 = vld [vmem:[%s27614_s8 + $0x2] sm:$0x3] }
 0xe27   :  { %v3714_v51 = vrot.slane %v18716_v27, %v27705_v31 }
 0xe28   :  { %4273 = vmatmul.mubr.f32.vlgmr.msra.gmra.mrb[6].mxu1 %v3801_v20 }
 0xe29   :  { %22082 = vmatpush1.bf16.msra.mxu1 %v24939_v3  ;;  %4359 = vmatprep.mubr.f32.mxu1 %v27689_v33  ;;  %v3710_v3 = vrot.slane %v18716_v27, %v27704_v50  ;;  %v5302_v27 = vld [vmem:[#allocation7 + $0x50] sm:$0xff] }
 0xe2a   :  { %22084 = vmatprep.subr.bf16.mxu1 %v24951_v36 }
 0xe2d   :  { %22086 = vmatpush1.bf16.msra.mxu1 %v24957_v28 }
 0xe2e   :  { %22088 = vmatprep.subr.bf16.mxu1 %v24965_v11 }
 0xe31   :  { %22090 = vmatpush1.bf16.msra.mxu1 %v24971_v32 }
 0xe32   :  { %22092 = vmatprep.subr.bf16.mxu1 %v24977_v22 }
 0xe35   :  { %22094 = vmatpush1.bf16.msra.mxu1 %v24991_v8 }
 0xe36   :  { %22167 = vmatprep.subr.bf16.mxu1 %v27709_v49 }
 0xe38   :  { %4361 = vmatmul.mubr.f32.vlgmr.msra.gmra.mrb[6].mxu1 %v3801_v20 }
 0xe39   :  { %20185 = vmatprep.mubr.msk.f32.mxu1 %vm23937_vm11, %v27689_v33 }
 0xf0b   :  { %v4362_v36 = vpop.f32.mrb[6].mxu1 }
 0xf0c   :  { %v23421_v28 = vadd.f32 %v4362_v36, %v3710_v3  ;;  %v4364_v11 = vpop.f32.mrb[7].mxu1  ;;  %v5303_v3 = vld [vmem:[#allocation7 + $0x58] sm:$0xff] }
 0xf0d   :  { %v23422_v21 = vadd.f32 %v4364_v11, %v3714_v51  ;;  %v5326_v11 = vand.u32 4294901760, %v5302_v27 }
 0xf0e   :  { %4368 = vrot.lane.b32.xlu0 %v23421_v28, %s23938_s22  ;;  %v4370_v32 = vsel %vm958_vm10, %v23421_v28, 0  ;;  %v25162_v28 = vsub.f32 %v5301_v37, %v5323_v30 }
 0xf0f   :  { %v4440_v22 = vand.u32 4294901760, %v4370_v32  ;;  %v4836_v9 = vsel %vm2078_vm12, %v23422_v21, 0 }
 0xf10   :  { %v4839_v26 = vand.u32 4294901760, %v4836_v9 }
 0xf11   :  { %v4441_v15 = vsub.f32 %v4370_v32, %v4440_v22  ;;  %v5329_v32 = vand.u32 4294901760, %v5303_v3 }
 0xf12   :  { %v4916_v57 = vsub.f32 %v4836_v9, %v4839_v26 }
 0xf13   :  { %v4442_v61 = vand.u32 4294901760, %v4441_v15 }
 0xf14   :  { %v4917_v60 = vand.u32 4294901760, %v4916_v57 }
 0xf15   :  { %v4443_v58 = vsub.f32 %v4441_v15, %v4442_v61 }
 0xf16   :  { %v4918_v29 = vsub.f32 %v4916_v57, %v4917_v60 }
 0xf17   :  { %v4444_v56 = vand.u32 4294901760, %v4443_v58  ;;  %v5307_v58 = vld [vmem:[#allocation7 + $0x78] sm:$0xff] }
 0xf18   :  { %v4919_v0 = vand.u32 4294901760, %v4918_v29 }
 0xf80   :  { %v4369_v8 = vpop.permute.xlu0 %4368 }
 0xf81   :  { %v4372_v16 = vsel %vm958_vm10, %v4369_v8, 0 }
 0xf82   :  { %v4375_v17 = vand.u32 4294901760, %v4372_v16 }
 0xf84   :  { %v4452_v24 = vsub.f32 %v4372_v16, %v4375_v17  ;;  %19996 = vmatpush3.xpose.msra.mxu0 %v4375_v17 }
 0xf85   :  { %20000 = vmatprep.subr.mxu0 %v27689_v33 }
 0xf86   :  { %v4453_v54 = vand.u32 4294901760, %v4452_v24 }
 0xf87   :  { %19998 = vmatmul.mubr.f32.vlgmr.msra.gmra.mrb[6].mxu0 %v4444_v56  ;;  %v25167_v56 = vsub.f32 %v5302_v27, %v5326_v11 }
 0xf88   :  { %v4454_v38 = vsub.f32 %v4452_v24, %v4453_v54  ;;  %20002 = vmatprep.mubr.msk.f32.mxu0 %vm23937_vm11, %v27689_v33 }
 0xf8a   :  { %v4455_v62 = vand.u32 4294901760, %v4454_v38  ;;  %v5341_v38 = vand.u32 4294901760, %v5307_v58 }
 0xf8c   :  { %20001 = vmatpush3.xpose.msra.mxu0 %v4455_v62 }
 0xf8d   :  { %20005 = vmatprep.subr.mxu0 %v27689_v33 }
 0xf8f   :  { %20003 = vmatmul.mubr.f32.vlgmr.msra.gmra.mrb[6].mxu0 %v4440_v22 }
 0xf90   :  { %20006 = vmatpush3.xpose.msra.mxu0 %v4452_v24  ;;  %20007 = vmatprep.mubr.msk.f32.mxu0 %vm23937_vm11, %v27689_v33  ;;  %v25165_v24 = vpack.c.bf16 %v5329_v32, %v5326_v11 }
 0xf91   :  { %20010 = vmatprep.subr.mxu0 %v27689_v33 }
 0xf97   :  { %20008 = vmatmul.mubr.f32.vlgmr.msra.gmra.mrb[6].mxu0 %v4441_v15  ;;  %v5305_v15 = vld [vmem:[#allocation7 + $0x68] sm:$0xff] }
 0xf98   :  { %20011 = vmatpush3.xpose.msra.mxu0 %v4375_v17  ;;  %20012 = vmatprep.mubr.msk.f32.mxu0 %vm23937_vm11, %v27689_v33  ;;  %v5335_v16 = vand.u32 4294901760, %v5305_v15 }
 0xf99   :  { %20015 = vmatprep.subr.mxu0 %v27689_v33 }
 0xf9a   :  { %v25173_v51 = vsub.f32 %v5305_v15, %v5335_v16 }
 0xf9f   :  { %20013 = vmatmul.mubr.f32.vlgmr.msra.gmra.mrb[6].mxu0 %v4442_v61  ;;  %v5306_v61 = vld [vmem:[#allocation7 + $0x70] sm:$0xff] }
 0xfa0   :  { %20016 = vmatpush3.xpose.msra.mxu0 %v4453_v54  ;;  %20017 = vmatprep.mubr.msk.f32.mxu0 %vm23937_vm11, %v27689_v33  ;;  %v25169_v54 = vsub.f32 %v5303_v3, %v5329_v32 }
 0xfa1   :  { %20020 = vmatprep.subr.mxu0 %v27689_v33 }
 0xfa2   :  { %v22123_v37 = vpack.c.bf16 %v25169_v54, %v25167_v56 }
 0xfa7   :  { %20018 = vmatmul.mubr.f32.vlgmr.msra.gmra.mrb[6].mxu0 %v4440_v22 }
 0xfa8   :  { %20021 = vmatpush3.xpose.msra.mxu0 %v4375_v17  ;;  %20022 = vmatprep.mubr.msk.f32.mxu0 %vm23937_vm11, %v27689_v33  ;;  %v5338_v17 = vand.u32 4294901760, %v5306_v61 }
 0xfa9   :  { %20025 = vmatprep.subr.mxu0 %v27689_v33 }
 0xfaa   :  { %v25175_v21 = vsub.f32 %v5306_v61, %v5338_v17 }
 0xfaf   :  { %20023 = vmatmul.mubr.f32.vlgmr.msra.gmra.mrb[6].mxu0 %v4440_v22  ;;  %v5304_v22 = vld [vmem:[#allocation7 + $0x60] sm:$0xff] }
 0xfb0   :  { %20026 = vmatpush3.msra.mxu0 %v4839_v26  ;;  %20027 = vmatprep.mubr.msk.f32.mxu0 %vm23937_vm11, %v27689_v33  ;;  %v5332_v8 = vand.u32 4294901760, %v5304_v22 }
 0xfb1   :  { %20030 = vmatprep.subr.mxu0 %v27689_v33 }
 0xfb2   :  { %v25171_v62 = vsub.f32 %v5304_v22, %v5332_v8  ;;  %v25178_v9 = vpack.c.bf16 %v5335_v16, %v5332_v8 }
0x1082   :  { %v4816_v2 = vpop.f32.mrb[6].mxu0 }
0x1083   :  { %v4820_v4 = vmul.f32 0.015625, %v4816_v2  ;;  %v20024_v45 = vpop.f32.mrb[7].mxu0  ;;  %v25184_v2 = vpack.c.bf16 %v5341_v38, %v5338_v17 }
0x1084   :  { %v5412_v45 = vand.u32 4294901760, %v25162_v28 }
0x1085   :  { %v4821_v5 = vsel %vm2062_vm13, %v4820_v4, -inf }
0x1086   :  { %4822 = vmax.xlane.f32.xlu1 %v4821_v5 }
0x1113   :  { %v4823_v40 = vpop.xlane.xlu1 %4822 }
0x1114   :  { %v4824_v14 = vsub.f32 %v4820_v4, %v4823_v40  ;;  %v5413_v40 = vsub.f32 %v25162_v28, %v5412_v45 }
0x1116   :  { %v4825_v41 = vmul.f32 1.442695, %v4824_v14 }
0x1118   :  { %23790 = vpow2.f32 %v4825_v41  ;;  %v5414_v41 = vand.u32 4294901760, %v5413_v40 }
0x1122   :  { %v23791_v43 = vpop.eup %23790 }
0x1123   :  { %v4827_v18 = vsel %vm2062_vm13, %v23791_v43, 0.0 }
0x1124   :  { %4828 = vadd.xlane.f32.xlu1 %v4827_v18  ;;  %v5426_v18 = vand.u32 4294901760, %v25169_v54 }
0x11b1   :  { %v4829_v55 = vpop.xlane.xlu1 %4828 }
0x11b2   :  { %23792 = vrcp.f32 %v4829_v55 }
0x11bc   :  { %v23793_v1 = vpop.eup %23792 }
0x11bd   :  { %v4831_v48 = vmul.f32 %v23793_v1, %v23791_v43  ;;  %v5419_v43 = vand.u32 4294901760, %v25167_v56 }
0x11bf   :  { %v4833_v34 = vsel %vm2074_vm14, %v4831_v48, 0  ;;  %v5420_v1 = vsub.f32 %v25167_v56, %v5419_v43  ;;  %v22147_v3 = vpack.c.bf16 %v5426_v18, %v5419_v43 }
0x11c0   :  { %v4904_v63 = vand.u32 4294901760, %v4833_v34 }
0x11c1   :  { %v5421_v48 = vand.u32 4294901760, %v5420_v1 }
0x11c2   :  { %v4905_v53 = vsub.f32 %v4833_v34, %v4904_v63 }
0x11c4   :  { %v4906_v6 = vand.u32 4294901760, %v4905_v53 }
0x11c6   :  { %v4907_v7 = vsub.f32 %v4905_v53, %v4906_v6 }
0x11c8   :  { %v4908_v10 = vand.u32 4294901760, %v4907_v7 }
0x11ca   :  { %20028 = vmatmul.mubr.f32.vlgmr.msra.gmra.mrb[8].mxu0 %v4908_v10 }
0x11cb   :  { %20031 = vmatpush3.msra.mxu0 %v4919_v0  ;;  %20032 = vmatprep.mubr.msk.f32.mxu0 %vm23937_vm11, %v27689_v33  ;;  %v5447_v0 = vand.u32 4294901760, %v25175_v21 }
0x11cc   :  { %20035 = vmatprep.subr.mxu0 %v27689_v33 }
0x11d2   :  { %20033 = vmatmul.mubr.f32.vlgmr.msra.gmra.mrb[8].mxu0 %v4904_v63 }
0x11d3   :  { %20036 = vmatpush3.msra.mxu0 %v4916_v57  ;;  %20037 = vmatprep.mubr.msk.f32.mxu0 %vm23937_vm11, %v27689_v33  ;;  %v5427_v57 = vsub.f32 %v25169_v54, %v5426_v18  ;;  %v5864_v18 = vld [vmem:[#allocation9 + $0x70] sm:$0xff] }
0x11d4   :  { %20040 = vmatprep.subr.mxu0 %v27689_v33  ;;  %v5896_v1 = vand.u32 4294901760, %v5864_v18 }
0x11d5   :  { %v5428_v34 = vand.u32 4294901760, %v5427_v57 }
0x11da   :  { %20038 = vmatmul.mubr.f32.vlgmr.msra.gmra.mrb[8].mxu0 %v4905_v53  ;;  %v22111_v53 = vpack.c.bf16 %v5428_v34, %v5421_v48 }
0x11db   :  { %20041 = vmatpush3.msra.mxu0 %v4839_v26  ;;  %20042 = vmatprep.mubr.msk.f32.mxu0 %vm23937_vm11, %v27689_v33 }
0x11dc   :  { %20045 = vmatprep.subr.mxu0 %v27689_v33 }
0x11e2   :  { %20043 = vmatmul.mubr.f32.vlgmr.msra.gmra.mrb[8].mxu0 %v4906_v6 }
0x11e3   :  { %20046 = vmatpush3.msra.mxu0 %v4917_v60  ;;  %20047 = vmatprep.mubr.msk.f32.mxu0 %vm23937_vm11, %v27689_v33  ;;  %v5440_v60 = vand.u32 4294901760, %v25173_v51 }
0x11e4   :  { %20050 = vmatprep.subr.mxu0 %v27689_v33 }
0x11e5   :  { %v5441_v29 = vsub.f32 %v25173_v51, %v5440_v60 }
0x11e7   :  { %v5442_v10 = vand.u32 4294901760, %v5441_v29 }
0x11ea   :  { %20048 = vmatmul.mubr.f32.vlgmr.msra.gmra.mrb[8].mxu0 %v4904_v63 }
0x11eb   :  { %20051 = vmatpush3.msra.mxu0 %v4839_v26  ;;  %20052 = vmatprep.mubr.msk.f32.mxu0 %vm23937_vm11, %v27689_v33  ;;  %v25180_v26 = vsub.f32 %v5307_v58, %v5341_v38 }
0x11ec   :  { %22095 = vmatprep.subr.bf16.mxu0 %v27709_v49 }
0x11f2   :  { %20053 = vmatmul.mubr.f32.vlgmr.msra.gmra.mrb[8].mxu0 %v4904_v63  ;;  %v5433_v63 = vand.u32 4294901760, %v25171_v62 }
0x11f3   :  { %20071 = vmatprep.mubr.msk.f32.mxu0 %vm23937_vm11, %v27689_v33 }
0x11f4   :  { %v5434_v6 = vsub.f32 %v25171_v62, %v5433_v63  ;;  %v22150_v11 = vpack.c.bf16 %v5440_v60, %v5433_v63 }
0x11f6   :  { %v5435_v7 = vand.u32 4294901760, %v5434_v6 }
0x12c5   :  { %v5280_v23 = vpop.f32.mrb[8].mxu0 }
0x12c6   :  { %v25147_v35 = vadd.f32 %v5280_v23, %v24927_v52  ;;  %v20054_v59 = vpop.f32.mrb[9].mxu0  ;;  %v5320_v52 = vand.u32 4294901760, %v5300_v25  ;;  %v5454_v23 = vand.u32 4294901760, %v25180_v26 }
0x12c7   :  { %v22114_v59 = vpack.c.bf16 %v5442_v10, %v5435_v7  ;;  %v25283_v7 = vsub.f32 %v5864_v18, %v5896_v1 }
0x12c8   :  { %v5284_v12 = vsel %vm439_vm9, %v25147_v35, 0.0  ;;  %v25157_v44 = vpack.c.bf16 %v5323_v30, %v5320_v52  ;;  %v25160_v36 = vsub.f32 %v5300_v25, %v5320_v52  ;;  %v22126_v52 = vpack.c.bf16 %v25173_v51, %v25171_v62 }
0x12c9   :  { %5285 = vadd.xlane.f32.xlu1 %v5284_v12  ;;  %v5448_v12 = vsub.f32 %v25175_v21, %v5447_v0  ;;  %v22129_v30 = vpack.c.bf16 %v25180_v26, %v25175_v21  ;;  %v22153_v32 = vpack.c.bf16 %v5454_v23, %v5447_v0  ;;  %v5860_v21 = vld [vmem:[#allocation9 + $0x50] sm:$0xff] }
0x12ca   :  { %22097 = vmatpush3.bf16.msra.mxu0 %v25157_v44  ;;  %v5405_v4 = vand.u32 4294901760, %v25160_v36  ;;  %v22120_v25 = vpack.c.bf16 %v25162_v28, %v25160_v36 }
0x12cb   :  { %22098 = vmatprep.subr.bf16.mxu0 %v27709_v49 }
0x12cc   :  { %v5406_v5 = vsub.f32 %v25160_v36, %v5405_v4  ;;  %v22144_v27 = vpack.c.bf16 %v5412_v45, %v5405_v4  ;;  %v5863_v45 = vld [vmem:[#allocation9 + $0x68] sm:$0xff] }
0x12cd   :  { %v5893_v40 = vand.u32 4294901760, %v5863_v45 }
0x12ce   :  { %22100 = vmatpush3.bf16.msra.mxu0 %v25165_v24  ;;  %v5407_v14 = vand.u32 4294901760, %v5406_v5 }
0x12cf   :  { %22101 = vmatprep.subr.bf16.mxu0 %v27709_v49  ;;  %v25279_v6 = vsub.f32 %v5863_v45, %v5893_v40 }
0x12d0   :  { %v22108_v55 = vpack.c.bf16 %v5414_v41, %v5407_v14 }
0x12d2   :  { %22103 = vmatpush3.bf16.msra.mxu0 %v25178_v9 }
0x12d3   :  { %22104 = vmatprep.subr.bf16.mxu0 %v27709_v49 }
0x12d6   :  { %22106 = vmatpush3.bf16.msra.mxu0 %v25184_v2 }
0x12d7   :  { %22107 = vmatprep.subr.bf16.mxu0 %v27709_v49 }
0x1356   :  { %v5286_v46 = vpop.xlane.xlu1 %5285 }
0x1357   :  { %v5287_v13 = vmul.f32 0.015625, %v5286_v46  ;;  %v5455_v46 = vsub.f32 %v25180_v26, %v5454_v23  ;;  %v5861_v26 = vld [vmem:[#allocation9 + $0x58] sm:$0xff] }
0x1358   :  { %v5887_v4 = vand.u32 4294901760, %v5861_v26 }
0x1359   :  { %v25152_v19 = vsub.f32 %v25147_v35, %v5287_v13  ;;  %v5449_v13 = vand.u32 4294901760, %v5448_v12 }
0x135a   :  { %v25275_v60 = vsub.f32 %v5861_v26, %v5887_v4  ;;  %v18718_v26 = vld [vmem:[%s27616_s10 + $0x1] ss:$0 sm:$0xff] }
0x135b   :  { %v5289_v42 = vmul.f32 %v25152_v19, %v25152_v19 }
0x135d   :  { %v5290_v20 = vsel %vm439_vm9, %v5289_v42, 0.0  ;;  %v5456_v42 = vand.u32 4294901760, %v5455_v46  ;;  %v5984_v46 = vand.u32 4294901760, %v25275_v60 }
0x135e   :  { %5291 = vadd.xlane.f32.xlu1 %v5290_v20 }
0x135f   :  { %v22117_v20 = vpack.c.bf16 %v5456_v42, %v5449_v13 }
0x13eb   :  { %v5292_v22 = vpop.xlane.xlu1 %5291 }
0x13ec   :  { %v5293_v15 = vmul.f32 0.015625, %v5292_v22 }
0x13ee   :  { %v5294_v61 = vadd.f32 1e-06, %v5293_v15 }
0x13f0   :  { %23794 = vrsqrt.f32 %v5294_v61  ;;  %v6005_v61 = vand.u32 4294901760, %v25283_v7 }
0x13fa   :  { %v23795_v8 = vpop.eup %23794 }
0x13fb   :  { %v5296_v36 = vmul.f32 %v23795_v8, %v25152_v19 }
0x13fd   :  { %v5297_v28 = vmul.f32 %v25062_v39, %v5296_v36  ;;  %v5858_v39 = vld [vmem:[#allocation9 + $0x40] sm:$0xff] }
0x13fe   :  { %v5878_v19 = vand.u32 4294901760, %v5858_v39 }
0x13ff   :  { %v5298_v16 = vadd.f32 %v25068_v47, %v5297_v28  ;;  %v5859_v47 = vld [vmem:[#allocation9 + $0x48] sm:$0xff]  ;;  %v6006_v28 = vsub.f32 %v25283_v7, %v6005_v61 }
0x1400   :  { %v25263_v14 = vsub.f32 %v5858_v39, %v5878_v19 }
0x1401   :  { %v5317_v58 = vsel %vm958_vm10, %v5298_v16, 0 }
0x1402   :  { %v5392_v17 = vand.u32 4294901760, %v5317_v58  ;;  %v5963_v48 = vand.u32 4294901760, %v25263_v14 }
0x1404   :  { %v5393_v56 = vsub.f32 %v5317_v58, %v5392_v17  ;;  %v5964_v0 = vsub.f32 %v25263_v14, %v5963_v48  ;;  %v6007_v58 = vand.u32 4294901760, %v6006_v28  ;;  %v6456_v28 = vld [vmem:[#allocation4 + $0x140] sm:$0xff] }
0x1406   :  { %v5394_v54 = vand.u32 4294901760, %v5393_v56 }
0x1408   :  { %v5395_v38 = vsub.f32 %v5393_v56, %v5394_v54 }
0x140a   :  { %v5396_v62 = vand.u32 4294901760, %v5395_v38 }
0x140c   :  { %20072 = vmatmul.mubr.f32.vlgmr.msra.gmra.mrb[10].mxu0 %v5396_v62 }
0x140d   :  { %22109 = vmatpush3.bf16.msra.mxu0 %v22108_v55  ;;  %20090 = vmatprep.mubr.msk.f32.mxu0 %vm23937_vm11, %v27689_v33  ;;  %v5865_v55 = vld [vmem:[#allocation9 + $0x78] sm:$0xff] }
0x140e   :  { %22110 = vmatprep.subr.bf16.mxu0 %v27709_v49  ;;  %v5899_v57 = vand.u32 4294901760, %v5865_v55 }
0x1410   :  { %v25281_v29 = vpack.c.bf16 %v5899_v57, %v5896_v1  ;;  %v25285_v10 = vsub.f32 %v5865_v55, %v5899_v57 }
0x1411   :  { %22112 = vmatpush3.bf16.msra.mxu0 %v22111_v53 }
0x1412   :  { %22113 = vmatprep.subr.bf16.mxu0 %v27709_v49  ;;  %v6012_v8 = vand.u32 4294901760, %v25285_v10  ;;  %v22201_v39 = vpack.c.bf16 %v25285_v10, %v25283_v7  ;;  %v6449_v7 = vld [vmem:[#allocation4 + $0x108] sm:$0xff] }
0x1414   :  { %v6013_v16 = vsub.f32 %v25285_v10, %v6012_v8  ;;  %v6451_v10 = vld [vmem:[#allocation4 + $0x118] sm:$0xff] }
0x1415   :  { %22115 = vmatpush3.bf16.msra.mxu0 %v22114_v59  ;;  %v5965_v59 = vand.u32 4294901760, %v5964_v0  ;;  %v6480_v0 = vand.u32 4294901760, %v6449_v7 }
0x1416   :  { %22116 = vmatprep.subr.bf16.mxu0 %v27709_v49 }
0x1419   :  { %22118 = vmatpush3.bf16.msra.mxu0 %v22117_v20  ;;  %v5985_v20 = vsub.f32 %v25275_v60, %v5984_v46 }
0x141a   :  { %22119 = vmatprep.subr.bf16.mxu0 %v27709_v49 }
0x141c   :  { %20091 = vmatmul.mubr.f32.vlgmr.msra.gmra.mrb[10].mxu0 %v5392_v17 }
0x141d   :  { %22121 = vmatpush3.bf16.msra.mxu0 %v22120_v25  ;;  %20109 = vmatprep.mubr.msk.f32.mxu0 %vm23937_vm11, %v27689_v33 }
0x141e   :  { %22122 = vmatprep.subr.bf16.mxu0 %v27709_v49 }
0x1421   :  { %22124 = vmatpush3.bf16.msra.mxu0 %v22123_v37 }
0x1422   :  { %22125 = vmatprep.subr.bf16.mxu0 %v27709_v49 }
0x1425   :  { %22127 = vmatpush3.bf16.msra.mxu0 %v22126_v52  ;;  %v5986_v52 = vand.u32 4294901760, %v5985_v20  ;;  %v6453_v20 = vld [vmem:[#allocation4 + $0x128] sm:$0xff] }
0x1426   :  { %22128 = vmatprep.subr.bf16.mxu0 %v27709_v49 }
0x1429   :  { %22130 = vmatpush3.bf16.msra.mxu0 %v22129_v30 }
0x142a   :  { %22131 = vmatprep.subr.bf16.mxu0 %v27709_v49 }
0x142c   :  { %20110 = vmatmul.mubr.f32.vlgmr.msra.gmra.mrb[10].mxu0 %v5393_v56 }
0x142d   :  { %22133 = vmatpush3.bf16.msra.mxu0 %v25157_v44  ;;  %20128 = vmatprep.mubr.msk.f32.mxu0 %vm23937_vm11, %v27689_v33 }
0x142e   :  { %22134 = vmatprep.subr.bf16.mxu0 %v27709_v49 }
0x1431   :  { %22136 = vmatpush3.bf16.msra.mxu0 %v25165_v24 }
0x1432   :  { %22137 = vmatprep.subr.bf16.mxu0 %v27709_v49 }
0x1435   :  { %22139 = vmatpush3.bf16.msra.mxu0 %v25178_v9 }
0x1436   :  { %22140 = vmatprep.subr.bf16.mxu0 %v27709_v49 }
0x1439   :  { %22142 = vmatpush3.bf16.msra.mxu0 %v25184_v2 }
0x143a   :  { %22143 = vmatprep.subr.bf16.mxu0 %v27709_v49 }
0x143c   :  { %20129 = vmatmul.mubr.f32.vlgmr.msra.gmra.mrb[10].mxu0 %v5394_v54 }
0x143d   :  { %22145 = vmatpush3.bf16.msra.mxu0 %v22144_v27  ;;  %20147 = vmatprep.mubr.msk.f32.mxu0 %vm23937_vm11, %v27689_v33  ;;  %v5998_v27 = vand.u32 4294901760, %v25279_v6 }
0x143e   :  { %22146 = vmatprep.subr.bf16.mxu0 %v27709_v49 }
0x1441   :  { %22148 = vmatpush3.bf16.msra.mxu0 %v22147_v3 }
0x1442   :  { %22149 = vmatprep.subr.bf16.mxu0 %v27709_v49 }
0x1445   :  { %22151 = vmatpush3.bf16.msra.mxu0 %v22150_v11 }
0x1446   :  { %22152 = vmatprep.subr.bf16.mxu0 %v27709_v49 }
0x1449   :  { %22154 = vmatpush3.bf16.msra.mxu0 %v22153_v32  ;;  %v5999_v32 = vsub.f32 %v25279_v6, %v5998_v27 }
0x144a   :  { %22155 = vmatprep.subr.bf16.mxu0 %v27709_v49 }
0x144b   :  { %v6000_v15 = vand.u32 4294901760, %v5999_v32  ;;  %v25375_v32 = vsub.f32 %v6449_v7, %v6480_v0 }
0x144c   :  { %20148 = vmatmul.mubr.f32.vlgmr.msra.gmra.mrb[10].mxu0 %v5392_v17 }
0x144d   :  { %22157 = vmatpush3.bf16.msra.mxu0 %v25157_v44  ;;  %20166 = vmatprep.mubr.msk.f32.mxu0 %vm23937_vm11, %v27689_v33  ;;  %v5881_v44 = vand.u32 4294901760, %v5859_v47 }
0x144e   :  { %22158 = vmatprep.subr.bf16.mxu0 %v27709_v49 }
0x144f   :  { %v25255_v51 = vpack.c.bf16 %v5881_v44, %v5878_v19  ;;  %v25265_v41 = vsub.f32 %v5859_v47, %v5881_v44 }
0x1451   :  { %22160 = vmatpush3.bf16.msra.mxu0 %v25165_v24  ;;  %22169 = vmatpush3.bf16.msra.mxu1 %v25255_v51  ;;  %v5884_v24 = vand.u32 4294901760, %v5860_v21  ;;  %v5970_v34 = vand.u32 4294901760, %v25265_v41  ;;  %v22192_v54 = vpack.c.bf16 %v25265_v41, %v25263_v14 }
0x1452   :  { %22161 = vmatprep.subr.bf16.mxu0 %v27709_v49  ;;  %22170 = vmatprep.subr.bf16.mxu1 %v27709_v49 }
0x1453   :  { %v25273_v63 = vsub.f32 %v5860_v21, %v5884_v24  ;;  %v5971_v23 = vsub.f32 %v25265_v41, %v5970_v34  ;;  %v22216_v47 = vpack.c.bf16 %v5970_v34, %v5963_v48  ;;  %v22225_v21 = vpack.c.bf16 %v6012_v8, %v6005_v61  ;;  %v6457_v8 = vld [vmem:[#allocation4 + $0x148] sm:$0xff] }
0x1455   :  { %22163 = vmatpush3.bf16.msra.mxu0 %v25178_v9  ;;  %v25259_v9 = vpack.c.bf16 %v5887_v4, %v5884_v24  ;;  %v5977_v12 = vand.u32 4294901760, %v25273_v63  ;;  %v5972_v13 = vand.u32 4294901760, %v5971_v23  ;;  %v22195_v38 = vpack.c.bf16 %v25275_v60, %v25273_v63  ;;  %v6448_v23 = vld [vmem:[#allocation4 + $0x100] sm:$0xff] }
0x1456   :  { %22164 = vmatprep.subr.bf16.mxu0 %v27709_v49 }
0x1457   :  { %22172 = vmatpush3.bf16.msra.mxu1 %v25259_v9  ;;  %v5978_v42 = vsub.f32 %v25273_v63, %v5977_v12  ;;  %v22180_v25 = vpack.c.bf16 %v5972_v13, %v5965_v59  ;;  %v22219_v19 = vpack.c.bf16 %v5984_v46, %v5977_v12  ;;  %v6450_v59 = vld [vmem:[#allocation4 + $0x110] sm:$0xff]  ;;  %v6482_v12 = vand.u32 4294901760, %v6448_v23 }
0x1458   :  { %22173 = vmatprep.subr.bf16.mxu1 %v27709_v49  ;;  %v6486_v46 = vand.u32 4294901760, %v6450_v59 }
0x1459   :  { %22166 = vmatpush3.bf16.msra.mxu0 %v25184_v2  ;;  %v5862_v2 = vld [vmem:[#allocation9 + $0x60] sm:$0xff]  ;;  %v5979_v37 = vand.u32 4294901760, %v5978_v42 }
0x145a   :  { %v5890_v5 = vand.u32 4294901760, %v5862_v2  ;;  %v25371_v42 = vpack.c.bf16 %v6486_v46, %v6482_v12  ;;  %v25381_v61 = vsub.f32 %v6450_v59, %v6486_v46 }
0x145b   :  { %v22183_v3 = vpack.c.bf16 %v5986_v52, %v5979_v37  ;;  %v6488_v37 = vand.u32 4294901760, %v6453_v20 }
0x145c   :  { %20167 = vmatmul.mubr.f32.vlgmr.msra.gmra.mrb[10].mxu0 %v5392_v17  ;;  %v25267_v43 = vpack.c.bf16 %v5893_v40, %v5890_v5  ;;  %v25277_v53 = vsub.f32 %v5862_v2, %v5890_v5  ;;  %v6014_v17 = vand.u32 4294901760, %v6013_v16 }
0x145d   :  { %6560 = vmatprep.mubr.f32.mxu0 %v27689_v33 }
0x145e   :  { %22175 = vmatpush3.bf16.msra.mxu1 %v25267_v43  ;;  %v5991_v30 = vand.u32 4294901760, %v25277_v53  ;;  %v22189_v56 = vpack.c.bf16 %v6014_v17, %v6007_v58  ;;  %v22198_v62 = vpack.c.bf16 %v25279_v6, %v25277_v53  ;;  %v25385_v58 = vsub.f32 %v6453_v20, %v6488_v37 }
0x145f   :  { %22176 = vmatprep.subr.bf16.mxu1 %v27709_v49 }
0x1460   :  { %v5992_v11 = vsub.f32 %v25277_v53, %v5991_v30  ;;  %v22222_v44 = vpack.c.bf16 %v5998_v27, %v5991_v30  ;;  %v6452_v30 = vld [vmem:[#allocation4 + $0x120] sm:$0xff]  ;;  %v6454_v27 = vld [vmem:[#allocation4 + $0x130] sm:$0xff] }
0x1462   :  { %22178 = vmatpush3.bf16.msra.mxu1 %v25281_v29  ;;  %v5993_v22 = vand.u32 4294901760, %v5992_v11  ;;  %v6494_v11 = vand.u32 4294901760, %v6454_v27 }
0x1463   :  { %22179 = vmatprep.subr.bf16.mxu1 %v27709_v49 }
0x1464   :  { %v22186_v36 = vpack.c.bf16 %v6000_v15, %v5993_v22  ;;  %v25379_v15 = vsub.f32 %v6448_v23, %v6482_v12 }
0x152f   :  { %v5852_v24 = vpop.f32.mrb[10].mxu0 }
0x1530   :  { %v23424_v4 = vadd.f32 %v18718_v26, %v5852_v24  ;;  %v20168_v2 = vpop.f32.mrb[11].mxu0  ;;  %v6498_v26 = vand.u32 4294901760, %v6456_v28 }
0x1532   :  { %v5856_v45 = vmax.f32 %v23424_v4, 0.0 }
0x1534   :  { %v5875_v5 = vsel %vm958_vm10, %v5856_v45, 0  ;;  %v6462_v45 = vld [vmem:[#allocation4 + $0x170] sm:$0xff] }
0x1535   :  { %v5950_v40 = vand.u32 4294901760, %v5875_v5 }
0x1537   :  { %v5951_v14 = vsub.f32 %v5875_v5, %v5950_v40 }
0x1539   :  { %v5952_v41 = vand.u32 4294901760, %v5951_v14 }
0x153b   :  { %v5953_v18 = vsub.f32 %v5951_v14, %v5952_v41 }
0x153d   :  { %v5954_v55 = vand.u32 4294901760, %v5953_v18 }
0x153f   :  { %20186 = vmatmul.mubr.f32.vlgmr.msra.gmra.mrb[8].mxu1 %v5954_v55  ;;  %v25405_v55 = vsub.f32 %v6456_v28, %v6498_v26 }
0x1540   :  { %22181 = vmatpush3.bf16.msra.mxu1 %v22180_v25  ;;  %20204 = vmatprep.mubr.msk.f32.mxu1 %vm23937_vm11, %v27689_v33  ;;  %v6455_v25 = vld [vmem:[#allocation4 + $0x138] sm:$0xff] }
0x1541   :  { %22182 = vmatprep.subr.bf16.mxu1 %v27709_v49  ;;  %v6492_v52 = vand.u32 4294901760, %v6455_v25 }
0x1543   :  { %v25383_v16 = vpack.c.bf16 %v6492_v52, %v6488_v37  ;;  %v25387_v17 = vsub.f32 %v6455_v25, %v6492_v52  ;;  %v6598_v37 = vand.u32 4294901760, %v25385_v58 }
0x1544   :  { %22184 = vmatpush3.bf16.msra.mxu1 %v22183_v3  ;;  %v6490_v3 = vand.u32 4294901760, %v6452_v30 }
0x1545   :  { %22185 = vmatprep.subr.bf16.mxu1 %v27709_v49  ;;  %v6610_v52 = vand.u32 4294901760, %v25387_v17 }
0x1548   :  { %22187 = vmatpush3.bf16.msra.mxu1 %v22186_v36  ;;  %v6459_v36 = vld [vmem:[#allocation4 + $0x158] sm:$0xff] }
0x1549   :  { %22188 = vmatprep.subr.bf16.mxu1 %v27709_v49 }
0x154c   :  { %22190 = vmatpush3.bf16.msra.mxu1 %v22189_v56  ;;  %v25389_v56 = vpack.c.bf16 %v6494_v11, %v6490_v3 }
0x154d   :  { %22191 = vmatprep.subr.bf16.mxu1 %v27709_v49 }
0x154f   :  { %20205 = vmatmul.mubr.f32.vlgmr.msra.gmra.mrb[8].mxu1 %v5950_v40 }
0x1550   :  { %22193 = vmatpush3.bf16.msra.mxu1 %v22192_v54  ;;  %20223 = vmatprep.mubr.msk.f32.mxu1 %vm23937_vm11, %v27689_v33  ;;  %v6458_v54 = vld [vmem:[#allocation4 + $0x150] sm:$0xff] }
0x1551   :  { %22194 = vmatprep.subr.bf16.mxu1 %v27709_v49  ;;  %v6502_v24 = vand.u32 4294901760, %v6458_v54 }
0x1553   :  { %v25403_v18 = vpack.c.bf16 %v6502_v24, %v6498_v26 }
0x1554   :  { %22196 = vmatpush3.bf16.msra.mxu1 %v22195_v38  ;;  %v6461_v38 = vld [vmem:[#allocation4 + $0x168] sm:$0xff] }
0x1555   :  { %22197 = vmatprep.subr.bf16.mxu1 %v27709_v49  ;;  %v6504_v4 = vand.u32 4294901760, %v6461_v38 }
0x1558   :  { %22199 = vmatpush3.bf16.msra.mxu1 %v22198_v62  ;;  %v6463_v62 = vld [vmem:[#allocation4 + $0x178] sm:$0xff] }
0x1559   :  { %22200 = vmatprep.subr.bf16.mxu1 %v27709_v49  ;;  %v6508_v2 = vand.u32 4294901760, %v6463_v62 }
0x155c   :  { %22202 = vmatpush3.bf16.msra.mxu1 %v22201_v39  ;;  %v25391_v39 = vsub.f32 %v6452_v30, %v6490_v3 }
0x155d   :  { %22203 = vmatprep.subr.bf16.mxu1 %v27709_v49 }
0x155e   :  { %v6604_v30 = vand.u32 4294901760, %v25391_v39 }
0x155f   :  { %20224 = vmatmul.mubr.f32.vlgmr.msra.gmra.mrb[8].mxu1 %v5951_v14 }
0x1560   :  { %22205 = vmatpush3.bf16.msra.mxu1 %v25255_v51  ;;  %20242 = vmatprep.mubr.msk.f32.mxu1 %vm23937_vm11, %v27689_v33  ;;  %v6605_v28 = vsub.f32 %v25391_v39, %v6604_v30 }
0x1561   :  { %22206 = vmatprep.subr.bf16.mxu1 %v27709_v49 }
0x1564   :  { %22208 = vmatpush3.bf16.msra.mxu1 %v25259_v9 }
0x1565   :  { %22209 = vmatprep.subr.bf16.mxu1 %v27709_v49 }
0x1568   :  { %22211 = vmatpush3.bf16.msra.mxu1 %v25267_v43 }
0x1569   :  { %22212 = vmatprep.subr.bf16.mxu1 %v27709_v49 }
0x156c   :  { %22214 = vmatpush3.bf16.msra.mxu1 %v25281_v29 }
0x156d   :  { %22215 = vmatprep.subr.bf16.mxu1 %v27709_v49 }
0x156f   :  { %20243 = vmatmul.mubr.f32.vlgmr.msra.gmra.mrb[8].mxu1 %v5952_v41 }
0x1570   :  { %22217 = vmatpush3.bf16.msra.mxu1 %v22216_v47  ;;  %20261 = vmatprep.mubr.msk.f32.mxu1 %vm23937_vm11, %v27689_v33  ;;  %v25393_v47 = vsub.f32 %v6454_v27, %v6494_v11 }
0x1571   :  { %22218 = vmatprep.subr.bf16.mxu1 %v27709_v49 }
0x1572   :  { %v6616_v27 = vand.u32 4294901760, %v25393_v47 }
0x1574   :  { %22220 = vmatpush3.bf16.msra.mxu1 %v22219_v19  ;;  %v6496_v19 = vand.u32 4294901760, %v6457_v8 }
0x1575   :  { %22221 = vmatprep.subr.bf16.mxu1 %v27709_v49 }
0x1578   :  { %22223 = vmatpush3.bf16.msra.mxu1 %v22222_v44  ;;  %v6500_v44 = vand.u32 4294901760, %v6459_v36 }
0x1579   :  { %22224 = vmatprep.subr.bf16.mxu1 %v27709_v49 }
0x157a   :  { %v25397_v5 = vpack.c.bf16 %v6500_v44, %v6496_v19  ;;  %v25401_v14 = vsub.f32 %v6459_v36, %v6500_v44  ;;  %v6611_v36 = vsub.f32 %v25387_v17, %v6610_v52 }
0x157c   :  { %22226 = vmatpush3.bf16.msra.mxu1 %v22225_v21  ;;  %v6460_v21 = vld [vmem:[#allocation4 + $0x160] sm:$0xff]  ;;  %v6612_v44 = vand.u32 4294901760, %v6611_v36 }
0x157d   :  { %22227 = vmatprep.subr.bf16.mxu1 %v27709_v49  ;;  %v6506_v41 = vand.u32 4294901760, %v6460_v21 }
0x157f   :  { %20262 = vmatmul.mubr.f32.vlgmr.msra.gmra.mrb[8].mxu1 %v5950_v40 }
0x1580   :  { %22229 = vmatpush3.bf16.msra.mxu1 %v25255_v51  ;;  %20280 = vmatprep.mubr.msk.f32.mxu1 %vm23937_vm11, %v27689_v33  ;;  %v18720_v51 = vld [vmem:[%s27618_s12 + $0x1] ss:$0 sm:$0xff] }
0x1581   :  { %22230 = vmatprep.subr.bf16.mxu1 %v27709_v49 }
0x1584   :  { %22232 = vmatpush3.bf16.msra.mxu1 %v25259_v9 }
0x1585   :  { %22233 = vmatprep.subr.bf16.mxu1 %v27709_v49 }
0x1588   :  { %22235 = vmatpush3.bf16.msra.mxu1 %v25267_v43 }
0x1589   :  { %22236 = vmatprep.subr.bf16.mxu1 %v27709_v49 }
0x158c   :  { %22238 = vmatpush3.bf16.msra.mxu1 %v25281_v29 }
0x158d   :  { %20283 = vmatprep.subr.mxu1 %v27689_v33 }
0x158f   :  { %20281 = vmatmul.mubr.f32.vlgmr.msra.gmra.mrb[8].mxu1 %v5950_v40  ;;  %v25399_v40 = vsub.f32 %v6457_v8, %v6496_v19  ;;  %v6599_v8 = vsub.f32 %v25385_v58, %v6598_v37 }
0x1590   :  { %20285 = vmatprep.mubr.msk.f32.mxu1 %vm23937_vm11, %v27689_v33 }
0x1591   :  { %v6600_v19 = vand.u32 4294901760, %v6599_v8 }
0x1662   :  { %v6410_v1 = vpop.f32.mrb[8].mxu1 }
0x1663   :  { %v23425_v9 = vadd.f32 %v18720_v51, %v6410_v1  ;;  %v20282_v57 = vpop.f32.mrb[9].mxu1  ;;  %v25407_v51 = vsub.f32 %v6458_v54, %v6502_v24  ;;  %v25409_v1 = vpack.c.bf16 %v6508_v2, %v6504_v4  ;;  %v6617_v54 = vsub.f32 %v25393_v47, %v6616_v27 }
0x1664   :  { %v25414_v57 = vsub.f32 %v6463_v62, %v6508_v2  ;;  %v6634_v62 = vand.u32 4294901760, %v25401_v14  ;;  %v6628_v2 = vand.u32 4294901760, %v25405_v55 }
0x1665   :  { %v6414_v48 = vmax.f32 %v23425_v9, 0.0  ;;  %v25412_v9 = vsub.f32 %v6461_v38, %v6504_v4  ;;  %v6622_v38 = vand.u32 4294901760, %v25399_v40  ;;  %v6618_v26 = vand.u32 4294901760, %v6617_v54 }
0x1666   :  { %v6635_v4 = vsub.f32 %v25401_v14, %v6634_v62 }
0x1667   :  { %v25359_v43 = vadd.f32 %v25147_v35, %v6414_v48  ;;  %v6484_v35 = vand.u32 4294901760, %v6451_v10  ;;  %v6510_v48 = vand.u32 4294901760, %v6462_v45  ;;  %v6623_v24 = vsub.f32 %v25399_v40, %v6622_v38 }
0x1669   :  { %v6420_v34 = vsel %vm439_vm9, %v25359_v43, 0.0  ;;  %v25369_v13 = vpack.c.bf16 %v6484_v35, %v6480_v0  ;;  %v25377_v22 = vsub.f32 %v6451_v10, %v6484_v35  ;;  %v25423_v7 = vpack.c.bf16 %v6510_v48, %v6506_v41 }
0x166a   :  { %6421 = vadd.xlane.f32.xlu1 %v6420_v34  ;;  %v25416_v34 = vsub.f32 %v6460_v21, %v6506_v41  ;;  %v25425_v10 = vsub.f32 %v6462_v45, %v6510_v48  ;;  %v6606_v21 = vand.u32 4294901760, %v6605_v28  ;;  %v6640_v45 = vand.u32 4294901760, %v25407_v51 }
0x166b   :  { %22240 = vmatprep.subr.bf16.mxu0 %v25369_v13  ;;  %v22259_v41 = vpack.c.bf16 %v6612_v44, %v6600_v19 }
0x166c   :  { %22242 = vmatpush1.bf16.msra.mxu0 %v25371_v42  ;;  %v22261_v48 = vpack.c.bf16 %v6618_v26, %v6606_v21 }
0x166d   :  { %22244 = vmatprep.subr.bf16.mxu0 %v25383_v16 }
0x1670   :  { %22246 = vmatpush1.bf16.msra.mxu0 %v25389_v56 }
0x1671   :  { %22248 = vmatprep.subr.bf16.mxu0 %v25397_v5 }
0x1674   :  { %22250 = vmatpush1.bf16.msra.mxu0 %v25403_v18 }
0x1675   :  { %22252 = vmatprep.subr.bf16.mxu0 %v25409_v1 }
0x1678   :  { %22254 = vmatpush1.bf16.msra.mxu0 %v25423_v7 }
0x16f7   :  { %v6422_v63 = vpop.xlane.xlu1 %6421 }
0x16f8   :  { %v6423_v60 = vmul.f32 0.015625, %v6422_v63  ;;  %v6574_v63 = vand.u32 4294901760, %v25375_v32 }
0x16fa   :  { %v25364_v53 = vsub.f32 %v25359_v43, %v6423_v60  ;;  %v27645_v60 = vand.u32 4294901760, %v25377_v22  ;;  %v6575_v0 = vsub.f32 %v25375_v32, %v6574_v63 }
0x16fc   :  { %v6425_v6 = vmul.f32 %v25364_v53, %v25364_v53  ;;  %v6587_v35 = vsub.f32 %v25377_v22, %v27645_v60  ;;  %v6576_v12 = vand.u32 4294901760, %v6575_v0  ;;  %v6624_v0 = vand.u32 4294901760, %v6623_v24 }
0x16fe   :  { %v6426_v29 = vsel %vm439_vm9, %v6425_v6, 0.0  ;;  %v27644_v6 = vand.u32 4294901760, %v25379_v15  ;;  %v6588_v46 = vand.u32 4294901760, %v6587_v35  ;;  %v6636_v35 = vand.u32 4294901760, %v6635_v4 }
0x16ff   :  { %6427 = vadd.xlane.f32.xlu1 %v6426_v29  ;;  %v27643_v29 = vand.u32 4294901760, %v25381_v61 }
0x1700   :  { %v6581_v23 = vsub.f32 %v25379_v15, %v27644_v6  ;;  %v22255_v3 = vpack.c.bf16 %v6588_v46, %v6576_v12  ;;  %v6646_v12 = vand.u32 4294901760, %v25412_v9  ;;  %v6658_v46 = vand.u32 4294901760, %v25414_v57 }
0x1701   :  { %v6593_v59 = vsub.f32 %v25381_v61, %v27643_v29 }
0x1702   :  { %v6582_v20 = vand.u32 4294901760, %v6581_v23  ;;  %22256 = vmatprep.subr.bf16.mxu0 %v22255_v3  ;;  %v6629_v23 = vsub.f32 %v25405_v55, %v6628_v2  ;;  %v22263_v3 = vpack.c.bf16 %v6636_v35, %v6624_v0  ;;  %v6647_v28 = vsub.f32 %v25412_v9, %v6646_v12 }
0x1703   :  { %v6594_v25 = vand.u32 4294901760, %v6593_v59  ;;  %v6641_v59 = vsub.f32 %v25407_v51, %v6640_v45  ;;  %v6659_v54 = vsub.f32 %v25414_v57, %v6658_v46  ;;  %v22271_v0 = vpack.c.bf16 %v25377_v22, %v25375_v32  ;;  %v25494_v32 = vld [vmem:[%s27611_s5 + $0x2] ss:$0 sm:$0xff] }
0x1704   :  { %v6630_v8 = vand.u32 4294901760, %v6629_v23  ;;  %v6648_v26 = vand.u32 4294901760, %v6647_v28  ;;  %v22273_v35 = vpack.c.bf16 %v25381_v61, %v25379_v15  ;;  %v22275_v23 = vpack.c.bf16 %v25387_v17, %v25385_v58 }
0x1705   :  { %v25445_v11 = vpack.c.bf16 %v6594_v25, %v6582_v20  ;;  %v6652_v20 = vand.u32 4294901760, %v25416_v34  ;;  %v6664_v25 = vand.u32 4294901760, %v25425_v10  ;;  %v6642_v36 = vand.u32 4294901760, %v6641_v59 }
0x1706   :  { %v6660_v24 = vand.u32 4294901760, %v6659_v54  ;;  %v22277_v59 = vpack.c.bf16 %v25393_v47, %v25391_v39  ;;  %v22285_v28 = vpack.c.bf16 %v25425_v10, %v25416_v34  ;;  %v27710_v54 = vand.u32 4294901760, %v25377_v22 }
0x1707   :  { %v6653_v19 = vsub.f32 %v25416_v34, %v6652_v20  ;;  %v6665_v44 = vsub.f32 %v25425_v10, %v6664_v25  ;;  %v22265_v21 = vpack.c.bf16 %v6642_v36, %v6630_v8  ;;  %v22279_v8 = vpack.c.bf16 %v25401_v14, %v25399_v40 }
0x1708   :  { %v22267_v6 = vpack.c.bf16 %v6660_v24, %v6648_v26  ;;  %v22281_v36 = vpack.c.bf16 %v25407_v51, %v25405_v55  ;;  %v22303_v58 = vpack.c.bf16 %v27710_v54, %v6574_v63  ;;  %v27711_v17 = vand.u32 4294901760, %v25379_v15  ;;  %v25500_v15 = vld [vmem:[%s27612_s6 + $0x2] ss:$0 sm:$0xff] }
0x1709   :  { %v6654_v4 = vand.u32 4294901760, %v6653_v19  ;;  %v6666_v29 = vand.u32 4294901760, %v6665_v44  ;;  %v27712_v39 = vand.u32 4294901760, %v25381_v61  ;;  %v22307_v40 = vpack.c.bf16 %v6610_v52, %v6598_v37 }
0x170a   :  { %v22309_v14 = vpack.c.bf16 %v6616_v27, %v6604_v30  ;;  %v22311_v19 = vpack.c.bf16 %v6634_v62, %v6622_v38  ;;  %v22313_v55 = vpack.c.bf16 %v6640_v45, %v6628_v2  ;;  %v22315_v51 = vpack.c.bf16 %v6658_v46, %v6646_v12 }
0x170b   :  { %v22269_v60 = vpack.c.bf16 %v6666_v29, %v6654_v4  ;;  %v22283_v29 = vpack.c.bf16 %v25414_v57, %v25412_v9  ;;  %v22305_v47 = vpack.c.bf16 %v27712_v39, %v27711_v17  ;;  %v22317_v44 = vpack.c.bf16 %v6664_v25, %v6652_v20 }
0x178c   :  { %v6428_v9 = vpop.xlane.xlu1 %6427 }
0x178d   :  { %v6429_v57 = vmul.f32 0.015625, %v6428_v9 }
0x178f   :  { %v6430_v26 = vadd.f32 1e-06, %v6429_v57 }
0x1791   :  { %23796 = vrsqrt.f32 %v6430_v26 }
0x179b   :  { %v23797_v34 = vpop.eup %23796 }
0x179c   :  { %v6432_v22 = vmul.f32 %v23797_v34, %v25364_v53  ;;  %v18725_v53 = vld [vmem:[%s27614_s8 + $0x4] sm:$0x3] }
0x179d   :  { %v6474_v46 = vrot.slane %v18725_v53, %v27705_v31 }
0x179e   :  { %v6439_v61 = vmul.f32 %v25494_v32, %v6432_v22 }
0x17a0   :  { %v6446_v63 = vadd.f32 %v25500_v15, %v6439_v61 }
0x17a2   :  { %v6478_v10 = vsel %vm958_vm10, %v6446_v63, 0 }
0x17a3   :  { %v6561_v37 = vand.u32 4294901760, %v6478_v10 }
0x17a5   :  { %v6562_v52 = vsub.f32 %v6478_v10, %v6561_v37 }
0x17a7   :  { %v6563_v30 = vand.u32 4294901760, %v6562_v52 }
0x17a9   :  { %v6564_v27 = vsub.f32 %v6562_v52, %v6563_v30 }
0x17ab   :  { %v6565_v38 = vand.u32 4294901760, %v6564_v27 }
0x17ad   :  { %6566 = vmatmul.mubr.f32.vlgmr.msra.gmra.mrb[12].mxu0 %v6565_v38 }
0x17ae   :  { %22258 = vmatpush1.bf16.msra.mxu0 %v25445_v11  ;;  %6716 = vmatprep.mubr.f32.mxu0 %v27689_v33 }
0x17af   :  { %22260 = vmatprep.subr.bf16.mxu0 %v22259_v41 }
0x17b2   :  { %22262 = vmatpush1.bf16.msra.mxu0 %v22261_v48 }
0x17b3   :  { %22264 = vmatprep.subr.bf16.mxu0 %v22263_v3 }
0x17b6   :  { %22266 = vmatpush1.bf16.msra.mxu0 %v22265_v21 }
0x17b7   :  { %22268 = vmatprep.subr.bf16.mxu0 %v22267_v6 }
0x17ba   :  { %22270 = vmatpush1.bf16.msra.mxu0 %v22269_v60 }
0x17bb   :  { %22272 = vmatprep.subr.bf16.mxu0 %v22271_v0 }
0x17bd   :  { %6718 = vmatmul.mubr.f32.vlgmr.msra.gmra.mrb[12].mxu0 %v6561_v37 }
0x17be   :  { %22274 = vmatpush1.bf16.msra.mxu0 %v22273_v35  ;;  %6820 = vmatprep.mubr.f32.mxu0 %v27689_v33 }
0x17bf   :  { %22276 = vmatprep.subr.bf16.mxu0 %v22275_v23 }
0x17c2   :  { %22278 = vmatpush1.bf16.msra.mxu0 %v22277_v59 }
0x17c3   :  { %22280 = vmatprep.subr.bf16.mxu0 %v22279_v8 }
0x17c6   :  { %22282 = vmatpush1.bf16.msra.mxu0 %v22281_v36 }
0x17c7   :  { %22284 = vmatprep.subr.bf16.mxu0 %v22283_v29 }
0x17ca   :  { %22286 = vmatpush1.bf16.msra.mxu0 %v22285_v28 }
0x17cb   :  { %22288 = vmatprep.subr.bf16.mxu0 %v25369_v13 }
0x17cd   :  { %6823 = vmatmul.mubr.f32.vlgmr.msra.gmra.mrb[12].mxu0 %v6562_v52  ;;  %v8060_v52 = vld [vmem:[#allocation7 + $0x80] sm:$0xff] }
0x17ce   :  { %22290 = vmatpush1.bf16.msra.mxu0 %v25371_v42  ;;  %6909 = vmatprep.mubr.f32.mxu0 %v27689_v33 }
0x17cf   :  { %22292 = vmatprep.subr.bf16.mxu0 %v25383_v16 }
0x17d2   :  { %22294 = vmatpush1.bf16.msra.mxu0 %v25389_v56 }
0x17d3   :  { %22296 = vmatprep.subr.bf16.mxu0 %v25397_v5 }
0x17d6   :  { %22298 = vmatpush1.bf16.msra.mxu0 %v25403_v18 }
0x17d7   :  { %22300 = vmatprep.subr.bf16.mxu0 %v25409_v1 }
0x17da   :  { %22302 = vmatpush1.bf16.msra.mxu0 %v25423_v7 }
0x17db   :  { %22304 = vmatprep.subr.bf16.mxu0 %v22303_v58 }
0x17dd   :  { %6913 = vmatmul.mubr.f32.vlgmr.msra.gmra.mrb[12].mxu0 %v6563_v30  ;;  %v8061_v30 = vld [vmem:[#allocation7 + $0x88] sm:$0xff] }
0x17de   :  { %22306 = vmatpush1.bf16.msra.mxu0 %v22305_v47  ;;  %7031 = vmatprep.mubr.f32.mxu0 %v27689_v33  ;;  %v8083_v27 = vand.u32 4294901760, %v8061_v30 }
0x17df   :  { %22308 = vmatprep.subr.bf16.mxu0 %v22307_v40 }
0x17e2   :  { %22310 = vmatpush1.bf16.msra.mxu0 %v22309_v14 }
0x17e3   :  { %22312 = vmatprep.subr.bf16.mxu0 %v22311_v19 }
0x17e6   :  { %22314 = vmatpush1.bf16.msra.mxu0 %v22313_v55 }
0x17e7   :  { %22316 = vmatprep.subr.bf16.mxu0 %v22315_v51 }
0x17ea   :  { %22318 = vmatpush1.bf16.msra.mxu0 %v22317_v44 }
0x17eb   :  { %22320 = vmatprep.subr.bf16.mxu0 %v25369_v13  ;;  %v6470_v13 = vrot.slane %v18725_v53, %v27704_v50  ;;  %v8062_v53 = vld [vmem:[#allocation7 + $0x90] sm:$0xff] }
0x17ed   :  { %7033 = vmatmul.mubr.f32.vlgmr.msra.gmra.mrb[12].mxu0 %v6561_v37 }
0x17ee   :  { %22322 = vmatpush1.bf16.msra.mxu0 %v25371_v42  ;;  %7119 = vmatprep.mubr.f32.mxu0 %v27689_v33 }
0x17ef   :  { %22324 = vmatprep.subr.bf16.mxu0 %v25383_v16 }
0x17f2   :  { %22326 = vmatpush1.bf16.msra.mxu0 %v25389_v56 }
0x17f3   :  { %22328 = vmatprep.subr.bf16.mxu0 %v25397_v5 }
0x17f6   :  { %22330 = vmatpush1.bf16.msra.mxu0 %v25403_v18 }
0x17f7   :  { %22332 = vmatprep.subr.bf16.mxu0 %v25409_v1 }
0x17fa   :  { %22334 = vmatpush1.bf16.msra.mxu0 %v25423_v7 }
0x17fb   :  { %22407 = vmatprep.subr.bf16.mxu0 %v27709_v49 }
0x17fd   :  { %7121 = vmatmul.mubr.f32.vlgmr.msra.gmra.mrb[12].mxu0 %v6561_v37 }
0x17fe   :  { %20473 = vmatprep.mubr.msk.f32.mxu0 %vm23937_vm11, %v27689_v33 }
0x18d0   :  { %v7122_v42 = vpop.f32.mrb[12].mxu0 }
0x18d1   :  { %v23426_v16 = vadd.f32 %v7122_v42, %v6470_v13  ;;  %v7124_v56 = vpop.f32.mrb[13].mxu0  ;;  %v8063_v13 = vld [vmem:[#allocation7 + $0x98] sm:$0xff] }
0x18d2   :  { %v23427_v20 = vadd.f32 %v7124_v56, %v6474_v46  ;;  %v8086_v56 = vand.u32 4294901760, %v8062_v53 }
0x18d3   :  { %7128 = vrot.lane.b32.xlu0 %v23426_v16, %s23938_s22  ;;  %v7130_v5 = vsel %vm958_vm10, %v23426_v16, 0  ;;  %v25594_v16 = vsub.f32 %v8061_v30, %v8083_v27 }
0x18d4   :  { %v7200_v18 = vand.u32 4294901760, %v7130_v5  ;;  %v7596_v25 = vsel %vm2078_vm12, %v23427_v20, 0 }
0x18d5   :  { %v7599_v3 = vand.u32 4294901760, %v7596_v25 }
0x18d6   :  { %v7201_v1 = vsub.f32 %v7130_v5, %v7200_v18  ;;  %v8089_v5 = vand.u32 4294901760, %v8063_v13 }
0x18d7   :  { %v7676_v54 = vsub.f32 %v7596_v25, %v7599_v3 }
0x18d8   :  { %v7202_v60 = vand.u32 4294901760, %v7201_v1 }
0x18d9   :  { %v7677_v47 = vand.u32 4294901760, %v7676_v54 }
0x18da   :  { %v7203_v11 = vsub.f32 %v7201_v1, %v7202_v60 }
0x18db   :  { %v7678_v19 = vsub.f32 %v7676_v54, %v7677_v47 }
0x18dc   :  { %v7204_v45 = vand.u32 4294901760, %v7203_v11  ;;  %v8067_v11 = vld [vmem:[#allocation7 + $0xb8] sm:$0xff] }
0x18dd   :  { %v7679_v44 = vand.u32 4294901760, %v7678_v19 }
0x1945   :  { %v7129_v6 = vpop.permute.xlu0 %7128 }
0x1946   :  { %v7132_v7 = vsel %vm958_vm10, %v7129_v6, 0 }
0x1947   :  { %v7135_v62 = vand.u32 4294901760, %v7132_v7 }
0x1949   :  { %v7212_v2 = vsub.f32 %v7132_v7, %v7135_v62  ;;  %20284 = vmatpush3.xpose.msra.mxu1 %v7135_v62 }
0x194a   :  { %20288 = vmatprep.subr.mxu1 %v27689_v33 }
0x194b   :  { %v7213_v41 = vand.u32 4294901760, %v7212_v2 }
0x194c   :  { %20286 = vmatmul.mubr.f32.vlgmr.msra.gmra.mrb[10].mxu1 %v7204_v45  ;;  %v25599_v45 = vsub.f32 %v8062_v53, %v8086_v56 }
0x194d   :  { %v7214_v48 = vsub.f32 %v7212_v2, %v7213_v41  ;;  %20290 = vmatprep.mubr.msk.f32.mxu1 %vm23937_vm11, %v27689_v33 }
0x194f   :  { %v7215_v12 = vand.u32 4294901760, %v7214_v48  ;;  %v8101_v48 = vand.u32 4294901760, %v8067_v11 }
0x1951   :  { %20289 = vmatpush3.xpose.msra.mxu1 %v7215_v12 }
0x1952   :  { %20293 = vmatprep.subr.mxu1 %v27689_v33 }
0x1954   :  { %20291 = vmatmul.mubr.f32.vlgmr.msra.gmra.mrb[10].mxu1 %v7200_v18 }
0x1955   :  { %20294 = vmatpush3.xpose.msra.mxu1 %v7212_v2  ;;  %20295 = vmatprep.mubr.msk.f32.mxu1 %vm23937_vm11, %v27689_v33  ;;  %v25597_v2 = vpack.c.bf16 %v8089_v5, %v8086_v56 }
0x1956   :  { %20298 = vmatprep.subr.mxu1 %v27689_v33 }
0x195c   :  { %20296 = vmatmul.mubr.f32.vlgmr.msra.gmra.mrb[10].mxu1 %v7201_v1  ;;  %v8065_v1 = vld [vmem:[#allocation7 + $0xa8] sm:$0xff] }
0x195d   :  { %20299 = vmatpush3.xpose.msra.mxu1 %v7135_v62  ;;  %20300 = vmatprep.mubr.msk.f32.mxu1 %vm23937_vm11, %v27689_v33  ;;  %v8095_v7 = vand.u32 4294901760, %v8065_v1 }
0x195e   :  { %20303 = vmatprep.subr.mxu1 %v27689_v33 }
0x195f   :  { %v25605_v46 = vsub.f32 %v8065_v1, %v8095_v7 }
0x1964   :  { %20301 = vmatmul.mubr.f32.vlgmr.msra.gmra.mrb[10].mxu1 %v7202_v60  ;;  %v8066_v60 = vld [vmem:[#allocation7 + $0xb0] sm:$0xff] }
0x1965   :  { %20304 = vmatpush3.xpose.msra.mxu1 %v7213_v41  ;;  %20305 = vmatprep.mubr.msk.f32.mxu1 %vm23937_vm11, %v27689_v33  ;;  %v25601_v41 = vsub.f32 %v8063_v13, %v8089_v5 }
0x1966   :  { %20308 = vmatprep.subr.mxu1 %v27689_v33 }
0x1967   :  { %v22363_v30 = vpack.c.bf16 %v25601_v41, %v25599_v45 }
0x196c   :  { %20306 = vmatmul.mubr.f32.vlgmr.msra.gmra.mrb[10].mxu1 %v7200_v18 }
0x196d   :  { %20309 = vmatpush3.xpose.msra.mxu1 %v7135_v62  ;;  %20310 = vmatprep.mubr.msk.f32.mxu1 %vm23937_vm11, %v27689_v33  ;;  %v8098_v62 = vand.u32 4294901760, %v8066_v60 }
0x196e   :  { %20313 = vmatprep.subr.mxu1 %v27689_v33 }
0x196f   :  { %v25607_v20 = vsub.f32 %v8066_v60, %v8098_v62 }
0x1974   :  { %20311 = vmatmul.mubr.f32.vlgmr.msra.gmra.mrb[10].mxu1 %v7200_v18  ;;  %v8064_v18 = vld [vmem:[#allocation7 + $0xa0] sm:$0xff] }
0x1975   :  { %20314 = vmatpush3.msra.mxu1 %v7599_v3  ;;  %20315 = vmatprep.mubr.msk.f32.mxu1 %vm23937_vm11, %v27689_v33  ;;  %v8092_v6 = vand.u32 4294901760, %v8064_v18 }
0x1976   :  { %20318 = vmatprep.subr.mxu1 %v27689_v33 }
0x1977   :  { %v25603_v12 = vsub.f32 %v8064_v18, %v8092_v6  ;;  %v25610_v25 = vpack.c.bf16 %v8095_v7, %v8092_v6 }
0x1a47   :  { %v7576_v21 = vpop.f32.mrb[10].mxu1 }
0x1a48   :  { %v7580_v24 = vmul.f32 0.015625, %v7576_v21  ;;  %v20312_v4 = vpop.f32.mrb[11].mxu1  ;;  %v25616_v21 = vpack.c.bf16 %v8101_v48, %v8098_v62 }
0x1a49   :  { %v8172_v4 = vand.u32 4294901760, %v25594_v16 }
0x1a4a   :  { %v7581_v0 = vsel %vm2062_vm13, %v7580_v24, -inf }
0x1a4b   :  { %7582 = vmax.xlane.f32.xlu1 %v7581_v0 }
0x1ad8   :  { %v7583_v35 = vpop.xlane.xlu1 %7582 }
0x1ad9   :  { %v7584_v23 = vsub.f32 %v7580_v24, %v7583_v35  ;;  %v8173_v35 = vsub.f32 %v25594_v16, %v8172_v4 }
0x1adb   :  { %v7585_v59 = vmul.f32 1.442695, %v7584_v23 }
0x1add   :  { %23798 = vpow2.f32 %v7585_v59  ;;  %v8174_v59 = vand.u32 4294901760, %v8173_v35 }
0x1ae7   :  { %v23799_v8 = vpop.eup %23798 }
0x1ae8   :  { %v7587_v36 = vsel %vm2062_vm13, %v23799_v8, 0.0 }
0x1ae9   :  { %7588 = vadd.xlane.f32.xlu0 %v7587_v36  ;;  %v8186_v36 = vand.u32 4294901760, %v25601_v41 }
0x1b76   :  { %v7589_v29 = vpop.xlane.xlu0 %7588 }
0x1b77   :  { %23800 = vrcp.f32 %v7589_v29 }
0x1b81   :  { %v23801_v28 = vpop.eup %23800 }
0x1b82   :  { %v7591_v58 = vmul.f32 %v23801_v28, %v23799_v8  ;;  %v8179_v8 = vand.u32 4294901760, %v25599_v45 }
0x1b84   :  { %v7593_v17 = vsel %vm2074_vm14, %v7591_v58, 0  ;;  %v8180_v28 = vsub.f32 %v25599_v45, %v8179_v8  ;;  %v22387_v13 = vpack.c.bf16 %v8186_v36, %v8179_v8 }
0x1b85   :  { %v7664_v39 = vand.u32 4294901760, %v7593_v17 }
0x1b86   :  { %v8181_v58 = vand.u32 4294901760, %v8180_v28 }
0x1b87   :  { %v7665_v40 = vsub.f32 %v7593_v17, %v7664_v39 }
0x1b89   :  { %v7666_v14 = vand.u32 4294901760, %v7665_v40 }
0x1b8b   :  { %v7667_v55 = vsub.f32 %v7665_v40, %v7666_v14 }
0x1b8d   :  { %v7668_v51 = vand.u32 4294901760, %v7667_v55 }
0x1b8f   :  { %20316 = vmatmul.mubr.f32.vlgmr.msra.gmra.mrb[12].mxu1 %v7668_v51 }
0x1b90   :  { %20319 = vmatpush3.msra.mxu1 %v7679_v44  ;;  %20320 = vmatprep.mubr.msk.f32.mxu1 %vm23937_vm11, %v27689_v33  ;;  %v8207_v44 = vand.u32 4294901760, %v25607_v20 }
0x1b91   :  { %20323 = vmatprep.subr.mxu1 %v27689_v33 }
0x1b97   :  { %20321 = vmatmul.mubr.f32.vlgmr.msra.gmra.mrb[12].mxu1 %v7664_v39 }
0x1b98   :  { %20324 = vmatpush3.msra.mxu1 %v7676_v54  ;;  %20325 = vmatprep.mubr.msk.f32.mxu1 %vm23937_vm11, %v27689_v33  ;;  %v8187_v54 = vsub.f32 %v25601_v41, %v8186_v36  ;;  %v8624_v36 = vld [vmem:[#allocation9 + $0xb0] sm:$0xff] }
0x1b99   :  { %20328 = vmatprep.subr.mxu1 %v27689_v33  ;;  %v8656_v28 = vand.u32 4294901760, %v8624_v36 }
0x1b9a   :  { %v8188_v17 = vand.u32 4294901760, %v8187_v54 }
0x1b9f   :  { %20326 = vmatmul.mubr.f32.vlgmr.msra.gmra.mrb[12].mxu1 %v7665_v40  ;;  %v22351_v40 = vpack.c.bf16 %v8188_v17, %v8181_v58 }
0x1ba0   :  { %20329 = vmatpush3.msra.mxu1 %v7599_v3  ;;  %20330 = vmatprep.mubr.msk.f32.mxu1 %vm23937_vm11, %v27689_v33 }
0x1ba1   :  { %20333 = vmatprep.subr.mxu1 %v27689_v33 }
0x1ba7   :  { %20331 = vmatmul.mubr.f32.vlgmr.msra.gmra.mrb[12].mxu1 %v7666_v14 }
0x1ba8   :  { %20334 = vmatpush3.msra.mxu1 %v7677_v47  ;;  %20335 = vmatprep.mubr.msk.f32.mxu1 %vm23937_vm11, %v27689_v33  ;;  %v8200_v47 = vand.u32 4294901760, %v25605_v46 }
0x1ba9   :  { %20338 = vmatprep.subr.mxu1 %v27689_v33 }
0x1baa   :  { %v8201_v19 = vsub.f32 %v25605_v46, %v8200_v47 }
0x1bac   :  { %v8202_v51 = vand.u32 4294901760, %v8201_v19 }
0x1baf   :  { %20336 = vmatmul.mubr.f32.vlgmr.msra.gmra.mrb[12].mxu1 %v7664_v39 }
0x1bb0   :  { %20339 = vmatpush3.msra.mxu1 %v7599_v3  ;;  %20340 = vmatprep.mubr.msk.f32.mxu1 %vm23937_vm11, %v27689_v33  ;;  %v25612_v3 = vsub.f32 %v8067_v11, %v8101_v48 }
0x1bb1   :  { %22335 = vmatprep.subr.bf16.mxu1 %v27709_v49 }
0x1bb7   :  { %20341 = vmatmul.mubr.f32.vlgmr.msra.gmra.mrb[12].mxu1 %v7664_v39  ;;  %v8193_v39 = vand.u32 4294901760, %v25603_v12 }
0x1bb8   :  { %20359 = vmatprep.mubr.msk.f32.mxu1 %vm23937_vm11, %v27689_v33 }
0x1bb9   :  { %v8194_v14 = vsub.f32 %v25603_v12, %v8193_v39  ;;  %v22390_v56 = vpack.c.bf16 %v8200_v47, %v8193_v39 }
0x1bbb   :  { %v8195_v55 = vand.u32 4294901760, %v8194_v14 }
0x1c8a   :  { %v8040_v9 = vpop.f32.mrb[12].mxu1 }
0x1c8b   :  { %v25579_v57 = vadd.f32 %v8040_v9, %v25359_v43  ;;  %v20342_v26 = vpop.f32.mrb[13].mxu1  ;;  %v8080_v43 = vand.u32 4294901760, %v8060_v52  ;;  %v8214_v9 = vand.u32 4294901760, %v25612_v3 }
0x1c8c   :  { %v22354_v26 = vpack.c.bf16 %v8202_v51, %v8195_v55  ;;  %v25715_v55 = vsub.f32 %v8624_v36, %v8656_v28 }
0x1c8d   :  { %v8044_v34 = vsel %vm439_vm9, %v25579_v57, 0.0  ;;  %v25589_v38 = vpack.c.bf16 %v8083_v27, %v8080_v43  ;;  %v25592_v42 = vsub.f32 %v8060_v52, %v8080_v43  ;;  %v22366_v43 = vpack.c.bf16 %v25605_v46, %v25603_v12 }
0x1c8e   :  { %8045 = vadd.xlane.f32.xlu1 %v8044_v34  ;;  %v8208_v34 = vsub.f32 %v25607_v20, %v8207_v44  ;;  %v22369_v27 = vpack.c.bf16 %v25612_v3, %v25607_v20  ;;  %v22393_v5 = vpack.c.bf16 %v8214_v9, %v8207_v44  ;;  %v8620_v20 = vld [vmem:[#allocation9 + $0x90] sm:$0xff] }
0x1c8f   :  { %22337 = vmatpush3.bf16.msra.mxu1 %v25589_v38  ;;  %v8165_v24 = vand.u32 4294901760, %v25592_v42  ;;  %v22360_v52 = vpack.c.bf16 %v25594_v16, %v25592_v42 }
0x1c90   :  { %22338 = vmatprep.subr.bf16.mxu1 %v27709_v49 }
0x1c91   :  { %v8166_v0 = vsub.f32 %v25592_v42, %v8165_v24  ;;  %v22384_v53 = vpack.c.bf16 %v8172_v4, %v8165_v24  ;;  %v8623_v4 = vld [vmem:[#allocation9 + $0xa8] sm:$0xff] }
0x1c92   :  { %v8653_v35 = vand.u32 4294901760, %v8623_v4 }
0x1c93   :  { %22340 = vmatpush3.bf16.msra.mxu1 %v25597_v2  ;;  %v8167_v23 = vand.u32 4294901760, %v8166_v0 }
0x1c94   :  { %22341 = vmatprep.subr.bf16.mxu1 %v27709_v49  ;;  %v25711_v14 = vsub.f32 %v8623_v4, %v8653_v35 }
0x1c95   :  { %v22348_v29 = vpack.c.bf16 %v8174_v59, %v8167_v23 }
0x1c97   :  { %22343 = vmatpush3.bf16.msra.mxu1 %v25610_v25 }
0x1c98   :  { %22344 = vmatprep.subr.bf16.mxu1 %v27709_v49 }
0x1c9b   :  { %22346 = vmatpush3.bf16.msra.mxu1 %v25616_v21 }
0x1c9c   :  { %22347 = vmatprep.subr.bf16.mxu1 %v27709_v49 }
0x1d1b   :  { %v8046_v22 = vpop.xlane.xlu1 %8045 }
0x1d1c   :  { %v8047_v61 = vmul.f32 0.015625, %v8046_v22  ;;  %v8215_v22 = vsub.f32 %v25612_v3, %v8214_v9  ;;  %v8621_v3 = vld [vmem:[#allocation9 + $0x98] sm:$0xff] }
0x1d1d   :  { %v8647_v24 = vand.u32 4294901760, %v8621_v3 }
0x1d1e   :  { %v25584_v63 = vsub.f32 %v25579_v57, %v8047_v61  ;;  %v8209_v61 = vand.u32 4294901760, %v8208_v34 }
0x1d1f   :  { %v25707_v47 = vsub.f32 %v8621_v3, %v8647_v24  ;;  %v18727_v3 = vld [vmem:[%s27616_s10 + $0x2] ss:$0 sm:$0xff] }
0x1d20   :  { %v8049_v10 = vmul.f32 %v25584_v63, %v25584_v63 }
0x1d22   :  { %v8050_v37 = vsel %vm439_vm9, %v8049_v10, 0.0  ;;  %v8216_v10 = vand.u32 4294901760, %v8215_v22  ;;  %v8744_v22 = vand.u32 4294901760, %v25707_v47 }
0x1d23   :  { %8051 = vadd.xlane.f32.xlu1 %v8050_v37 }
0x1d24   :  { %v22357_v37 = vpack.c.bf16 %v8216_v10, %v8209_v61 }
0x1db0   :  { %v8052_v18 = vpop.xlane.xlu1 %8051 }
0x1db1   :  { %v8053_v1 = vmul.f32 0.015625, %v8052_v18 }
0x1db3   :  { %v8054_v60 = vadd.f32 1e-06, %v8053_v1 }
0x1db5   :  { %23802 = vrsqrt.f32 %v8054_v60  ;;  %v8765_v60 = vand.u32 4294901760, %v25715_v55 }
0x1dbf   :  { %v23803_v6 = vpop.eup %23802 }
0x1dc0   :  { %v8056_v42 = vmul.f32 %v23803_v6, %v25584_v63 }
0x1dc2   :  { %v8057_v16 = vmul.f32 %v25494_v32, %v8056_v42  ;;  %v8618_v32 = vld [vmem:[#allocation9 + $0x80] sm:$0xff] }
0x1dc3   :  { %v8638_v63 = vand.u32 4294901760, %v8618_v32 }
0x1dc4   :  { %v8058_v7 = vadd.f32 %v25500_v15, %v8057_v16  ;;  %v8619_v15 = vld [vmem:[#allocation9 + $0x88] sm:$0xff]  ;;  %v8766_v16 = vsub.f32 %v25715_v55, %v8765_v60 }
0x1dc5   :  { %v25695_v23 = vsub.f32 %v8618_v32, %v8638_v63 }
0x1dc6   :  { %v8077_v11 = vsel %vm958_vm10, %v8058_v7, 0 }
0x1dc7   :  { %v8152_v62 = vand.u32 4294901760, %v8077_v11  ;;  %v8723_v58 = vand.u32 4294901760, %v25695_v23 }
0x1dc9   :  { %v8153_v45 = vsub.f32 %v8077_v11, %v8152_v62  ;;  %v8724_v44 = vsub.f32 %v25695_v23, %v8723_v58  ;;  %v8767_v11 = vand.u32 4294901760, %v8766_v16  ;;  %v9216_v16 = vld [vmem:[#allocation4 + $0x1c0] sm:$0xff] }
0x1dcb   :  { %v8154_v41 = vand.u32 4294901760, %v8153_v45 }
0x1dcd   :  { %v8155_v48 = vsub.f32 %v8153_v45, %v8154_v41 }
0x1dcf   :  { %v8156_v12 = vand.u32 4294901760, %v8155_v48 }
0x1dd1   :  { %20360 = vmatmul.mubr.f32.vlgmr.msra.gmra.mrb[14].mxu1 %v8156_v12 }
0x1dd2   :  { %22349 = vmatpush3.bf16.msra.mxu1 %v22348_v29  ;;  %20378 = vmatprep.mubr.msk.f32.mxu1 %vm23937_vm11, %v27689_v33  ;;  %v8625_v29 = vld [vmem:[#allocation9 + $0xb8] sm:$0xff] }
0x1dd3   :  { %22350 = vmatprep.subr.bf16.mxu1 %v27709_v49  ;;  %v8659_v54 = vand.u32 4294901760, %v8625_v29 }
0x1dd5   :  { %v25713_v19 = vpack.c.bf16 %v8659_v54, %v8656_v28  ;;  %v25717_v51 = vsub.f32 %v8625_v29, %v8659_v54 }
0x1dd6   :  { %22352 = vmatpush3.bf16.msra.mxu1 %v22351_v40 }
0x1dd7   :  { %22353 = vmatprep.subr.bf16.mxu1 %v27709_v49  ;;  %v8772_v6 = vand.u32 4294901760, %v25717_v51  ;;  %v22441_v32 = vpack.c.bf16 %v25717_v51, %v25715_v55  ;;  %v9209_v55 = vld [vmem:[#allocation4 + $0x188] sm:$0xff] }
0x1dd9   :  { %v8773_v7 = vsub.f32 %v25717_v51, %v8772_v6  ;;  %v9211_v51 = vld [vmem:[#allocation4 + $0x198] sm:$0xff] }
0x1dda   :  { %22355 = vmatpush3.bf16.msra.mxu1 %v22354_v26  ;;  %v8725_v26 = vand.u32 4294901760, %v8724_v44  ;;  %v9240_v44 = vand.u32 4294901760, %v9209_v55 }
0x1ddb   :  { %22356 = vmatprep.subr.bf16.mxu1 %v27709_v49 }
0x1dde   :  { %22358 = vmatpush3.bf16.msra.mxu1 %v22357_v37  ;;  %v8745_v37 = vsub.f32 %v25707_v47, %v8744_v22 }
0x1ddf   :  { %22359 = vmatprep.subr.bf16.mxu1 %v27709_v49 }
0x1de1   :  { %20379 = vmatmul.mubr.f32.vlgmr.msra.gmra.mrb[14].mxu1 %v8152_v62 }
0x1de2   :  { %22361 = vmatpush3.bf16.msra.mxu1 %v22360_v52  ;;  %20397 = vmatprep.mubr.msk.f32.mxu1 %vm23937_vm11, %v27689_v33 }
0x1de3   :  { %22362 = vmatprep.subr.bf16.mxu1 %v27709_v49 }
0x1de6   :  { %22364 = vmatpush3.bf16.msra.mxu1 %v22363_v30 }
0x1de7   :  { %22365 = vmatprep.subr.bf16.mxu1 %v27709_v49 }
0x1dea   :  { %22367 = vmatpush3.bf16.msra.mxu1 %v22366_v43  ;;  %v8746_v43 = vand.u32 4294901760, %v8745_v37  ;;  %v9213_v37 = vld [vmem:[#allocation4 + $0x1a8] sm:$0xff] }
0x1deb   :  { %22368 = vmatprep.subr.bf16.mxu1 %v27709_v49 }
0x1dee   :  { %22370 = vmatpush3.bf16.msra.mxu1 %v22369_v27 }
0x1def   :  { %22371 = vmatprep.subr.bf16.mxu1 %v27709_v49 }
0x1df1   :  { %20398 = vmatmul.mubr.f32.vlgmr.msra.gmra.mrb[14].mxu1 %v8153_v45 }
0x1df2   :  { %22373 = vmatpush3.bf16.msra.mxu1 %v25589_v38  ;;  %20416 = vmatprep.mubr.msk.f32.mxu1 %vm23937_vm11, %v27689_v33 }
0x1df3   :  { %22374 = vmatprep.subr.bf16.mxu1 %v27709_v49 }
0x1df6   :  { %22376 = vmatpush3.bf16.msra.mxu1 %v25597_v2 }
0x1df7   :  { %22377 = vmatprep.subr.bf16.mxu1 %v27709_v49 }
0x1dfa   :  { %22379 = vmatpush3.bf16.msra.mxu1 %v25610_v25 }
0x1dfb   :  { %22380 = vmatprep.subr.bf16.mxu1 %v27709_v49 }
0x1dfe   :  { %22382 = vmatpush3.bf16.msra.mxu1 %v25616_v21 }
0x1dff   :  { %22383 = vmatprep.subr.bf16.mxu1 %v27709_v49 }
0x1e01   :  { %20417 = vmatmul.mubr.f32.vlgmr.msra.gmra.mrb[14].mxu1 %v8154_v41 }
0x1e02   :  { %22385 = vmatpush3.bf16.msra.mxu1 %v22384_v53  ;;  %20435 = vmatprep.mubr.msk.f32.mxu1 %vm23937_vm11, %v27689_v33  ;;  %v8758_v53 = vand.u32 4294901760, %v25711_v14 }
0x1e03   :  { %22386 = vmatprep.subr.bf16.mxu1 %v27709_v49 }
0x1e06   :  { %22388 = vmatpush3.bf16.msra.mxu1 %v22387_v13 }
0x1e07   :  { %22389 = vmatprep.subr.bf16.mxu1 %v27709_v49 }
0x1e0a   :  { %22391 = vmatpush3.bf16.msra.mxu1 %v22390_v56 }
0x1e0b   :  { %22392 = vmatprep.subr.bf16.mxu1 %v27709_v49 }
0x1e0e   :  { %22394 = vmatpush3.bf16.msra.mxu1 %v22393_v5  ;;  %v8759_v5 = vsub.f32 %v25711_v14, %v8758_v53 }
0x1e0f   :  { %22395 = vmatprep.subr.bf16.mxu1 %v27709_v49 }
0x1e10   :  { %v8760_v1 = vand.u32 4294901760, %v8759_v5  ;;  %v25807_v5 = vsub.f32 %v9209_v55, %v9240_v44 }
0x1e11   :  { %20436 = vmatmul.mubr.f32.vlgmr.msra.gmra.mrb[14].mxu1 %v8152_v62 }
0x1e12   :  { %22397 = vmatpush3.bf16.msra.mxu1 %v25589_v38  ;;  %20454 = vmatprep.mubr.msk.f32.mxu1 %vm23937_vm11, %v27689_v33  ;;  %v8641_v38 = vand.u32 4294901760, %v8619_v15 }
0x1e13   :  { %22398 = vmatprep.subr.bf16.mxu1 %v27709_v49 }
0x1e14   :  { %v25687_v46 = vpack.c.bf16 %v8641_v38, %v8638_v63  ;;  %v25697_v59 = vsub.f32 %v8619_v15, %v8641_v38 }
0x1e16   :  { %22400 = vmatpush3.bf16.msra.mxu1 %v25597_v2  ;;  %22409 = vmatpush3.bf16.msra.mxu0 %v25687_v46  ;;  %v8644_v2 = vand.u32 4294901760, %v8620_v20  ;;  %v8730_v17 = vand.u32 4294901760, %v25697_v59  ;;  %v22432_v41 = vpack.c.bf16 %v25697_v59, %v25695_v23 }
0x1e17   :  { %22401 = vmatprep.subr.bf16.mxu1 %v27709_v49  ;;  %22410 = vmatprep.subr.bf16.mxu0 %v27709_v49 }
0x1e18   :  { %v25705_v39 = vsub.f32 %v8620_v20, %v8644_v2  ;;  %v8731_v9 = vsub.f32 %v25697_v59, %v8730_v17  ;;  %v22456_v15 = vpack.c.bf16 %v8730_v17, %v8723_v58  ;;  %v22465_v20 = vpack.c.bf16 %v8772_v6, %v8765_v60  ;;  %v9217_v6 = vld [vmem:[#allocation4 + $0x1c8] sm:$0xff] }
0x1e1a   :  { %22403 = vmatpush3.bf16.msra.mxu1 %v25610_v25  ;;  %v25691_v25 = vpack.c.bf16 %v8647_v24, %v8644_v2  ;;  %v8737_v34 = vand.u32 4294901760, %v25705_v39  ;;  %v8732_v61 = vand.u32 4294901760, %v8731_v9  ;;  %v22435_v48 = vpack.c.bf16 %v25707_v47, %v25705_v39  ;;  %v9208_v9 = vld [vmem:[#allocation4 + $0x180] sm:$0xff] }
0x1e1b   :  { %22404 = vmatprep.subr.bf16.mxu1 %v27709_v49 }
0x1e1c   :  { %22412 = vmatpush3.bf16.msra.mxu0 %v25691_v25  ;;  %v8738_v10 = vsub.f32 %v25705_v39, %v8737_v34  ;;  %v22420_v52 = vpack.c.bf16 %v8732_v61, %v8725_v26  ;;  %v22459_v63 = vpack.c.bf16 %v8744_v22, %v8737_v34  ;;  %v9210_v26 = vld [vmem:[#allocation4 + $0x190] sm:$0xff]  ;;  %v9242_v34 = vand.u32 4294901760, %v9208_v9 }
0x1e1d   :  { %22413 = vmatprep.subr.bf16.mxu0 %v27709_v49  ;;  %v9246_v22 = vand.u32 4294901760, %v9210_v26 }
0x1e1e   :  { %22406 = vmatpush3.bf16.msra.mxu1 %v25616_v21  ;;  %v8622_v21 = vld [vmem:[#allocation9 + $0xa0] sm:$0xff]  ;;  %v8739_v30 = vand.u32 4294901760, %v8738_v10 }
0x1e1f   :  { %v8650_v0 = vand.u32 4294901760, %v8622_v21  ;;  %v25803_v10 = vpack.c.bf16 %v9246_v22, %v9242_v34  ;;  %v25813_v60 = vsub.f32 %v9210_v26, %v9246_v22 }
0x1e20   :  { %v22423_v13 = vpack.c.bf16 %v8746_v43, %v8739_v30  ;;  %v9248_v30 = vand.u32 4294901760, %v9213_v37 }
0x1e21   :  { %20455 = vmatmul.mubr.f32.vlgmr.msra.gmra.mrb[14].mxu1 %v8152_v62  ;;  %v25699_v8 = vpack.c.bf16 %v8653_v35, %v8650_v0  ;;  %v25709_v40 = vsub.f32 %v8622_v21, %v8650_v0  ;;  %v8774_v62 = vand.u32 4294901760, %v8773_v7 }
0x1e22   :  { %9320 = vmatprep.mubr.f32.mxu1 %v27689_v33 }
0x1e23   :  { %22415 = vmatpush3.bf16.msra.mxu0 %v25699_v8  ;;  %v8751_v27 = vand.u32 4294901760, %v25709_v40  ;;  %v22429_v45 = vpack.c.bf16 %v8774_v62, %v8767_v11  ;;  %v22438_v12 = vpack.c.bf16 %v25711_v14, %v25709_v40  ;;  %v25817_v11 = vsub.f32 %v9213_v37, %v9248_v30 }
0x1e24   :  { %22416 = vmatprep.subr.bf16.mxu0 %v27709_v49 }
0x1e25   :  { %v8752_v56 = vsub.f32 %v25709_v40, %v8751_v27  ;;  %v22462_v38 = vpack.c.bf16 %v8758_v53, %v8751_v27  ;;  %v9212_v27 = vld [vmem:[#allocation4 + $0x1a0] sm:$0xff]  ;;  %v9214_v53 = vld [vmem:[#allocation4 + $0x1b0] sm:$0xff] }
0x1e27   :  { %22418 = vmatpush3.bf16.msra.mxu0 %v25713_v19  ;;  %v8753_v18 = vand.u32 4294901760, %v8752_v56  ;;  %v9254_v56 = vand.u32 4294901760, %v9214_v53 }
0x1e28   :  { %22419 = vmatprep.subr.bf16.mxu0 %v27709_v49 }
0x1e29   :  { %v22426_v42 = vpack.c.bf16 %v8760_v1, %v8753_v18  ;;  %v25811_v1 = vsub.f32 %v9208_v9, %v9242_v34 }
0x1ef4   :  { %v8612_v2 = vpop.f32.mrb[14].mxu1 }
0x1ef5   :  { %v23429_v24 = vadd.f32 %v18727_v3, %v8612_v2  ;;  %v20456_v21 = vpop.f32.mrb[15].mxu1  ;;  %v9258_v3 = vand.u32 4294901760, %v9216_v16 }
0x1ef7   :  { %v8616_v4 = vmax.f32 %v23429_v24, 0.0 }
0x1ef9   :  { %v8635_v0 = vsel %vm958_vm10, %v8616_v4, 0  ;;  %v9222_v4 = vld [vmem:[#allocation4 + $0x1f0] sm:$0xff] }
0x1efa   :  { %v8710_v35 = vand.u32 4294901760, %v8635_v0 }
0x1efc   :  { %v8711_v23 = vsub.f32 %v8635_v0, %v8710_v35 }
0x1efe   :  { %v8712_v59 = vand.u32 4294901760, %v8711_v23 }
0x1f00   :  { %v8713_v36 = vsub.f32 %v8711_v23, %v8712_v59 }
0x1f02   :  { %v8714_v29 = vand.u32 4294901760, %v8713_v36 }
0x1f04   :  { %20474 = vmatmul.mubr.f32.vlgmr.msra.gmra.mrb[14].mxu0 %v8714_v29  ;;  %v25837_v29 = vsub.f32 %v9216_v16, %v9258_v3 }
0x1f05   :  { %22421 = vmatpush3.bf16.msra.mxu0 %v22420_v52  ;;  %20492 = vmatprep.mubr.msk.f32.mxu0 %vm23937_vm11, %v27689_v33  ;;  %v9215_v52 = vld [vmem:[#allocation4 + $0x1b8] sm:$0xff] }
0x1f06   :  { %22422 = vmatprep.subr.bf16.mxu0 %v27709_v49  ;;  %v9252_v43 = vand.u32 4294901760, %v9215_v52 }
0x1f08   :  { %v25815_v7 = vpack.c.bf16 %v9252_v43, %v9248_v30  ;;  %v25819_v62 = vsub.f32 %v9215_v52, %v9252_v43  ;;  %v9358_v30 = vand.u32 4294901760, %v25817_v11 }
0x1f09   :  { %22424 = vmatpush3.bf16.msra.mxu0 %v22423_v13  ;;  %v9250_v13 = vand.u32 4294901760, %v9212_v27 }
0x1f0a   :  { %22425 = vmatprep.subr.bf16.mxu0 %v27709_v49  ;;  %v9370_v43 = vand.u32 4294901760, %v25819_v62 }
0x1f0d   :  { %22427 = vmatpush3.bf16.msra.mxu0 %v22426_v42  ;;  %v9219_v42 = vld [vmem:[#allocation4 + $0x1d8] sm:$0xff] }
0x1f0e   :  { %22428 = vmatprep.subr.bf16.mxu0 %v27709_v49 }
0x1f11   :  { %22430 = vmatpush3.bf16.msra.mxu0 %v22429_v45  ;;  %v25821_v45 = vpack.c.bf16 %v9254_v56, %v9250_v13 }
0x1f12   :  { %22431 = vmatprep.subr.bf16.mxu0 %v27709_v49 }
0x1f14   :  { %20493 = vmatmul.mubr.f32.vlgmr.msra.gmra.mrb[14].mxu0 %v8710_v35 }
0x1f15   :  { %22433 = vmatpush3.bf16.msra.mxu0 %v22432_v41  ;;  %20511 = vmatprep.mubr.msk.f32.mxu0 %vm23937_vm11, %v27689_v33  ;;  %v9218_v41 = vld [vmem:[#allocation4 + $0x1d0] sm:$0xff] }
0x1f16   :  { %22434 = vmatprep.subr.bf16.mxu0 %v27709_v49  ;;  %v9262_v2 = vand.u32 4294901760, %v9218_v41 }
0x1f18   :  { %v25835_v36 = vpack.c.bf16 %v9262_v2, %v9258_v3 }
0x1f19   :  { %22436 = vmatpush3.bf16.msra.mxu0 %v22435_v48  ;;  %v9221_v48 = vld [vmem:[#allocation4 + $0x1e8] sm:$0xff] }
0x1f1a   :  { %22437 = vmatprep.subr.bf16.mxu0 %v27709_v49  ;;  %v9264_v24 = vand.u32 4294901760, %v9221_v48 }
0x1f1d   :  { %22439 = vmatpush3.bf16.msra.mxu0 %v22438_v12  ;;  %v9223_v12 = vld [vmem:[#allocation4 + $0x1f8] sm:$0xff] }
0x1f1e   :  { %22440 = vmatprep.subr.bf16.mxu0 %v27709_v49  ;;  %v9268_v21 = vand.u32 4294901760, %v9223_v12 }
0x1f21   :  { %22442 = vmatpush3.bf16.msra.mxu0 %v22441_v32  ;;  %v25823_v32 = vsub.f32 %v9212_v27, %v9250_v13 }
0x1f22   :  { %22443 = vmatprep.subr.bf16.mxu0 %v27709_v49 }
0x1f23   :  { %v9364_v27 = vand.u32 4294901760, %v25823_v32 }
0x1f24   :  { %20512 = vmatmul.mubr.f32.vlgmr.msra.gmra.mrb[14].mxu0 %v8711_v23 }
0x1f25   :  { %22445 = vmatpush3.bf16.msra.mxu0 %v25687_v46  ;;  %20530 = vmatprep.mubr.msk.f32.mxu0 %vm23937_vm11, %v27689_v33  ;;  %v9365_v16 = vsub.f32 %v25823_v32, %v9364_v27 }
0x1f26   :  { %22446 = vmatprep.subr.bf16.mxu0 %v27709_v49 }
0x1f29   :  { %22448 = vmatpush3.bf16.msra.mxu0 %v25691_v25 }
0x1f2a   :  { %22449 = vmatprep.subr.bf16.mxu0 %v27709_v49 }
0x1f2d   :  { %22451 = vmatpush3.bf16.msra.mxu0 %v25699_v8 }
0x1f2e   :  { %22452 = vmatprep.subr.bf16.mxu0 %v27709_v49 }
0x1f31   :  { %22454 = vmatpush3.bf16.msra.mxu0 %v25713_v19 }
0x1f32   :  { %22455 = vmatprep.subr.bf16.mxu0 %v27709_v49 }
0x1f34   :  { %20531 = vmatmul.mubr.f32.vlgmr.msra.gmra.mrb[14].mxu0 %v8712_v59 }
0x1f35   :  { %22457 = vmatpush3.bf16.msra.mxu0 %v22456_v15  ;;  %20549 = vmatprep.mubr.msk.f32.mxu0 %vm23937_vm11, %v27689_v33  ;;  %v25825_v15 = vsub.f32 %v9214_v53, %v9254_v56 }
0x1f36   :  { %22458 = vmatprep.subr.bf16.mxu0 %v27709_v49 }
0x1f37   :  { %v9376_v53 = vand.u32 4294901760, %v25825_v15 }
0x1f39   :  { %22460 = vmatpush3.bf16.msra.mxu0 %v22459_v63  ;;  %v9256_v63 = vand.u32 4294901760, %v9217_v6 }
0x1f3a   :  { %22461 = vmatprep.subr.bf16.mxu0 %v27709_v49 }
0x1f3d   :  { %22463 = vmatpush3.bf16.msra.mxu0 %v22462_v38  ;;  %v9260_v38 = vand.u32 4294901760, %v9219_v42 }
0x1f3e   :  { %22464 = vmatprep.subr.bf16.mxu0 %v27709_v49 }
0x1f3f   :  { %v25829_v0 = vpack.c.bf16 %v9260_v38, %v9256_v63  ;;  %v25833_v23 = vsub.f32 %v9219_v42, %v9260_v38  ;;  %v9371_v42 = vsub.f32 %v25819_v62, %v9370_v43 }
0x1f41   :  { %22466 = vmatpush3.bf16.msra.mxu0 %v22465_v20  ;;  %v9220_v20 = vld [vmem:[#allocation4 + $0x1e0] sm:$0xff]  ;;  %v9372_v38 = vand.u32 4294901760, %v9371_v42 }
0x1f42   :  { %22467 = vmatprep.subr.bf16.mxu0 %v27709_v49  ;;  %v9266_v59 = vand.u32 4294901760, %v9220_v20 }
0x1f44   :  { %20550 = vmatmul.mubr.f32.vlgmr.msra.gmra.mrb[14].mxu0 %v8710_v35 }
0x1f45   :  { %22469 = vmatpush3.bf16.msra.mxu0 %v25687_v46  ;;  %20568 = vmatprep.mubr.msk.f32.mxu0 %vm23937_vm11, %v27689_v33  ;;  %v18729_v46 = vld [vmem:[%s27618_s12 + $0x2] ss:$0 sm:$0xff] }
0x1f46   :  { %22470 = vmatprep.subr.bf16.mxu0 %v27709_v49 }
0x1f49   :  { %22472 = vmatpush3.bf16.msra.mxu0 %v25691_v25 }
0x1f4a   :  { %22473 = vmatprep.subr.bf16.mxu0 %v27709_v49 }
0x1f4d   :  { %22475 = vmatpush3.bf16.msra.mxu0 %v25699_v8 }
0x1f4e   :  { %22476 = vmatprep.subr.bf16.mxu0 %v27709_v49 }
0x1f51   :  { %22478 = vmatpush3.bf16.msra.mxu0 %v25713_v19 }
0x1f52   :  { %20571 = vmatprep.subr.mxu0 %v27689_v33 }
0x1f54   :  { %20569 = vmatmul.mubr.f32.vlgmr.msra.gmra.mrb[14].mxu0 %v8710_v35  ;;  %v25831_v35 = vsub.f32 %v9217_v6, %v9256_v63  ;;  %v9359_v6 = vsub.f32 %v25817_v11, %v9358_v30 }
0x1f55   :  { %20573 = vmatprep.mubr.msk.f32.mxu0 %vm23937_vm11, %v27689_v33 }
0x1f56   :  { %v9360_v63 = vand.u32 4294901760, %v9359_v6 }
0x2027   :  { %v9170_v28 = vpop.f32.mrb[14].mxu0 }
0x2028   :  { %v23430_v25 = vadd.f32 %v18729_v46, %v9170_v28  ;;  %v20570_v54 = vpop.f32.mrb[15].mxu0  ;;  %v25839_v46 = vsub.f32 %v9218_v41, %v9262_v2  ;;  %v25841_v28 = vpack.c.bf16 %v9268_v21, %v9264_v24  ;;  %v9377_v41 = vsub.f32 %v25825_v15, %v9376_v53 }
0x2029   :  { %v25846_v54 = vsub.f32 %v9223_v12, %v9268_v21  ;;  %v9394_v12 = vand.u32 4294901760, %v25833_v23  ;;  %v9388_v21 = vand.u32 4294901760, %v25837_v29 }
0x202a   :  { %v9174_v58 = vmax.f32 %v23430_v25, 0.0  ;;  %v25844_v25 = vsub.f32 %v9221_v48, %v9264_v24  ;;  %v9382_v48 = vand.u32 4294901760, %v25831_v35  ;;  %v9378_v3 = vand.u32 4294901760, %v9377_v41 }
0x202b   :  { %v9395_v24 = vsub.f32 %v25833_v23, %v9394_v12 }
0x202c   :  { %v25791_v8 = vadd.f32 %v25579_v57, %v9174_v58  ;;  %v9244_v57 = vand.u32 4294901760, %v9211_v51  ;;  %v9270_v58 = vand.u32 4294901760, %v9222_v4  ;;  %v9383_v2 = vsub.f32 %v25831_v35, %v9382_v48 }
0x202e   :  { %v9180_v17 = vsel %vm439_vm9, %v25791_v8, 0.0  ;;  %v25801_v61 = vpack.c.bf16 %v9244_v57, %v9240_v44  ;;  %v25809_v18 = vsub.f32 %v9211_v51, %v9244_v57  ;;  %v25855_v55 = vpack.c.bf16 %v9270_v58, %v9266_v59 }
0x202f   :  { %9181 = vadd.xlane.f32.xlu1 %v9180_v17  ;;  %v25848_v17 = vsub.f32 %v9220_v20, %v9266_v59  ;;  %v25857_v51 = vsub.f32 %v9222_v4, %v9270_v58  ;;  %v9366_v20 = vand.u32 4294901760, %v9365_v16  ;;  %v9400_v4 = vand.u32 4294901760, %v25839_v46 }
0x2030   :  { %22480 = vmatprep.subr.bf16.mxu1 %v25801_v61  ;;  %v22499_v59 = vpack.c.bf16 %v9372_v38, %v9360_v63 }
0x2031   :  { %22482 = vmatpush1.bf16.msra.mxu1 %v25803_v10  ;;  %v22501_v58 = vpack.c.bf16 %v9378_v3, %v9366_v20 }
0x2032   :  { %22484 = vmatprep.subr.bf16.mxu1 %v25815_v7 }
0x2035   :  { %22486 = vmatpush1.bf16.msra.mxu1 %v25821_v45 }
0x2036   :  { %22488 = vmatprep.subr.bf16.mxu1 %v25829_v0 }
0x2039   :  { %22490 = vmatpush1.bf16.msra.mxu1 %v25835_v36 }
0x203a   :  { %22492 = vmatprep.subr.bf16.mxu1 %v25841_v28 }
0x203d   :  { %22494 = vmatpush1.bf16.msra.mxu1 %v25855_v55 }
0x20bc   :  { %v9182_v39 = vpop.xlane.xlu1 %9181 }
0x20bd   :  { %v9183_v47 = vmul.f32 0.015625, %v9182_v39  ;;  %v9334_v39 = vand.u32 4294901760, %v25807_v5 }
0x20bf   :  { %v25796_v40 = vsub.f32 %v25791_v8, %v9183_v47  ;;  %v27648_v47 = vand.u32 4294901760, %v25809_v18  ;;  %v9335_v44 = vsub.f32 %v25807_v5, %v9334_v39 }
0x20c1   :  { %v9185_v14 = vmul.f32 %v25796_v40, %v25796_v40  ;;  %v9347_v57 = vsub.f32 %v25809_v18, %v27648_v47  ;;  %v9336_v34 = vand.u32 4294901760, %v9335_v44  ;;  %v9384_v44 = vand.u32 4294901760, %v9383_v2 }
0x20c3   :  { %v9186_v19 = vsel %vm439_vm9, %v9185_v14, 0.0  ;;  %v27647_v14 = vand.u32 4294901760, %v25811_v1  ;;  %v9348_v22 = vand.u32 4294901760, %v9347_v57  ;;  %v9396_v57 = vand.u32 4294901760, %v9395_v24 }
0x20c4   :  { %9187 = vadd.xlane.f32.xlu1 %v9186_v19  ;;  %v27646_v19 = vand.u32 4294901760, %v25813_v60 }
0x20c5   :  { %v9341_v9 = vsub.f32 %v25811_v1, %v27647_v14  ;;  %v22495_v13 = vpack.c.bf16 %v9348_v22, %v9336_v34  ;;  %v9406_v34 = vand.u32 4294901760, %v25844_v25  ;;  %v9418_v22 = vand.u32 4294901760, %v25846_v54 }
0x20c6   :  { %v9353_v26 = vsub.f32 %v25813_v60, %v27646_v19 }
0x20c7   :  { %v9342_v37 = vand.u32 4294901760, %v9341_v9  ;;  %22496 = vmatprep.subr.bf16.mxu1 %v22495_v13  ;;  %v9389_v9 = vsub.f32 %v25837_v29, %v9388_v21  ;;  %v22503_v13 = vpack.c.bf16 %v9396_v57, %v9384_v44  ;;  %v9407_v16 = vsub.f32 %v25844_v25, %v9406_v34 }
0x20c8   :  { %v9354_v52 = vand.u32 4294901760, %v9353_v26  ;;  %v9401_v26 = vsub.f32 %v25839_v46, %v9400_v4  ;;  %v9419_v41 = vsub.f32 %v25846_v54, %v9418_v22  ;;  %v22511_v44 = vpack.c.bf16 %v25809_v18, %v25807_v5  ;;  %v25926_v5 = vld [vmem:[%s27611_s5 + $0x3] ss:$0 sm:$0xff] }
0x20c9   :  { %v9390_v6 = vand.u32 4294901760, %v9389_v9  ;;  %v9408_v3 = vand.u32 4294901760, %v9407_v16  ;;  %v22513_v57 = vpack.c.bf16 %v25813_v60, %v25811_v1  ;;  %v22515_v9 = vpack.c.bf16 %v25819_v62, %v25817_v11 }
0x20ca   :  { %v25877_v56 = vpack.c.bf16 %v9354_v52, %v9342_v37  ;;  %v9412_v37 = vand.u32 4294901760, %v25848_v17  ;;  %v9424_v52 = vand.u32 4294901760, %v25857_v51  ;;  %v9402_v42 = vand.u32 4294901760, %v9401_v26 }
0x20cb   :  { %v9420_v2 = vand.u32 4294901760, %v9419_v41  ;;  %v22517_v26 = vpack.c.bf16 %v25825_v15, %v25823_v32  ;;  %v22525_v16 = vpack.c.bf16 %v25857_v51, %v25848_v17  ;;  %v27713_v41 = vand.u32 4294901760, %v25809_v18 }
0x20cc   :  { %v9413_v63 = vsub.f32 %v25848_v17, %v9412_v37  ;;  %v9425_v38 = vsub.f32 %v25857_v51, %v9424_v52  ;;  %v22505_v20 = vpack.c.bf16 %v9402_v42, %v9390_v6  ;;  %v22519_v6 = vpack.c.bf16 %v25833_v23, %v25831_v35 }
0x20cd   :  { %v22507_v14 = vpack.c.bf16 %v9420_v2, %v9408_v3  ;;  %v22521_v42 = vpack.c.bf16 %v25839_v46, %v25837_v29  ;;  %v22543_v11 = vpack.c.bf16 %v27713_v41, %v9334_v39  ;;  %v27714_v62 = vand.u32 4294901760, %v25811_v1  ;;  %v25932_v1 = vld [vmem:[%s27612_s6 + $0x3] ss:$0 sm:$0xff] }
0x20ce   :  { %v9414_v24 = vand.u32 4294901760, %v9413_v63  ;;  %v9426_v19 = vand.u32 4294901760, %v9425_v38  ;;  %v27715_v32 = vand.u32 4294901760, %v25813_v60  ;;  %v22547_v35 = vpack.c.bf16 %v9370_v43, %v9358_v30 }
0x20cf   :  { %v22549_v23 = vpack.c.bf16 %v9376_v53, %v9364_v27  ;;  %v22551_v63 = vpack.c.bf16 %v9394_v12, %v9382_v48  ;;  %v22553_v29 = vpack.c.bf16 %v9400_v4, %v9388_v21  ;;  %v22555_v46 = vpack.c.bf16 %v9418_v22, %v9406_v34 }
0x20d0   :  { %v22509_v47 = vpack.c.bf16 %v9426_v19, %v9414_v24  ;;  %v22523_v19 = vpack.c.bf16 %v25846_v54, %v25844_v25  ;;  %v22545_v15 = vpack.c.bf16 %v27715_v32, %v27714_v62  ;;  %v22557_v38 = vpack.c.bf16 %v9424_v52, %v9412_v37 }
0x2151   :  { %v9188_v25 = vpop.xlane.xlu1 %9187 }
0x2152   :  { %v9189_v54 = vmul.f32 0.015625, %v9188_v25 }
0x2154   :  { %v9190_v3 = vadd.f32 1e-06, %v9189_v54 }
0x2156   :  { %23804 = vrsqrt.f32 %v9190_v3 }
0x2160   :  { %v23805_v17 = vpop.eup %23804 }
0x2161   :  { %v9192_v18 = vmul.f32 %v23805_v17, %v25796_v40  ;;  %v18734_v40 = vld [vmem:[%s27614_s8 + $0x6] sm:$0x3] }
0x2162   :  { %v9234_v22 = vrot.slane %v18734_v40, %v27705_v31 }
0x2163   :  { %v9199_v60 = vmul.f32 %v25926_v5, %v9192_v18 }
0x2165   :  { %v9206_v39 = vadd.f32 %v25932_v1, %v9199_v60 }
0x2167   :  { %v9238_v51 = vsel %vm958_vm10, %v9206_v39, 0 }
0x2168   :  { %v9321_v30 = vand.u32 4294901760, %v9238_v51 }
0x216a   :  { %v9322_v43 = vsub.f32 %v9238_v51, %v9321_v30 }
0x216c   :  { %v9323_v27 = vand.u32 4294901760, %v9322_v43 }
0x216e   :  { %v9324_v53 = vsub.f32 %v9322_v43, %v9323_v27 }
0x2170   :  { %v9325_v48 = vand.u32 4294901760, %v9324_v53 }
0x2172   :  { %9326 = vmatmul.mubr.f32.vlgmr.msra.gmra.mrb[16].mxu1 %v9325_v48 }
0x2173   :  { %22498 = vmatpush1.bf16.msra.mxu1 %v25877_v56  ;;  %9476 = vmatprep.mubr.f32.mxu1 %v27689_v33 }
0x2174   :  { %22500 = vmatprep.subr.bf16.mxu1 %v22499_v59 }
0x2177   :  { %22502 = vmatpush1.bf16.msra.mxu1 %v22501_v58 }
0x2178   :  { %22504 = vmatprep.subr.bf16.mxu1 %v22503_v13 }
0x217b   :  { %22506 = vmatpush1.bf16.msra.mxu1 %v22505_v20 }
0x217c   :  { %22508 = vmatprep.subr.bf16.mxu1 %v22507_v14 }
0x217f   :  { %22510 = vmatpush1.bf16.msra.mxu1 %v22509_v47 }
0x2180   :  { %22512 = vmatprep.subr.bf16.mxu1 %v22511_v44 }
0x2182   :  { %9478 = vmatmul.mubr.f32.vlgmr.msra.gmra.mrb[16].mxu1 %v9321_v30 }
0x2183   :  { %22514 = vmatpush1.bf16.msra.mxu1 %v22513_v57  ;;  %9580 = vmatprep.mubr.f32.mxu1 %v27689_v33 }
0x2184   :  { %22516 = vmatprep.subr.bf16.mxu1 %v22515_v9 }
0x2187   :  { %22518 = vmatpush1.bf16.msra.mxu1 %v22517_v26 }
0x2188   :  { %22520 = vmatprep.subr.bf16.mxu1 %v22519_v6 }
0x218b   :  { %22522 = vmatpush1.bf16.msra.mxu1 %v22521_v42 }
0x218c   :  { %22524 = vmatprep.subr.bf16.mxu1 %v22523_v19 }
0x218f   :  { %22526 = vmatpush1.bf16.msra.mxu1 %v22525_v16 }
0x2190   :  { %22528 = vmatprep.subr.bf16.mxu1 %v25801_v61 }
0x2192   :  { %9583 = vmatmul.mubr.f32.vlgmr.msra.gmra.mrb[16].mxu1 %v9322_v43  ;;  %v10820_v43 = vld [vmem:[#allocation7 + $0xc0] sm:$0xff] }
0x2193   :  { %22530 = vmatpush1.bf16.msra.mxu1 %v25803_v10  ;;  %9669 = vmatprep.mubr.f32.mxu1 %v27689_v33 }
0x2194   :  { %22532 = vmatprep.subr.bf16.mxu1 %v25815_v7 }
0x2197   :  { %22534 = vmatpush1.bf16.msra.mxu1 %v25821_v45 }
0x2198   :  { %22536 = vmatprep.subr.bf16.mxu1 %v25829_v0 }
0x219b   :  { %22538 = vmatpush1.bf16.msra.mxu1 %v25835_v36 }
0x219c   :  { %22540 = vmatprep.subr.bf16.mxu1 %v25841_v28 }
0x219f   :  { %22542 = vmatpush1.bf16.msra.mxu1 %v25855_v55 }
0x21a0   :  { %22544 = vmatprep.subr.bf16.mxu1 %v22543_v11 }
0x21a2   :  { %9673 = vmatmul.mubr.f32.vlgmr.msra.gmra.mrb[16].mxu1 %v9323_v27  ;;  %v10821_v27 = vld [vmem:[#allocation7 + $0xc8] sm:$0xff] }
0x21a3   :  { %22546 = vmatpush1.bf16.msra.mxu1 %v22545_v15  ;;  %9791 = vmatprep.mubr.f32.mxu1 %v27689_v33  ;;  %v10843_v53 = vand.u32 4294901760, %v10821_v27 }
0x21a4   :  { %22548 = vmatprep.subr.bf16.mxu1 %v22547_v35 }
0x21a7   :  { %22550 = vmatpush1.bf16.msra.mxu1 %v22549_v23 }
0x21a8   :  { %22552 = vmatprep.subr.bf16.mxu1 %v22551_v63 }
0x21ab   :  { %22554 = vmatpush1.bf16.msra.mxu1 %v22553_v29 }
0x21ac   :  { %22556 = vmatprep.subr.bf16.mxu1 %v22555_v46 }
0x21af   :  { %22558 = vmatpush1.bf16.msra.mxu1 %v22557_v38 }
0x21b0   :  { %22560 = vmatprep.subr.bf16.mxu1 %v25801_v61  ;;  %v9230_v61 = vrot.slane %v18734_v40, %v27704_v50  ;;  %v10822_v40 = vld [vmem:[#allocation7 + $0xd0] sm:$0xff] }
0x21b2   :  { %9793 = vmatmul.mubr.f32.vlgmr.msra.gmra.mrb[16].mxu1 %v9321_v30 }
0x21b3   :  { %22562 = vmatpush1.bf16.msra.mxu1 %v25803_v10  ;;  %9879 = vmatprep.mubr.f32.mxu1 %v27689_v33 }
0x21b4   :  { %22564 = vmatprep.subr.bf16.mxu1 %v25815_v7 }
0x21b7   :  { %22566 = vmatpush1.bf16.msra.mxu1 %v25821_v45 }
0x21b8   :  { %22568 = vmatprep.subr.bf16.mxu1 %v25829_v0 }
0x21bb   :  { %22570 = vmatpush1.bf16.msra.mxu1 %v25835_v36 }
0x21bc   :  { %22572 = vmatprep.subr.bf16.mxu1 %v25841_v28 }
0x21bf   :  { %22574 = vmatpush1.bf16.msra.mxu1 %v25855_v55 }
0x21c0   :  { %22647 = vmatprep.subr.bf16.mxu1 %v27709_v49 }
0x21c2   :  { %9881 = vmatmul.mubr.f32.vlgmr.msra.gmra.mrb[16].mxu1 %v9321_v30 }
0x21c3   :  { %20761 = vmatprep.mubr.msk.f32.mxu1 %vm23937_vm11, %v27689_v33 }
0x2295   :  { %v9882_v10 = vpop.f32.mrb[16].mxu1 }
0x2296   :  { %v23431_v7 = vadd.f32 %v9882_v10, %v9230_v61  ;;  %v9884_v45 = vpop.f32.mrb[17].mxu1  ;;  %v10823_v61 = vld [vmem:[#allocation7 + $0xd8] sm:$0xff] }
0x2297   :  { %v23432_v37 = vadd.f32 %v9884_v45, %v9234_v22  ;;  %v10846_v45 = vand.u32 4294901760, %v10822_v40 }
0x2298   :  { %9888 = vrot.lane.b32.xlu1 %v23431_v7, %s23938_s22  ;;  %v9890_v0 = vsel %vm958_vm10, %v23431_v7, 0  ;;  %v26026_v7 = vsub.f32 %v10821_v27, %v10843_v53 }
0x2299   :  { %v9960_v36 = vand.u32 4294901760, %v9890_v0  ;;  %v10356_v52 = vsel %vm2078_vm12, %v23432_v37, 0 }
0x229a   :  { %v10359_v13 = vand.u32 4294901760, %v10356_v52 }
0x229b   :  { %v9961_v28 = vsub.f32 %v9890_v0, %v9960_v36  ;;  %v10849_v0 = vand.u32 4294901760, %v10823_v61 }
0x229c   :  { %v10436_v41 = vsub.f32 %v10356_v52, %v10359_v13 }
0x229d   :  { %v9962_v47 = vand.u32 4294901760, %v9961_v28 }
0x229e   :  { %v10437_v15 = vand.u32 4294901760, %v10436_v41 }
0x229f   :  { %v9963_v56 = vsub.f32 %v9961_v28, %v9962_v47 }
0x22a0   :  { %v10438_v63 = vsub.f32 %v10436_v41, %v10437_v15 }
0x22a1   :  { %v9964_v4 = vand.u32 4294901760, %v9963_v56  ;;  %v10827_v56 = vld [vmem:[#allocation7 + $0xf8] sm:$0xff] }
0x22a2   :  { %v10439_v38 = vand.u32 4294901760, %v10438_v63 }
0x230a   :  { %v9889_v14 = vpop.permute.xlu1 %9888 }
0x230b   :  { %v9892_v55 = vsel %vm958_vm10, %v9889_v14, 0 }
0x230c   :  { %v9895_v12 = vand.u32 4294901760, %v9892_v55 }
0x230e   :  { %v9972_v21 = vsub.f32 %v9892_v55, %v9895_v12  ;;  %20572 = vmatpush3.xpose.msra.mxu0 %v9895_v12 }
0x230f   :  { %20576 = vmatprep.subr.mxu0 %v27689_v33 }
0x2310   :  { %v9973_v59 = vand.u32 4294901760, %v9972_v21 }
0x2311   :  { %20574 = vmatmul.mubr.f32.vlgmr.msra.gmra.mrb[16].mxu0 %v9964_v4  ;;  %v26031_v4 = vsub.f32 %v10822_v40, %v10846_v45 }
0x2312   :  { %v9974_v58 = vsub.f32 %v9972_v21, %v9973_v59  ;;  %20578 = vmatprep.mubr.msk.f32.mxu0 %vm23937_vm11, %v27689_v33 }
0x2314   :  { %v9975_v34 = vand.u32 4294901760, %v9974_v58  ;;  %v10861_v58 = vand.u32 4294901760, %v10827_v56 }
0x2316   :  { %20577 = vmatpush3.xpose.msra.mxu0 %v9975_v34 }
0x2317   :  { %20581 = vmatprep.subr.mxu0 %v27689_v33 }
0x2319   :  { %20579 = vmatmul.mubr.f32.vlgmr.msra.gmra.mrb[16].mxu0 %v9960_v36 }
0x231a   :  { %20582 = vmatpush3.xpose.msra.mxu0 %v9972_v21  ;;  %20583 = vmatprep.mubr.msk.f32.mxu0 %vm23937_vm11, %v27689_v33  ;;  %v26029_v21 = vpack.c.bf16 %v10849_v0, %v10846_v45 }
0x231b   :  { %20586 = vmatprep.subr.mxu0 %v27689_v33 }
0x2321   :  { %20584 = vmatmul.mubr.f32.vlgmr.msra.gmra.mrb[16].mxu0 %v9961_v28  ;;  %v10825_v28 = vld [vmem:[#allocation7 + $0xe8] sm:$0xff] }
0x2322   :  { %20587 = vmatpush3.xpose.msra.mxu0 %v9895_v12  ;;  %20588 = vmatprep.mubr.msk.f32.mxu0 %vm23937_vm11, %v27689_v33  ;;  %v10855_v55 = vand.u32 4294901760, %v10825_v28 }
0x2323   :  { %20591 = vmatprep.subr.mxu0 %v27689_v33 }
0x2324   :  { %v26037_v22 = vsub.f32 %v10825_v28, %v10855_v55 }
0x2329   :  { %20589 = vmatmul.mubr.f32.vlgmr.msra.gmra.mrb[16].mxu0 %v9962_v47  ;;  %v10826_v47 = vld [vmem:[#allocation7 + $0xf0] sm:$0xff] }
0x232a   :  { %20592 = vmatpush3.xpose.msra.mxu0 %v9973_v59  ;;  %20593 = vmatprep.mubr.msk.f32.mxu0 %vm23937_vm11, %v27689_v33  ;;  %v26033_v59 = vsub.f32 %v10823_v61, %v10849_v0 }
0x232b   :  { %20596 = vmatprep.subr.mxu0 %v27689_v33 }
0x232c   :  { %v22603_v27 = vpack.c.bf16 %v26033_v59, %v26031_v4 }
0x2331   :  { %20594 = vmatmul.mubr.f32.vlgmr.msra.gmra.mrb[16].mxu0 %v9960_v36 }
0x2332   :  { %20597 = vmatpush3.xpose.msra.mxu0 %v9895_v12  ;;  %20598 = vmatprep.mubr.msk.f32.mxu0 %vm23937_vm11, %v27689_v33  ;;  %v10858_v12 = vand.u32 4294901760, %v10826_v47 }
0x2333   :  { %20601 = vmatprep.subr.mxu0 %v27689_v33 }
0x2334   :  { %v26039_v37 = vsub.f32 %v10826_v47, %v10858_v12 }
0x2339   :  { %20599 = vmatmul.mubr.f32.vlgmr.msra.gmra.mrb[16].mxu0 %v9960_v36  ;;  %v10824_v36 = vld [vmem:[#allocation7 + $0xe0] sm:$0xff] }
0x233a   :  { %20602 = vmatpush3.msra.mxu0 %v10359_v13  ;;  %20603 = vmatprep.mubr.msk.f32.mxu0 %vm23937_vm11, %v27689_v33  ;;  %v10852_v14 = vand.u32 4294901760, %v10824_v36 }
0x233b   :  { %20606 = vmatprep.subr.mxu0 %v27689_v33 }
0x233c   :  { %v26035_v34 = vsub.f32 %v10824_v36, %v10852_v14  ;;  %v26042_v52 = vpack.c.bf16 %v10855_v55, %v10852_v14 }
0x240c   :  { %v10336_v20 = vpop.f32.mrb[16].mxu0 }
0x240d   :  { %v10340_v2 = vmul.f32 0.015625, %v10336_v20  ;;  %v20600_v24 = vpop.f32.mrb[17].mxu0  ;;  %v26048_v20 = vpack.c.bf16 %v10861_v58, %v10858_v12 }
0x240e   :  { %v10932_v24 = vand.u32 4294901760, %v26026_v7 }
0x240f   :  { %v10341_v44 = vsel %vm2062_vm13, %v10340_v2, -inf }
0x2410   :  { %10342 = vmax.xlane.f32.xlu0 %v10341_v44 }
0x249d   :  { %v10343_v57 = vpop.xlane.xlu0 %10342 }
0x249e   :  { %v10344_v9 = vsub.f32 %v10340_v2, %v10343_v57  ;;  %v10933_v57 = vsub.f32 %v26026_v7, %v10932_v24 }
0x24a0   :  { %v10345_v26 = vmul.f32 1.442695, %v10344_v9 }
0x24a2   :  { %23806 = vpow2.f32 %v10345_v26  ;;  %v10934_v26 = vand.u32 4294901760, %v10933_v57 }
0x24ac   :  { %v23807_v6 = vpop.eup %23806 }
0x24ad   :  { %v10347_v42 = vsel %vm2062_vm13, %v23807_v6, 0.0 }
0x24ae   :  { %10348 = vadd.xlane.f32.xlu0 %v10347_v42  ;;  %v10946_v42 = vand.u32 4294901760, %v26033_v59 }
0x253b   :  { %v10349_v19 = vpop.xlane.xlu0 %10348 }
0x253c   :  { %23808 = vrcp.f32 %v10349_v19 }
0x2546   :  { %v23809_v16 = vpop.eup %23808 }
0x2547   :  { %v10351_v11 = vmul.f32 %v23809_v16, %v23807_v6  ;;  %v10939_v6 = vand.u32 4294901760, %v26031_v4 }
0x2549   :  { %v10353_v62 = vsel %vm2074_vm14, %v10351_v11, 0  ;;  %v10940_v16 = vsub.f32 %v26031_v4, %v10939_v6  ;;  %v22627_v61 = vpack.c.bf16 %v10946_v42, %v10939_v6 }
0x254a   :  { %v10424_v32 = vand.u32 4294901760, %v10353_v62 }
0x254b   :  { %v10941_v11 = vand.u32 4294901760, %v10940_v16 }
0x254c   :  { %v10425_v35 = vsub.f32 %v10353_v62, %v10424_v32 }
0x254e   :  { %v10426_v23 = vand.u32 4294901760, %v10425_v35 }
0x2550   :  { %v10427_v29 = vsub.f32 %v10425_v35, %v10426_v23 }
0x2552   :  { %v10428_v46 = vand.u32 4294901760, %v10427_v29 }
0x2554   :  { %20604 = vmatmul.mubr.f32.vlgmr.msra.gmra.mrb[18].mxu0 %v10428_v46 }
0x2555   :  { %20607 = vmatpush3.msra.mxu0 %v10439_v38  ;;  %20608 = vmatprep.mubr.msk.f32.mxu0 %vm23937_vm11, %v27689_v33  ;;  %v10967_v38 = vand.u32 4294901760, %v26039_v37 }
0x2556   :  { %20611 = vmatprep.subr.mxu0 %v27689_v33 }
0x255c   :  { %20609 = vmatmul.mubr.f32.vlgmr.msra.gmra.mrb[18].mxu0 %v10424_v32 }
0x255d   :  { %20612 = vmatpush3.msra.mxu0 %v10436_v41  ;;  %20613 = vmatprep.mubr.msk.f32.mxu0 %vm23937_vm11, %v27689_v33  ;;  %v10947_v41 = vsub.f32 %v26033_v59, %v10946_v42  ;;  %v11384_v42 = vld [vmem:[#allocation9 + $0xf0] sm:$0xff] }
0x255e   :  { %20616 = vmatprep.subr.mxu0 %v27689_v33  ;;  %v11416_v16 = vand.u32 4294901760, %v11384_v42 }
0x255f   :  { %v10948_v62 = vand.u32 4294901760, %v10947_v41 }
0x2564   :  { %20614 = vmatmul.mubr.f32.vlgmr.msra.gmra.mrb[18].mxu0 %v10425_v35  ;;  %v22591_v35 = vpack.c.bf16 %v10948_v62, %v10941_v11 }
0x2565   :  { %20617 = vmatpush3.msra.mxu0 %v10359_v13  ;;  %20618 = vmatprep.mubr.msk.f32.mxu0 %vm23937_vm11, %v27689_v33 }
0x2566   :  { %20621 = vmatprep.subr.mxu0 %v27689_v33 }
0x256c   :  { %20619 = vmatmul.mubr.f32.vlgmr.msra.gmra.mrb[18].mxu0 %v10426_v23 }
0x256d   :  { %20622 = vmatpush3.msra.mxu0 %v10437_v15  ;;  %20623 = vmatprep.mubr.msk.f32.mxu0 %vm23937_vm11, %v27689_v33  ;;  %v10960_v15 = vand.u32 4294901760, %v26037_v22 }
0x256e   :  { %20626 = vmatprep.subr.mxu0 %v27689_v33 }
0x256f   :  { %v10961_v63 = vsub.f32 %v26037_v22, %v10960_v15 }
0x2571   :  { %v10962_v46 = vand.u32 4294901760, %v10961_v63 }
0x2574   :  { %20624 = vmatmul.mubr.f32.vlgmr.msra.gmra.mrb[18].mxu0 %v10424_v32 }
0x2575   :  { %20627 = vmatpush3.msra.mxu0 %v10359_v13  ;;  %20628 = vmatprep.mubr.msk.f32.mxu0 %vm23937_vm11, %v27689_v33  ;;  %v26044_v13 = vsub.f32 %v10827_v56, %v10861_v58 }
0x2576   :  { %22575 = vmatprep.subr.bf16.mxu0 %v27709_v49 }
0x257c   :  { %20629 = vmatmul.mubr.f32.vlgmr.msra.gmra.mrb[18].mxu0 %v10424_v32  ;;  %v10953_v32 = vand.u32 4294901760, %v26035_v34 }
0x257d   :  { %20647 = vmatprep.mubr.msk.f32.mxu0 %vm23937_vm11, %v27689_v33 }
0x257e   :  { %v10954_v23 = vsub.f32 %v26035_v34, %v10953_v32  ;;  %v22630_v45 = vpack.c.bf16 %v10960_v15, %v10953_v32 }
0x2580   :  { %v10955_v29 = vand.u32 4294901760, %v10954_v23 }
0x264f   :  { %v10800_v25 = vpop.f32.mrb[18].mxu0 }
0x2650   :  { %v26011_v54 = vadd.f32 %v10800_v25, %v25791_v8  ;;  %v20630_v3 = vpop.f32.mrb[19].mxu0  ;;  %v10840_v8 = vand.u32 4294901760, %v10820_v43  ;;  %v10974_v25 = vand.u32 4294901760, %v26044_v13 }
0x2651   :  { %v22594_v3 = vpack.c.bf16 %v10962_v46, %v10955_v29  ;;  %v26147_v29 = vsub.f32 %v11384_v42, %v11416_v16 }
0x2652   :  { %v10804_v17 = vsel %vm439_vm9, %v26011_v54, 0.0  ;;  %v26021_v48 = vpack.c.bf16 %v10843_v53, %v10840_v8  ;;  %v26024_v10 = vsub.f32 %v10820_v43, %v10840_v8  ;;  %v22606_v8 = vpack.c.bf16 %v26037_v22, %v26035_v34 }
0x2653   :  { %10805 = vadd.xlane.f32.xlu1 %v10804_v17  ;;  %v10968_v17 = vsub.f32 %v26039_v37, %v10967_v38  ;;  %v22609_v53 = vpack.c.bf16 %v26044_v13, %v26039_v37  ;;  %v22633_v0 = vpack.c.bf16 %v10974_v25, %v10967_v38  ;;  %v11380_v37 = vld [vmem:[#allocation9 + $0xd0] sm:$0xff] }
0x2654   :  { %22577 = vmatpush3.bf16.msra.mxu0 %v26021_v48  ;;  %v10925_v2 = vand.u32 4294901760, %v26024_v10  ;;  %v22600_v43 = vpack.c.bf16 %v26026_v7, %v26024_v10 }
0x2655   :  { %22578 = vmatprep.subr.bf16.mxu0 %v27709_v49 }
0x2656   :  { %v10926_v44 = vsub.f32 %v26024_v10, %v10925_v2  ;;  %v22624_v40 = vpack.c.bf16 %v10932_v24, %v10925_v2  ;;  %v11383_v24 = vld [vmem:[#allocation9 + $0xe8] sm:$0xff] }
0x2657   :  { %v11413_v57 = vand.u32 4294901760, %v11383_v24 }
0x2658   :  { %22580 = vmatpush3.bf16.msra.mxu0 %v26029_v21  ;;  %v10927_v9 = vand.u32 4294901760, %v10926_v44 }
0x2659   :  { %22581 = vmatprep.subr.bf16.mxu0 %v27709_v49  ;;  %v26143_v23 = vsub.f32 %v11383_v24, %v11413_v57 }
0x265a   :  { %v22588_v19 = vpack.c.bf16 %v10934_v26, %v10927_v9 }
0x265c   :  { %22583 = vmatpush3.bf16.msra.mxu0 %v26042_v52 }
0x265d   :  { %22584 = vmatprep.subr.bf16.mxu0 %v27709_v49 }
0x2660   :  { %22586 = vmatpush3.bf16.msra.mxu0 %v26048_v20 }
0x2661   :  { %22587 = vmatprep.subr.bf16.mxu0 %v27709_v49 }
0x26e0   :  { %v10806_v18 = vpop.xlane.xlu1 %10805 }
0x26e1   :  { %v10807_v60 = vmul.f32 0.015625, %v10806_v18  ;;  %v10975_v18 = vsub.f32 %v26044_v13, %v10974_v25  ;;  %v11381_v13 = vld [vmem:[#allocation9 + $0xd8] sm:$0xff] }
0x26e2   :  { %v11407_v2 = vand.u32 4294901760, %v11381_v13 }
0x26e3   :  { %v26016_v39 = vsub.f32 %v26011_v54, %v10807_v60  ;;  %v10969_v60 = vand.u32 4294901760, %v10968_v17 }
0x26e4   :  { %v26139_v15 = vsub.f32 %v11381_v13, %v11407_v2  ;;  %v18736_v13 = vld [vmem:[%s27616_s10 + $0x3] ss:$0 sm:$0xff] }
0x26e5   :  { %v10809_v51 = vmul.f32 %v26016_v39, %v26016_v39 }
0x26e7   :  { %v10810_v30 = vsel %vm439_vm9, %v10809_v51, 0.0  ;;  %v10976_v51 = vand.u32 4294901760, %v10975_v18  ;;  %v11504_v18 = vand.u32 4294901760, %v26139_v15 }
0x26e8   :  { %10811 = vadd.xlane.f32.xlu0 %v10810_v30 }
0x26e9   :  { %v22597_v30 = vpack.c.bf16 %v10976_v51, %v10969_v60 }
0x2775   :  { %v10812_v36 = vpop.xlane.xlu0 %10811 }
0x2776   :  { %v10813_v28 = vmul.f32 0.015625, %v10812_v36 }
0x2778   :  { %v10814_v47 = vadd.f32 1e-06, %v10813_v28 }
0x277a   :  { %23810 = vrsqrt.f32 %v10814_v47  ;;  %v11525_v47 = vand.u32 4294901760, %v26147_v29 }
0x2784   :  { %v23811_v14 = vpop.eup %23810 }
0x2785   :  { %v10816_v10 = vmul.f32 %v23811_v14, %v26016_v39 }
0x2787   :  { %v10817_v7 = vmul.f32 %v25926_v5, %v10816_v10  ;;  %v11378_v5 = vld [vmem:[#allocation9 + $0xc0] sm:$0xff] }
0x2788   :  { %v11398_v39 = vand.u32 4294901760, %v11378_v5 }
0x2789   :  { %v10818_v55 = vadd.f32 %v25932_v1, %v10817_v7  ;;  %v11379_v1 = vld [vmem:[#allocation9 + $0xc8] sm:$0xff]  ;;  %v11526_v7 = vsub.f32 %v26147_v29, %v11525_v47 }
0x278a   :  { %v26127_v9 = vsub.f32 %v11378_v5, %v11398_v39 }
0x278b   :  { %v10837_v56 = vsel %vm958_vm10, %v10818_v55, 0 }
0x278c   :  { %v10912_v12 = vand.u32 4294901760, %v10837_v56  ;;  %v11483_v11 = vand.u32 4294901760, %v26127_v9 }
0x278e   :  { %v10913_v4 = vsub.f32 %v10837_v56, %v10912_v12  ;;  %v11484_v38 = vsub.f32 %v26127_v9, %v11483_v11  ;;  %v11527_v56 = vand.u32 4294901760, %v11526_v7  ;;  %v11976_v7 = vld [vmem:[#allocation4 + $0x240] sm:$0xff] }
0x2790   :  { %v10914_v59 = vand.u32 4294901760, %v10913_v4 }
0x2792   :  { %v10915_v58 = vsub.f32 %v10913_v4, %v10914_v59 }
0x2794   :  { %v10916_v34 = vand.u32 4294901760, %v10915_v58 }
0x2796   :  { %20648 = vmatmul.mubr.f32.vlgmr.msra.gmra.mrb[20].mxu0 %v10916_v34 }
0x2797   :  { %22589 = vmatpush3.bf16.msra.mxu0 %v22588_v19  ;;  %20666 = vmatprep.mubr.msk.f32.mxu0 %vm23937_vm11, %v27689_v33  ;;  %v11385_v19 = vld [vmem:[#allocation9 + $0xf8] sm:$0xff] }
0x2798   :  { %22590 = vmatprep.subr.bf16.mxu0 %v27709_v49  ;;  %v11419_v41 = vand.u32 4294901760, %v11385_v19 }
0x279a   :  { %v26145_v63 = vpack.c.bf16 %v11419_v41, %v11416_v16  ;;  %v26149_v46 = vsub.f32 %v11385_v19, %v11419_v41 }
0x279b   :  { %22592 = vmatpush3.bf16.msra.mxu0 %v22591_v35 }
0x279c   :  { %22593 = vmatprep.subr.bf16.mxu0 %v27709_v49  ;;  %v11532_v14 = vand.u32 4294901760, %v26149_v46  ;;  %v22681_v5 = vpack.c.bf16 %v26149_v46, %v26147_v29  ;;  %v11969_v29 = vld [vmem:[#allocation4 + $0x208] sm:$0xff] }
0x279e   :  { %v11533_v55 = vsub.f32 %v26149_v46, %v11532_v14  ;;  %v11971_v46 = vld [vmem:[#allocation4 + $0x218] sm:$0xff] }
0x279f   :  { %22595 = vmatpush3.bf16.msra.mxu0 %v22594_v3  ;;  %v11485_v3 = vand.u32 4294901760, %v11484_v38  ;;  %v12000_v38 = vand.u32 4294901760, %v11969_v29 }
0x27a0   :  { %22596 = vmatprep.subr.bf16.mxu0 %v27709_v49 }
0x27a3   :  { %22598 = vmatpush3.bf16.msra.mxu0 %v22597_v30  ;;  %v11505_v30 = vsub.f32 %v26139_v15, %v11504_v18 }
0x27a4   :  { %22599 = vmatprep.subr.bf16.mxu0 %v27709_v49 }
0x27a6   :  { %20667 = vmatmul.mubr.f32.vlgmr.msra.gmra.mrb[20].mxu0 %v10912_v12 }
0x27a7   :  { %22601 = vmatpush3.bf16.msra.mxu0 %v22600_v43  ;;  %20685 = vmatprep.mubr.msk.f32.mxu0 %vm23937_vm11, %v27689_v33 }
0x27a8   :  { %22602 = vmatprep.subr.bf16.mxu0 %v27709_v49 }
0x27ab   :  { %22604 = vmatpush3.bf16.msra.mxu0 %v22603_v27 }
0x27ac   :  { %22605 = vmatprep.subr.bf16.mxu0 %v27709_v49 }
0x27af   :  { %22607 = vmatpush3.bf16.msra.mxu0 %v22606_v8  ;;  %v11506_v8 = vand.u32 4294901760, %v11505_v30  ;;  %v11973_v30 = vld [vmem:[#allocation4 + $0x228] sm:$0xff] }
0x27b0   :  { %22608 = vmatprep.subr.bf16.mxu0 %v27709_v49 }
0x27b3   :  { %22610 = vmatpush3.bf16.msra.mxu0 %v22609_v53 }
0x27b4   :  { %22611 = vmatprep.subr.bf16.mxu0 %v27709_v49 }
0x27b6   :  { %20686 = vmatmul.mubr.f32.vlgmr.msra.gmra.mrb[20].mxu0 %v10913_v4 }
0x27b7   :  { %22613 = vmatpush3.bf16.msra.mxu0 %v26021_v48  ;;  %20704 = vmatprep.mubr.msk.f32.mxu0 %vm23937_vm11, %v27689_v33 }
0x27b8   :  { %22614 = vmatprep.subr.bf16.mxu0 %v27709_v49 }
0x27bb   :  { %22616 = vmatpush3.bf16.msra.mxu0 %v26029_v21 }
0x27bc   :  { %22617 = vmatprep.subr.bf16.mxu0 %v27709_v49 }
0x27bf   :  { %22619 = vmatpush3.bf16.msra.mxu0 %v26042_v52 }
0x27c0   :  { %22620 = vmatprep.subr.bf16.mxu0 %v27709_v49 }
0x27c3   :  { %22622 = vmatpush3.bf16.msra.mxu0 %v26048_v20 }
0x27c4   :  { %22623 = vmatprep.subr.bf16.mxu0 %v27709_v49 }
0x27c6   :  { %20705 = vmatmul.mubr.f32.vlgmr.msra.gmra.mrb[20].mxu0 %v10914_v59 }
0x27c7   :  { %22625 = vmatpush3.bf16.msra.mxu0 %v22624_v40  ;;  %20723 = vmatprep.mubr.msk.f32.mxu0 %vm23937_vm11, %v27689_v33  ;;  %v11518_v40 = vand.u32 4294901760, %v26143_v23 }
0x27c8   :  { %22626 = vmatprep.subr.bf16.mxu0 %v27709_v49 }
0x27cb   :  { %22628 = vmatpush3.bf16.msra.mxu0 %v22627_v61 }
0x27cc   :  { %22629 = vmatprep.subr.bf16.mxu0 %v27709_v49 }
0x27cf   :  { %22631 = vmatpush3.bf16.msra.mxu0 %v22630_v45 }
0x27d0   :  { %22632 = vmatprep.subr.bf16.mxu0 %v27709_v49 }
0x27d3   :  { %22634 = vmatpush3.bf16.msra.mxu0 %v22633_v0  ;;  %v11519_v0 = vsub.f32 %v26143_v23, %v11518_v40 }
0x27d4   :  { %22635 = vmatprep.subr.bf16.mxu0 %v27709_v49 }
0x27d5   :  { %v11520_v28 = vand.u32 4294901760, %v11519_v0  ;;  %v26239_v0 = vsub.f32 %v11969_v29, %v12000_v38 }
0x27d6   :  { %20724 = vmatmul.mubr.f32.vlgmr.msra.gmra.mrb[20].mxu0 %v10912_v12 }
0x27d7   :  { %22637 = vmatpush3.bf16.msra.mxu0 %v26021_v48  ;;  %20742 = vmatprep.mubr.msk.f32.mxu0 %vm23937_vm11, %v27689_v33  ;;  %v11401_v48 = vand.u32 4294901760, %v11379_v1 }
0x27d8   :  { %22638 = vmatprep.subr.bf16.mxu0 %v27709_v49 }
0x27d9   :  { %v26119_v22 = vpack.c.bf16 %v11401_v48, %v11398_v39  ;;  %v26129_v26 = vsub.f32 %v11379_v1, %v11401_v48 }
0x27db   :  { %22640 = vmatpush3.bf16.msra.mxu0 %v26029_v21  ;;  %22649 = vmatpush3.bf16.msra.mxu1 %v26119_v22  ;;  %v11404_v21 = vand.u32 4294901760, %v11380_v37  ;;  %v11490_v62 = vand.u32 4294901760, %v26129_v26  ;;  %v22672_v59 = vpack.c.bf16 %v26129_v26, %v26127_v9 }
0x27dc   :  { %22641 = vmatprep.subr.bf16.mxu0 %v27709_v49  ;;  %22650 = vmatprep.subr.bf16.mxu1 %v27709_v49 }
0x27dd   :  { %v26137_v32 = vsub.f32 %v11380_v37, %v11404_v21  ;;  %v11491_v25 = vsub.f32 %v26129_v26, %v11490_v62  ;;  %v22696_v1 = vpack.c.bf16 %v11490_v62, %v11483_v11  ;;  %v22705_v37 = vpack.c.bf16 %v11532_v14, %v11525_v47  ;;  %v11977_v14 = vld [vmem:[#allocation4 + $0x248] sm:$0xff] }
0x27df   :  { %22643 = vmatpush3.bf16.msra.mxu0 %v26042_v52  ;;  %v26123_v52 = vpack.c.bf16 %v11407_v2, %v11404_v21  ;;  %v11497_v17 = vand.u32 4294901760, %v26137_v32  ;;  %v11492_v60 = vand.u32 4294901760, %v11491_v25  ;;  %v22675_v58 = vpack.c.bf16 %v26139_v15, %v26137_v32  ;;  %v11968_v25 = vld [vmem:[#allocation4 + $0x200] sm:$0xff] }
0x27e0   :  { %22644 = vmatprep.subr.bf16.mxu0 %v27709_v49 }
0x27e1   :  { %22652 = vmatpush3.bf16.msra.mxu1 %v26123_v52  ;;  %v11498_v51 = vsub.f32 %v26137_v32, %v11497_v17  ;;  %v22660_v43 = vpack.c.bf16 %v11492_v60, %v11485_v3  ;;  %v22699_v39 = vpack.c.bf16 %v11504_v18, %v11497_v17  ;;  %v11970_v3 = vld [vmem:[#allocation4 + $0x210] sm:$0xff]  ;;  %v12002_v17 = vand.u32 4294901760, %v11968_v25 }
0x27e2   :  { %22653 = vmatprep.subr.bf16.mxu1 %v27709_v49  ;;  %v12006_v18 = vand.u32 4294901760, %v11970_v3 }
0x27e3   :  { %22646 = vmatpush3.bf16.msra.mxu0 %v26048_v20  ;;  %v11382_v20 = vld [vmem:[#allocation9 + $0xe0] sm:$0xff]  ;;  %v11499_v27 = vand.u32 4294901760, %v11498_v51 }
0x27e4   :  { %v11410_v44 = vand.u32 4294901760, %v11382_v20  ;;  %v26235_v51 = vpack.c.bf16 %v12006_v18, %v12002_v17  ;;  %v26245_v47 = vsub.f32 %v11970_v3, %v12006_v18 }
0x27e5   :  { %v22663_v61 = vpack.c.bf16 %v11506_v8, %v11499_v27  ;;  %v12008_v27 = vand.u32 4294901760, %v11973_v30 }
0x27e6   :  { %20743 = vmatmul.mubr.f32.vlgmr.msra.gmra.mrb[20].mxu0 %v10912_v12  ;;  %v26131_v6 = vpack.c.bf16 %v11413_v57, %v11410_v44  ;;  %v26141_v35 = vsub.f32 %v11382_v20, %v11410_v44  ;;  %v11534_v12 = vand.u32 4294901760, %v11533_v55 }
0x27e7   :  { %12080 = vmatprep.mubr.f32.mxu0 %v27689_v33 }
0x27e8   :  { %22655 = vmatpush3.bf16.msra.mxu1 %v26131_v6  ;;  %v11511_v53 = vand.u32 4294901760, %v26141_v35  ;;  %v22669_v4 = vpack.c.bf16 %v11534_v12, %v11527_v56  ;;  %v22678_v34 = vpack.c.bf16 %v26143_v23, %v26141_v35  ;;  %v26249_v56 = vsub.f32 %v11973_v30, %v12008_v27 }
0x27e9   :  { %22656 = vmatprep.subr.bf16.mxu1 %v27709_v49 }
0x27ea   :  { %v11512_v45 = vsub.f32 %v26141_v35, %v11511_v53  ;;  %v22702_v48 = vpack.c.bf16 %v11518_v40, %v11511_v53  ;;  %v11972_v53 = vld [vmem:[#allocation4 + $0x220] sm:$0xff]  ;;  %v11974_v40 = vld [vmem:[#allocation4 + $0x230] sm:$0xff] }
0x27ec   :  { %22658 = vmatpush3.bf16.msra.mxu1 %v26145_v63  ;;  %v11513_v36 = vand.u32 4294901760, %v11512_v45  ;;  %v12014_v45 = vand.u32 4294901760, %v11974_v40 }
0x27ed   :  { %22659 = vmatprep.subr.bf16.mxu1 %v27709_v49 }
0x27ee   :  { %v22666_v10 = vpack.c.bf16 %v11520_v28, %v11513_v36  ;;  %v26243_v28 = vsub.f32 %v11968_v25, %v12002_v17 }
0x28b9   :  { %v11372_v21 = vpop.f32.mrb[20].mxu0 }
0x28ba   :  { %v23434_v2 = vadd.f32 %v18736_v13, %v11372_v21  ;;  %v20744_v20 = vpop.f32.mrb[21].mxu0  ;;  %v12018_v13 = vand.u32 4294901760, %v11976_v7 }
0x28bc   :  { %v11376_v24 = vmax.f32 %v23434_v2, 0.0 }
0x28be   :  { %v11395_v44 = vsel %vm958_vm10, %v11376_v24, 0  ;;  %v11982_v24 = vld [vmem:[#allocation4 + $0x270] sm:$0xff] }
0x28bf   :  { %v11470_v57 = vand.u32 4294901760, %v11395_v44 }
0x28c1   :  { %v11471_v9 = vsub.f32 %v11395_v44, %v11470_v57 }
0x28c3   :  { %v11472_v26 = vand.u32 4294901760, %v11471_v9 }
0x28c5   :  { %v11473_v42 = vsub.f32 %v11471_v9, %v11472_v26 }
0x28c7   :  { %v11474_v19 = vand.u32 4294901760, %v11473_v42 }
0x28c9   :  { %20762 = vmatmul.mubr.f32.vlgmr.msra.gmra.mrb[18].mxu1 %v11474_v19  ;;  %v26269_v19 = vsub.f32 %v11976_v7, %v12018_v13 }
0x28ca   :  { %22661 = vmatpush3.bf16.msra.mxu1 %v22660_v43  ;;  %20780 = vmatprep.mubr.msk.f32.mxu1 %vm23937_vm11, %v27689_v33  ;;  %v11975_v43 = vld [vmem:[#allocation4 + $0x238] sm:$0xff] }
0x28cb   :  { %22662 = vmatprep.subr.bf16.mxu1 %v27709_v49  ;;  %v12012_v8 = vand.u32 4294901760, %v11975_v43 }
0x28cd   :  { %v26247_v55 = vpack.c.bf16 %v12012_v8, %v12008_v27  ;;  %v26251_v12 = vsub.f32 %v11975_v43, %v12012_v8  ;;  %v12118_v27 = vand.u32 4294901760, %v26249_v56 }
0x28ce   :  { %22664 = vmatpush3.bf16.msra.mxu1 %v22663_v61  ;;  %v12010_v61 = vand.u32 4294901760, %v11972_v53 }
0x28cf   :  { %22665 = vmatprep.subr.bf16.mxu1 %v27709_v49  ;;  %v12130_v8 = vand.u32 4294901760, %v26251_v12 }
0x28d2   :  { %22667 = vmatpush3.bf16.msra.mxu1 %v22666_v10  ;;  %v11979_v10 = vld [vmem:[#allocation4 + $0x258] sm:$0xff] }
0x28d3   :  { %22668 = vmatprep.subr.bf16.mxu1 %v27709_v49 }
0x28d6   :  { %22670 = vmatpush3.bf16.msra.mxu1 %v22669_v4  ;;  %v26253_v4 = vpack.c.bf16 %v12014_v45, %v12010_v61 }
0x28d7   :  { %22671 = vmatprep.subr.bf16.mxu1 %v27709_v49 }
0x28d9   :  { %20781 = vmatmul.mubr.f32.vlgmr.msra.gmra.mrb[18].mxu1 %v11470_v57 }
0x28da   :  { %22673 = vmatpush3.bf16.msra.mxu1 %v22672_v59  ;;  %20799 = vmatprep.mubr.msk.f32.mxu1 %vm23937_vm11, %v27689_v33  ;;  %v11978_v59 = vld [vmem:[#allocation4 + $0x250] sm:$0xff] }
0x28db   :  { %22674 = vmatprep.subr.bf16.mxu1 %v27709_v49  ;;  %v12022_v21 = vand.u32 4294901760, %v11978_v59 }
0x28dd   :  { %v26267_v42 = vpack.c.bf16 %v12022_v21, %v12018_v13 }
0x28de   :  { %22676 = vmatpush3.bf16.msra.mxu1 %v22675_v58  ;;  %v11981_v58 = vld [vmem:[#allocation4 + $0x268] sm:$0xff] }
0x28df   :  { %22677 = vmatprep.subr.bf16.mxu1 %v27709_v49  ;;  %v12024_v2 = vand.u32 4294901760, %v11981_v58 }
0x28e2   :  { %22679 = vmatpush3.bf16.msra.mxu1 %v22678_v34  ;;  %v11983_v34 = vld [vmem:[#allocation4 + $0x278] sm:$0xff] }
0x28e3   :  { %22680 = vmatprep.subr.bf16.mxu1 %v27709_v49  ;;  %v12028_v20 = vand.u32 4294901760, %v11983_v34 }
0x28e6   :  { %22682 = vmatpush3.bf16.msra.mxu1 %v22681_v5  ;;  %v26255_v5 = vsub.f32 %v11972_v53, %v12010_v61 }
0x28e7   :  { %22683 = vmatprep.subr.bf16.mxu1 %v27709_v49 }
0x28e8   :  { %v12124_v53 = vand.u32 4294901760, %v26255_v5 }
0x28e9   :  { %20800 = vmatmul.mubr.f32.vlgmr.msra.gmra.mrb[18].mxu1 %v11471_v9 }
0x28ea   :  { %22685 = vmatpush3.bf16.msra.mxu1 %v26119_v22  ;;  %20818 = vmatprep.mubr.msk.f32.mxu1 %vm23937_vm11, %v27689_v33  ;;  %v12125_v7 = vsub.f32 %v26255_v5, %v12124_v53 }
0x28eb   :  { %22686 = vmatprep.subr.bf16.mxu1 %v27709_v49 }
0x28ee   :  { %22688 = vmatpush3.bf16.msra.mxu1 %v26123_v52 }
0x28ef   :  { %22689 = vmatprep.subr.bf16.mxu1 %v27709_v49 }
0x28f2   :  { %22691 = vmatpush3.bf16.msra.mxu1 %v26131_v6 }
0x28f3   :  { %22692 = vmatprep.subr.bf16.mxu1 %v27709_v49 }
0x28f6   :  { %22694 = vmatpush3.bf16.msra.mxu1 %v26145_v63 }
0x28f7   :  { %22695 = vmatprep.subr.bf16.mxu1 %v27709_v49 }
0x28f9   :  { %20819 = vmatmul.mubr.f32.vlgmr.msra.gmra.mrb[18].mxu1 %v11472_v26 }
0x28fa   :  { %22697 = vmatpush3.bf16.msra.mxu1 %v22696_v1  ;;  %20837 = vmatprep.mubr.msk.f32.mxu1 %vm23937_vm11, %v27689_v33  ;;  %v26257_v1 = vsub.f32 %v11974_v40, %v12014_v45 }
0x28fb   :  { %22698 = vmatprep.subr.bf16.mxu1 %v27709_v49 }
0x28fc   :  { %v12136_v40 = vand.u32 4294901760, %v26257_v1 }
0x28fe   :  { %22700 = vmatpush3.bf16.msra.mxu1 %v22699_v39  ;;  %v12016_v39 = vand.u32 4294901760, %v11977_v14 }
0x28ff   :  { %22701 = vmatprep.subr.bf16.mxu1 %v27709_v49 }
0x2902   :  { %22703 = vmatpush3.bf16.msra.mxu1 %v22702_v48  ;;  %v12020_v48 = vand.u32 4294901760, %v11979_v10 }
0x2903   :  { %22704 = vmatprep.subr.bf16.mxu1 %v27709_v49 }
0x2904   :  { %v26261_v44 = vpack.c.bf16 %v12020_v48, %v12016_v39  ;;  %v26265_v9 = vsub.f32 %v11979_v10, %v12020_v48  ;;  %v12131_v10 = vsub.f32 %v26251_v12, %v12130_v8 }
0x2906   :  { %22706 = vmatpush3.bf16.msra.mxu1 %v22705_v37  ;;  %v11980_v37 = vld [vmem:[#allocation4 + $0x260] sm:$0xff]  ;;  %v12132_v48 = vand.u32 4294901760, %v12131_v10 }
0x2907   :  { %22707 = vmatprep.subr.bf16.mxu1 %v27709_v49  ;;  %v12026_v26 = vand.u32 4294901760, %v11980_v37 }
0x2909   :  { %20838 = vmatmul.mubr.f32.vlgmr.msra.gmra.mrb[18].mxu1 %v11470_v57 }
0x290a   :  { %22709 = vmatpush3.bf16.msra.mxu1 %v26119_v22  ;;  %20856 = vmatprep.mubr.msk.f32.mxu1 %vm23937_vm11, %v27689_v33  ;;  %v18738_v22 = vld [vmem:[%s27618_s12 + $0x3] ss:$0 sm:$0xff] }
0x290b   :  { %22710 = vmatprep.subr.bf16.mxu1 %v27709_v49 }
0x290e   :  { %22712 = vmatpush3.bf16.msra.mxu1 %v26123_v52 }
0x290f   :  { %22713 = vmatprep.subr.bf16.mxu1 %v27709_v49 }
0x2912   :  { %22715 = vmatpush3.bf16.msra.mxu1 %v26131_v6 }
0x2913   :  { %22716 = vmatprep.subr.bf16.mxu1 %v27709_v49 }
0x2916   :  { %22718 = vmatpush3.bf16.msra.mxu1 %v26145_v63 }
0x2917   :  { %20859 = vmatprep.subr.mxu1 %v27689_v33 }
0x2919   :  { %20857 = vmatmul.mubr.f32.vlgmr.msra.gmra.mrb[18].mxu1 %v11470_v57  ;;  %v26263_v57 = vsub.f32 %v11977_v14, %v12016_v39  ;;  %v12119_v14 = vsub.f32 %v26249_v56, %v12118_v27 }
0x291a   :  { %20861 = vmatprep.mubr.msk.f32.mxu1 %vm23937_vm11, %v27689_v33 }
0x291b   :  { %v12120_v39 = vand.u32 4294901760, %v12119_v14 }
0x29ec   :  { %v11930_v16 = vpop.f32.mrb[18].mxu1 }
0x29ed   :  { %v23435_v52 = vadd.f32 %v18738_v22, %v11930_v16  ;;  %v20858_v41 = vpop.f32.mrb[19].mxu1  ;;  %v26271_v22 = vsub.f32 %v11978_v59, %v12022_v21  ;;  %v26273_v16 = vpack.c.bf16 %v12028_v20, %v12024_v2  ;;  %v12137_v59 = vsub.f32 %v26257_v1, %v12136_v40 }
0x29ee   :  { %v26278_v41 = vsub.f32 %v11983_v34, %v12028_v20  ;;  %v12154_v34 = vand.u32 4294901760, %v26265_v9  ;;  %v12148_v20 = vand.u32 4294901760, %v26269_v19 }
0x29ef   :  { %v11934_v11 = vmax.f32 %v23435_v52, 0.0  ;;  %v26276_v52 = vsub.f32 %v11981_v58, %v12024_v2  ;;  %v12142_v58 = vand.u32 4294901760, %v26263_v57  ;;  %v12138_v13 = vand.u32 4294901760, %v12137_v59 }
0x29f0   :  { %v12155_v2 = vsub.f32 %v26265_v9, %v12154_v34 }
0x29f1   :  { %v26223_v6 = vadd.f32 %v26011_v54, %v11934_v11  ;;  %v12004_v54 = vand.u32 4294901760, %v11971_v46  ;;  %v12030_v11 = vand.u32 4294901760, %v11982_v24  ;;  %v12143_v21 = vsub.f32 %v26263_v57, %v12142_v58 }
0x29f3   :  { %v11940_v62 = vsel %vm439_vm9, %v26223_v6, 0.0  ;;  %v26233_v60 = vpack.c.bf16 %v12004_v54, %v12000_v38  ;;  %v26241_v36 = vsub.f32 %v11971_v46, %v12004_v54  ;;  %v26287_v29 = vpack.c.bf16 %v12030_v11, %v12026_v26 }
0x29f4   :  { %11941 = vadd.xlane.f32.xlu0 %v11940_v62  ;;  %v26280_v62 = vsub.f32 %v11980_v37, %v12026_v26  ;;  %v26289_v46 = vsub.f32 %v11982_v24, %v12030_v11  ;;  %v12126_v37 = vand.u32 4294901760, %v12125_v7  ;;  %v12160_v24 = vand.u32 4294901760, %v26271_v22 }
0x29f5   :  { %22720 = vmatprep.subr.bf16.mxu0 %v26233_v60  ;;  %v22739_v26 = vpack.c.bf16 %v12132_v48, %v12120_v39 }
0x29f6   :  { %22722 = vmatpush1.bf16.msra.mxu0 %v26235_v51  ;;  %v22741_v11 = vpack.c.bf16 %v12138_v13, %v12126_v37 }
0x29f7   :  { %22724 = vmatprep.subr.bf16.mxu0 %v26247_v55 }
0x29fa   :  { %22726 = vmatpush1.bf16.msra.mxu0 %v26253_v4 }
0x29fb   :  { %22728 = vmatprep.subr.bf16.mxu0 %v26261_v44 }
0x29fe   :  { %22730 = vmatpush1.bf16.msra.mxu0 %v26267_v42 }
0x29ff   :  { %22732 = vmatprep.subr.bf16.mxu0 %v26273_v16 }
0x2a02   :  { %22734 = vmatpush1.bf16.msra.mxu0 %v26287_v29 }
0x2a81   :  { %v11942_v32 = vpop.xlane.xlu0 %11941 }
0x2a82   :  { %v11943_v15 = vmul.f32 0.015625, %v11942_v32  ;;  %v12094_v32 = vand.u32 4294901760, %v26239_v0 }
0x2a84   :  { %v26228_v35 = vsub.f32 %v26223_v6, %v11943_v15  ;;  %v27651_v15 = vand.u32 4294901760, %v26241_v36  ;;  %v12095_v38 = vsub.f32 %v26239_v0, %v12094_v32 }
0x2a86   :  { %v11945_v23 = vmul.f32 %v26228_v35, %v26228_v35  ;;  %v12107_v54 = vsub.f32 %v26241_v36, %v27651_v15  ;;  %v12096_v17 = vand.u32 4294901760, %v12095_v38  ;;  %v12144_v38 = vand.u32 4294901760, %v12143_v21 }
0x2a88   :  { %v11946_v63 = vsel %vm439_vm9, %v11945_v23, 0.0  ;;  %v27650_v23 = vand.u32 4294901760, %v26243_v28  ;;  %v12108_v18 = vand.u32 4294901760, %v12107_v54  ;;  %v12156_v54 = vand.u32 4294901760, %v12155_v2 }
0x2a89   :  { %11947 = vadd.xlane.f32.xlu0 %v11946_v63  ;;  %v27649_v63 = vand.u32 4294901760, %v26245_v47 }
0x2a8a   :  { %v12101_v25 = vsub.f32 %v26243_v28, %v27650_v23  ;;  %v22735_v61 = vpack.c.bf16 %v12108_v18, %v12096_v17  ;;  %v12166_v17 = vand.u32 4294901760, %v26276_v52  ;;  %v12178_v18 = vand.u32 4294901760, %v26278_v41 }
0x2a8b   :  { %v12113_v3 = vsub.f32 %v26245_v47, %v27649_v63 }
0x2a8c   :  { %v12102_v30 = vand.u32 4294901760, %v12101_v25  ;;  %22736 = vmatprep.subr.bf16.mxu0 %v22735_v61  ;;  %v12149_v25 = vsub.f32 %v26269_v19, %v12148_v20  ;;  %v22743_v61 = vpack.c.bf16 %v12156_v54, %v12144_v38  ;;  %v12167_v7 = vsub.f32 %v26276_v52, %v12166_v17 }
0x2a8d   :  { %v12114_v43 = vand.u32 4294901760, %v12113_v3  ;;  %v12161_v3 = vsub.f32 %v26271_v22, %v12160_v24  ;;  %v12179_v59 = vsub.f32 %v26278_v41, %v12178_v18  ;;  %v22751_v38 = vpack.c.bf16 %v26241_v36, %v26239_v0  ;;  %v26358_v0 = vld [vmem:[%s27611_s5 + $0x4] ss:$0 sm:$0xff] }
0x2a8e   :  { %v12150_v14 = vand.u32 4294901760, %v12149_v25  ;;  %v12168_v13 = vand.u32 4294901760, %v12167_v7  ;;  %v22753_v54 = vpack.c.bf16 %v26245_v47, %v26243_v28  ;;  %v22755_v25 = vpack.c.bf16 %v26251_v12, %v26249_v56 }
0x2a8f   :  { %v26309_v45 = vpack.c.bf16 %v12114_v43, %v12102_v30  ;;  %v12172_v30 = vand.u32 4294901760, %v26280_v62  ;;  %v12184_v43 = vand.u32 4294901760, %v26289_v46  ;;  %v12162_v10 = vand.u32 4294901760, %v12161_v3 }
0x2a90   :  { %v12180_v21 = vand.u32 4294901760, %v12179_v59  ;;  %v22757_v3 = vpack.c.bf16 %v26257_v1, %v26255_v5  ;;  %v22765_v7 = vpack.c.bf16 %v26289_v46, %v26280_v62  ;;  %v27716_v59 = vand.u32 4294901760, %v26241_v36 }
0x2a91   :  { %v12173_v39 = vsub.f32 %v26280_v62, %v12172_v30  ;;  %v12185_v48 = vsub.f32 %v26289_v46, %v12184_v43  ;;  %v22745_v37 = vpack.c.bf16 %v12162_v10, %v12150_v14  ;;  %v22759_v14 = vpack.c.bf16 %v26265_v9, %v26263_v57 }
0x2a92   :  { %v22747_v23 = vpack.c.bf16 %v12180_v21, %v12168_v13  ;;  %v22761_v10 = vpack.c.bf16 %v26271_v22, %v26269_v19  ;;  %v22783_v56 = vpack.c.bf16 %v27716_v59, %v12094_v32  ;;  %v27717_v12 = vand.u32 4294901760, %v26243_v28  ;;  %v26364_v28 = vld [vmem:[%s27612_s6 + $0x4] ss:$0 sm:$0xff] }
0x2a93   :  { %v12174_v2 = vand.u32 4294901760, %v12173_v39  ;;  %v12186_v63 = vand.u32 4294901760, %v12185_v48  ;;  %v27718_v5 = vand.u32 4294901760, %v26245_v47  ;;  %v22787_v57 = vpack.c.bf16 %v12130_v8, %v12118_v27 }
0x2a94   :  { %v22789_v9 = vpack.c.bf16 %v12136_v40, %v12124_v53  ;;  %v22791_v39 = vpack.c.bf16 %v12154_v34, %v12142_v58  ;;  %v22793_v19 = vpack.c.bf16 %v12160_v24, %v12148_v20  ;;  %v22795_v22 = vpack.c.bf16 %v12178_v18, %v12166_v17 }
0x2a95   :  { %v22749_v15 = vpack.c.bf16 %v12186_v63, %v12174_v2  ;;  %v22763_v63 = vpack.c.bf16 %v26278_v41, %v26276_v52  ;;  %v22785_v1 = vpack.c.bf16 %v27718_v5, %v27717_v12  ;;  %v22797_v48 = vpack.c.bf16 %v12184_v43, %v12172_v30 }
0x2b16   :  { %v11948_v52 = vpop.xlane.xlu0 %11947 }
0x2b17   :  { %v11949_v41 = vmul.f32 0.015625, %v11948_v52 }
0x2b19   :  { %v11950_v13 = vadd.f32 1e-06, %v11949_v41 }
0x2b1b   :  { %23812 = vrsqrt.f32 %v11950_v13 }
0x2b25   :  { %v23813_v62 = vpop.eup %23812 }
0x2b26   :  { %v11952_v36 = vmul.f32 %v23813_v62, %v26228_v35  ;;  %v18743_v35 = vld [vmem:[%s27614_s8 + $0x8] sm:$0x3] }
0x2b27   :  { %v11994_v18 = vrot.slane %v18743_v35, %v27705_v31 }
0x2b28   :  { %v11959_v47 = vmul.f32 %v26358_v0, %v11952_v36 }
0x2b2a   :  { %v11966_v32 = vadd.f32 %v26364_v28, %v11959_v47 }
0x2b2c   :  { %v11998_v46 = vsel %vm958_vm10, %v11966_v32, 0 }
0x2b2d   :  { %v12081_v27 = vand.u32 4294901760, %v11998_v46 }
0x2b2f   :  { %v12082_v8 = vsub.f32 %v11998_v46, %v12081_v27 }
0x2b31   :  { %v12083_v53 = vand.u32 4294901760, %v12082_v8 }
0x2b33   :  { %v12084_v40 = vsub.f32 %v12082_v8, %v12083_v53 }
0x2b35   :  { %v12085_v58 = vand.u32 4294901760, %v12084_v40 }
0x2b37   :  { %12086 = vmatmul.mubr.f32.vlgmr.msra.gmra.mrb[22].mxu0 %v12085_v58 }
0x2b38   :  { %22738 = vmatpush1.bf16.msra.mxu0 %v26309_v45  ;;  %12236 = vmatprep.mubr.f32.mxu0 %v27689_v33 }
0x2b39   :  { %22740 = vmatprep.subr.bf16.mxu0 %v22739_v26 }
0x2b3c   :  { %22742 = vmatpush1.bf16.msra.mxu0 %v22741_v11 }
0x2b3d   :  { %22744 = vmatprep.subr.bf16.mxu0 %v22743_v61 }
0x2b40   :  { %22746 = vmatpush1.bf16.msra.mxu0 %v22745_v37 }
0x2b41   :  { %22748 = vmatprep.subr.bf16.mxu0 %v22747_v23 }
0x2b44   :  { %22750 = vmatpush1.bf16.msra.mxu0 %v22749_v15 }
0x2b45   :  { %22752 = vmatprep.subr.bf16.mxu0 %v22751_v38 }
0x2b47   :  { %12238 = vmatmul.mubr.f32.vlgmr.msra.gmra.mrb[22].mxu0 %v12081_v27 }
0x2b48   :  { %22754 = vmatpush1.bf16.msra.mxu0 %v22753_v54  ;;  %12340 = vmatprep.mubr.f32.mxu0 %v27689_v33 }
0x2b49   :  { %22756 = vmatprep.subr.bf16.mxu0 %v22755_v25 }
0x2b4c   :  { %22758 = vmatpush1.bf16.msra.mxu0 %v22757_v3 }
0x2b4d   :  { %22760 = vmatprep.subr.bf16.mxu0 %v22759_v14 }
0x2b50   :  { %22762 = vmatpush1.bf16.msra.mxu0 %v22761_v10 }
0x2b51   :  { %22764 = vmatprep.subr.bf16.mxu0 %v22763_v63 }
0x2b54   :  { %22766 = vmatpush1.bf16.msra.mxu0 %v22765_v7 }
0x2b55   :  { %22768 = vmatprep.subr.bf16.mxu0 %v26233_v60 }
0x2b57   :  { %12343 = vmatmul.mubr.f32.vlgmr.msra.gmra.mrb[22].mxu0 %v12082_v8  ;;  %v13580_v8 = vld [vmem:[#allocation7 + $0x100] sm:$0xff] }
0x2b58   :  { %22770 = vmatpush1.bf16.msra.mxu0 %v26235_v51  ;;  %12429 = vmatprep.mubr.f32.mxu0 %v27689_v33 }
0x2b59   :  { %22772 = vmatprep.subr.bf16.mxu0 %v26247_v55 }
0x2b5c   :  { %22774 = vmatpush1.bf16.msra.mxu0 %v26253_v4 }
0x2b5d   :  { %22776 = vmatprep.subr.bf16.mxu0 %v26261_v44 }
0x2b60   :  { %22778 = vmatpush1.bf16.msra.mxu0 %v26267_v42 }
0x2b61   :  { %22780 = vmatprep.subr.bf16.mxu0 %v26273_v16 }
0x2b64   :  { %22782 = vmatpush1.bf16.msra.mxu0 %v26287_v29 }
0x2b65   :  { %22784 = vmatprep.subr.bf16.mxu0 %v22783_v56 }
0x2b67   :  { %12433 = vmatmul.mubr.f32.vlgmr.msra.gmra.mrb[22].mxu0 %v12083_v53  ;;  %v13581_v53 = vld [vmem:[#allocation7 + $0x108] sm:$0xff] }
0x2b68   :  { %22786 = vmatpush1.bf16.msra.mxu0 %v22785_v1  ;;  %12551 = vmatprep.mubr.f32.mxu0 %v27689_v33  ;;  %v13603_v40 = vand.u32 4294901760, %v13581_v53 }
0x2b69   :  { %22788 = vmatprep.subr.bf16.mxu0 %v22787_v57 }
0x2b6c   :  { %22790 = vmatpush1.bf16.msra.mxu0 %v22789_v9 }
0x2b6d   :  { %22792 = vmatprep.subr.bf16.mxu0 %v22791_v39 }
0x2b70   :  { %22794 = vmatpush1.bf16.msra.mxu0 %v22793_v19 }
0x2b71   :  { %22796 = vmatprep.subr.bf16.mxu0 %v22795_v22 }
0x2b74   :  { %22798 = vmatpush1.bf16.msra.mxu0 %v22797_v48 }
0x2b75   :  { %22800 = vmatprep.subr.bf16.mxu0 %v26233_v60  ;;  %v11990_v60 = vrot.slane %v18743_v35, %v27704_v50  ;;  %v13582_v35 = vld [vmem:[#allocation7 + $0x110] sm:$0xff] }
0x2b77   :  { %12553 = vmatmul.mubr.f32.vlgmr.msra.gmra.mrb[22].mxu0 %v12081_v27 }
0x2b78   :  { %22802 = vmatpush1.bf16.msra.mxu0 %v26235_v51  ;;  %12639 = vmatprep.mubr.f32.mxu0 %v27689_v33 }
0x2b79   :  { %22804 = vmatprep.subr.bf16.mxu0 %v26247_v55 }
0x2b7c   :  { %22806 = vmatpush1.bf16.msra.mxu0 %v26253_v4 }
0x2b7d   :  { %22808 = vmatprep.subr.bf16.mxu0 %v26261_v44 }
0x2b80   :  { %22810 = vmatpush1.bf16.msra.mxu0 %v26267_v42 }
0x2b81   :  { %22812 = vmatprep.subr.bf16.mxu0 %v26273_v16 }
0x2b84   :  { %22814 = vmatpush1.bf16.msra.mxu0 %v26287_v29 }
0x2b85   :  { %22887 = vmatprep.subr.bf16.mxu0 %v27709_v49 }
0x2b87   :  { %12641 = vmatmul.mubr.f32.vlgmr.msra.gmra.mrb[22].mxu0 %v12081_v27 }
0x2b88   :  { %21049 = vmatprep.mubr.msk.f32.mxu0 %vm23937_vm11, %v27689_v33 }
0x2c5a   :  { %v12642_v51 = vpop.f32.mrb[22].mxu0 }
0x2c5b   :  { %v23436_v55 = vadd.f32 %v12642_v51, %v11990_v60  ;;  %v12644_v4 = vpop.f32.mrb[23].mxu0  ;;  %v13583_v60 = vld [vmem:[#allocation7 + $0x118] sm:$0xff] }
0x2c5c   :  { %v23437_v30 = vadd.f32 %v12644_v4, %v11994_v18  ;;  %v13606_v4 = vand.u32 4294901760, %v13582_v35 }
0x2c5d   :  { %12648 = vrot.lane.b32.xlu0 %v23436_v55, %s23938_s22  ;;  %v12650_v44 = vsel %vm958_vm10, %v23436_v55, 0  ;;  %v26458_v55 = vsub.f32 %v13581_v53, %v13603_v40 }
0x2c5e   :  { %v12720_v42 = vand.u32 4294901760, %v12650_v44  ;;  %v13116_v43 = vsel %vm2078_vm12, %v23437_v30, 0 }
0x2c5f   :  { %v13119_v61 = vand.u32 4294901760, %v13116_v43 }
0x2c60   :  { %v12721_v16 = vsub.f32 %v12650_v44, %v12720_v42  ;;  %v13609_v44 = vand.u32 4294901760, %v13583_v60 }
0x2c61   :  { %v13196_v59 = vsub.f32 %v13116_v43, %v13119_v61 }
0x2c62   :  { %v12722_v15 = vand.u32 4294901760, %v12721_v16 }
0x2c63   :  { %v13197_v1 = vand.u32 4294901760, %v13196_v59 }
0x2c64   :  { %v12723_v45 = vsub.f32 %v12721_v16, %v12722_v15 }
0x2c65   :  { %v13198_v39 = vsub.f32 %v13196_v59, %v13197_v1 }
0x2c66   :  { %v12724_v24 = vand.u32 4294901760, %v12723_v45  ;;  %v13587_v45 = vld [vmem:[#allocation7 + $0x138] sm:$0xff] }
0x2c67   :  { %v13199_v48 = vand.u32 4294901760, %v13198_v39 }
0x2ccf   :  { %v12649_v23 = vpop.permute.xlu0 %12648 }
0x2cd0   :  { %v12652_v29 = vsel %vm958_vm10, %v12649_v23, 0 }
0x2cd1   :  { %v12655_v34 = vand.u32 4294901760, %v12652_v29 }
0x2cd3   :  { %v12732_v20 = vsub.f32 %v12652_v29, %v12655_v34  ;;  %20860 = vmatpush3.xpose.msra.mxu1 %v12655_v34 }
0x2cd4   :  { %20864 = vmatprep.subr.mxu1 %v27689_v33 }
0x2cd5   :  { %v12733_v26 = vand.u32 4294901760, %v12732_v20 }
0x2cd6   :  { %20862 = vmatmul.mubr.f32.vlgmr.msra.gmra.mrb[20].mxu1 %v12724_v24  ;;  %v26463_v24 = vsub.f32 %v13582_v35, %v13606_v4 }
0x2cd7   :  { %v12734_v11 = vsub.f32 %v12732_v20, %v12733_v26  ;;  %20866 = vmatprep.mubr.msk.f32.mxu1 %vm23937_vm11, %v27689_v33 }
0x2cd9   :  { %v12735_v17 = vand.u32 4294901760, %v12734_v11  ;;  %v13621_v11 = vand.u32 4294901760, %v13587_v45 }
0x2cdb   :  { %20865 = vmatpush3.xpose.msra.mxu1 %v12735_v17 }
0x2cdc   :  { %20869 = vmatprep.subr.mxu1 %v27689_v33 }
0x2cde   :  { %20867 = vmatmul.mubr.f32.vlgmr.msra.gmra.mrb[20].mxu1 %v12720_v42 }
0x2cdf   :  { %20870 = vmatpush3.xpose.msra.mxu1 %v12732_v20  ;;  %20871 = vmatprep.mubr.msk.f32.mxu1 %vm23937_vm11, %v27689_v33  ;;  %v26461_v20 = vpack.c.bf16 %v13609_v44, %v13606_v4 }
0x2ce0   :  { %20874 = vmatprep.subr.mxu1 %v27689_v33 }
0x2ce6   :  { %20872 = vmatmul.mubr.f32.vlgmr.msra.gmra.mrb[20].mxu1 %v12721_v16  ;;  %v13585_v16 = vld [vmem:[#allocation7 + $0x128] sm:$0xff] }
0x2ce7   :  { %20875 = vmatpush3.xpose.msra.mxu1 %v12655_v34  ;;  %20876 = vmatprep.mubr.msk.f32.mxu1 %vm23937_vm11, %v27689_v33  ;;  %v13615_v29 = vand.u32 4294901760, %v13585_v16 }
0x2ce8   :  { %20879 = vmatprep.subr.mxu1 %v27689_v33 }
0x2ce9   :  { %v26469_v18 = vsub.f32 %v13585_v16, %v13615_v29 }
0x2cee   :  { %20877 = vmatmul.mubr.f32.vlgmr.msra.gmra.mrb[20].mxu1 %v12722_v15  ;;  %v13586_v15 = vld [vmem:[#allocation7 + $0x130] sm:$0xff] }
0x2cef   :  { %20880 = vmatpush3.xpose.msra.mxu1 %v12733_v26  ;;  %20881 = vmatprep.mubr.msk.f32.mxu1 %vm23937_vm11, %v27689_v33  ;;  %v26465_v26 = vsub.f32 %v13583_v60, %v13609_v44 }
0x2cf0   :  { %20884 = vmatprep.subr.mxu1 %v27689_v33 }
0x2cf1   :  { %v22843_v53 = vpack.c.bf16 %v26465_v26, %v26463_v24 }
0x2cf6   :  { %20882 = vmatmul.mubr.f32.vlgmr.msra.gmra.mrb[20].mxu1 %v12720_v42 }
0x2cf7   :  { %20885 = vmatpush3.xpose.msra.mxu1 %v12655_v34  ;;  %20886 = vmatprep.mubr.msk.f32.mxu1 %vm23937_vm11, %v27689_v33  ;;  %v13618_v34 = vand.u32 4294901760, %v13586_v15 }
0x2cf8   :  { %20889 = vmatprep.subr.mxu1 %v27689_v33 }
0x2cf9   :  { %v26471_v30 = vsub.f32 %v13586_v15, %v13618_v34 }
0x2cfe   :  { %20887 = vmatmul.mubr.f32.vlgmr.msra.gmra.mrb[20].mxu1 %v12720_v42  ;;  %v13584_v42 = vld [vmem:[#allocation7 + $0x120] sm:$0xff] }
0x2cff   :  { %20890 = vmatpush3.msra.mxu1 %v13119_v61  ;;  %20891 = vmatprep.mubr.msk.f32.mxu1 %vm23937_vm11, %v27689_v33  ;;  %v13612_v23 = vand.u32 4294901760, %v13584_v42 }
0x2d00   :  { %20894 = vmatprep.subr.mxu1 %v27689_v33 }
0x2d01   :  { %v26467_v17 = vsub.f32 %v13584_v42, %v13612_v23  ;;  %v26474_v43 = vpack.c.bf16 %v13615_v29, %v13612_v23 }
0x2dd1   :  { %v13096_v37 = vpop.f32.mrb[20].mxu1 }
0x2dd2   :  { %v13100_v21 = vmul.f32 0.015625, %v13096_v37  ;;  %v20888_v2 = vpop.f32.mrb[21].mxu1  ;;  %v26480_v37 = vpack.c.bf16 %v13621_v11, %v13618_v34 }
0x2dd3   :  { %v13692_v2 = vand.u32 4294901760, %v26458_v55 }
0x2dd4   :  { %v13101_v38 = vsel %vm2062_vm13, %v13100_v21, -inf }
0x2dd5   :  { %13102 = vmax.xlane.f32.xlu1 %v13101_v38 }
0x2e62   :  { %v13103_v54 = vpop.xlane.xlu1 %13102 }
0x2e63   :  { %v13104_v25 = vsub.f32 %v13100_v21, %v13103_v54  ;;  %v13693_v54 = vsub.f32 %v26458_v55, %v13692_v2 }
0x2e65   :  { %v13105_v3 = vmul.f32 1.442695, %v13104_v25 }
0x2e67   :  { %23814 = vpow2.f32 %v13105_v3  ;;  %v13694_v3 = vand.u32 4294901760, %v13693_v54 }
0x2e71   :  { %v23815_v14 = vpop.eup %23814 }
0x2e72   :  { %v13107_v10 = vsel %vm2062_vm13, %v23815_v14, 0.0 }
0x2e73   :  { %13108 = vadd.xlane.f32.xlu0 %v13107_v10  ;;  %v13706_v10 = vand.u32 4294901760, %v26465_v26 }
0x2f00   :  { %v13109_v63 = vpop.xlane.xlu0 %13108 }
0x2f01   :  { %23816 = vrcp.f32 %v13109_v63 }
0x2f0b   :  { %v23817_v7 = vpop.eup %23816 }
0x2f0c   :  { %v13111_v56 = vmul.f32 %v23817_v7, %v23815_v14  ;;  %v13699_v14 = vand.u32 4294901760, %v26463_v24 }
0x2f0e   :  { %v13113_v12 = vsel %vm2074_vm14, %v13111_v56, 0  ;;  %v13700_v7 = vsub.f32 %v26463_v24, %v13699_v14  ;;  %v22867_v60 = vpack.c.bf16 %v13706_v10, %v13699_v14 }
0x2f0f   :  { %v13184_v5 = vand.u32 4294901760, %v13113_v12 }
0x2f10   :  { %v13701_v56 = vand.u32 4294901760, %v13700_v7 }
0x2f11   :  { %v13185_v57 = vsub.f32 %v13113_v12, %v13184_v5 }
0x2f13   :  { %v13186_v9 = vand.u32 4294901760, %v13185_v57 }
0x2f15   :  { %v13187_v19 = vsub.f32 %v13185_v57, %v13186_v9 }
0x2f17   :  { %v13188_v22 = vand.u32 4294901760, %v13187_v19 }
0x2f19   :  { %20892 = vmatmul.mubr.f32.vlgmr.msra.gmra.mrb[22].mxu1 %v13188_v22 }
0x2f1a   :  { %20895 = vmatpush3.msra.mxu1 %v13199_v48  ;;  %20896 = vmatprep.mubr.msk.f32.mxu1 %vm23937_vm11, %v27689_v33  ;;  %v13727_v48 = vand.u32 4294901760, %v26471_v30 }
0x2f1b   :  { %20899 = vmatprep.subr.mxu1 %v27689_v33 }
0x2f21   :  { %20897 = vmatmul.mubr.f32.vlgmr.msra.gmra.mrb[22].mxu1 %v13184_v5 }
0x2f22   :  { %20900 = vmatpush3.msra.mxu1 %v13196_v59  ;;  %20901 = vmatprep.mubr.msk.f32.mxu1 %vm23937_vm11, %v27689_v33  ;;  %v13707_v59 = vsub.f32 %v26465_v26, %v13706_v10  ;;  %v14144_v10 = vld [vmem:[#allocation9 + $0x130] sm:$0xff] }
0x2f23   :  { %20904 = vmatprep.subr.mxu1 %v27689_v33  ;;  %v14176_v7 = vand.u32 4294901760, %v14144_v10 }
0x2f24   :  { %v13708_v12 = vand.u32 4294901760, %v13707_v59 }
0x2f29   :  { %20902 = vmatmul.mubr.f32.vlgmr.msra.gmra.mrb[22].mxu1 %v13185_v57  ;;  %v22831_v57 = vpack.c.bf16 %v13708_v12, %v13701_v56 }
0x2f2a   :  { %20905 = vmatpush3.msra.mxu1 %v13119_v61  ;;  %20906 = vmatprep.mubr.msk.f32.mxu1 %vm23937_vm11, %v27689_v33 }
0x2f2b   :  { %20909 = vmatprep.subr.mxu1 %v27689_v33 }
0x2f31   :  { %20907 = vmatmul.mubr.f32.vlgmr.msra.gmra.mrb[22].mxu1 %v13186_v9 }
0x2f32   :  { %20910 = vmatpush3.msra.mxu1 %v13197_v1  ;;  %20911 = vmatprep.mubr.msk.f32.mxu1 %vm23937_vm11, %v27689_v33  ;;  %v13720_v1 = vand.u32 4294901760, %v26469_v18 }
0x2f33   :  { %20914 = vmatprep.subr.mxu1 %v27689_v33 }
0x2f34   :  { %v13721_v39 = vsub.f32 %v26469_v18, %v13720_v1 }
0x2f36   :  { %v13722_v22 = vand.u32 4294901760, %v13721_v39 }
0x2f39   :  { %20912 = vmatmul.mubr.f32.vlgmr.msra.gmra.mrb[22].mxu1 %v13184_v5 }
0x2f3a   :  { %20915 = vmatpush3.msra.mxu1 %v13119_v61  ;;  %20916 = vmatprep.mubr.msk.f32.mxu1 %vm23937_vm11, %v27689_v33  ;;  %v26476_v61 = vsub.f32 %v13587_v45, %v13621_v11 }
0x2f3b   :  { %22815 = vmatprep.subr.bf16.mxu1 %v27709_v49 }
0x2f41   :  { %20917 = vmatmul.mubr.f32.vlgmr.msra.gmra.mrb[22].mxu1 %v13184_v5  ;;  %v13713_v5 = vand.u32 4294901760, %v26467_v17 }
0x2f42   :  { %20935 = vmatprep.mubr.msk.f32.mxu1 %vm23937_vm11, %v27689_v33 }
0x2f43   :  { %v13714_v9 = vsub.f32 %v26467_v17, %v13713_v5  ;;  %v22870_v4 = vpack.c.bf16 %v13720_v1, %v13713_v5 }
0x2f45   :  { %v13715_v19 = vand.u32 4294901760, %v13714_v9 }
0x3014   :  { %v13560_v52 = vpop.f32.mrb[22].mxu1 }
0x3015   :  { %v26443_v41 = vadd.f32 %v13560_v52, %v26223_v6  ;;  %v20918_v13 = vpop.f32.mrb[23].mxu1  ;;  %v13600_v6 = vand.u32 4294901760, %v13580_v8  ;;  %v13734_v52 = vand.u32 4294901760, %v26476_v61 }
0x3016   :  { %v22834_v13 = vpack.c.bf16 %v13722_v22, %v13715_v19  ;;  %v26579_v19 = vsub.f32 %v14144_v10, %v14176_v7 }
0x3017   :  { %v13564_v62 = vsel %vm439_vm9, %v26443_v41, 0.0  ;;  %v26453_v58 = vpack.c.bf16 %v13603_v40, %v13600_v6  ;;  %v26456_v51 = vsub.f32 %v13580_v8, %v13600_v6  ;;  %v22846_v6 = vpack.c.bf16 %v26469_v18, %v26467_v17 }
0x3018   :  { %13565 = vadd.xlane.f32.xlu1 %v13564_v62  ;;  %v13728_v62 = vsub.f32 %v26471_v30, %v13727_v48  ;;  %v22849_v40 = vpack.c.bf16 %v26476_v61, %v26471_v30  ;;  %v22873_v44 = vpack.c.bf16 %v13734_v52, %v13727_v48  ;;  %v14140_v30 = vld [vmem:[#allocation9 + $0x110] sm:$0xff] }
0x3019   :  { %22817 = vmatpush3.bf16.msra.mxu1 %v26453_v58  ;;  %v13685_v21 = vand.u32 4294901760, %v26456_v51  ;;  %v22840_v8 = vpack.c.bf16 %v26458_v55, %v26456_v51 }
0x301a   :  { %22818 = vmatprep.subr.bf16.mxu1 %v27709_v49 }
0x301b   :  { %v13686_v38 = vsub.f32 %v26456_v51, %v13685_v21  ;;  %v22864_v35 = vpack.c.bf16 %v13692_v2, %v13685_v21  ;;  %v14143_v2 = vld [vmem:[#allocation9 + $0x128] sm:$0xff] }
0x301c   :  { %v14173_v54 = vand.u32 4294901760, %v14143_v2 }
0x301d   :  { %22820 = vmatpush3.bf16.msra.mxu1 %v26461_v20  ;;  %v13687_v25 = vand.u32 4294901760, %v13686_v38 }
0x301e   :  { %22821 = vmatprep.subr.bf16.mxu1 %v27709_v49  ;;  %v26575_v9 = vsub.f32 %v14143_v2, %v14173_v54 }
0x301f   :  { %v22828_v63 = vpack.c.bf16 %v13694_v3, %v13687_v25 }
0x3021   :  { %22823 = vmatpush3.bf16.msra.mxu1 %v26474_v43 }
0x3022   :  { %22824 = vmatprep.subr.bf16.mxu1 %v27709_v49 }
0x3025   :  { %22826 = vmatpush3.bf16.msra.mxu1 %v26480_v37 }
0x3026   :  { %22827 = vmatprep.subr.bf16.mxu1 %v27709_v49 }
0x30a5   :  { %v13566_v36 = vpop.xlane.xlu1 %13565 }
0x30a6   :  { %v13567_v47 = vmul.f32 0.015625, %v13566_v36  ;;  %v13735_v36 = vsub.f32 %v26476_v61, %v13734_v52  ;;  %v14141_v61 = vld [vmem:[#allocation9 + $0x118] sm:$0xff] }
0x30a7   :  { %v14167_v21 = vand.u32 4294901760, %v14141_v61 }
0x30a8   :  { %v26448_v32 = vsub.f32 %v26443_v41, %v13567_v47  ;;  %v13729_v47 = vand.u32 4294901760, %v13728_v62 }
0x30a9   :  { %v26571_v1 = vsub.f32 %v14141_v61, %v14167_v21  ;;  %v18745_v61 = vld [vmem:[%s27616_s10 + $0x4] ss:$0 sm:$0xff] }
0x30aa   :  { %v13569_v46 = vmul.f32 %v26448_v32, %v26448_v32 }
0x30ac   :  { %v13570_v27 = vsel %vm439_vm9, %v13569_v46, 0.0  ;;  %v13736_v46 = vand.u32 4294901760, %v13735_v36  ;;  %v14264_v36 = vand.u32 4294901760, %v26571_v1 }
0x30ad   :  { %13571 = vadd.xlane.f32.xlu1 %v13570_v27 }
0x30ae   :  { %v22837_v27 = vpack.c.bf16 %v13736_v46, %v13729_v47 }
0x313a   :  { %v13572_v42 = vpop.xlane.xlu1 %13571 }
0x313b   :  { %v13573_v16 = vmul.f32 0.015625, %v13572_v42 }
0x313d   :  { %v13574_v15 = vadd.f32 1e-06, %v13573_v16 }
0x313f   :  { %23818 = vrsqrt.f32 %v13574_v15  ;;  %v14285_v15 = vand.u32 4294901760, %v26579_v19 }
0x3149   :  { %v23819_v23 = vpop.eup %23818 }
0x314a   :  { %v13576_v51 = vmul.f32 %v23819_v23, %v26448_v32 }
0x314c   :  { %v13577_v55 = vmul.f32 %v26358_v0, %v13576_v51  ;;  %v14138_v0 = vld [vmem:[#allocation9 + $0x100] sm:$0xff] }
0x314d   :  { %v14158_v32 = vand.u32 4294901760, %v14138_v0 }
0x314e   :  { %v13578_v29 = vadd.f32 %v26364_v28, %v13577_v55  ;;  %v14139_v28 = vld [vmem:[#allocation9 + $0x108] sm:$0xff]  ;;  %v14286_v55 = vsub.f32 %v26579_v19, %v14285_v15 }
0x314f   :  { %v26559_v25 = vsub.f32 %v14138_v0, %v14158_v32 }
0x3150   :  { %v13597_v45 = vsel %vm958_vm10, %v13578_v29, 0 }
0x3151   :  { %v13672_v34 = vand.u32 4294901760, %v13597_v45  ;;  %v14243_v56 = vand.u32 4294901760, %v26559_v25 }
0x3153   :  { %v13673_v24 = vsub.f32 %v13597_v45, %v13672_v34  ;;  %v14244_v48 = vsub.f32 %v26559_v25, %v14243_v56  ;;  %v14287_v45 = vand.u32 4294901760, %v14286_v55  ;;  %v14736_v55 = vld [vmem:[#allocation4 + $0x2c0] sm:$0xff] }
0x3155   :  { %v13674_v26 = vand.u32 4294901760, %v13673_v24 }
0x3157   :  { %v13675_v11 = vsub.f32 %v13673_v24, %v13674_v26 }
0x3159   :  { %v13676_v17 = vand.u32 4294901760, %v13675_v11 }
0x315b   :  { %20936 = vmatmul.mubr.f32.vlgmr.msra.gmra.mrb[24].mxu1 %v13676_v17 }
0x315c   :  { %22829 = vmatpush3.bf16.msra.mxu1 %v22828_v63  ;;  %20954 = vmatprep.mubr.msk.f32.mxu1 %vm23937_vm11, %v27689_v33  ;;  %v14145_v63 = vld [vmem:[#allocation9 + $0x138] sm:$0xff] }
0x315d   :  { %22830 = vmatprep.subr.bf16.mxu1 %v27709_v49  ;;  %v14179_v59 = vand.u32 4294901760, %v14145_v63 }
0x315f   :  { %v26577_v39 = vpack.c.bf16 %v14179_v59, %v14176_v7  ;;  %v26581_v22 = vsub.f32 %v14145_v63, %v14179_v59 }
0x3160   :  { %22832 = vmatpush3.bf16.msra.mxu1 %v22831_v57 }
0x3161   :  { %22833 = vmatprep.subr.bf16.mxu1 %v27709_v49  ;;  %v14292_v23 = vand.u32 4294901760, %v26581_v22  ;;  %v22921_v0 = vpack.c.bf16 %v26581_v22, %v26579_v19  ;;  %v14729_v19 = vld [vmem:[#allocation4 + $0x288] sm:$0xff] }
0x3163   :  { %v14293_v29 = vsub.f32 %v26581_v22, %v14292_v23  ;;  %v14731_v22 = vld [vmem:[#allocation4 + $0x298] sm:$0xff] }
0x3164   :  { %22835 = vmatpush3.bf16.msra.mxu1 %v22834_v13  ;;  %v14245_v13 = vand.u32 4294901760, %v14244_v48  ;;  %v14760_v48 = vand.u32 4294901760, %v14729_v19 }
0x3165   :  { %22836 = vmatprep.subr.bf16.mxu1 %v27709_v49 }
0x3168   :  { %22838 = vmatpush3.bf16.msra.mxu1 %v22837_v27  ;;  %v14265_v27 = vsub.f32 %v26571_v1, %v14264_v36 }
0x3169   :  { %22839 = vmatprep.subr.bf16.mxu1 %v27709_v49 }
0x316b   :  { %20955 = vmatmul.mubr.f32.vlgmr.msra.gmra.mrb[24].mxu1 %v13672_v34 }
0x316c   :  { %22841 = vmatpush3.bf16.msra.mxu1 %v22840_v8  ;;  %20973 = vmatprep.mubr.msk.f32.mxu1 %vm23937_vm11, %v27689_v33 }
0x316d   :  { %22842 = vmatprep.subr.bf16.mxu1 %v27709_v49 }
0x3170   :  { %22844 = vmatpush3.bf16.msra.mxu1 %v22843_v53 }
0x3171   :  { %22845 = vmatprep.subr.bf16.mxu1 %v27709_v49 }
0x3174   :  { %22847 = vmatpush3.bf16.msra.mxu1 %v22846_v6  ;;  %v14266_v6 = vand.u32 4294901760, %v14265_v27  ;;  %v14733_v27 = vld [vmem:[#allocation4 + $0x2a8] sm:$0xff] }
0x3175   :  { %22848 = vmatprep.subr.bf16.mxu1 %v27709_v49 }
0x3178   :  { %22850 = vmatpush3.bf16.msra.mxu1 %v22849_v40 }
0x3179   :  { %22851 = vmatprep.subr.bf16.mxu1 %v27709_v49 }
0x317b   :  { %20974 = vmatmul.mubr.f32.vlgmr.msra.gmra.mrb[24].mxu1 %v13673_v24 }
0x317c   :  { %22853 = vmatpush3.bf16.msra.mxu1 %v26453_v58  ;;  %20992 = vmatprep.mubr.msk.f32.mxu1 %vm23937_vm11, %v27689_v33 }
0x317d   :  { %22854 = vmatprep.subr.bf16.mxu1 %v27709_v49 }
0x3180   :  { %22856 = vmatpush3.bf16.msra.mxu1 %v26461_v20 }
0x3181   :  { %22857 = vmatprep.subr.bf16.mxu1 %v27709_v49 }
0x3184   :  { %22859 = vmatpush3.bf16.msra.mxu1 %v26474_v43 }
0x3185   :  { %22860 = vmatprep.subr.bf16.mxu1 %v27709_v49 }
0x3188   :  { %22862 = vmatpush3.bf16.msra.mxu1 %v26480_v37 }
0x3189   :  { %22863 = vmatprep.subr.bf16.mxu1 %v27709_v49 }
0x318b   :  { %20993 = vmatmul.mubr.f32.vlgmr.msra.gmra.mrb[24].mxu1 %v13674_v26 }
0x318c   :  { %22865 = vmatpush3.bf16.msra.mxu1 %v22864_v35  ;;  %21011 = vmatprep.mubr.msk.f32.mxu1 %vm23937_vm11, %v27689_v33  ;;  %v14278_v35 = vand.u32 4294901760, %v26575_v9 }
0x318d   :  { %22866 = vmatprep.subr.bf16.mxu1 %v27709_v49 }
0x3190   :  { %22868 = vmatpush3.bf16.msra.mxu1 %v22867_v60 }
0x3191   :  { %22869 = vmatprep.subr.bf16.mxu1 %v27709_v49 }
0x3194   :  { %22871 = vmatpush3.bf16.msra.mxu1 %v22870_v4 }
0x3195   :  { %22872 = vmatprep.subr.bf16.mxu1 %v27709_v49 }
0x3198   :  { %22874 = vmatpush3.bf16.msra.mxu1 %v22873_v44  ;;  %v14279_v44 = vsub.f32 %v26575_v9, %v14278_v35 }
0x3199   :  { %22875 = vmatprep.subr.bf16.mxu1 %v27709_v49 }
0x319a   :  { %v14280_v16 = vand.u32 4294901760, %v14279_v44  ;;  %v26671_v44 = vsub.f32 %v14729_v19, %v14760_v48 }
0x319b   :  { %21012 = vmatmul.mubr.f32.vlgmr.msra.gmra.mrb[24].mxu1 %v13672_v34 }
0x319c   :  { %22877 = vmatpush3.bf16.msra.mxu1 %v26453_v58  ;;  %21030 = vmatprep.mubr.msk.f32.mxu1 %vm23937_vm11, %v27689_v33  ;;  %v14161_v58 = vand.u32 4294901760, %v14139_v28 }
0x319d   :  { %22878 = vmatprep.subr.bf16.mxu1 %v27709_v49 }
0x319e   :  { %v26551_v18 = vpack.c.bf16 %v14161_v58, %v14158_v32  ;;  %v26561_v3 = vsub.f32 %v14139_v28, %v14161_v58 }
0x31a0   :  { %22880 = vmatpush3.bf16.msra.mxu1 %v26461_v20  ;;  %22889 = vmatpush3.bf16.msra.mxu0 %v26551_v18  ;;  %v14164_v20 = vand.u32 4294901760, %v14140_v30  ;;  %v14250_v12 = vand.u32 4294901760, %v26561_v3  ;;  %v22912_v26 = vpack.c.bf16 %v26561_v3, %v26559_v25 }
0x31a1   :  { %22881 = vmatprep.subr.bf16.mxu1 %v27709_v49  ;;  %22890 = vmatprep.subr.bf16.mxu0 %v27709_v49 }
0x31a2   :  { %v26569_v5 = vsub.f32 %v14140_v30, %v14164_v20  ;;  %v14251_v52 = vsub.f32 %v26561_v3, %v14250_v12  ;;  %v22936_v28 = vpack.c.bf16 %v14250_v12, %v14243_v56  ;;  %v22945_v30 = vpack.c.bf16 %v14292_v23, %v14285_v15  ;;  %v14737_v23 = vld [vmem:[#allocation4 + $0x2c8] sm:$0xff] }
0x31a4   :  { %22883 = vmatpush3.bf16.msra.mxu1 %v26474_v43  ;;  %v26555_v43 = vpack.c.bf16 %v14167_v21, %v14164_v20  ;;  %v14257_v62 = vand.u32 4294901760, %v26569_v5  ;;  %v14252_v47 = vand.u32 4294901760, %v14251_v52  ;;  %v22915_v11 = vpack.c.bf16 %v26571_v1, %v26569_v5  ;;  %v14728_v52 = vld [vmem:[#allocation4 + $0x280] sm:$0xff] }
0x31a5   :  { %22884 = vmatprep.subr.bf16.mxu1 %v27709_v49 }
0x31a6   :  { %22892 = vmatpush3.bf16.msra.mxu0 %v26555_v43  ;;  %v14258_v46 = vsub.f32 %v26569_v5, %v14257_v62  ;;  %v22900_v8 = vpack.c.bf16 %v14252_v47, %v14245_v13  ;;  %v22939_v32 = vpack.c.bf16 %v14264_v36, %v14257_v62  ;;  %v14730_v13 = vld [vmem:[#allocation4 + $0x290] sm:$0xff]  ;;  %v14762_v62 = vand.u32 4294901760, %v14728_v52 }
0x31a7   :  { %22893 = vmatprep.subr.bf16.mxu0 %v27709_v49  ;;  %v14766_v36 = vand.u32 4294901760, %v14730_v13 }
0x31a8   :  { %22886 = vmatpush3.bf16.msra.mxu1 %v26480_v37  ;;  %v14142_v37 = vld [vmem:[#allocation9 + $0x120] sm:$0xff]  ;;  %v14259_v53 = vand.u32 4294901760, %v14258_v46 }
0x31a9   :  { %v14170_v38 = vand.u32 4294901760, %v14142_v37  ;;  %v26667_v46 = vpack.c.bf16 %v14766_v36, %v14762_v62  ;;  %v26677_v15 = vsub.f32 %v14730_v13, %v14766_v36 }
0x31aa   :  { %v22903_v60 = vpack.c.bf16 %v14266_v6, %v14259_v53  ;;  %v14768_v53 = vand.u32 4294901760, %v14733_v27 }
0x31ab   :  { %21031 = vmatmul.mubr.f32.vlgmr.msra.gmra.mrb[24].mxu1 %v13672_v34  ;;  %v26563_v14 = vpack.c.bf16 %v14173_v54, %v14170_v38  ;;  %v26573_v57 = vsub.f32 %v14142_v37, %v14170_v38  ;;  %v14294_v34 = vand.u32 4294901760, %v14293_v29 }
0x31ac   :  { %14840 = vmatprep.mubr.f32.mxu1 %v27689_v33 }
0x31ad   :  { %22895 = vmatpush3.bf16.msra.mxu0 %v26563_v14  ;;  %v14271_v40 = vand.u32 4294901760, %v26573_v57  ;;  %v22909_v24 = vpack.c.bf16 %v14294_v34, %v14287_v45  ;;  %v22918_v17 = vpack.c.bf16 %v26575_v9, %v26573_v57  ;;  %v26681_v45 = vsub.f32 %v14733_v27, %v14768_v53 }
0x31ae   :  { %22896 = vmatprep.subr.bf16.mxu0 %v27709_v49 }
0x31af   :  { %v14272_v4 = vsub.f32 %v26573_v57, %v14271_v40  ;;  %v22942_v58 = vpack.c.bf16 %v14278_v35, %v14271_v40  ;;  %v14732_v40 = vld [vmem:[#allocation4 + $0x2a0] sm:$0xff]  ;;  %v14734_v35 = vld [vmem:[#allocation4 + $0x2b0] sm:$0xff] }
0x31b1   :  { %22898 = vmatpush3.bf16.msra.mxu0 %v26577_v39  ;;  %v14273_v42 = vand.u32 4294901760, %v14272_v4  ;;  %v14774_v4 = vand.u32 4294901760, %v14734_v35 }
0x31b2   :  { %22899 = vmatprep.subr.bf16.mxu0 %v27709_v49 }
0x31b3   :  { %v22906_v51 = vpack.c.bf16 %v14280_v16, %v14273_v42  ;;  %v26675_v16 = vsub.f32 %v14728_v52, %v14762_v62 }
0x327e   :  { %v14132_v20 = vpop.f32.mrb[24].mxu1 }
0x327f   :  { %v23439_v21 = vadd.f32 %v18745_v61, %v14132_v20  ;;  %v21032_v37 = vpop.f32.mrb[25].mxu1  ;;  %v14778_v61 = vand.u32 4294901760, %v14736_v55 }
0x3281   :  { %v14136_v2 = vmax.f32 %v23439_v21, 0.0 }
0x3283   :  { %v14155_v38 = vsel %vm958_vm10, %v14136_v2, 0  ;;  %v14742_v2 = vld [vmem:[#allocation4 + $0x2f0] sm:$0xff] }
0x3284   :  { %v14230_v54 = vand.u32 4294901760, %v14155_v38 }
0x3286   :  { %v14231_v25 = vsub.f32 %v14155_v38, %v14230_v54 }
0x3288   :  { %v14232_v3 = vand.u32 4294901760, %v14231_v25 }
0x328a   :  { %v14233_v10 = vsub.f32 %v14231_v25, %v14232_v3 }
0x328c   :  { %v14234_v63 = vand.u32 4294901760, %v14233_v10 }
0x328e   :  { %21050 = vmatmul.mubr.f32.vlgmr.msra.gmra.mrb[24].mxu0 %v14234_v63  ;;  %v26701_v63 = vsub.f32 %v14736_v55, %v14778_v61 }
0x328f   :  { %22901 = vmatpush3.bf16.msra.mxu0 %v22900_v8  ;;  %21068 = vmatprep.mubr.msk.f32.mxu0 %vm23937_vm11, %v27689_v33  ;;  %v14735_v8 = vld [vmem:[#allocation4 + $0x2b8] sm:$0xff] }
0x3290   :  { %22902 = vmatprep.subr.bf16.mxu0 %v27709_v49  ;;  %v14772_v6 = vand.u32 4294901760, %v14735_v8 }
0x3292   :  { %v26679_v29 = vpack.c.bf16 %v14772_v6, %v14768_v53  ;;  %v26683_v34 = vsub.f32 %v14735_v8, %v14772_v6  ;;  %v14878_v53 = vand.u32 4294901760, %v26681_v45 }
0x3293   :  { %22904 = vmatpush3.bf16.msra.mxu0 %v22903_v60  ;;  %v14770_v60 = vand.u32 4294901760, %v14732_v40 }
0x3294   :  { %22905 = vmatprep.subr.bf16.mxu0 %v27709_v49  ;;  %v14890_v6 = vand.u32 4294901760, %v26683_v34 }
0x3297   :  { %22907 = vmatpush3.bf16.msra.mxu0 %v22906_v51  ;;  %v14739_v51 = vld [vmem:[#allocation4 + $0x2d8] sm:$0xff] }
0x3298   :  { %22908 = vmatprep.subr.bf16.mxu0 %v27709_v49 }
0x329b   :  { %22910 = vmatpush3.bf16.msra.mxu0 %v22909_v24  ;;  %v26685_v24 = vpack.c.bf16 %v14774_v4, %v14770_v60 }
0x329c   :  { %22911 = vmatprep.subr.bf16.mxu0 %v27709_v49 }
0x329e   :  { %21069 = vmatmul.mubr.f32.vlgmr.msra.gmra.mrb[24].mxu0 %v14230_v54 }
0x329f   :  { %22913 = vmatpush3.bf16.msra.mxu0 %v22912_v26  ;;  %21087 = vmatprep.mubr.msk.f32.mxu0 %vm23937_vm11, %v27689_v33  ;;  %v14738_v26 = vld [vmem:[#allocation4 + $0x2d0] sm:$0xff] }
0x32a0   :  { %22914 = vmatprep.subr.bf16.mxu0 %v27709_v49  ;;  %v14782_v20 = vand.u32 4294901760, %v14738_v26 }
0x32a2   :  { %v26699_v10 = vpack.c.bf16 %v14782_v20, %v14778_v61 }
0x32a3   :  { %22916 = vmatpush3.bf16.msra.mxu0 %v22915_v11  ;;  %v14741_v11 = vld [vmem:[#allocation4 + $0x2e8] sm:$0xff] }
0x32a4   :  { %22917 = vmatprep.subr.bf16.mxu0 %v27709_v49  ;;  %v14784_v21 = vand.u32 4294901760, %v14741_v11 }
0x32a7   :  { %22919 = vmatpush3.bf16.msra.mxu0 %v22918_v17  ;;  %v14743_v17 = vld [vmem:[#allocation4 + $0x2f8] sm:$0xff] }
0x32a8   :  { %22920 = vmatprep.subr.bf16.mxu0 %v27709_v49  ;;  %v14788_v37 = vand.u32 4294901760, %v14743_v17 }
0x32ab   :  { %22922 = vmatpush3.bf16.msra.mxu0 %v22921_v0  ;;  %v26687_v0 = vsub.f32 %v14732_v40, %v14770_v60 }
0x32ac   :  { %22923 = vmatprep.subr.bf16.mxu0 %v27709_v49 }
0x32ad   :  { %v14884_v40 = vand.u32 4294901760, %v26687_v0 }
0x32ae   :  { %21088 = vmatmul.mubr.f32.vlgmr.msra.gmra.mrb[24].mxu0 %v14231_v25 }
0x32af   :  { %22925 = vmatpush3.bf16.msra.mxu0 %v26551_v18  ;;  %21106 = vmatprep.mubr.msk.f32.mxu0 %vm23937_vm11, %v27689_v33  ;;  %v14885_v55 = vsub.f32 %v26687_v0, %v14884_v40 }
0x32b0   :  { %22926 = vmatprep.subr.bf16.mxu0 %v27709_v49 }
0x32b3   :  { %22928 = vmatpush3.bf16.msra.mxu0 %v26555_v43 }
0x32b4   :  { %22929 = vmatprep.subr.bf16.mxu0 %v27709_v49 }
0x32b7   :  { %22931 = vmatpush3.bf16.msra.mxu0 %v26563_v14 }
0x32b8   :  { %22932 = vmatprep.subr.bf16.mxu0 %v27709_v49 }
0x32bb   :  { %22934 = vmatpush3.bf16.msra.mxu0 %v26577_v39 }
0x32bc   :  { %22935 = vmatprep.subr.bf16.mxu0 %v27709_v49 }
0x32be   :  { %21107 = vmatmul.mubr.f32.vlgmr.msra.gmra.mrb[24].mxu0 %v14232_v3 }
0x32bf   :  { %22937 = vmatpush3.bf16.msra.mxu0 %v22936_v28  ;;  %21125 = vmatprep.mubr.msk.f32.mxu0 %vm23937_vm11, %v27689_v33  ;;  %v26689_v28 = vsub.f32 %v14734_v35, %v14774_v4 }
0x32c0   :  { %22938 = vmatprep.subr.bf16.mxu0 %v27709_v49 }
0x32c1   :  { %v14896_v35 = vand.u32 4294901760, %v26689_v28 }
0x32c3   :  { %22940 = vmatpush3.bf16.msra.mxu0 %v22939_v32  ;;  %v14776_v32 = vand.u32 4294901760, %v14737_v23 }
0x32c4   :  { %22941 = vmatprep.subr.bf16.mxu0 %v27709_v49 }
0x32c7   :  { %22943 = vmatpush3.bf16.msra.mxu0 %v22942_v58  ;;  %v14780_v58 = vand.u32 4294901760, %v14739_v51 }
0x32c8   :  { %22944 = vmatprep.subr.bf16.mxu0 %v27709_v49 }
0x32c9   :  { %v26693_v38 = vpack.c.bf16 %v14780_v58, %v14776_v32  ;;  %v26697_v25 = vsub.f32 %v14739_v51, %v14780_v58  ;;  %v14891_v51 = vsub.f32 %v26683_v34, %v14890_v6 }
0x32cb   :  { %22946 = vmatpush3.bf16.msra.mxu0 %v22945_v30  ;;  %v14740_v30 = vld [vmem:[#allocation4 + $0x2e0] sm:$0xff]  ;;  %v14892_v58 = vand.u32 4294901760, %v14891_v51 }
0x32cc   :  { %22947 = vmatprep.subr.bf16.mxu0 %v27709_v49  ;;  %v14786_v3 = vand.u32 4294901760, %v14740_v30 }
0x32ce   :  { %21126 = vmatmul.mubr.f32.vlgmr.msra.gmra.mrb[24].mxu0 %v14230_v54 }
0x32cf   :  { %22949 = vmatpush3.bf16.msra.mxu0 %v26551_v18  ;;  %21144 = vmatprep.mubr.msk.f32.mxu0 %vm23937_vm11, %v27689_v33  ;;  %v18747_v18 = vld [vmem:[%s27618_s12 + $0x4] ss:$0 sm:$0xff] }
0x32d0   :  { %22950 = vmatprep.subr.bf16.mxu0 %v27709_v49 }
0x32d3   :  { %22952 = vmatpush3.bf16.msra.mxu0 %v26555_v43 }
0x32d4   :  { %22953 = vmatprep.subr.bf16.mxu0 %v27709_v49 }
0x32d7   :  { %22955 = vmatpush3.bf16.msra.mxu0 %v26563_v14 }
0x32d8   :  { %22956 = vmatprep.subr.bf16.mxu0 %v27709_v49 }
0x32db   :  { %22958 = vmatpush3.bf16.msra.mxu0 %v26577_v39 }
0x32dc   :  { %21147 = vmatprep.subr.mxu0 %v27689_v33 }
0x32de   :  { %21145 = vmatmul.mubr.f32.vlgmr.msra.gmra.mrb[24].mxu0 %v14230_v54  ;;  %v26695_v54 = vsub.f32 %v14737_v23, %v14776_v32  ;;  %v14879_v23 = vsub.f32 %v26681_v45, %v14878_v53 }
0x32df   :  { %21149 = vmatprep.mubr.msk.f32.mxu0 %vm23937_vm11, %v27689_v33 }
0x32e0   :  { %v14880_v32 = vand.u32 4294901760, %v14879_v23 }
0x33b1   :  { %v14690_v7 = vpop.f32.mrb[24].mxu0 }
0x33b2   :  { %v23440_v43 = vadd.f32 %v18747_v18, %v14690_v7  ;;  %v21146_v59 = vpop.f32.mrb[25].mxu0  ;;  %v26703_v18 = vsub.f32 %v14738_v26, %v14782_v20  ;;  %v26705_v7 = vpack.c.bf16 %v14788_v37, %v14784_v21  ;;  %v14897_v26 = vsub.f32 %v26689_v28, %v14896_v35 }
0x33b3   :  { %v26710_v59 = vsub.f32 %v14743_v17, %v14788_v37  ;;  %v14914_v17 = vand.u32 4294901760, %v26697_v25  ;;  %v14908_v37 = vand.u32 4294901760, %v26701_v63 }
0x33b4   :  { %v14694_v56 = vmax.f32 %v23440_v43, 0.0  ;;  %v26708_v43 = vsub.f32 %v14741_v11, %v14784_v21  ;;  %v14902_v11 = vand.u32 4294901760, %v26695_v54  ;;  %v14898_v61 = vand.u32 4294901760, %v14897_v26 }
0x33b5   :  { %v14915_v21 = vsub.f32 %v26697_v25, %v14914_v17 }
0x33b6   :  { %v26655_v14 = vadd.f32 %v26443_v41, %v14694_v56  ;;  %v14764_v41 = vand.u32 4294901760, %v14731_v22  ;;  %v14790_v56 = vand.u32 4294901760, %v14742_v2  ;;  %v14903_v20 = vsub.f32 %v26695_v54, %v14902_v11 }
0x33b8   :  { %v14700_v12 = vsel %vm439_vm9, %v26655_v14, 0.0  ;;  %v26665_v47 = vpack.c.bf16 %v14764_v41, %v14760_v48  ;;  %v26673_v42 = vsub.f32 %v14731_v22, %v14764_v41  ;;  %v26719_v19 = vpack.c.bf16 %v14790_v56, %v14786_v3 }
0x33b9   :  { %14701 = vadd.xlane.f32.xlu1 %v14700_v12  ;;  %v26712_v12 = vsub.f32 %v14740_v30, %v14786_v3  ;;  %v26721_v22 = vsub.f32 %v14742_v2, %v14790_v56  ;;  %v14886_v30 = vand.u32 4294901760, %v14885_v55  ;;  %v14920_v2 = vand.u32 4294901760, %v26703_v18 }
0x33ba   :  { %22960 = vmatprep.subr.bf16.mxu1 %v26665_v47  ;;  %v22979_v3 = vpack.c.bf16 %v14892_v58, %v14880_v32 }
0x33bb   :  { %22962 = vmatpush1.bf16.msra.mxu1 %v26667_v46  ;;  %v22981_v56 = vpack.c.bf16 %v14898_v61, %v14886_v30 }
0x33bc   :  { %22964 = vmatprep.subr.bf16.mxu1 %v26679_v29 }
0x33bf   :  { %22966 = vmatpush1.bf16.msra.mxu1 %v26685_v24 }
0x33c0   :  { %22968 = vmatprep.subr.bf16.mxu1 %v26693_v38 }
0x33c3   :  { %22970 = vmatpush1.bf16.msra.mxu1 %v26699_v10 }
0x33c4   :  { %22972 = vmatprep.subr.bf16.mxu1 %v26705_v7 }
0x33c7   :  { %22974 = vmatpush1.bf16.msra.mxu1 %v26719_v19 }
0x3446   :  { %v14702_v5 = vpop.xlane.xlu1 %14701 }
0x3447   :  { %v14703_v1 = vmul.f32 0.015625, %v14702_v5  ;;  %v14854_v5 = vand.u32 4294901760, %v26671_v44 }
0x3449   :  { %v26660_v57 = vsub.f32 %v26655_v14, %v14703_v1  ;;  %v27654_v1 = vand.u32 4294901760, %v26673_v42  ;;  %v14855_v48 = vsub.f32 %v26671_v44, %v14854_v5 }
0x344b   :  { %v14705_v9 = vmul.f32 %v26660_v57, %v26660_v57  ;;  %v14867_v41 = vsub.f32 %v26673_v42, %v27654_v1  ;;  %v14856_v62 = vand.u32 4294901760, %v14855_v48  ;;  %v14904_v48 = vand.u32 4294901760, %v14903_v20 }
0x344d   :  { %v14706_v39 = vsel %vm439_vm9, %v14705_v9, 0.0  ;;  %v27653_v9 = vand.u32 4294901760, %v26675_v16  ;;  %v14868_v36 = vand.u32 4294901760, %v14867_v41  ;;  %v14916_v41 = vand.u32 4294901760, %v14915_v21 }
0x344e   :  { %14707 = vadd.xlane.f32.xlu1 %v14706_v39  ;;  %v27652_v39 = vand.u32 4294901760, %v26677_v15 }
0x344f   :  { %v14861_v52 = vsub.f32 %v26675_v16, %v27653_v9  ;;  %v22975_v60 = vpack.c.bf16 %v14868_v36, %v14856_v62  ;;  %v14926_v62 = vand.u32 4294901760, %v26708_v43  ;;  %v14938_v36 = vand.u32 4294901760, %v26710_v59 }
0x3450   :  { %v14873_v13 = vsub.f32 %v26677_v15, %v27652_v39 }
0x3451   :  { %v14862_v27 = vand.u32 4294901760, %v14861_v52  ;;  %22976 = vmatprep.subr.bf16.mxu1 %v22975_v60  ;;  %v14909_v52 = vsub.f32 %v26701_v63, %v14908_v37  ;;  %v22983_v60 = vpack.c.bf16 %v14916_v41, %v14904_v48  ;;  %v14927_v55 = vsub.f32 %v26708_v43, %v14926_v62 }
0x3452   :  { %v14874_v8 = vand.u32 4294901760, %v14873_v13  ;;  %v14921_v13 = vsub.f32 %v26703_v18, %v14920_v2  ;;  %v14939_v26 = vsub.f32 %v26710_v59, %v14938_v36  ;;  %v22991_v48 = vpack.c.bf16 %v26673_v42, %v26671_v44  ;;  %v26790_v44 = vld [vmem:[%s27611_s5 + $0x5] ss:$0 sm:$0xff] }
0x3453   :  { %v14910_v23 = vand.u32 4294901760, %v14909_v52  ;;  %v14928_v61 = vand.u32 4294901760, %v14927_v55  ;;  %v22993_v41 = vpack.c.bf16 %v26677_v15, %v26675_v16  ;;  %v22995_v52 = vpack.c.bf16 %v26683_v34, %v26681_v45 }
0x3454   :  { %v26741_v4 = vpack.c.bf16 %v14874_v8, %v14862_v27  ;;  %v14932_v27 = vand.u32 4294901760, %v26712_v12  ;;  %v14944_v8 = vand.u32 4294901760, %v26721_v22  ;;  %v14922_v51 = vand.u32 4294901760, %v14921_v13 }
0x3455   :  { %v14940_v20 = vand.u32 4294901760, %v14939_v26  ;;  %v22997_v13 = vpack.c.bf16 %v26689_v28, %v26687_v0  ;;  %v23005_v55 = vpack.c.bf16 %v26721_v22, %v26712_v12  ;;  %v27719_v26 = vand.u32 4294901760, %v26673_v42 }
0x3456   :  { %v14933_v32 = vsub.f32 %v26712_v12, %v14932_v27  ;;  %v14945_v58 = vsub.f32 %v26721_v22, %v14944_v8  ;;  %v22985_v30 = vpack.c.bf16 %v14922_v51, %v14910_v23  ;;  %v22999_v23 = vpack.c.bf16 %v26697_v25, %v26695_v54 }
0x3457   :  { %v22987_v9 = vpack.c.bf16 %v14940_v20, %v14928_v61  ;;  %v23001_v51 = vpack.c.bf16 %v26703_v18, %v26701_v63  ;;  %v23023_v45 = vpack.c.bf16 %v27719_v26, %v14854_v5  ;;  %v27720_v34 = vand.u32 4294901760, %v26675_v16  ;;  %v26796_v16 = vld [vmem:[%s27612_s6 + $0x5] ss:$0 sm:$0xff] }
0x3458   :  { %v14934_v21 = vand.u32 4294901760, %v14933_v32  ;;  %v14946_v39 = vand.u32 4294901760, %v14945_v58  ;;  %v27721_v0 = vand.u32 4294901760, %v26677_v15  ;;  %v23027_v54 = vpack.c.bf16 %v14890_v6, %v14878_v53 }
0x3459   :  { %v23029_v25 = vpack.c.bf16 %v14896_v35, %v14884_v40  ;;  %v23031_v32 = vpack.c.bf16 %v14914_v17, %v14902_v11  ;;  %v23033_v63 = vpack.c.bf16 %v14920_v2, %v14908_v37  ;;  %v23035_v18 = vpack.c.bf16 %v14938_v36, %v14926_v62 }
0x345a   :  { %v22989_v1 = vpack.c.bf16 %v14946_v39, %v14934_v21  ;;  %v23003_v39 = vpack.c.bf16 %v26710_v59, %v26708_v43  ;;  %v23025_v28 = vpack.c.bf16 %v27721_v0, %v27720_v34  ;;  %v23037_v58 = vpack.c.bf16 %v14944_v8, %v14932_v27 }
0x34db   :  { %v14708_v43 = vpop.xlane.xlu1 %14707 }
0x34dc   :  { %v14709_v59 = vmul.f32 0.015625, %v14708_v43 }
0x34de   :  { %v14710_v61 = vadd.f32 1e-06, %v14709_v59 }
0x34e0   :  { %23820 = vrsqrt.f32 %v14710_v61 }
0x34ea   :  { %v23821_v12 = vpop.eup %23820 }
0x34eb   :  { %v14712_v42 = vmul.f32 %v23821_v12, %v26660_v57  ;;  %v18752_v57 = vld [vmem:[%s27614_s8 + $0xa] sm:$0x3] }
0x34ec   :  { %v14754_v62 = vrot.slane %v18752_v57, %v27705_v31 }
0x34ed   :  { %v14719_v15 = vmul.f32 %v26790_v44, %v14712_v42 }
0x34ef   :  { %v14726_v5 = vadd.f32 %v26796_v16, %v14719_v15 }
0x34f1   :  { %v14758_v22 = vsel %vm958_vm10, %v14726_v5, 0 }
0x34f2   :  { %v14841_v53 = vand.u32 4294901760, %v14758_v22 }
0x34f4   :  { %v14842_v6 = vsub.f32 %v14758_v22, %v14841_v53  ;;  %v16340_v22 = vld [vmem:[#allocation7 + $0x140] sm:$0xff] }
0x34f6   :  { %v14843_v40 = vand.u32 4294901760, %v14842_v6 }
0x34f8   :  { %v14844_v35 = vsub.f32 %v14842_v6, %v14843_v40 }
0x34fa   :  { %v14845_v11 = vand.u32 4294901760, %v14844_v35  ;;  %v16342_v35 = vld [vmem:[#allocation7 + $0x150] sm:$0xff] }
0x34fc   :  { %14846 = vmatmul.mubr.f32.vlgmr.msra.gmra.mrb[26].mxu1 %v14845_v11  ;;  %v16343_v11 = vld [vmem:[#allocation7 + $0x158] sm:$0xff] }
0x34fd   :  { %22978 = vmatpush1.bf16.msra.mxu1 %v26741_v4  ;;  %14996 = vmatprep.mubr.f32.mxu1 %v27689_v33 }
0x34fe   :  { %22980 = vmatprep.subr.bf16.mxu1 %v22979_v3 }
0x3501   :  { %22982 = vmatpush1.bf16.msra.mxu1 %v22981_v56 }
0x3502   :  { %22984 = vmatprep.subr.bf16.mxu1 %v22983_v60 }
0x3505   :  { %22986 = vmatpush1.bf16.msra.mxu1 %v22985_v30 }
0x3506   :  { %22988 = vmatprep.subr.bf16.mxu1 %v22987_v9 }
0x3509   :  { %22990 = vmatpush1.bf16.msra.mxu1 %v22989_v1 }
0x350a   :  { %22992 = vmatprep.subr.bf16.mxu1 %v22991_v48 }
0x350c   :  { %14998 = vmatmul.mubr.f32.vlgmr.msra.gmra.mrb[26].mxu1 %v14841_v53 }
0x350d   :  { %22994 = vmatpush1.bf16.msra.mxu1 %v22993_v41  ;;  %15100 = vmatprep.mubr.f32.mxu1 %v27689_v33 }
0x350e   :  { %22996 = vmatprep.subr.bf16.mxu1 %v22995_v52 }
0x3511   :  { %22998 = vmatpush1.bf16.msra.mxu1 %v22997_v13 }
0x3512   :  { %23000 = vmatprep.subr.bf16.mxu1 %v22999_v23 }
0x3515   :  { %23002 = vmatpush1.bf16.msra.mxu1 %v23001_v51 }
0x3516   :  { %23004 = vmatprep.subr.bf16.mxu1 %v23003_v39 }
0x3519   :  { %23006 = vmatpush1.bf16.msra.mxu1 %v23005_v55 }
0x351a   :  { %23008 = vmatprep.subr.bf16.mxu1 %v26665_v47 }
0x351c   :  { %15103 = vmatmul.mubr.f32.vlgmr.msra.gmra.mrb[26].mxu1 %v14842_v6 }
0x351d   :  { %23010 = vmatpush1.bf16.msra.mxu1 %v26667_v46  ;;  %15189 = vmatprep.mubr.f32.mxu1 %v27689_v33 }
0x351e   :  { %23012 = vmatprep.subr.bf16.mxu1 %v26679_v29 }
0x3521   :  { %23014 = vmatpush1.bf16.msra.mxu1 %v26685_v24 }
0x3522   :  { %23016 = vmatprep.subr.bf16.mxu1 %v26693_v38 }
0x3525   :  { %23018 = vmatpush1.bf16.msra.mxu1 %v26699_v10 }
0x3526   :  { %23020 = vmatprep.subr.bf16.mxu1 %v26705_v7 }
0x3529   :  { %23022 = vmatpush1.bf16.msra.mxu1 %v26719_v19 }
0x352a   :  { %23024 = vmatprep.subr.bf16.mxu1 %v23023_v45 }
0x352c   :  { %15193 = vmatmul.mubr.f32.vlgmr.msra.gmra.mrb[26].mxu1 %v14843_v40 }
0x352d   :  { %23026 = vmatpush1.bf16.msra.mxu1 %v23025_v28  ;;  %15311 = vmatprep.mubr.f32.mxu1 %v27689_v33 }
0x352e   :  { %23028 = vmatprep.subr.bf16.mxu1 %v23027_v54 }
0x3531   :  { %23030 = vmatpush1.bf16.msra.mxu1 %v23029_v25 }
0x3532   :  { %23032 = vmatprep.subr.bf16.mxu1 %v23031_v32 }
0x3535   :  { %23034 = vmatpush1.bf16.msra.mxu1 %v23033_v63 }
0x3536   :  { %23036 = vmatprep.subr.bf16.mxu1 %v23035_v18 }
0x3539   :  { %23038 = vmatpush1.bf16.msra.mxu1 %v23037_v58 }
0x353a   :  { %23040 = vmatprep.subr.bf16.mxu1 %v26665_v47  ;;  %v14750_v47 = vrot.slane %v18752_v57, %v27704_v50 }
0x353c   :  { %15313 = vmatmul.mubr.f32.vlgmr.msra.gmra.mrb[26].mxu1 %v14841_v53 }
0x353d   :  { %23042 = vmatpush1.bf16.msra.mxu1 %v26667_v46  ;;  %15399 = vmatprep.mubr.f32.mxu1 %v27689_v33 }
0x353e   :  { %23044 = vmatprep.subr.bf16.mxu1 %v26679_v29 }
0x3541   :  { %23046 = vmatpush1.bf16.msra.mxu1 %v26685_v24 }
0x3542   :  { %23048 = vmatprep.subr.bf16.mxu1 %v26693_v38 }
0x3545   :  { %23050 = vmatpush1.bf16.msra.mxu1 %v26699_v10 }
0x3546   :  { %23052 = vmatprep.subr.bf16.mxu1 %v26705_v7 }
0x3549   :  { %23054 = vmatpush1.bf16.msra.mxu1 %v26719_v19 }
0x354a   :  { %23127 = vmatprep.subr.bf16.mxu1 %v27709_v49 }
0x354c   :  { %15401 = vmatmul.mubr.f32.vlgmr.msra.gmra.mrb[26].mxu1 %v14841_v53  ;;  %v16341_v53 = vld [vmem:[#allocation7 + $0x148] sm:$0xff] }
0x354d   :  { %21337 = vmatprep.mubr.msk.f32.mxu1 %vm23937_vm11, %v27689_v33  ;;  %v16363_v6 = vand.u32 4294901760, %v16341_v53 }
0x361f   :  { %v15402_v46 = vpop.f32.mrb[26].mxu1 }
0x3620   :  { %v23441_v29 = vadd.f32 %v15402_v46, %v14750_v47  ;;  %v15404_v24 = vpop.f32.mrb[27].mxu1  ;;  %v26890_v47 = vsub.f32 %v16341_v53, %v16363_v6  ;;  %v16366_v46 = vand.u32 4294901760, %v16342_v35 }
0x3621   :  { %v23442_v36 = vadd.f32 %v15404_v24, %v14754_v62  ;;  %v16344_v24 = vld [vmem:[#allocation7 + $0x160] sm:$0xff] }
0x3622   :  { %15408 = vrot.lane.b32.xlu1 %v23441_v29, %s23938_s22  ;;  %v15410_v38 = vsel %vm958_vm10, %v23441_v29, 0  ;;  %v16369_v29 = vand.u32 4294901760, %v16343_v11  ;;  %s23940_s22 = smov [#allocation10]  }
0x3623   :  { %v15480_v10 = vand.u32 4294901760, %v15410_v38  ;;  %v15876_v27 = vsel %vm2078_vm12, %v23442_v36, 0 }
0x3624   :  { %v15879_v8 = vand.u32 4294901760, %v15876_v27 }
0x3625   :  { %v15481_v7 = vsub.f32 %v15410_v38, %v15480_v10  ;;  %v16345_v38 = vld [vmem:[#allocation7 + $0x168] sm:$0xff] }
0x3626   :  { %v15956_v39 = vsub.f32 %v15876_v27, %v15879_v8 }
0x3627   :  { %v15482_v1 = vand.u32 4294901760, %v15481_v7 }
0x3628   :  { %v15957_v34 = vand.u32 4294901760, %v15956_v39 }
0x3629   :  { %v15483_v4 = vsub.f32 %v15481_v7, %v15482_v1 }
0x362a   :  { %v15958_v54 = vsub.f32 %v15956_v39, %v15957_v34 }
0x362b   :  { %v15484_v2 = vand.u32 4294901760, %v15483_v4  ;;  %v26893_v4 = vpack.c.bf16 %v16369_v29, %v16366_v46 }
0x362c   :  { %v15959_v63 = vand.u32 4294901760, %v15958_v54 }
0x3694   :  { %v15409_v9 = vpop.permute.xlu1 %15408 }
0x3695   :  { %v15412_v19 = vsel %vm958_vm10, %v15409_v9, 0  ;;  %v16347_v9 = vld [vmem:[#allocation7 + $0x178] sm:$0xff] }
0x3696   :  { %v15415_v17 = vand.u32 4294901760, %v15412_v19 }
0x3698   :  { %v15492_v37 = vsub.f32 %v15412_v19, %v15415_v17  ;;  %21148 = vmatpush3.xpose.msra.mxu0 %v15415_v17 }
0x3699   :  { %21152 = vmatprep.subr.mxu0 %v27689_v33 }
0x369a   :  { %v15493_v50 = vand.u32 4294901760, %v15492_v37 }
0x369b   :  { %21150 = vmatmul.mubr.f32.vlgmr.msra.gmra.mrb[26].mxu0 %v15484_v2  ;;  %v16381_v2 = vand.u32 4294901760, %v16347_v9 }
0x369c   :  { %v15494_v3 = vsub.f32 %v15492_v37, %v15493_v50  ;;  %21154 = vmatprep.mubr.msk.f32.mxu0 %vm23937_vm11, %v27689_v33 }
0x369d   :  { %v26908_v36 = vsub.f32 %v16347_v9, %v16381_v2 }
0x369e   :  { %v15495_v56 = vand.u32 4294901760, %v15494_v3 }
0x36a0   :  { %21153 = vmatpush3.xpose.msra.mxu0 %v15495_v56 }
0x36a1   :  { %21157 = vmatprep.subr.mxu0 %v27689_v33 }
0x36a3   :  { %21155 = vmatmul.mubr.f32.vlgmr.msra.gmra.mrb[26].mxu0 %v15480_v10 }
0x36a4   :  { %21158 = vmatpush3.xpose.msra.mxu0 %v15492_v37  ;;  %21159 = vmatprep.mubr.msk.f32.mxu0 %vm23937_vm11, %v27689_v33  ;;  %v26897_v37 = vsub.f32 %v16343_v11, %v16369_v29 }
0x36a5   :  { %21162 = vmatprep.subr.mxu0 %v27689_v33 }
0x36ab   :  { %21160 = vmatmul.mubr.f32.vlgmr.msra.gmra.mrb[26].mxu0 %v15481_v7  ;;  %v16372_v7 = vand.u32 4294901760, %v16344_v24 }
0x36ac   :  { %21163 = vmatpush3.xpose.msra.mxu0 %v15415_v17  ;;  %21164 = vmatprep.mubr.msk.f32.mxu0 %vm23937_vm11, %v27689_v33 }
0x36ad   :  { %21167 = vmatprep.subr.mxu0 %v27689_v33 }
0x36b3   :  { %21165 = vmatmul.mubr.f32.vlgmr.msra.gmra.mrb[26].mxu0 %v15482_v1  ;;  %v16375_v1 = vand.u32 4294901760, %v16345_v38 }
0x36b4   :  { %21168 = vmatpush3.xpose.msra.mxu0 %v15493_v50  ;;  %21169 = vmatprep.mubr.msk.f32.mxu0 %vm23937_vm11, %v27689_v33  ;;  %v26899_v50 = vsub.f32 %v16344_v24, %v16372_v7 }
0x36b5   :  { %21172 = vmatprep.subr.mxu0 %v27689_v33  ;;  %v26901_v3 = vsub.f32 %v16345_v38, %v16375_v1  ;;  %v26906_v62 = vpack.c.bf16 %v16375_v1, %v16372_v7 }
0x36bb   :  { %21170 = vmatmul.mubr.f32.vlgmr.msra.gmra.mrb[26].mxu0 %v15480_v10 }
0x36bc   :  { %21173 = vmatpush3.xpose.msra.mxu0 %v15415_v17  ;;  %21174 = vmatprep.mubr.msk.f32.mxu0 %vm23937_vm11, %v27689_v33  ;;  %v26895_v17 = vsub.f32 %v16342_v35, %v16366_v46 }
0x36bd   :  { %21177 = vmatprep.subr.mxu0 %v27689_v33 }
0x36c3   :  { %21175 = vmatmul.mubr.f32.vlgmr.msra.gmra.mrb[26].mxu0 %v15480_v10  ;;  %v16346_v10 = vld [vmem:[#allocation7 + $0x170] sm:$0xff] }
0x36c4   :  { %21178 = vmatpush3.msra.mxu0 %v15879_v8  ;;  %21179 = vmatprep.mubr.msk.f32.mxu0 %vm23937_vm11, %v27689_v33  ;;  %v16378_v19 = vand.u32 4294901760, %v16346_v10 }
0x36c5   :  { %21182 = vmatprep.subr.mxu0 %v27689_v33 }
0x36c6   :  { %v26903_v56 = vsub.f32 %v16346_v10, %v16378_v19  ;;  %v26912_v27 = vpack.c.bf16 %v16381_v2, %v16378_v19 }
0x36c8   :  { %v23089_v53 = vpack.c.bf16 %v26908_v36, %v26903_v56 }
0x3796   :  { %v15856_v60 = vpop.f32.mrb[26].mxu0 }
0x3797   :  { %v15860_v31 = vmul.f32 0.015625, %v15856_v60  ;;  %v21176_v30 = vpop.f32.mrb[27].mxu0  ;;  %v16452_v60 = vand.u32 4294901760, %v26890_v47 }
0x3799   :  { %v15861_v20 = vsel %vm2062_vm13, %v15860_v31, -inf  ;;  %v16453_v30 = vsub.f32 %v26890_v47, %v16452_v60 }
0x379a   :  { %15862 = vmax.xlane.f32.xlu0 %v15861_v20 }
0x3827   :  { %v15863_v21 = vpop.xlane.xlu0 %15862 }
0x3828   :  { %v15864_v48 = vsub.f32 %v15860_v31, %v15863_v21  ;;  %v16454_v21 = vand.u32 4294901760, %v16453_v30 }
0x382a   :  { %v15865_v41 = vmul.f32 1.442695, %v15864_v48  ;;  %v16459_v48 = vand.u32 4294901760, %v26895_v17 }
0x382c   :  { %23822 = vpow2.f32 %v15865_v41  ;;  %v16466_v41 = vand.u32 4294901760, %v26897_v37 }
0x3836   :  { %v23823_v52 = vpop.eup %23822 }
0x3837   :  { %v15867_v13 = vsel %vm2062_vm13, %v23823_v52, 0.0 }
0x3838   :  { %15868 = vadd.xlane.f32.xlu0 %v15867_v13  ;;  %v16460_v13 = vsub.f32 %v26895_v17, %v16459_v48 }
0x38c5   :  { %v15869_v23 = vpop.xlane.xlu0 %15868 }
0x38c6   :  { %23824 = vrcp.f32 %v15869_v23  ;;  %v16467_v23 = vsub.f32 %v26897_v37, %v16466_v41 }
0x38d0   :  { %v23825_v51 = vpop.eup %23824 }
0x38d1   :  { %v15871_v55 = vmul.f32 %v23825_v51, %v23823_v52  ;;  %v16461_v51 = vand.u32 4294901760, %v16460_v13 }
0x38d3   :  { %v15873_v26 = vsel %vm2074_vm14, %v15871_v55, 0  ;;  %v16473_v55 = vand.u32 4294901760, %v26899_v50 }
0x38d4   :  { %v15944_v45 = vand.u32 4294901760, %v15873_v26 }
0x38d6   :  { %v15945_v0 = vsub.f32 %v15873_v26, %v15944_v45  ;;  %v16480_v26 = vand.u32 4294901760, %v26901_v3 }
0x38d8   :  { %v15946_v28 = vand.u32 4294901760, %v15945_v0  ;;  %v23110_v35 = vpack.c.bf16 %v16480_v26, %v16473_v55 }
0x38da   :  { %v15947_v25 = vsub.f32 %v15945_v0, %v15946_v28 }
0x38dc   :  { %v15948_v32 = vand.u32 4294901760, %v15947_v25  ;;  %v16487_v25 = vand.u32 4294901760, %v26903_v56 }
0x38de   :  { %21180 = vmatmul.mubr.f32.vlgmr.msra.gmra.mrb[28].mxu0 %v15948_v32  ;;  %v16494_v32 = vand.u32 4294901760, %v26908_v36 }
0x38df   :  { %21183 = vmatpush3.msra.mxu0 %v15959_v63  ;;  %21184 = vmatprep.mubr.msk.f32.mxu0 %vm23937_vm11, %v27689_v33 }
0x38e0   :  { %21187 = vmatprep.subr.mxu0 %v27689_v33  ;;  %v23113_v11 = vpack.c.bf16 %v16494_v32, %v16487_v25 }
0x38e6   :  { %21185 = vmatmul.mubr.f32.vlgmr.msra.gmra.mrb[28].mxu0 %v15944_v45 }
0x38e7   :  { %21188 = vmatpush3.msra.mxu0 %v15956_v39  ;;  %21189 = vmatprep.mubr.msk.f32.mxu0 %vm23937_vm11, %v27689_v33  ;;  %v16468_v39 = vand.u32 4294901760, %v16467_v23 }
0x38e8   :  { %21192 = vmatprep.subr.mxu0 %v27689_v33 }
0x38ee   :  { %21190 = vmatmul.mubr.f32.vlgmr.msra.gmra.mrb[28].mxu0 %v15945_v0  ;;  %v16481_v0 = vsub.f32 %v26901_v3, %v16480_v26 }
0x38ef   :  { %21193 = vmatpush3.msra.mxu0 %v15879_v8  ;;  %21194 = vmatprep.mubr.msk.f32.mxu0 %vm23937_vm11, %v27689_v33 }
0x38f0   :  { %21197 = vmatprep.subr.mxu0 %v27689_v33  ;;  %v16482_v54 = vand.u32 4294901760, %v16481_v0 }
0x38f6   :  { %21195 = vmatmul.mubr.f32.vlgmr.msra.gmra.mrb[28].mxu0 %v15946_v28 }
0x38f7   :  { %21198 = vmatpush3.msra.mxu0 %v15957_v34  ;;  %21199 = vmatprep.mubr.msk.f32.mxu0 %vm23937_vm11, %v27689_v33  ;;  %v16474_v34 = vsub.f32 %v26899_v50, %v16473_v55 }
0x38f8   :  { %21202 = vmatprep.subr.mxu0 %v27689_v33 }
0x38f9   :  { %v16475_v28 = vand.u32 4294901760, %v16474_v34 }
0x38fb   :  { %v23074_v63 = vpack.c.bf16 %v16482_v54, %v16475_v28 }
0x38fe   :  { %21200 = vmatmul.mubr.f32.vlgmr.msra.gmra.mrb[28].mxu0 %v15944_v45 }
0x38ff   :  { %21203 = vmatpush3.msra.mxu0 %v15879_v8  ;;  %21204 = vmatprep.mubr.msk.f32.mxu0 %vm23937_vm11, %v27689_v33 }
0x3900   :  { %23055 = vmatprep.subr.bf16.mxu0 %v27709_v49 }
0x3906   :  { %21205 = vmatmul.mubr.f32.vlgmr.msra.gmra.mrb[28].mxu0 %v15944_v45  ;;  %v23071_v45 = vpack.c.bf16 %v16468_v39, %v16461_v51 }
0x3907   :  { %21223 = vmatprep.mubr.msk.f32.mxu0 %vm23937_vm11, %v27689_v33 }
0x39d9   :  { %v16320_v18 = vpop.f32.mrb[28].mxu0 }
0x39da   :  { %v26875_v58 = vadd.f32 %v16320_v18, %v26655_v14  ;;  %v21206_v43 = vpop.f32.mrb[29].mxu0  ;;  %v16360_v14 = vand.u32 4294901760, %v16340_v22  ;;  %v16488_v18 = vsub.f32 %v26903_v56, %v16487_v25 }
0x39db   :  { %v16495_v43 = vsub.f32 %v26908_v36, %v16494_v32  ;;  %v16902_v36 = vld [vmem:[#allocation9 + $0x160] sm:$0xff] }
0x39dc   :  { %v16324_v59 = vsel %vm439_vm9, %v26875_v58, 0.0  ;;  %v26885_v40 = vpack.c.bf16 %v16363_v6, %v16360_v14  ;;  %v26888_v57 = vsub.f32 %v16340_v22, %v16360_v14  ;;  %v23086_v22 = vpack.c.bf16 %v26901_v3, %v26899_v50  ;;  %v16901_v50 = vld [vmem:[#allocation9 + $0x158] sm:$0xff] }
0x39dd   :  { %16325 = vadd.xlane.f32.xlu1 %v16324_v59  ;;  %v16489_v59 = vand.u32 4294901760, %v16488_v18  ;;  %v23107_v6 = vpack.c.bf16 %v16466_v41, %v16459_v48  ;;  %v16927_v56 = vand.u32 4294901760, %v16901_v50  ;;  %v16905_v48 = vld [vmem:[#allocation9 + $0x178] sm:$0xff] }
0x39de   :  { %23057 = vmatpush3.bf16.msra.mxu0 %v26885_v40  ;;  %v16445_v8 = vand.u32 4294901760, %v26888_v57 }
0x39df   :  { %23058 = vmatprep.subr.bf16.mxu0 %v27709_v49  ;;  %v27005_v39 = vsub.f32 %v16901_v50, %v16927_v56 }
0x39e0   :  { %v16446_v31 = vsub.f32 %v26888_v57, %v16445_v8  ;;  %v23104_v14 = vpack.c.bf16 %v16452_v60, %v16445_v8  ;;  %v16930_v8 = vand.u32 4294901760, %v16902_v36 }
0x39e2   :  { %23060 = vmatpush3.bf16.msra.mxu0 %v26893_v4  ;;  %v16447_v20 = vand.u32 4294901760, %v16446_v31  ;;  %v27007_v55 = vsub.f32 %v16902_v36, %v16930_v8 }
0x39e3   :  { %23061 = vmatprep.subr.bf16.mxu0 %v27709_v49 }
0x39e4   :  { %v23068_v52 = vpack.c.bf16 %v16454_v21, %v16447_v20  ;;  %v16904_v21 = vld [vmem:[#allocation9 + $0x170] sm:$0xff] }
0x39e5   :  { %v16936_v41 = vand.u32 4294901760, %v16904_v21 }
0x39e6   :  { %23063 = vmatpush3.bf16.msra.mxu0 %v26906_v62 }
0x39e7   :  { %23064 = vmatprep.subr.bf16.mxu0 %v27709_v49  ;;  %v27013_v34 = vsub.f32 %v16904_v21, %v16936_v41 }
0x39ea   :  { %23066 = vmatpush3.bf16.msra.mxu0 %v26912_v27 }
0x39eb   :  { %23067 = vmatprep.subr.bf16.mxu0 %v27709_v49 }
0x3a6a   :  { %v16326_v61 = vpop.xlane.xlu1 %16325 }
0x3a6b   :  { %v16327_v12 = vmul.f32 0.015625, %v16326_v61  ;;  %v16496_v61 = vand.u32 4294901760, %v16495_v43 }
0x3a6d   :  { %v26880_v42 = vsub.f32 %v26875_v58, %v16327_v12  ;;  %v23077_v12 = vpack.c.bf16 %v16496_v61, %v16489_v59 }
0x3a6f   :  { %v16329_v15 = vmul.f32 %v26880_v42, %v26880_v42 }
0x3a71   :  { %v16330_v5 = vsel %vm439_vm9, %v16329_v15, 0.0  ;;  %v23080_v15 = vpack.c.bf16 %v26890_v47, %v26888_v57 }
0x3a72   :  { %16331 = vadd.xlane.f32.xlu0 %v16330_v5  ;;  %v23083_v5 = vpack.c.bf16 %v26897_v37, %v26895_v17 }
0x3aff   :  { %v16332_v46 = vpop.xlane.xlu0 %16331 }
0x3b00   :  { %v16333_v29 = vmul.f32 0.015625, %v16332_v46  ;;  %v17045_v46 = vand.u32 4294901760, %v27013_v34 }
0x3b02   :  { %v16334_v24 = vadd.f32 1e-06, %v16333_v29 }
0x3b04   :  { %23826 = vrsqrt.f32 %v16334_v24 }
0x3b0e   :  { %v23827_v38 = vpop.eup %23826 }
0x3b0f   :  { %v16336_v57 = vmul.f32 %v23827_v38, %v26880_v42  ;;  %v17046_v38 = vsub.f32 %v27013_v34, %v17045_v46 }
0x3b11   :  { %v16337_v47 = vmul.f32 %v26790_v44, %v16336_v57  ;;  %v16898_v44 = vld [vmem:[#allocation9 + $0x140] sm:$0xff] }
0x3b12   :  { %v16918_v42 = vand.u32 4294901760, %v16898_v44 }
0x3b13   :  { %v16338_v10 = vadd.f32 %v26796_v16, %v16337_v47  ;;  %v16899_v16 = vld [vmem:[#allocation9 + $0x148] sm:$0xff]  ;;  %v17047_v47 = vand.u32 4294901760, %v17046_v38 }
0x3b14   :  { %v26993_v31 = vsub.f32 %v16898_v44, %v16918_v42 }
0x3b15   :  { %v16357_v7 = vsel %vm958_vm10, %v16338_v10, 0 }
0x3b16   :  { %v16432_v1 = vand.u32 4294901760, %v16357_v7  ;;  %v17003_v13 = vand.u32 4294901760, %v26993_v31 }
0x3b18   :  { %v16433_v9 = vsub.f32 %v16357_v7, %v16432_v1  ;;  %v17004_v28 = vsub.f32 %v26993_v31, %v17003_v13 }
0x3b1a   :  { %v16434_v19 = vand.u32 4294901760, %v16433_v9  ;;  %v17005_v25 = vand.u32 4294901760, %v17004_v28 }
0x3b1c   :  { %v16435_v17 = vsub.f32 %v16433_v9, %v16434_v19 }
0x3b1e   :  { %v16436_v37 = vand.u32 4294901760, %v16435_v17 }
0x3b20   :  { %21224 = vmatmul.mubr.f32.vlgmr.msra.gmra.mrb[30].mxu0 %v16436_v37 }
0x3b21   :  { %23069 = vmatpush3.bf16.msra.mxu0 %v23068_v52  ;;  %21242 = vmatprep.mubr.msk.f32.mxu0 %vm23937_vm11, %v27689_v33  ;;  %v16939_v52 = vand.u32 4294901760, %v16905_v48 }
0x3b22   :  { %23070 = vmatprep.subr.bf16.mxu0 %v27709_v49 }
0x3b23   :  { %v27015_v0 = vsub.f32 %v16905_v48, %v16939_v52 }
0x3b25   :  { %23072 = vmatpush3.bf16.msra.mxu0 %v23071_v45  ;;  %v27011_v45 = vpack.c.bf16 %v16939_v52, %v16936_v41  ;;  %v17052_v29 = vand.u32 4294901760, %v27015_v0  ;;  %v23161_v17 = vpack.c.bf16 %v27015_v0, %v27013_v34  ;;  %v17458_v41 = vld [vmem:[%s27619_s13 + $0x10] sm:$0xff]  ;;  %v17459_v52 = vld [vmem:[%s27619_s13 + $0x18] sm:$0xff] }
0x3b26   :  { %23073 = vmatprep.subr.bf16.mxu0 %v27709_v49 }
0x3b27   :  { %v17053_v57 = vsub.f32 %v27015_v0, %v17052_v29 }
0x3b29   :  { %23075 = vmatpush3.bf16.msra.mxu0 %v23074_v63  ;;  %v17024_v63 = vand.u32 4294901760, %v27005_v39  ;;  %v17054_v10 = vand.u32 4294901760, %v17053_v57 }
0x3b2a   :  { %23076 = vmatprep.subr.bf16.mxu0 %v27709_v49 }
0x3b2b   :  { %v17025_v59 = vsub.f32 %v27005_v39, %v17024_v63  ;;  %v23149_v7 = vpack.c.bf16 %v17054_v10, %v17047_v47 }
0x3b2d   :  { %23078 = vmatpush3.bf16.msra.mxu0 %v23077_v12 }
0x3b2e   :  { %23079 = vmatprep.subr.bf16.mxu0 %v27709_v49 }
0x3b30   :  { %21243 = vmatmul.mubr.f32.vlgmr.msra.gmra.mrb[30].mxu0 %v16432_v1 }
0x3b31   :  { %23081 = vmatpush3.bf16.msra.mxu0 %v23080_v15  ;;  %21261 = vmatprep.mubr.msk.f32.mxu0 %vm23937_vm11, %v27689_v33  ;;  %v17026_v15 = vand.u32 4294901760, %v17025_v59 }
0x3b32   :  { %23082 = vmatprep.subr.bf16.mxu0 %v27709_v49 }
0x3b35   :  { %23084 = vmatpush3.bf16.msra.mxu0 %v23083_v5  ;;  %v17031_v5 = vand.u32 4294901760, %v27007_v55 }
0x3b36   :  { %23085 = vmatprep.subr.bf16.mxu0 %v27709_v49 }
0x3b39   :  { %23087 = vmatpush3.bf16.msra.mxu0 %v23086_v22 }
0x3b3a   :  { %23088 = vmatprep.subr.bf16.mxu0 %v27709_v49 }
0x3b3d   :  { %23090 = vmatpush3.bf16.msra.mxu0 %v23089_v53 }
0x3b3e   :  { %23091 = vmatprep.subr.bf16.mxu0 %v27709_v49 }
0x3b40   :  { %21262 = vmatmul.mubr.f32.vlgmr.msra.gmra.mrb[30].mxu0 %v16433_v9 }
0x3b41   :  { %23093 = vmatpush3.bf16.msra.mxu0 %v26885_v40  ;;  %21280 = vmatprep.mubr.msk.f32.mxu0 %vm23937_vm11, %v27689_v33 }
0x3b42   :  { %23094 = vmatprep.subr.bf16.mxu0 %v27709_v49 }
0x3b45   :  { %23096 = vmatpush3.bf16.msra.mxu0 %v26893_v4 }
0x3b46   :  { %23097 = vmatprep.subr.bf16.mxu0 %v27709_v49 }
0x3b49   :  { %23099 = vmatpush3.bf16.msra.mxu0 %v26906_v62 }
0x3b4a   :  { %23100 = vmatprep.subr.bf16.mxu0 %v27709_v49 }
0x3b4d   :  { %23102 = vmatpush3.bf16.msra.mxu0 %v26912_v27 }
0x3b4e   :  { %23103 = vmatprep.subr.bf16.mxu0 %v27709_v49 }
0x3b50   :  { %21281 = vmatmul.mubr.f32.vlgmr.msra.gmra.mrb[30].mxu0 %v16434_v19 }
0x3b51   :  { %23105 = vmatpush3.bf16.msra.mxu0 %v23104_v14  ;;  %21299 = vmatprep.mubr.msk.f32.mxu0 %vm23937_vm11, %v27689_v33  ;;  %v17032_v14 = vsub.f32 %v27007_v55, %v17031_v5 }
0x3b52   :  { %23106 = vmatprep.subr.bf16.mxu0 %v27709_v49 }
0x3b55   :  { %23108 = vmatpush3.bf16.msra.mxu0 %v23107_v6 }
0x3b56   :  { %23109 = vmatprep.subr.bf16.mxu0 %v27709_v49 }
0x3b59   :  { %23111 = vmatpush3.bf16.msra.mxu0 %v23110_v35  ;;  %v17033_v35 = vand.u32 4294901760, %v17032_v14 }
0x3b5a   :  { %23112 = vmatprep.subr.bf16.mxu0 %v27709_v49 }
0x3b5d   :  { %23114 = vmatpush3.bf16.msra.mxu0 %v23113_v11 }
0x3b5e   :  { %23115 = vmatprep.subr.bf16.mxu0 %v27709_v49 }
0x3b60   :  { %21300 = vmatmul.mubr.f32.vlgmr.msra.gmra.mrb[30].mxu0 %v16432_v1 }
0x3b61   :  { %23117 = vmatpush3.bf16.msra.mxu0 %v26885_v40  ;;  %21318 = vmatprep.mubr.msk.f32.mxu0 %vm23937_vm11, %v27689_v33  ;;  %v16921_v40 = vand.u32 4294901760, %v16899_v16 }
0x3b62   :  { %23118 = vmatprep.subr.bf16.mxu0 %v27709_v49 }
0x3b63   :  { %v26985_v2 = vpack.c.bf16 %v16921_v40, %v16918_v42  ;;  %v26995_v30 = vsub.f32 %v16899_v16, %v16921_v40  ;;  %v23185_v42 = vpack.c.bf16 %v17052_v29, %v17045_v46  ;;  %v18754_v40 = vld [vmem:[%s27616_s10 + $0x5] ss:$0 sm:$0xff] }
0x3b65   :  { %23120 = vmatpush3.bf16.msra.mxu0 %v26893_v4  ;;  %v16900_v4 = vld [vmem:[#allocation9 + $0x150] sm:$0xff]  ;;  %23129 = vmatpush3.bf16.msra.mxu1 %v26985_v2  ;;  %v17010_v23 = vand.u32 4294901760, %v26995_v30 }
0x3b66   :  { %23121 = vmatprep.subr.bf16.mxu0 %v27709_v49  ;;  %v16924_v3 = vand.u32 4294901760, %v16900_v4  ;;  %23130 = vmatprep.subr.bf16.mxu1 %v27709_v49 }
0x3b67   :  { %v17011_v54 = vsub.f32 %v26995_v30, %v17010_v23  ;;  %v23176_v37 = vpack.c.bf16 %v17010_v23, %v17003_v13  ;;  %v17481_v13 = vand.u32 4294901760, %v17458_v41  ;;  %v17484_v23 = vand.u32 4294901760, %v17459_v52 }
0x3b68   :  { %v27003_v51 = vsub.f32 %v16900_v4, %v16924_v3 }
0x3b69   :  { %23123 = vmatpush3.bf16.msra.mxu0 %v26906_v62  ;;  %v26989_v62 = vpack.c.bf16 %v16927_v56, %v16924_v3  ;;  %v17012_v18 = vand.u32 4294901760, %v17011_v54  ;;  %v17462_v54 = vld [vmem:[%s27619_s13 + $0x30] sm:$0xff] }
0x3b6a   :  { %23124 = vmatprep.subr.bf16.mxu0 %v27709_v49  ;;  %v17017_v32 = vand.u32 4294901760, %v27003_v51  ;;  %v23155_v9 = vpack.c.bf16 %v27005_v39, %v27003_v51  ;;  %v17460_v39 = vld [vmem:[%s27619_s13 + $0x20] sm:$0xff]  ;;  %v17493_v59 = vand.u32 4294901760, %v17462_v54 }
0x3b6b   :  { %23132 = vmatpush3.bf16.msra.mxu1 %v26989_v62  ;;  %v23140_v61 = vpack.c.bf16 %v17012_v18, %v17005_v25  ;;  %v17463_v25 = vld [vmem:[%s27619_s13 + $0x38] sm:$0xff] }
0x3b6c   :  { %23133 = vmatprep.subr.bf16.mxu1 %v27709_v49  ;;  %v17018_v43 = vsub.f32 %v27003_v51, %v17017_v32  ;;  %v23179_v44 = vpack.c.bf16 %v17024_v63, %v17017_v32  ;;  %v27101_v51 = vpack.c.bf16 %v17484_v23, %v17481_v13  ;;  %v27123_v32 = vsub.f32 %v17458_v41, %v17481_v13  ;;  %v18013_v41 = vld [vmem:[%s27621_s15 + $0x8] sm:$0xff] }
0x3b6d   :  { %23126 = vmatpush3.bf16.msra.mxu0 %v26912_v27  ;;  %v16903_v27 = vld [vmem:[#allocation9 + $0x168] sm:$0xff]  ;;  %v27125_v63 = vsub.f32 %v17459_v52, %v17484_v23  ;;  %v18039_v23 = vand.u32 4294901760, %v18013_v41 }
0x3b6e   :  { %23199 = vmatprep.subr.bf16.mxu0 %v27709_v49  ;;  %v16933_v60 = vand.u32 4294901760, %v16903_v27  ;;  %v17019_v12 = vand.u32 4294901760, %v17018_v43  ;;  %v18014_v52 = vld [vmem:[%s27621_s15 + $0x10] sm:$0xff] }
0x3b6f   :  { %v17581_v46 = vand.u32 4294901760, %v27125_v63 }
0x3b70   :  { %21319 = vmatmul.mubr.f32.vlgmr.msra.gmra.mrb[30].mxu0 %v16432_v1  ;;  %v26997_v20 = vpack.c.bf16 %v16933_v60, %v16930_v8  ;;  %v27009_v26 = vsub.f32 %v16903_v27, %v16933_v60  ;;  %v23143_v53 = vpack.c.bf16 %v17026_v15, %v17019_v12  ;;  %v23152_v1 = vpack.c.bf16 %v26995_v30, %v26993_v31 }
0x3b71   :  { %21451 = vmatprep.mubr.msk.f32.mxu0 %vm23937_vm11, %v27689_v33  ;;  %v17582_v38 = vsub.f32 %v27125_v63, %v17581_v46 }
0x3b72   :  { %23135 = vmatpush3.bf16.msra.mxu1 %v26997_v20  ;;  %v17038_v22 = vand.u32 4294901760, %v27009_v26  ;;  %v23158_v19 = vpack.c.bf16 %v27009_v26, %v27007_v55  ;;  %v17461_v55 = vld [vmem:[%s27619_s13 + $0x28] sm:$0xff] }
0x3b73   :  { %23136 = vmatprep.subr.bf16.mxu1 %v27709_v49  ;;  %v17583_v10 = vand.u32 4294901760, %v17582_v38 }
0x3b74   :  { %v17039_v6 = vsub.f32 %v27009_v26, %v17038_v22  ;;  %v23182_v16 = vpack.c.bf16 %v17038_v22, %v17031_v5  ;;  %v17487_v26 = vand.u32 4294901760, %v17460_v39  ;;  %v27137_v22 = vsub.f32 %v17462_v54, %v17493_v59 }
0x3b76   :  { %23138 = vmatpush3.bf16.msra.mxu1 %v27011_v45  ;;  %v17040_v11 = vand.u32 4294901760, %v17039_v6  ;;  %v27128_v18 = vsub.f32 %v17460_v39, %v17487_v26  ;;  %v18015_v39 = vld [vmem:[%s27621_s15 + $0x18] sm:$0xff] }
0x3b77   :  { %23139 = vmatprep.subr.bf16.mxu1 %v27709_v49  ;;  %v18045_v54 = vand.u32 4294901760, %v18015_v39 }
0x3b78   :  { %v23146_v24 = vpack.c.bf16 %v17040_v11, %v17033_v35  ;;  %v17574_v11 = vand.u32 4294901760, %v27123_v32 }
0x3c43   :  { %v16892_v4 = vpop.f32.mrb[30].mxu0 }
0x3c44   :  { %v23444_v50 = vadd.f32 %v18754_v40, %v16892_v4  ;;  %v21320_v3 = vpop.f32.mrb[31].mxu0 }
0x3c46   :  { %v16896_v56 = vmax.f32 %v23444_v50, 0.0 }
0x3c48   :  { %v16915_v36 = vsel %vm958_vm10, %v16896_v56, 0 }
0x3c49   :  { %v16990_v27 = vand.u32 4294901760, %v16915_v36 }
0x3c4b   :  { %v16991_v8 = vsub.f32 %v16915_v36, %v16990_v27 }
0x3c4d   :  { %v16992_v60 = vand.u32 4294901760, %v16991_v8 }
0x3c4f   :  { %v16993_v31 = vsub.f32 %v16991_v8, %v16992_v60 }
0x3c51   :  { %v16994_v30 = vand.u32 4294901760, %v16993_v31 }
0x3c53   :  { %21338 = vmatmul.mubr.f32.vlgmr.msra.gmra.mrb[28].mxu1 %v16994_v30 }
0x3c54   :  { %23141 = vmatpush3.bf16.msra.mxu1 %v23140_v61  ;;  %21356 = vmatprep.mubr.msk.f32.mxu1 %vm23937_vm11, %v27689_v33  ;;  %v17496_v61 = vand.u32 4294901760, %v17463_v25 }
0x3c55   :  { %23142 = vmatprep.subr.bf16.mxu1 %v27709_v49 }
0x3c56   :  { %v27135_v5 = vpack.c.bf16 %v17496_v61, %v17493_v59 }
0x3c58   :  { %23144 = vmatpush3.bf16.msra.mxu1 %v23143_v53  ;;  %v27139_v53 = vsub.f32 %v17463_v25, %v17496_v61  ;;  %v18018_v61 = vld [vmem:[%s27621_s15 + $0x30] sm:$0xff] }
0x3c59   :  { %23145 = vmatprep.subr.bf16.mxu1 %v27709_v49 }
0x3c5c   :  { %23147 = vmatpush3.bf16.msra.mxu1 %v23146_v24  ;;  %v17575_v24 = vsub.f32 %v27123_v32, %v17574_v11 }
0x3c5d   :  { %23148 = vmatprep.subr.bf16.mxu1 %v27709_v49 }
0x3c5e   :  { %v17576_v47 = vand.u32 4294901760, %v17575_v24  ;;  %v18054_v24 = vand.u32 4294901760, %v18018_v61 }
0x3c60   :  { %23150 = vmatpush3.bf16.msra.mxu1 %v23149_v7  ;;  %v17588_v7 = vand.u32 4294901760, %v27128_v18 }
0x3c61   :  { %23151 = vmatprep.subr.bf16.mxu1 %v27709_v49 }
0x3c63   :  { %21357 = vmatmul.mubr.f32.vlgmr.msra.gmra.mrb[28].mxu1 %v16990_v27 }
0x3c64   :  { %23153 = vmatpush3.bf16.msra.mxu1 %v23152_v1  ;;  %21375 = vmatprep.mubr.msk.f32.mxu1 %vm23937_vm11, %v27689_v33 }
0x3c65   :  { %23154 = vmatprep.subr.bf16.mxu1 %v27709_v49 }
0x3c68   :  { %23156 = vmatpush3.bf16.msra.mxu1 %v23155_v9  ;;  %v27153_v9 = vpack.c.bf16 %v17583_v10, %v17576_v47 }
0x3c69   :  { %23157 = vmatprep.subr.bf16.mxu1 %v27709_v49 }
0x3c6c   :  { %23159 = vmatpush3.bf16.msra.mxu1 %v23158_v19  ;;  %v17589_v19 = vsub.f32 %v27128_v18, %v17588_v7 }
0x3c6d   :  { %23160 = vmatprep.subr.bf16.mxu1 %v27709_v49 }
0x3c70   :  { %23162 = vmatpush3.bf16.msra.mxu1 %v23161_v17 }
0x3c71   :  { %23163 = vmatprep.subr.bf16.mxu1 %v27709_v49 }
0x3c73   :  { %21376 = vmatmul.mubr.f32.vlgmr.msra.gmra.mrb[28].mxu1 %v16991_v8 }
0x3c74   :  { %23165 = vmatpush3.bf16.msra.mxu1 %v26985_v2  ;;  %21394 = vmatprep.mubr.msk.f32.mxu1 %vm23937_vm11, %v27689_v33 }
0x3c75   :  { %23166 = vmatprep.subr.bf16.mxu1 %v27709_v49 }
0x3c78   :  { %23168 = vmatpush3.bf16.msra.mxu1 %v26989_v62 }
0x3c79   :  { %23169 = vmatprep.subr.bf16.mxu1 %v27709_v49 }
0x3c7c   :  { %23171 = vmatpush3.bf16.msra.mxu1 %v26997_v20 }
0x3c7d   :  { %23172 = vmatprep.subr.bf16.mxu1 %v27709_v49 }
0x3c80   :  { %23174 = vmatpush3.bf16.msra.mxu1 %v27011_v45 }
0x3c81   :  { %23175 = vmatprep.subr.bf16.mxu1 %v27709_v49 }
0x3c83   :  { %21395 = vmatmul.mubr.f32.vlgmr.msra.gmra.mrb[28].mxu1 %v16992_v60 }
0x3c84   :  { %23177 = vmatpush3.bf16.msra.mxu1 %v23176_v37  ;;  %21413 = vmatprep.mubr.msk.f32.mxu1 %vm23937_vm11, %v27689_v33  ;;  %v17590_v37 = vand.u32 4294901760, %v17589_v19 }
0x3c85   :  { %23178 = vmatprep.subr.bf16.mxu1 %v27709_v49 }
0x3c88   :  { %23180 = vmatpush3.bf16.msra.mxu1 %v23179_v44 }
0x3c89   :  { %23181 = vmatprep.subr.bf16.mxu1 %v27709_v49 }
0x3c8c   :  { %23183 = vmatpush3.bf16.msra.mxu1 %v23182_v16  ;;  %v17602_v16 = vand.u32 4294901760, %v27137_v22 }
0x3c8d   :  { %23184 = vmatprep.subr.bf16.mxu1 %v27709_v49 }
0x3c8e   :  { %v17603_v4 = vsub.f32 %v27137_v22, %v17602_v16 }
0x3c90   :  { %23186 = vmatpush3.bf16.msra.mxu1 %v23185_v42  ;;  %v17609_v42 = vand.u32 4294901760, %v27139_v53  ;;  %v17604_v3 = vand.u32 4294901760, %v17603_v4 }
0x3c91   :  { %23187 = vmatprep.subr.bf16.mxu1 %v27709_v49 }
0x3c92   :  { %v17610_v50 = vsub.f32 %v27139_v53, %v17609_v42 }
0x3c93   :  { %21414 = vmatmul.mubr.f32.vlgmr.msra.gmra.mrb[28].mxu1 %v16990_v27 }
0x3c94   :  { %23189 = vmatpush3.bf16.msra.mxu1 %v26985_v2  ;;  %21432 = vmatprep.mubr.msk.f32.mxu1 %vm23937_vm11, %v27689_v33  ;;  %v17456_v2 = vld [vmem:[%s27619_s13] sm:$0xff]  ;;  %v17611_v56 = vand.u32 4294901760, %v17610_v50 }
0x3c95   :  { %23190 = vmatprep.subr.bf16.mxu1 %v27709_v49  ;;  %v17475_v21 = vand.u32 4294901760, %v17456_v2 }
0x3c96   :  { %v27163_v36 = vpack.c.bf16 %v17611_v56, %v17604_v3 }
0x3c97   :  { %v27111_v34 = vsub.f32 %v17456_v2, %v17475_v21  ;;  %v27175_v2 = vpack.c.bf16 %v17581_v46, %v17574_v11  ;;  %v27213_v11 = vsub.f32 %v18015_v39, %v18045_v54 }
0x3c98   :  { %23192 = vmatpush3.bf16.msra.mxu1 %v26989_v62  ;;  %v17457_v62 = vld [vmem:[%s27619_s13 + $0x8] sm:$0xff] }
0x3c99   :  { %23193 = vmatprep.subr.bf16.mxu1 %v27709_v49  ;;  %v17560_v12 = vand.u32 4294901760, %v27111_v34 }
0x3c9b   :  { %v17561_v14 = vsub.f32 %v27111_v34, %v17560_v12 }
0x3c9c   :  { %23195 = vmatpush3.bf16.msra.mxu1 %v26997_v20  ;;  %v17478_v20 = vand.u32 4294901760, %v17457_v62 }
0x3c9d   :  { %23196 = vmatprep.subr.bf16.mxu1 %v27709_v49  ;;  %v17562_v35 = vand.u32 4294901760, %v17561_v14  ;;  %v27207_v14 = vsub.f32 %v18013_v41, %v18039_v23  ;;  %v27251_v41 = vld [vmem:[%s27621_s15 + $0x40] sm:$0xff] }
0x3c9e   :  { %v27091_v48 = vpack.c.bf16 %v17478_v20, %v17475_v21  ;;  %v27113_v0 = vsub.f32 %v17457_v62, %v17478_v20  ;;  %v27179_v21 = vpack.c.bf16 %v17609_v42, %v17602_v16  ;;  %v18012_v20 = vld [vmem:[%s27621_s15] sm:$0xff] }
0x3c9f   :  { %v18036_v13 = vand.u32 4294901760, %v18012_v20  ;;  %v27661_v47 = vand.u32 4294901760, %v27207_v14 }
0x3ca0   :  { %23198 = vmatpush3.bf16.msra.mxu1 %v27011_v45  ;;  %23201 = vmatpush3.bf16.msra.mxu0 %v27091_v48  ;;  %v17490_v45 = vand.u32 4294901760, %v17461_v55  ;;  %v17567_v15 = vand.u32 4294901760, %v27113_v0 }
0x3ca1   :  { %23295 = vmatprep.subr.bf16.mxu1 %v27709_v49  ;;  %23202 = vmatprep.subr.bf16.mxu0 %v27709_v49  ;;  %v18137_v16 = vsub.f32 %v27207_v14, %v27661_v47 }
0x3ca2   :  { %v27115_v28 = vpack.c.bf16 %v17490_v45, %v17487_v26  ;;  %v27130_v43 = vsub.f32 %v17461_v55, %v17490_v45  ;;  %v17568_v6 = vsub.f32 %v27113_v0, %v17567_v15  ;;  %v27173_v30 = vpack.c.bf16 %v17567_v15, %v17560_v12  ;;  %v18016_v26 = vld [vmem:[%s27621_s15 + $0x20] sm:$0xff]  ;;  %v18017_v45 = vld [vmem:[%s27621_s15 + $0x28] sm:$0xff]  ;;  %v18019_v12 = vld [vmem:[%s27621_s15 + $0x38] sm:$0xff] }
0x3ca3   :  { %21433 = vmatmul.mubr.f32.vlgmr.msra.gmra.mrb[28].mxu1 %v16990_v27  ;;  %v18042_v55 = vand.u32 4294901760, %v18014_v52  ;;  %v18048_v25 = vand.u32 4294901760, %v18016_v26  ;;  %v18051_v59 = vand.u32 4294901760, %v18017_v45  ;;  %v27205_v15 = vsub.f32 %v18012_v20, %v18036_v13 }
0x3ca4   :  { %21616 = vmatprep.mubr.msk.f32.mxu1 %vm23937_vm11, %v27689_v33  ;;  %23204 = vmatpush3.bf16.msra.mxu0 %v27101_v51  ;;  %v17569_v29 = vand.u32 4294901760, %v17568_v6  ;;  %v17595_v1 = vand.u32 4294901760, %v27130_v43 }
0x3ca5   :  { %23205 = vmatprep.subr.bf16.mxu0 %v27709_v49  ;;  %v27209_v6 = vsub.f32 %v18014_v52, %v18042_v55  ;;  %v27215_v46 = vsub.f32 %v18016_v26, %v18048_v25  ;;  %v27662_v38 = vand.u32 4294901760, %v27205_v15  ;;  %v27257_v26 = vld [vmem:[%s27621_s15 + $0x48] sm:$0xff] }
0x3ca6   :  { %v27149_v57 = vpack.c.bf16 %v17569_v29, %v17562_v35  ;;  %v17596_v17 = vsub.f32 %v27130_v43, %v17595_v1  ;;  %v27177_v62 = vpack.c.bf16 %v17595_v1, %v17588_v7  ;;  %v27211_v35 = vpack.c.bf16 %v18039_v23, %v18036_v13 }
0x3ca7   :  { %v27217_v29 = vsub.f32 %v18017_v45, %v18051_v59  ;;  %v27660_v10 = vand.u32 4294901760, %v27209_v6  ;;  %v18057_v7 = vand.u32 4294901760, %v18019_v12  ;;  %v27657_v1 = vand.u32 4294901760, %v27213_v11 }
0x3ca8   :  { %23207 = vmatpush3.bf16.msra.mxu0 %v27115_v28  ;;  %v17597_v44 = vand.u32 4294901760, %v17596_v17  ;;  %v27656_v19 = vand.u32 4294901760, %v27215_v46  ;;  %v18138_v13 = vand.u32 4294901760, %v18137_v16  ;;  %v27267_v16 = vpack.c.bf16 %v18045_v54, %v18042_v55 }
0x3ca9   :  { %23208 = vmatprep.subr.bf16.mxu0 %v27709_v49  ;;  %v27655_v17 = vand.u32 4294901760, %v27217_v29  ;;  %v18144_v42 = vsub.f32 %v27209_v6, %v27660_v10  ;;  %v27236_v4 = vsub.f32 %v18019_v12, %v18057_v7  ;;  %v18151_v50 = vsub.f32 %v27213_v11, %v27657_v1 }
0x3caa   :  { %v27159_v40 = vpack.c.bf16 %v17597_v44, %v17590_v37  ;;  %v27225_v37 = vsub.f32 %v18018_v61, %v18054_v24  ;;  %v18130_v44 = vsub.f32 %v27205_v15, %v27662_v38  ;;  %v18158_v3 = vsub.f32 %v27215_v46, %v27656_v19  ;;  %v27262_v61 = vld [vmem:[%s27621_s15 + $0x50] sm:$0xff] }
0x3cab   :  { %v18165_v56 = vsub.f32 %v27217_v29, %v27655_v17  ;;  %v18145_v23 = vand.u32 4294901760, %v18144_v42  ;;  %v27659_v39 = vand.u32 4294901760, %v27236_v4  ;;  %v18152_v45 = vand.u32 4294901760, %v18151_v50  ;;  %v27273_v17 = vld [vmem:[%s27621_s15 + $0x58] sm:$0xff] }
0x3cac   :  { %23210 = vmatpush3.bf16.msra.mxu0 %v27135_v5  ;;  %v27658_v20 = vand.u32 4294901760, %v27225_v37  ;;  %v18131_v52 = vand.u32 4294901760, %v18130_v44  ;;  %v27668_v42 = vand.u32 4294901760, %v27251_v41  ;;  %v18159_v50 = vand.u32 4294901760, %v18158_v3 }
0x3cad   :  { %23211 = vmatprep.subr.bf16.mxu0 %v27709_v49  ;;  %v18166_v19 = vand.u32 4294901760, %v18165_v56  ;;  %v18179_v1 = vsub.f32 %v27236_v4, %v27659_v39  ;;  %v27284_v54 = vpack.c.bf16 %v18051_v59, %v18048_v25  ;;  %v27665_v56 = vand.u32 4294901760, %v27273_v17  ;;  %v27304_v25 = vld [vmem:[%s27621_s15 + $0x68] sm:$0xff] }
0x3cae   :  { %v23296_v12 = vpack.c.bf16 %v18138_v13, %v18131_v52  ;;  %v18172_v44 = vsub.f32 %v27225_v37, %v27658_v20  ;;  %v27663_v52 = vand.u32 4294901760, %v27257_v26  ;;  %v23299_v13 = vpack.c.bf16 %v18152_v45, %v18145_v23  ;;  %v27299_v23 = vld [vmem:[%s27621_s15 + $0x60] sm:$0xff] }
0x3caf   :  { %v27282_v55 = vsub.f32 %v27251_v41, %v27668_v42  ;;  %v27664_v20 = vand.u32 4294901760, %v27262_v61  ;;  %v27317_v47 = vsub.f32 %v27273_v17, %v27665_v56  ;;  %v27670_v38 = vand.u32 4294901760, %v27304_v25 }
0x3cb0   :  { %23297 = vmatpush3.bf16.msra.mxu1 %v23296_v12  ;;  %v27291_v3 = vsub.f32 %v27257_v26, %v27663_v52  ;;  %v27294_v12 = vpack.c.bf16 %v18057_v7, %v18054_v24  ;;  %v18173_v59 = vand.u32 4294901760, %v18172_v44  ;;  %v27667_v24 = vand.u32 4294901760, %v27299_v23 }
0x3cb1   :  { %23298 = vmatprep.subr.bf16.mxu1 %v27709_v49  ;;  %v27666_v45 = vand.u32 4294901760, %v27282_v55  ;;  %v27310_v39 = vsub.f32 %v27262_v61, %v27664_v20  ;;  %v18180_v7 = vand.u32 4294901760, %v18179_v1  ;;  %v23302_v44 = vpack.c.bf16 %v18166_v19, %v18159_v50 }
0x3cb2   :  { %v27669_v10 = vand.u32 4294901760, %v27291_v3  ;;  %v27327_v1 = vsub.f32 %v27299_v23, %v27667_v24  ;;  %v27337_v19 = vsub.f32 %v27304_v25, %v27670_v38 }
0x3cb3   :  { %v18186_v52 = vsub.f32 %v27282_v55, %v27666_v45  ;;  %v27673_v20 = vand.u32 4294901760, %v27310_v39  ;;  %v23305_v50 = vpack.c.bf16 %v18180_v7, %v18173_v59 }
0x3cb4   :  { %23300 = vmatpush3.bf16.msra.mxu1 %v23299_v13  ;;  %v18193_v56 = vsub.f32 %v27291_v3, %v27669_v10  ;;  %v27671_v13 = vand.u32 4294901760, %v27317_v47  ;;  %v27672_v10 = vand.u32 4294901760, %v27327_v1  ;;  %v27674_v60 = vand.u32 4294901760, %v27337_v19 }
0x3cb5   :  { %23301 = vmatprep.subr.bf16.mxu1 %v27709_v49  ;;  %v18187_v45 = vand.u32 4294901760, %v18186_v52  ;;  %v18200_v24 = vsub.f32 %v27310_v39, %v27673_v20 }
0x3cb6   :  { %v18194_v42 = vand.u32 4294901760, %v18193_v56  ;;  %v18207_v31 = vsub.f32 %v27317_v47, %v27671_v13  ;;  %v18214_v7 = vsub.f32 %v27327_v1, %v27672_v10  ;;  %v18221_v56 = vsub.f32 %v27337_v19, %v27674_v60 }
0x3cb7   :  { %v18201_v38 = vand.u32 4294901760, %v18200_v24 }
0x3cb8   :  { %23303 = vmatpush3.bf16.msra.mxu1 %v23302_v44  ;;  %v23308_v59 = vpack.c.bf16 %v18194_v42, %v18187_v45  ;;  %v18208_v52 = vand.u32 4294901760, %v18207_v31  ;;  %v18756_v44 = vld [vmem:[%s27618_s12 + $0x5] ss:$0 sm:$0xff]  ;;  %v18215_v24 = vand.u32 4294901760, %v18214_v7 }
0x3cb9   :  { %23304 = vmatprep.subr.bf16.mxu1 %v27709_v49 }
0x3cba   :  { %v23311_v13 = vpack.c.bf16 %v18208_v52, %v18201_v38 }
0x3cbc   :  { %23306 = vmatpush3.bf16.msra.mxu1 %v23305_v50  ;;  %v18222_v50 = vand.u32 4294901760, %v18221_v56  ;;  %v23320_v56 = vpack.c.bf16 %v27207_v14, %v27205_v15 }
0x3cbd   :  { %23307 = vmatprep.subr.bf16.mxu1 %v27709_v49 }
0x3cbe   :  { %v23314_v20 = vpack.c.bf16 %v18222_v50, %v18215_v24  ;;  %v23323_v50 = vpack.c.bf16 %v27213_v11, %v27209_v6 }
0x3cc0   :  { %23309 = vmatpush3.bf16.msra.mxu1 %v23308_v59 }
0x3cc1   :  { %23310 = vmatprep.subr.bf16.mxu1 %v27709_v49 }
0x3cc4   :  { %23312 = vmatpush3.bf16.msra.mxu1 %v23311_v13 }
0x3cc5   :  { %23313 = vmatprep.subr.bf16.mxu1 %v27709_v49 }
0x3cc8   :  { %23315 = vmatpush3.bf16.msra.mxu1 %v23314_v20 }
0x3cc9   :  { %23316 = vmatprep.subr.bf16.mxu1 %v27709_v49 }
0x3d76   :  { %v17450_v42 = vpop.f32.mrb[28].mxu1 }
0x3d77   :  { %v23445_v31 = vadd.f32 %v18756_v44, %v17450_v42  ;;  %v21434_v45 = vpop.f32.mrb[29].mxu1 }
0x3d78   :  { %v23326_v45 = vpack.c.bf16 %v27217_v29, %v27215_v46 }
0x3d79   :  { %v17454_v10 = vmax.f32 %v23445_v31, 0.0 }
0x3d7b   :  { %v17455_v60 = vadd.f32 %v26875_v58, %v17454_v10  ;;  %v27722_v58 = vpack.c.bf16 %v27113_v0, %v27111_v34  ;;  %v27725_v34 = vpack.c.bf16 %v27139_v53, %v27137_v22  ;;  %v27726_v53 = vand.u32 4294901760, %v27251_v41 }
0x3d7c   :  { %v27731_v10 = vand.u32 4294901760, %v27304_v25 }
0x3d7d   :  { %v17472_v8 = vsel %vm958_vm10, %v17455_v60, 0 }
0x3d7e   :  { %v17547_v27 = vand.u32 4294901760, %v17472_v8 }
0x3d80   :  { %v17548_v38 = vsub.f32 %v17472_v8, %v17547_v27 }
0x3d82   :  { %v17549_v59 = vand.u32 4294901760, %v17548_v38 }
0x3d84   :  { %v17550_v52 = vsub.f32 %v17548_v38, %v17549_v59 }
0x3d86   :  { %v17551_v7 = vand.u32 4294901760, %v17550_v52  ;;  %v23332_v52 = vpack.c.bf16 %v27291_v3, %v27282_v55 }
0x3d88   :  { %21452 = vmatmul.mubr.f32.vlgmr.msra.gmra.mrb[32].mxu0 %v17551_v7  ;;  %v23335_v7 = vpack.c.bf16 %v27317_v47, %v27310_v39 }
0x3d89   :  { %23213 = vmatpush3.bf16.msra.mxu0 %v27149_v57  ;;  %21470 = vmatprep.mubr.msk.f32.mxu0 %vm23937_vm11, %v27689_v33  ;;  %v27723_v57 = vpack.c.bf16 %v27125_v63, %v27123_v32 }
0x3d8a   :  { %23214 = vmatprep.subr.bf16.mxu0 %v27709_v49 }
0x3d8d   :  { %23216 = vmatpush3.bf16.msra.mxu0 %v27153_v9  ;;  %v27724_v9 = vpack.c.bf16 %v27130_v43, %v27128_v18 }
0x3d8e   :  { %23217 = vmatprep.subr.bf16.mxu0 %v27709_v49 }
0x3d91   :  { %23219 = vmatpush3.bf16.msra.mxu0 %v27159_v40  ;;  %v27727_v40 = vand.u32 4294901760, %v27257_v26  ;;  %v18757_v26 = vld [vmem:[%s27620_s14] ss:$0 sm:$0xff] }
0x3d92   :  { %23220 = vmatprep.subr.bf16.mxu0 %v27709_v49 }
0x3d95   :  { %23222 = vmatpush3.bf16.msra.mxu0 %v27163_v36  ;;  %v27453_v36 = vpack.c.bf16 %v27727_v40, %v27726_v53  ;;  %v27741_v53 = vand.u32 4294901760, %v27291_v3 }
0x3d96   :  { %23223 = vmatprep.subr.bf16.mxu0 %v27709_v49 }
0x3d98   :  { %21471 = vmatmul.mubr.f32.vlgmr.msra.gmra.mrb[32].mxu0 %v17547_v27 }
0x3d99   :  { %23225 = vmatpush3.bf16.msra.mxu0 %v27722_v58  ;;  %21489 = vmatprep.mubr.msk.f32.mxu0 %vm23937_vm11, %v27689_v33  ;;  %v23338_v58 = vpack.c.bf16 %v27337_v19, %v27327_v1 }
0x3d9a   :  { %23226 = vmatprep.subr.bf16.mxu0 %v27709_v49 }
0x3d9d   :  { %23228 = vmatpush3.bf16.msra.mxu0 %v27723_v57  ;;  %v27732_v57 = vand.u32 4294901760, %v27205_v15  ;;  %v27736_v15 = vand.u32 4294901760, %v27215_v46  ;;  %v27742_v46 = vand.u32 4294901760, %v27310_v39 }
0x3d9e   :  { %23229 = vmatprep.subr.bf16.mxu0 %v27709_v49 }
0x3da1   :  { %23231 = vmatpush3.bf16.msra.mxu0 %v27724_v9  ;;  %v27733_v9 = vand.u32 4294901760, %v27207_v14  ;;  %v27737_v14 = vand.u32 4294901760, %v27217_v29  ;;  %v27743_v29 = vand.u32 4294901760, %v27317_v47  ;;  %v18758_v47 = vld [vmem:[%s27622_s16] ss:$0 sm:$0xff]  ;;  %s18695_s16 = sshll.u32 %s23940_s22, 4  ;;  %s18696_s16 = int_to_ptr.vmem [resolvable:$true] %s18695_s16 }
0x3da2   :  { %23232 = vmatprep.subr.bf16.mxu0 %v27709_v49  ;;  %s23900_s10 = scalar_lea.vmem %s18696_s16, 32  ;;  %p23905_p11 = scmp.lt.s32.totalorder %s18696_s16, %s18696_s16 }
0x3da3   :  { %p23901_p10 = scmp.ne.s32.totalorder %s18696_s16, %s23900_s10  ;;  %p23906_p12 = scmp.lt.s32.totalorder %s23900_s10, %s23900_s10 }
0x3da5   :  { %23234 = vmatpush3.bf16.msra.mxu0 %v27725_v34  ;;  %v23368_v34 = vpack.c.bf16 %v27733_v9, %v27732_v57  ;;  %p23907_p13 = por %p23906_p12, %p23905_p11 }
0x3da6   :  { %23235 = vmatprep.subr.bf16.mxu0 %v27709_v49 }
0x3da7   :  { %p23908_p0 = pnand %p23907_p13, %p23901_p10 }
0x3da8   :  { %21490 = vmatmul.mubr.f32.vlgmr.msra.gmra.mrb[32].mxu0 %v17548_v38 }
0x3da9   :  { %23237 = vmatpush3.bf16.msra.mxu0 %v27091_v48  ;;  %21508 = vmatprep.mubr.msk.f32.mxu0 %vm23937_vm11, %v27689_v33 }
0x3daa   :  { %23238 = vmatprep.subr.bf16.mxu0 %v27709_v49 }
0x3dad   :  { %23240 = vmatpush3.bf16.msra.mxu0 %v27101_v51 }
0x3dae   :  { %23241 = vmatprep.subr.bf16.mxu0 %v27709_v49 }
0x3db1   :  { %23243 = vmatpush3.bf16.msra.mxu0 %v27115_v28 }
0x3db2   :  { %23244 = vmatprep.subr.bf16.mxu0 %v27709_v49 }
0x3db5   :  { %23246 = vmatpush3.bf16.msra.mxu0 %v27135_v5 }
0x3db6   :  { %23247 = vmatprep.subr.bf16.mxu0 %v27709_v49 }
0x3db8   :  { %21509 = vmatmul.mubr.f32.vlgmr.msra.gmra.mrb[32].mxu0 %v17549_v59  ;;  %v23329_v59 = vpack.c.bf16 %v27236_v4, %v27225_v37 }
0x3db9   :  { %23249 = vmatpush3.bf16.msra.mxu0 %v27173_v30  ;;  %21527 = vmatprep.mubr.msk.f32.mxu0 %vm23937_vm11, %v27689_v33  ;;  %v27728_v30 = vand.u32 4294901760, %v27262_v61 }
0x3dba   :  { %23250 = vmatprep.subr.bf16.mxu0 %v27709_v49 }
0x3dbd   :  { %23252 = vmatpush3.bf16.msra.mxu0 %v27175_v2  ;;  %v27729_v2 = vand.u32 4294901760, %v27273_v17 }
0x3dbe   :  { %23253 = vmatprep.subr.bf16.mxu0 %v27709_v49 }
0x3dc1   :  { %23255 = vmatpush3.bf16.msra.mxu0 %v27177_v62  ;;  %v27461_v62 = vpack.c.bf16 %v27729_v2, %v27728_v30 }
0x3dc2   :  { %23256 = vmatprep.subr.bf16.mxu0 %v27709_v49 }
0x3dc5   :  { %23258 = vmatpush3.bf16.msra.mxu0 %v27179_v21  ;;  %v27730_v21 = vand.u32 4294901760, %v27299_v23 }
0x3dc6   :  { %23259 = vmatprep.subr.bf16.mxu0 %v27709_v49 }
0x3dc7   :  { %v27470_v20 = vpack.c.bf16 %v27731_v10, %v27730_v21 }
0x3dc8   :  { %21528 = vmatmul.mubr.f32.vlgmr.msra.gmra.mrb[32].mxu0 %v17547_v27 }
0x3dc9   :  { %23261 = vmatpush3.bf16.msra.mxu0 %v27091_v48  ;;  %21546 = vmatprep.mubr.msk.f32.mxu0 %vm23937_vm11, %v27689_v33  ;;  %v18026_v48 = vld [vmem:[%s27621_s15 + $0x70] sm:$0xff] }
0x3dca   :  { %23262 = vmatprep.subr.bf16.mxu0 %v27709_v49  ;;  %v18078_v0 = vand.u32 4294901760, %v18026_v48 }
0x3dcc   :  { %v27437_v32 = vsub.f32 %v18026_v48, %v18078_v0  ;;  %v27734_v48 = vand.u32 4294901760, %v27209_v6  ;;  %v27739_v6 = vand.u32 4294901760, %v27236_v4  ;;  %v27745_v4 = vand.u32 4294901760, %v27337_v19 }
0x3dcd   :  { %23264 = vmatpush3.bf16.msra.mxu0 %v27101_v51  ;;  %v18027_v51 = vld [vmem:[%s27621_s15 + $0x78] sm:$0xff] }
0x3dce   :  { %23265 = vmatprep.subr.bf16.mxu0 %v27709_v49  ;;  %v18227_v18 = vand.u32 4294901760, %v27437_v32 }
0x3dd1   :  { %23267 = vmatpush3.bf16.msra.mxu0 %v27115_v28  ;;  %v18081_v28 = vand.u32 4294901760, %v18027_v51 }
0x3dd2   :  { %23268 = vmatprep.subr.bf16.mxu0 %v27709_v49 }
0x3dd3   :  { %v27439_v63 = vsub.f32 %v18027_v51, %v18081_v28  ;;  %v27474_v17 = vpack.c.bf16 %v18081_v28, %v18078_v0  ;;  %v27735_v51 = vand.u32 4294901760, %v27213_v11  ;;  %v23374_v28 = vpack.c.bf16 %v27737_v14, %v27736_v15 }
0x3dd5   :  { %23270 = vmatpush3.bf16.msra.mxu0 %v27135_v5  ;;  %v18234_v43 = vand.u32 4294901760, %v27439_v63  ;;  %v18228_v5 = vsub.f32 %v27437_v32, %v18227_v18  ;;  %v23341_v41 = vpack.c.bf16 %v27439_v63, %v27437_v32  ;;  %v23371_v0 = vpack.c.bf16 %v27735_v51, %v27734_v48 }
0x3dd6   :  { %23271 = vmatprep.subr.bf16.mxu0 %v27709_v49 }
0x3dd7   :  { %v18235_v22 = vsub.f32 %v27439_v63, %v18234_v43 }
0x3dd8   :  { %21547 = vmatmul.mubr.f32.vlgmr.msra.gmra.mrb[32].mxu0 %v17547_v27  ;;  %v18229_v27 = vand.u32 4294901760, %v18228_v5  ;;  %v27738_v5 = vand.u32 4294901760, %v27225_v37  ;;  %v27744_v37 = vand.u32 4294901760, %v27327_v1 }
0x3dd9   :  { %23273 = vmatpush3.bf16.msra.mxu0 %v27211_v35  ;;  %21581 = vmatprep.mubr.msk.f32.mxu0 %vm23937_vm11, %v27689_v33  ;;  %v18236_v8 = vand.u32 4294901760, %v18235_v22  ;;  %v27740_v22 = vand.u32 4294901760, %v27282_v55  ;;  %v23389_v55 = vpack.c.bf16 %v18234_v43, %v18227_v18 }
0x3dda   :  { %23274 = vmatprep.subr.bf16.mxu0 %v27709_v49  ;;  %v23377_v11 = vpack.c.bf16 %v27739_v6, %v27738_v5 }
0x3ddb   :  { %v23317_v60 = vpack.c.bf16 %v18236_v8, %v18229_v27  ;;  %v23380_v40 = vpack.c.bf16 %v27741_v53, %v27740_v22  ;;  %v23383_v27 = vpack.c.bf16 %v27743_v29, %v27742_v46  ;;  %v23386_v8 = vpack.c.bf16 %v27745_v4, %v27744_v37 }
0x3ddd   :  { %23276 = vmatpush3.bf16.msra.mxu0 %v27267_v16  ;;  %23318 = vmatpush3.bf16.msra.mxu1 %v23317_v60 }
0x3dde   :  { %23277 = vmatprep.subr.bf16.mxu0 %v27709_v49  ;;  %23319 = vmatprep.subr.bf16.mxu1 %v27709_v49 }
0x3de1   :  { %23279 = vmatpush3.bf16.msra.mxu0 %v27284_v54 }
0x3de2   :  { %23280 = vmatprep.subr.bf16.mxu0 %v27709_v49 }
0x3de5   :  { %23282 = vmatpush3.bf16.msra.mxu0 %v27294_v12 }
0x3de6   :  { %23283 = vmatprep.subr.bf16.mxu0 %v27709_v49 }
0x3de9   :  { %23285 = vmatpush3.bf16.msra.mxu0 %v27453_v36 }
0x3dea   :  { %23286 = vmatprep.subr.bf16.mxu0 %v27709_v49 }
0x3ded   :  { %23288 = vmatpush3.bf16.msra.mxu0 %v27461_v62 }
0x3dee   :  { %23289 = vmatprep.subr.bf16.mxu0 %v27709_v49 }
0x3df1   :  { %23291 = vmatpush3.bf16.msra.mxu0 %v27470_v20 }
0x3df2   :  { %23292 = vmatprep.subr.bf16.mxu0 %v27709_v49 }
0x3df5   :  { %23294 = vmatpush3.bf16.msra.mxu0 %v27474_v17 }
0x3eab   :  { %v18007_v61 = vpop.f32.mrb[32].mxu0 }
0x3eac   :  { %v23446_v23 = vadd.f32 %v18757_v26, %v18007_v61  ;;  %v21548_v25 = vpop.f32.mrb[33].mxu0 }
0x3eae   :  { %v18011_v13 = vmax.f32 %v23446_v23, 0.0 }
0x3eb0   :  { %v27484_v44 = vand.u32 4294901760, %v18011_v13 }
0x3eb2   :  { %v18117_v24 = vsub.f32 %v18011_v13, %v27484_v44  ;;  %21617 = vmatmul.mubr.f32.vlgmr.msra.gmra.mrb[30].mxu1 %v27484_v44 }
0x3eb3   :  { %23321 = vmatpush3.bf16.msra.mxu1 %v23320_v56  ;;  %21651 = vmatprep.mubr.msk.f32.mxu1 %vm23937_vm11, %v27689_v33 }
0x3eb4   :  { %v18118_v42 = vand.u32 4294901760, %v18117_v24  ;;  %23322 = vmatprep.subr.bf16.mxu1 %v27709_v49 }
0x3eb6   :  { %v18119_v31 = vsub.f32 %v18117_v24, %v18118_v42 }
0x3eb7   :  { %23324 = vmatpush3.bf16.msra.mxu1 %v23323_v50 }
0x3eb8   :  { %23325 = vmatprep.subr.bf16.mxu1 %v27709_v49  ;;  %v18120_v38 = vand.u32 4294901760, %v18119_v31 }
0x3eba   :  { %21582 = vmatmul.mubr.f32.vlgmr.msra.gmra.mrb[34].mxu0 %v18120_v38 }
0x3ebb   :  { %23327 = vmatpush3.bf16.msra.mxu1 %v23326_v45 }
0x3ebc   :  { %23328 = vmatprep.subr.bf16.mxu1 %v27709_v49 }
0x3ebf   :  { %23330 = vmatpush3.bf16.msra.mxu1 %v23329_v59 }
0x3ec0   :  { %23331 = vmatprep.subr.bf16.mxu1 %v27709_v49 }
0x3ec3   :  { %23333 = vmatpush3.bf16.msra.mxu1 %v23332_v52 }
0x3ec4   :  { %23334 = vmatprep.subr.bf16.mxu1 %v27709_v49 }
0x3ec7   :  { %23336 = vmatpush3.bf16.msra.mxu1 %v23335_v7 }
0x3ec8   :  { %23337 = vmatprep.subr.bf16.mxu1 %v27709_v49 }
0x3ecb   :  { %23339 = vmatpush3.bf16.msra.mxu1 %v23338_v58 }
0x3ecc   :  { %23340 = vmatprep.subr.bf16.mxu1 %v27709_v49 }
0x3ecf   :  { %23342 = vmatpush3.bf16.msra.mxu1 %v23341_v41 }
0x3ed0   :  { %23343 = vmatprep.subr.bf16.mxu1 %v27709_v49 }
0x3ed2   :  { %21652 = vmatmul.mubr.f32.vlgmr.msra.gmra.mrb[30].mxu1 %v18117_v24 }
0x3ed3   :  { %23345 = vmatpush3.bf16.msra.mxu1 %v27211_v35  ;;  %21686 = vmatprep.mubr.msk.f32.mxu1 %vm23937_vm11, %v27689_v33 }
0x3ed4   :  { %23346 = vmatprep.subr.bf16.mxu1 %v27709_v49 }
0x3ed7   :  { %23348 = vmatpush3.bf16.msra.mxu1 %v27267_v16 }
0x3ed8   :  { %23349 = vmatprep.subr.bf16.mxu1 %v27709_v49 }
0x3edb   :  { %23351 = vmatpush3.bf16.msra.mxu1 %v27284_v54 }
0x3edc   :  { %23352 = vmatprep.subr.bf16.mxu1 %v27709_v49 }
0x3edf   :  { %23354 = vmatpush3.bf16.msra.mxu1 %v27294_v12 }
0x3ee0   :  { %23355 = vmatprep.subr.bf16.mxu1 %v27709_v49 }
0x3ee3   :  { %23357 = vmatpush3.bf16.msra.mxu1 %v27453_v36 }
0x3ee4   :  { %23358 = vmatprep.subr.bf16.mxu1 %v27709_v49 }
0x3ee7   :  { %23360 = vmatpush3.bf16.msra.mxu1 %v27461_v62 }
0x3ee8   :  { %23361 = vmatprep.subr.bf16.mxu1 %v27709_v49 }
0x3eeb   :  { %23363 = vmatpush3.bf16.msra.mxu1 %v27470_v20 }
0x3eec   :  { %23364 = vmatprep.subr.bf16.mxu1 %v27709_v49 }
0x3eef   :  { %23366 = vmatpush3.bf16.msra.mxu1 %v27474_v17 }
0x3ef0   :  { %23367 = vmatprep.subr.bf16.mxu1 %v27709_v49 }
0x3ef2   :  { %21687 = vmatmul.mubr.f32.vlgmr.msra.gmra.mrb[30].mxu1 %v18118_v42 }
0x3ef3   :  { %23369 = vmatpush3.bf16.msra.mxu1 %v23368_v34  ;;  %21721 = vmatprep.mubr.msk.f32.mxu1 %vm23937_vm11, %v27689_v33 }
0x3ef4   :  { %23370 = vmatprep.subr.bf16.mxu1 %v27709_v49 }
0x3ef7   :  { %23372 = vmatpush3.bf16.msra.mxu1 %v23371_v0 }
0x3ef8   :  { %23373 = vmatprep.subr.bf16.mxu1 %v27709_v49 }
0x3efb   :  { %23375 = vmatpush3.bf16.msra.mxu1 %v23374_v28 }
0x3efc   :  { %23376 = vmatprep.subr.bf16.mxu1 %v27709_v49 }
0x3eff   :  { %23378 = vmatpush3.bf16.msra.mxu1 %v23377_v11 }
0x3f00   :  { %23379 = vmatprep.subr.bf16.mxu1 %v27709_v49 }
0x3f03   :  { %23381 = vmatpush3.bf16.msra.mxu1 %v23380_v40 }
0x3f04   :  { %23382 = vmatprep.subr.bf16.mxu1 %v27709_v49 }
0x3f07   :  { %23384 = vmatpush3.bf16.msra.mxu1 %v23383_v27 }
0x3f08   :  { %23385 = vmatprep.subr.bf16.mxu1 %v27709_v49 }
0x3f0b   :  { %23387 = vmatpush3.bf16.msra.mxu1 %v23386_v8 }
0x3f0c   :  { %23388 = vmatprep.subr.bf16.mxu1 %v27709_v49 }
0x3f0f   :  { %23390 = vmatpush3.bf16.msra.mxu1 %v23389_v55 }
0x3f10   :  { %23391 = vmatprep.subr.bf16.mxu1 %v27709_v49 }
0x3f12   :  { %21722 = vmatmul.mubr.f32.vlgmr.msra.gmra.mrb[30].mxu1 %v27484_v44 }
0x3f13   :  { %23393 = vmatpush3.bf16.msra.mxu1 %v27211_v35  ;;  %21756 = vmatprep.mubr.msk.f32.mxu1 %vm23937_vm11, %v27689_v33 }
0x3f14   :  { %23394 = vmatprep.subr.bf16.mxu1 %v27709_v49 }
0x3f17   :  { %23396 = vmatpush3.bf16.msra.mxu1 %v27267_v16 }
0x3f18   :  { %23397 = vmatprep.subr.bf16.mxu1 %v27709_v49 }
0x3f1b   :  { %23399 = vmatpush3.bf16.msra.mxu1 %v27284_v54 }
0x3f1c   :  { %23400 = vmatprep.subr.bf16.mxu1 %v27709_v49 }
0x3f1f   :  { %23402 = vmatpush3.bf16.msra.mxu1 %v27294_v12 }
0x3f20   :  { %23403 = vmatprep.subr.bf16.mxu1 %v27709_v49 }
0x3f23   :  { %23405 = vmatpush3.bf16.msra.mxu1 %v27453_v36 }
0x3f24   :  { %23406 = vmatprep.subr.bf16.mxu1 %v27709_v49 }
0x3f27   :  { %23408 = vmatpush3.bf16.msra.mxu1 %v27461_v62 }
0x3f28   :  { %23409 = vmatprep.subr.bf16.mxu1 %v27709_v49 }
0x3f2b   :  { %23411 = vmatpush3.bf16.msra.mxu1 %v27470_v20 }
0x3f2c   :  { %23412 = vmatprep.subr.bf16.mxu1 %v27709_v49 }
0x3f2f   :  { %23414 = vmatpush3.bf16.msra.mxu1 %v27474_v17 }
0x3f32   :  { %21757 = vmatmul.mubr.f32.vlgmr.msra.gmra.mrb[30].mxu1 %v27484_v44 }
0x3f8d   :  { %v18122_v33 = vpop.f32.mrb[34].mxu0 }
0x3f8e   :  { %v21583_v35 = vpop.f32.mrb[35].mxu0  ;;  %v18123_v39 = vadd.f32 %v18758_v47, %v18122_v33 }
0x4005   :  { %v18672_v16 = vpop.f32.mrb[30].mxu1 }
0x4006   :  { %v23448_v54 = vadd.f32 %v18672_v16, %v18123_v39  ;;  %v21758_v3 = vpop.f32.mrb[31].mxu1 }
0x4008   :  { %v18676_v12 = vmax.f32 %v23448_v54, 0.0 }
0x400a   :  { %v18677_v1 = vsel %vm2078_vm12, %v18676_v12, -inf }
0x400b   :  { %18678 = vmax.xlane.f32.xlu0 %v18677_v1 }
0x4098   :  { %v18679_v19 = vpop.xlane.xlu0 %18678 }
0x4099   :  { %v18680_v49 = vsub.f32 %v18676_v12, %v18679_v19 }
0x409b   :  { %v18681_v32 = vmul.f32 1.442695, %v18680_v49 }
0x409d   :  { %23828 = vpow2.f32 %v18681_v32 }
0x40a7   :  { %v23829_v63 = vpop.eup %23828 }
0x40a8   :  { %v18683_v18 = vsel %vm2078_vm12, %v23829_v63, 0.0 }
0x40a9   :  { %18684 = vadd.xlane.f32.xlu0 %v18683_v18 }
0x4136   :  { %v18685_v43 = vpop.xlane.xlu0 %18684 }
0x4137   :  { %23830 = vrcp.f32 %v18685_v43 }
0x4141   :  { %v23831_v36 = vpop.eup %23830 }
0x4142   :  { %v18687_v60 = vmul.f32 %v23831_v36, %v23829_v63 }
0x4144   :  { %18688 = vst [vmem:[#allocation10] sm:$0x3] %v18687_v60 }
0x4145   :  { %23911 = shalt.err (!%p23908_p0)
}
0x4146   :  { %s23912_s4 = scalar_lea.hbm %s27623_s17, 32 }
0x4147   :  { %p23913_p1 = scmp.ne.s32.totalorder %s27623_s17, %s23912_s4  ;;  %p23916_p2 = scmp.lt.u32.totalorder %s23912_s4, %s27623_s17 }
0x4149   :  { %p23918_p3 = pnand %p23916_p2, %p23913_p1 }
0x414b   :  { %23921 = shalt.err (!%p23918_p3)
}
0x414c   :  { %18698 = dma.vmem_to_hbm [thread:$0]  %s18696_s16, 32, %s27623_s17, [#allocation6]  }
0x414d   :  { %23926 = dma.done.wait [#allocation6], 32  }
0x414e   :  { %23927 = vsyncadd [#allocation6], 4294967264 }
0x414f   :  { %18702 = vsyncpa [#allocation5], 1 }
0x4150   :  { %18703 = vsyncpa [#allocation8], 1 }
0x4151   :  { %18704 = vsyncpa [#allocation6], 1 }

</bundles_post_ra>
